<compile_context>
chip_gen: v6e
topology: v6e:2x2x1
jax: 0.10.0
libtpu: 0.0.40
codegen_flags: <defaults>
</compile_context>

<pallas_src>
import jax
import jax.numpy as jnp
from jax import lax
from jax.experimental import pallas as pl
from jax.experimental.pallas import tpu as pltpu


# ----------------------------------------------------------------------------
# Static geometry (input for which the flatten gives exactly 320):
#   106088 -(conv0 k500 s10 p1)-> 10560 -pool-> 5280
#          -(conv1 k100 s20 p1)->   260 -pool->  130
#          -(conv2 k50  s2  p1)->    42 -pool->   21
#          -(conv3 k5   s2  p1)->    10 -pool->    5   -> 64*5 = 320
# ----------------------------------------------------------------------------
INPUT_SIZE = 106088

ROWS0 = 24                       # pooled-position groups (of 40) per grid step
GRID0 = 6                        # 6*24 = 144 groups (132 valid = 5280 positions)
NROWS_IN = GRID0 * ROWS0 + 8     # 152 input rows of 800 samples (+8 halo rows)


# ----------------------------------------------------------------------------
# Kernel 1: conv0 + ReLU + MaxPool(2)  (single deep-K matmul per tile)
# ----------------------------------------------------------------------------
def _conv0_pool_kernel(xm_ref, xh_ref, w_ref, b_ref, o_ref):
    """xm_ref: (24, 800)  row s = padded input samples [800*(24i+s), +800)
       xh_ref: (8, 800)   next 8 rows (halo; only row 0 is used)
       w_ref : (1600, 640) taps; col = p*320 + c*40 + r, row kk = 20r + 10p + k
       b_ref : (1, 320)   conv0 bias replicated over r (col = c*40 + r)
       o_ref : (24, 320)  o[s, c*40+r] = relu(maxpool(conv0))[c, 40*(24i+s)+r]
    """
    m = xm_ref[...]                                              # (24, 800)
    nxt = jnp.concatenate([m[1:, :], xh_ref[0:1, :]], axis=0)    # rows shifted +1
    # window [s, 0:1600) = xp[800*(24i+s) : +1600) ; two K=800 MXU passes
    acc = jnp.dot(m, w_ref[0:800, :], preferred_element_type=jnp.float32)
    acc = acc + jnp.dot(nxt, w_ref[800:1600, :],
                        preferred_element_type=jnp.float32)      # (24, 640)
    y = jnp.maximum(acc[:, :320], acc[:, 320:]) + b_ref[...]     # max over pool pair
    o_ref[...] = jnp.maximum(y, 0.0)                             # ReLU


# ----------------------------------------------------------------------------
# Kernel 2: conv1..conv3 (+ReLU+pool) and fc1..fc3, all weights VMEM-resident
# ----------------------------------------------------------------------------
def _tail_kernel(x_ref, sel2_ref, sel3_ref, u1_ref, b1_ref, u2_ref, b2_ref,
                 u3_ref, b3_ref, wf1_ref, bf1_ref, wf2_ref, bf2_ref,
                 wf3_ref, bf3_ref, o_ref):
    f32 = jnp.float32
    x = x_ref[...]                                               # (144, 320)

    # conv1 (k100 s20 p1) + ReLU + pool -> (130, 32).  x rows already group 40
    # pooled conv0 positions; the conv1 left pad is a prepended zero row.
    xp1 = jnp.concatenate([jnp.zeros((1, 320), f32), x[0:132, :]], axis=0)
    acc = jnp.dot(xp1[0:130, :], u1_ref[0:320, :], preferred_element_type=f32)
    for m in range(1, 4):
        acc = acc + jnp.dot(xp1[m:m + 130, :], u1_ref[320 * m:320 * (m + 1), :],
                            preferred_element_type=f32)
    y1 = jnp.maximum(jnp.maximum(acc[:, :32], acc[:, 32:]) + b1_ref[...], 0.0)

    # regroup rows by 4 (precomputed 0/1 selection matmul), then conv2 -> (21, 48)
    y1pad = jnp.concatenate(
        [jnp.zeros((1, 32), f32), y1, jnp.zeros((1, 32), f32)], axis=0)  # (132, 32)
    g2 = jnp.dot(sel2_ref[...], y1pad, preferred_element_type=f32)       # (132, 32)
    p2 = jnp.concatenate([g2[33 * r:33 * (r + 1), :] for r in range(4)],
                         axis=1)                                         # (33, 128)
    acc = jnp.dot(p2[0:21, :], u2_ref[0:128, :], preferred_element_type=f32)
    for m in range(1, 13):
        acc = acc + jnp.dot(p2[m:m + 21, :], u2_ref[128 * m:128 * (m + 1), :],
                            preferred_element_type=f32)
    y2 = jnp.maximum(jnp.maximum(acc[:, :48], acc[:, 48:]) + b2_ref[...], 0.0)

    # regroup by 4, conv3 -> (5, 64)
    y2pad = jnp.concatenate(
        [jnp.zeros((1, 48), f32), y2, jnp.zeros((2, 48), f32)], axis=0)  # (24, 48)
    g3 = jnp.dot(sel3_ref[...], y2pad, preferred_element_type=f32)       # (24, 48)
    p3 = jnp.concatenate([g3[6 * r:6 * (r + 1), :] for r in range(4)],
                         axis=1)                                         # (6, 192)
    acc = jnp.dot(p3[0:5, :], u3_ref[0:192, :], preferred_element_type=f32)
    acc = acc + jnp.dot(p3[1:6, :], u3_ref[192:384, :], preferred_element_type=f32)
    y3 = jnp.maximum(jnp.maximum(acc[:, :64], acc[:, 64:]) + b3_ref[...], 0.0)

    # flatten (position-major; fc1 weight is pre-permuted on the host) + FCs
    v = jnp.concatenate([y3[l:l + 1, :] for l in range(5)], axis=1)      # (1, 320)
    h = jnp.maximum(jnp.dot(v, wf1_ref[...], preferred_element_type=f32)
                    + bf1_ref[...], 0.0)
    h = jnp.maximum(jnp.dot(h, wf2_ref[...], preferred_element_type=f32)
                    + bf2_ref[...], 0.0)
    o_ref[...] = jnp.dot(h, wf3_ref[...], preferred_element_type=f32) + bf3_ref[...]


# ----------------------------------------------------------------------------
# One-time host-side weight preparation (call once, outside the jitted forward)
# ----------------------------------------------------------------------------
def prepare_params(params):
    f32 = jnp.float32

    # conv0 tap matrix: W0[kk, p*320 + c*40 + r] = w0[c, kk - 20r - 10p]
    w0 = params["conv0_w"].reshape(8, 500).astype(f32)
    kk = jnp.arange(1600)
    p_, r_ = jnp.arange(2), jnp.arange(40)
    tap = kk[:, None, None] - (10 * p_[None, :, None] + 20 * r_[None, None, :])
    g = jnp.where(((tap >= 0) & (tap < 500))[None],
                  w0[:, jnp.clip(tap, 0, 499)], 0.0)             # (8, 1600, 2, 40)
    W0 = jnp.transpose(g, (1, 2, 0, 3)).reshape(1600, 640)
    b0 = jnp.repeat(params["conv0_b"].astype(f32), 40).reshape(1, 320)

    # conv1: rows = m*320 + c0*40 + r, cols = p*32 + c1, tap k = 40(m-1)+r+1-20p
    w1 = params["conv1_w"].astype(f32)                           # (32, 8, 100)
    m_, r_, p_ = jnp.arange(4), jnp.arange(40), jnp.arange(2)
    k = 40 * (m_[:, None, None] - 1) + r_[None, :, None] + 1 - 20 * p_[None, None, :]
    g = jnp.where(((k >= 0) & (k < 100))[None, None],
                  w1[:, :, jnp.clip(k, 0, 99)], 0.0)             # (32, 8, 4, 40, 2)
    U1 = jnp.transpose(g, (2, 1, 3, 4, 0)).reshape(1280, 64)
    b1 = params["conv1_b"].astype(f32).reshape(1, 32)

    # conv2: rows = m*128 + r*32 + c1, cols = p*48 + c2, tap k = 4m + r - 2p
    w2 = params["conv2_w"].astype(f32)                           # (48, 32, 50)
    m_, r_, p_ = jnp.arange(13), jnp.arange(4), jnp.arange(2)
    k = 4 * m_[:, None, None] + r_[None, :, None] - 2 * p_[None, None, :]
    g = jnp.where(((k >= 0) & (k < 50))[None, None],
                  w2[:, :, jnp.clip(k, 0, 49)], 0.0)             # (48, 32, 13, 4, 2)
    U2 = jnp.transpose(g, (2, 3, 1, 4, 0)).reshape(1664, 96)
    b2 = params["conv2_b"].astype(f32).reshape(1, 48)

    # conv3: rows = m*192 + r*48 + c2, cols = p*64 + c3, tap k = 4m + r - 2p
    w3 = params["conv3_w"].astype(f32)                           # (64, 48, 5)
    m_, r_, p_ = jnp.arange(2), jnp.arange(4), jnp.arange(2)
    k = 4 * m_[:, None, None] + r_[None, :, None] - 2 * p_[None, None, :]
    g = jnp.where(((k >= 0) & (k < 5))[None, None],
                  w3[:, :, jnp.clip(k, 0, 4)], 0.0)              # (64, 48, 2, 4, 2)
    U3 = jnp.transpose(g, (2, 3, 1, 4, 0)).reshape(384, 128)
    b3 = params["conv3_b"].astype(f32).reshape(1, 64)

    # 0/1 selection matrices for the stride-4 position regroups (fix: host-built)
    def sel(nr, ng, nin):
        r = jnp.arange(nr).reshape(nr, 1, 1)
        gg = jnp.arange(ng).reshape(1, ng, 1)
        q = jnp.arange(nin).reshape(1, 1, nin)
        return (q == 4 * gg + r).astype(f32).reshape(nr * ng, nin)
    SEL2 = sel(4, 33, 132)
    SEL3 = sel(4, 6, 24)

    # fc weights: fc1 permuted so the position-major flatten matches x.view(-1)
    Wf1 = (params["fc1_w"].astype(f32).reshape(32, 64, 5)
           .transpose(2, 1, 0).reshape(320, 32))
    bf1 = params["fc1_b"].astype(f32).reshape(1, 32)
    Wf2 = params["fc2_w"].astype(f32).T
    bf2 = params["fc2_b"].astype(f32).reshape(1, 16)
    nout = params["fc3_b"].shape[0]
    npad = 128 * ((nout + 127) // 128)                           # lane-dense output
    Wf3 = jnp.pad(params["fc3_w"].astype(f32).T, ((0, 0), (0, npad - nout)))
    bf3 = jnp.pad(params["fc3_b"].astype(f32).reshape(1, nout),
                  ((0, 0), (0, npad - nout)))

    return dict(w0=W0, b0=b0, u1=U1, b1=b1, u2=U2, b2=b2, u3=U3, b3=b3,
                sel2=SEL2, sel3=SEL3, wf1=Wf1, bf1=bf1, wf2=Wf2, bf2=bf2,
                wf3=Wf3, bf3=bf3)


# ----------------------------------------------------------------------------
# Forward pass
# ----------------------------------------------------------------------------
def forward(prep, x, *, nout):
    """x: (1, 1, 106088) NCW -> (nout,)"""
    if x.shape != (1, 1, INPUT_SIZE):
        raise ValueError("hardcoded fc1=Linear(320,32) requires input shape "
                         f"(1, 1, {INPUT_SIZE}); got {x.shape}")
    f32 = jnp.float32
    xf = x.reshape(-1).astype(f32)
    # conv0 left pad (1) + zero tail; rows of 800 samples (no host transpose)
    xp = jnp.pad(xf, (1, NROWS_IN * 800 - (INPUT_SIZE + 1)))
    xin = xp.reshape(NROWS_IN, 800)

    # ---- kernel 1: conv0 + ReLU + pool ------------------------------------
    y0 = pl.pallas_call(
        _conv0_pool_kernel,
        out_shape=jax.ShapeDtypeStruct((GRID0 * ROWS0, 320), f32),
        grid=(GRID0,),
        in_specs=[
            pl.BlockSpec((ROWS0, 800), lambda i: (i, 0)),
            pl.BlockSpec((8, 800), lambda i: ((i + 1) * (ROWS0 // 8), 0)),  # halo
            pl.BlockSpec((1600, 640), lambda i: (0, 0)),
            pl.BlockSpec((1, 320), lambda i: (0, 0)),
        ],
        out_specs=pl.BlockSpec((ROWS0, 320), lambda i: (i, 0)),
        compiler_params=pltpu.CompilerParams(dimension_semantics=("parallel",)),
        cost_estimate=pl.CostEstimate(
            flops=2 * GRID0 * ROWS0 * 1600 * 640,
            transcendentals=0,
            bytes_accessed=4 * (NROWS_IN * 800 + GRID0 * 8 * 800
                                + 1600 * 640 + GRID0 * ROWS0 * 320)),
    )(xin, xin, prep["w0"], prep["b0"])                          # (144, 320)

    # ---- kernel 2: fused conv1..conv3 + fc1..fc3 (consumes y0 directly) ----
    tail_args = (y0, prep["sel2"], prep["sel3"],
                 prep["u1"], prep["b1"], prep["u2"], prep["b2"],
                 prep["u3"], prep["b3"],
                 prep["wf1"], prep["bf1"], prep["wf2"], prep["bf2"],
                 prep["wf3"], prep["bf3"])
    npad = prep["wf3"].shape[1]
    out = pl.pallas_call(
        _tail_kernel,
        out_shape=jax.ShapeDtypeStruct((1, npad), f32),
        grid=(1,),
        in_specs=[pl.BlockSpec(a.shape, lambda i: (0, 0)) for a in tail_args],
        out_specs=pl.BlockSpec((1, npad), lambda i: (0, 0)),
        compiler_params=pltpu.CompilerParams(dimension_semantics=("arbitrary",)),
        cost_estimate=pl.CostEstimate(
            flops=30_000_000, transcendentals=0, bytes_accessed=1_500_000),
    )(*tail_args)
    return out[0, :nout]


# ----------------------------------------------------------------------------
# Parameter init (PyTorch-default-style uniform(-1/sqrt(fan_in), +...))
# ----------------------------------------------------------------------------
def init_params(key, output_size):
    def uinit(k, shape, fan_in):
        bound = 1.0 / float(fan_in) ** 0.5
        return jax.random.uniform(k, shape, jnp.float32, -bound, bound)

    keys = jax.random.split(key, 14)
    p, i = {}, 0
    for name, cin, cout, ksz in [("conv0", 1, 8, 500), ("conv1", 8, 32, 100),
                                 ("conv2", 32, 48, 50), ("conv3", 48, 64, 5)]:
        p[name + "_w"] = uinit(keys[i], (cout, cin, ksz), cin * ksz); i += 1
        p[name + "_b"] = uinit(keys[i], (cout,), cin * ksz); i += 1
    for name, fin, fout in [("fc1", 320, 32), ("fc2", 32, 16), ("fc3", 16, output_size)]:
        p[name + "_w"] = uinit(keys[i], (fout, fin), fin); i += 1
        p[name + "_b"] = uinit(keys[i], (fout,), fin); i += 1
    return p


# ----------------------------------------------------------------------------
# Pure-JAX reference (numerical sanity check)
# ----------------------------------------------------------------------------
def _ref_conv1d_relu(x, w, b, stride, padding):
    y = lax.conv_general_dilated(
        x, w, (stride,), [(padding, padding)],
        dimension_numbers=("NCH", "OIH", "NCH"),
        precision=lax.Precision.HIGHEST)
    return jax.nn.relu(y + b[None, :, None])


def _ref_pool(x):
    _, c, l = x.shape
    lout = -(-l // 2)
    xp = jnp.pad(x, ((0, 0), (0, 0), (0, 2 * lout - l)), constant_values=-jnp.inf)
    return jnp.max(xp.reshape(1, c, lout, 2), axis=-1)


def reference_forward(params, x):
    h = _ref_pool(_ref_conv1d_relu(x, params["conv0_w"], params["conv0_b"], 10, 1))
    h = _ref_pool(_ref_conv1d_relu(h, params["conv1_w"], params["conv1_b"], 20, 1))
    h = _ref_pool(_ref_conv1d_relu(h, params["conv2_w"], params["conv2_b"], 2, 1))
    h = _ref_pool(_ref_conv1d_relu(h, params["conv3_w"], params["conv3_b"], 2, 1))
    h = h.reshape(-1)
    hp = lax.Precision.HIGHEST
    h = jax.nn.relu(jnp.dot(params["fc1_w"], h, precision=hp) + params["fc1_b"])
    h = jax.nn.relu(jnp.dot(params["fc2_w"], h, precision=hp) + params["fc2_b"])
    return jnp.dot(params["fc3_w"], h, precision=hp) + params["fc3_b"]


# ----------------------------------------------------------------------------
if __name__ == "__main__":
    OUTPUT_SIZE = 1

    key = jax.random.PRNGKey(0)
    kx, kp = jax.random.split(key)
    # The module hardcodes fc1=Linear(320, 32); input (1, 1, 106088) is the
    # shape for which the conv/pool chain flattens to exactly 320 features.
    x = jax.random.normal(kx, (1, 1, INPUT_SIZE), dtype=jnp.float32)
    params = init_params(kp, OUTPUT_SIZE)

    prep = prepare_params(params)                 # one-time weight prep
    fwd = jax.jit(forward, static_argnames=("nout",))
    out = jax.block_until_ready(fwd(prep, x, nout=OUTPUT_SIZE))

    ref = reference_forward(params, x)
    assert out.shape == (OUTPUT_SIZE,), out.shape
    assert jnp.allclose(out, ref, rtol=5e-2, atol=5e-2), (out, ref)

    print("KERNEL_OK")
</pallas_src>

<mosaic_0001>
module attributes {stable_mosaic.version = 11 : i64} {
  func.func @_conv0_pool_kernel(%arg0: i32, %arg1: memref<24x800xf32, #tpu.memory_space<vmem>>, %arg2: memref<8x800xf32, #tpu.memory_space<vmem>>, %arg3: memref<1600x640xf32, #tpu.memory_space<vmem>>, %arg4: memref<1x320xf32, #tpu.memory_space<vmem>>, %arg5: memref<24x320xf32, #tpu.memory_space<vmem>>) attributes {dimension_semantics = [#tpu.dimension_semantics<parallel>], iteration_bounds = array<i64: 6>, scalar_prefetch = 0 : i64, scratch_operands = 0 : i64, tpu.core_type = #tpu.core_type<tc>, window_params = [{transform_indices = @transform_0, window_bounds = array<i64: 24, 800>}, {transform_indices = @transform_1, window_bounds = array<i64: 8, 800>}, {pipeline_mode = #tpu.pipeline_mode<synchronous>, transform_indices = @transform_2, window_bounds = array<i64: 1600, 640>}, {pipeline_mode = #tpu.pipeline_mode<synchronous>, transform_indices = @transform_3, window_bounds = array<i64: 1, 320>}, {transform_indices = @transform_4, window_bounds = array<i64: 24, 320>}]} {
    %c0 = arith.constant 0 : index
    %c0_0 = arith.constant 0 : index
    %0 = vector.load %arg1[%c0, %c0_0] : memref<24x800xf32, #tpu.memory_space<vmem>>, vector<24x800xf32>
    %1 = vector.extract_strided_slice %0 {offsets = [1, 0], sizes = [23, 800], strides = [1, 1]} : vector<24x800xf32> to vector<23x800xf32>
    %c0_1 = arith.constant 0 : index
    %c0_2 = arith.constant 0 : index
    %2 = vector.load %arg2[%c0_1, %c0_2] : memref<8x800xf32, #tpu.memory_space<vmem>>, vector<1x800xf32>
    %3 = tpu.concatenate %1, %2 in 0 : vector<23x800xf32>, vector<1x800xf32> -> vector<24x800xf32>
    %c0_3 = arith.constant 0 : index
    %c0_4 = arith.constant 0 : index
    %4 = vector.load %arg3[%c0_3, %c0_4] : memref<1600x640xf32, #tpu.memory_space<vmem>>, vector<800x640xf32>
    %cst = arith.constant dense<0.000000e+00> : vector<24x640xf32>
    %5 = tpu.matmul %0, %4, %cst {dimension_numbers = #tpu.dot_dimension_numbers<[1], [0], [0], [1], [0, 0, 1, 1], [], []>} : vector<24x800xf32>, vector<800x640xf32>, vector<24x640xf32> -> vector<24x640xf32>
    %c800 = arith.constant 800 : index
    %c0_5 = arith.constant 0 : index
    %6 = vector.load %arg3[%c800, %c0_5] : memref<1600x640xf32, #tpu.memory_space<vmem>>, vector<800x640xf32>
    %cst_6 = arith.constant dense<0.000000e+00> : vector<24x640xf32>
    %7 = tpu.matmul %3, %6, %cst_6 {dimension_numbers = #tpu.dot_dimension_numbers<[1], [0], [0], [1], [0, 0, 1, 1], [], []>} : vector<24x800xf32>, vector<800x640xf32>, vector<24x640xf32> -> vector<24x640xf32>
    %8 = arith.addf %5, %7 : vector<24x640xf32>
    %9 = vector.extract_strided_slice %8 {offsets = [0, 0], sizes = [24, 320], strides = [1, 1]} : vector<24x640xf32> to vector<24x320xf32>
    %10 = vector.extract_strided_slice %8 {offsets = [0, 320], sizes = [24, 320], strides = [1, 1]} : vector<24x640xf32> to vector<24x320xf32>
    %11 = arith.maximumf %9, %10 : vector<24x320xf32>
    %c0_7 = arith.constant 0 : index
    %c0_8 = arith.constant 0 : index
    %12 = vector.load %arg4[%c0_7, %c0_8] : memref<1x320xf32, #tpu.memory_space<vmem>>, vector<1x320xf32>
    %13 = vector.broadcast %12 : vector<1x320xf32> to vector<24x320xf32>
    %14 = arith.addf %11, %13 : vector<24x320xf32>
    %cst_9 = arith.constant 0.000000e+00 : f32
    %15 = vector.broadcast %cst_9 : f32 to vector<24x320xf32>
    %16 = arith.maximumf %14, %15 : vector<24x320xf32>
    %c0_10 = arith.constant 0 : index
    %c0_11 = arith.constant 0 : index
    %17 = vector.load %arg5[%c0_10, %c0_11] : memref<24x320xf32, #tpu.memory_space<vmem>>, vector<24x320xf32>
    tpu.vector_store %arg5[%c0_10, %c0_11], %16 {strides = array<i32>} : memref<24x320xf32, #tpu.memory_space<vmem>>, vector<24x320xf32>,
    return
  }
  func.func @transform_0(%arg0: i32) -> (i32, i32) {
    %c0_i32 = arith.constant 0 : i32
    %c0_i32_0 = arith.constant 0 : i32
    return %arg0, %c0_i32 : i32, i32
  }
  func.func @transform_1(%arg0: i32) -> (i32, i32) {
    %c1_i32 = arith.constant 1 : i32
    %0 = arith.addi %arg0, %c1_i32 : i32
    %c3_i32 = arith.constant 3 : i32
    %1 = arith.muli %0, %c3_i32 : i32
    %c0_i32 = arith.constant 0 : i32
    %c0_i32_0 = arith.constant 0 : i32
    return %1, %c0_i32 : i32, i32
  }
  func.func @transform_2(%arg0: i32) -> (i32, i32) {
    %c0_i32 = arith.constant 0 : i32
    %c0_i32_0 = arith.constant 0 : i32
    %c0_i32_1 = arith.constant 0 : i32
    return %c0_i32, %c0_i32_0 : i32, i32
  }
  func.func @transform_3(%arg0: i32) -> (i32, i32) {
    %c0_i32 = arith.constant 0 : i32
    %c0_i32_0 = arith.constant 0 : i32
    %c0_i32_1 = arith.constant 0 : i32
    return %c0_i32, %c0_i32_0 : i32, i32
  }
  func.func @transform_4(%arg0: i32) -> (i32, i32) {
    %c0_i32 = arith.constant 0 : i32
    %c0_i32_0 = arith.constant 0 : i32
    return %arg0, %c0_i32 : i32, i32
  }
}

module attributes {stable_mosaic.version = 11 : i64} {
  func.func @_tail_kernel(%arg0: i32, %arg1: memref<144x320xf32, #tpu.memory_space<vmem>>, %arg2: memref<132x132xf32, #tpu.memory_space<vmem>>, %arg3: memref<24x24xf32, #tpu.memory_space<vmem>>, %arg4: memref<1280x64xf32, #tpu.memory_space<vmem>>, %arg5: memref<1x32xf32, #tpu.memory_space<vmem>>, %arg6: memref<1664x96xf32, #tpu.memory_space<vmem>>, %arg7: memref<1x48xf32, #tpu.memory_space<vmem>>, %arg8: memref<384x128xf32, #tpu.memory_space<vmem>>, %arg9: memref<1x64xf32, #tpu.memory_space<vmem>>, %arg10: memref<320x32xf32, #tpu.memory_space<vmem>>, %arg11: memref<1x32xf32, #tpu.memory_space<vmem>>, %arg12: memref<32x16xf32, #tpu.memory_space<vmem>>, %arg13: memref<1x16xf32, #tpu.memory_space<vmem>>, %arg14: memref<16x128xf32, #tpu.memory_space<vmem>>, %arg15: memref<1x128xf32, #tpu.memory_space<vmem>>, %arg16: memref<1x128xf32, #tpu.memory_space<vmem>>) attributes {dimension_semantics = [#tpu.dimension_semantics<arbitrary>], iteration_bounds = array<i64: 1>, scalar_prefetch = 0 : i64, scratch_operands = 0 : i64, tpu.core_type = #tpu.core_type<tc>, window_params = [{pipeline_mode = #tpu.pipeline_mode<synchronous>, transform_indices = @transform_0, window_bounds = array<i64: 144, 320>}, {pipeline_mode = #tpu.pipeline_mode<synchronous>, transform_indices = @transform_1, window_bounds = array<i64: 132, 132>}, {pipeline_mode = #tpu.pipeline_mode<synchronous>, transform_indices = @transform_2, window_bounds = array<i64: 24, 24>}, {pipeline_mode = #tpu.pipeline_mode<synchronous>, transform_indices = @transform_3, window_bounds = array<i64: 1280, 64>}, {pipeline_mode = #tpu.pipeline_mode<synchronous>, transform_indices = @transform_4, window_bounds = array<i64: 1, 32>}, {pipeline_mode = #tpu.pipeline_mode<synchronous>, transform_indices = @transform_5, window_bounds = array<i64: 1664, 96>}, {pipeline_mode = #tpu.pipeline_mode<synchronous>, transform_indices = @transform_6, window_bounds = array<i64: 1, 48>}, {pipeline_mode = #tpu.pipeline_mode<synchronous>, transform_indices = @transform_7, window_bounds = array<i64: 384, 128>}, {pipeline_mode = #tpu.pipeline_mode<synchronous>, transform_indices = @transform_8, window_bounds = array<i64: 1, 64>}, {pipeline_mode = #tpu.pipeline_mode<synchronous>, transform_indices = @transform_9, window_bounds = array<i64: 320, 32>}, {pipeline_mode = #tpu.pipeline_mode<synchronous>, transform_indices = @transform_10, window_bounds = array<i64: 1, 32>}, {pipeline_mode = #tpu.pipeline_mode<synchronous>, transform_indices = @transform_11, window_bounds = array<i64: 32, 16>}, {pipeline_mode = #tpu.pipeline_mode<synchronous>, transform_indices = @transform_12, window_bounds = array<i64: 1, 16>}, {pipeline_mode = #tpu.pipeline_mode<synchronous>, transform_indices = @transform_13, window_bounds = array<i64: 16, 128>}, {pipeline_mode = #tpu.pipeline_mode<synchronous>, transform_indices = @transform_14, window_bounds = array<i64: 1, 128>}, {pipeline_mode = #tpu.pipeline_mode<synchronous>, transform_indices = @transform_15, window_bounds = array<i64: 1, 128>}]} {
    %c0 = arith.constant 0 : index
    %c0_0 = arith.constant 0 : index
    %0 = vector.load %arg1[%c0, %c0_0] : memref<144x320xf32, #tpu.memory_space<vmem>>, vector<144x320xf32>
    %cst = arith.constant 0.000000e+00 : f32
    %1 = vector.broadcast %cst : f32 to vector<1x320xf32>
    %2 = vector.extract_strided_slice %0 {offsets = [0, 0], sizes = [132, 320], strides = [1, 1]} : vector<144x320xf32> to vector<132x320xf32>
    %3 = tpu.concatenate %1, %2 in 0 : vector<1x320xf32>, vector<132x320xf32> -> vector<133x320xf32>
    %4 = vector.extract_strided_slice %3 {offsets = [0, 0], sizes = [130, 320], strides = [1, 1]} : vector<133x320xf32> to vector<130x320xf32>
    %c0_1 = arith.constant 0 : index
    %c0_2 = arith.constant 0 : index
    %5 = vector.load %arg4[%c0_1, %c0_2] : memref<1280x64xf32, #tpu.memory_space<vmem>>, vector<320x64xf32>
    %cst_3 = arith.constant dense<0.000000e+00> : vector<130x64xf32>
    %6 = tpu.matmul %4, %5, %cst_3 {dimension_numbers = #tpu.dot_dimension_numbers<[1], [0], [0], [1], [0, 0, 1, 1], [], []>} : vector<130x320xf32>, vector<320x64xf32>, vector<130x64xf32> -> vector<130x64xf32>
    %7 = vector.extract_strided_slice %3 {offsets = [1, 0], sizes = [130, 320], strides = [1, 1]} : vector<133x320xf32> to vector<130x320xf32>
    %c320 = arith.constant 320 : index
    %c0_4 = arith.constant 0 : index
    %8 = vector.load %arg4[%c320, %c0_4] : memref<1280x64xf32, #tpu.memory_space<vmem>>, vector<320x64xf32>
    %cst_5 = arith.constant dense<0.000000e+00> : vector<130x64xf32>
    %9 = tpu.matmul %7, %8, %cst_5 {dimension_numbers = #tpu.dot_dimension_numbers<[1], [0], [0], [1], [0, 0, 1, 1], [], []>} : vector<130x320xf32>, vector<320x64xf32>, vector<130x64xf32> -> vector<130x64xf32>
    %10 = arith.addf %6, %9 : vector<130x64xf32>
    %11 = vector.extract_strided_slice %3 {offsets = [2, 0], sizes = [130, 320], strides = [1, 1]} : vector<133x320xf32> to vector<130x320xf32>
    %c640 = arith.constant 640 : index
    %c0_6 = arith.constant 0 : index
    %12 = vector.load %arg4[%c640, %c0_6] : memref<1280x64xf32, #tpu.memory_space<vmem>>, vector<320x64xf32>
    %cst_7 = arith.constant dense<0.000000e+00> : vector<130x64xf32>
    %13 = tpu.matmul %11, %12, %cst_7 {dimension_numbers = #tpu.dot_dimension_numbers<[1], [0], [0], [1], [0, 0, 1, 1], [], []>} : vector<130x320xf32>, vector<320x64xf32>, vector<130x64xf32> -> vector<130x64xf32>
    %14 = arith.addf %10, %13 : vector<130x64xf32>
    %15 = vector.extract_strided_slice %3 {offsets = [3, 0], sizes = [130, 320], strides = [1, 1]} : vector<133x320xf32> to vector<130x320xf32>
    %c960 = arith.constant 960 : index
    %c0_8 = arith.constant 0 : index
    %16 = vector.load %arg4[%c960, %c0_8] : memref<1280x64xf32, #tpu.memory_space<vmem>>, vector<320x64xf32>
    %cst_9 = arith.constant dense<0.000000e+00> : vector<130x64xf32>
    %17 = tpu.matmul %15, %16, %cst_9 {dimension_numbers = #tpu.dot_dimension_numbers<[1], [0], [0], [1], [0, 0, 1, 1], [], []>} : vector<130x320xf32>, vector<320x64xf32>, vector<130x64xf32> -> vector<130x64xf32>
    %18 = arith.addf %14, %17 : vector<130x64xf32>
    %19 = vector.extract_strided_slice %18 {offsets = [0, 0], sizes = [130, 32], strides = [1, 1]} : vector<130x64xf32> to vector<130x32xf32>
    %20 = vector.extract_strided_slice %18 {offsets = [0, 32], sizes = [130, 32], strides = [1, 1]} : vector<130x64xf32> to vector<130x32xf32>
    %21 = arith.maximumf %19, %20 : vector<130x32xf32>
    %c0_10 = arith.constant 0 : index
    %c0_11 = arith.constant 0 : index
    %22 = vector.load %arg5[%c0_10, %c0_11] : memref<1x32xf32, #tpu.memory_space<vmem>>, vector<1x32xf32>
    %23 = vector.broadcast %22 : vector<1x32xf32> to vector<130x32xf32>
    %24 = arith.addf %21, %23 : vector<130x32xf32>
    %cst_12 = arith.constant 0.000000e+00 : f32
    %25 = vector.broadcast %cst_12 : f32 to vector<130x32xf32>
    %26 = arith.maximumf %24, %25 : vector<130x32xf32>
    %cst_13 = arith.constant 0.000000e+00 : f32
    %27 = vector.broadcast %cst_13 : f32 to vector<1x32xf32>
    %cst_14 = arith.constant 0.000000e+00 : f32
    %28 = vector.broadcast %cst_14 : f32 to vector<1x32xf32>
    %29 = tpu.concatenate %27, %26, %28 in 0 : vector<1x32xf32>, vector<130x32xf32>, vector<1x32xf32> -> vector<132x32xf32>
    %c0_15 = arith.constant 0 : index
    %c0_16 = arith.constant 0 : index
    %30 = vector.load %arg2[%c0_15, %c0_16] : memref<132x132xf32, #tpu.memory_space<vmem>>, vector<132x132xf32>
    %cst_17 = arith.constant dense<0.000000e+00> : vector<132x32xf32>
    %31 = tpu.matmul %30, %29, %cst_17 {dimension_numbers = #tpu.dot_dimension_numbers<[1], [0], [0], [1], [0, 0, 1, 1], [], []>} : vector<132x132xf32>, vector<132x32xf32>, vector<132x32xf32> -> vector<132x32xf32>
    %32 = vector.extract_strided_slice %31 {offsets = [0, 0], sizes = [33, 32], strides = [1, 1]} : vector<132x32xf32> to vector<33x32xf32>
    %33 = vector.extract_strided_slice %31 {offsets = [33, 0], sizes = [33, 32], strides = [1, 1]} : vector<132x32xf32> to vector<33x32xf32>
    %34 = vector.extract_strided_slice %31 {offsets = [66, 0], sizes = [33, 32], strides = [1, 1]} : vector<132x32xf32> to vector<33x32xf32>
    %35 = vector.extract_strided_slice %31 {offsets = [99, 0], sizes = [33, 32], strides = [1, 1]} : vector<132x32xf32> to vector<33x32xf32>
    %36 = tpu.concatenate %32, %33, %34, %35 in 1 : vector<33x32xf32>, vector<33x32xf32>, vector<33x32xf32>, vector<33x32xf32> -> vector<33x128xf32>
    %37 = vector.extract_strided_slice %36 {offsets = [0, 0], sizes = [21, 128], strides = [1, 1]} : vector<33x128xf32> to vector<21x128xf32>
    %c0_18 = arith.constant 0 : index
    %c0_19 = arith.constant 0 : index
    %38 = vector.load %arg6[%c0_18, %c0_19] : memref<1664x96xf32, #tpu.memory_space<vmem>>, vector<128x96xf32>
    %cst_20 = arith.constant dense<0.000000e+00> : vector<21x96xf32>
    %39 = tpu.matmul %37, %38, %cst_20 {dimension_numbers = #tpu.dot_dimension_numbers<[1], [0], [0], [1], [0, 0, 1, 1], [], []>} : vector<21x128xf32>, vector<128x96xf32>, vector<21x96xf32> -> vector<21x96xf32>
    %40 = vector.extract_strided_slice %36 {offsets = [1, 0], sizes = [21, 128], strides = [1, 1]} : vector<33x128xf32> to vector<21x128xf32>
    %c128 = arith.constant 128 : index
    %c0_21 = arith.constant 0 : index
    %41 = vector.load %arg6[%c128, %c0_21] : memref<1664x96xf32, #tpu.memory_space<vmem>>, vector<128x96xf32>
    %cst_22 = arith.constant dense<0.000000e+00> : vector<21x96xf32>
    %42 = tpu.matmul %40, %41, %cst_22 {dimension_numbers = #tpu.dot_dimension_numbers<[1], [0], [0], [1], [0, 0, 1, 1], [], []>} : vector<21x128xf32>, vector<128x96xf32>, vector<21x96xf32> -> vector<21x96xf32>
    %43 = arith.addf %39, %42 : vector<21x96xf32>
    %44 = vector.extract_strided_slice %36 {offsets = [2, 0], sizes = [21, 128], strides = [1, 1]} : vector<33x128xf32> to vector<21x128xf32>
    %c256 = arith.constant 256 : index
    %c0_23 = arith.constant 0 : index
    %45 = vector.load %arg6[%c256, %c0_23] : memref<1664x96xf32, #tpu.memory_space<vmem>>, vector<128x96xf32>
    %cst_24 = arith.constant dense<0.000000e+00> : vector<21x96xf32>
    %46 = tpu.matmul %44, %45, %cst_24 {dimension_numbers = #tpu.dot_dimension_numbers<[1], [0], [0], [1], [0, 0, 1, 1], [], []>} : vector<21x128xf32>, vector<128x96xf32>, vector<21x96xf32> -> vector<21x96xf32>
    %47 = arith.addf %43, %46 : vector<21x96xf32>
    %48 = vector.extract_strided_slice %36 {offsets = [3, 0], sizes = [21, 128], strides = [1, 1]} : vector<33x128xf32> to vector<21x128xf32>
    %c384 = arith.constant 384 : index
    %c0_25 = arith.constant 0 : index
    %49 = vector.load %arg6[%c384, %c0_25] : memref<1664x96xf32, #tpu.memory_space<vmem>>, vector<128x96xf32>
    %cst_26 = arith.constant dense<0.000000e+00> : vector<21x96xf32>
    %50 = tpu.matmul %48, %49, %cst_26 {dimension_numbers = #tpu.dot_dimension_numbers<[1], [0], [0], [1], [0, 0, 1, 1], [], []>} : vector<21x128xf32>, vector<128x96xf32>, vector<21x96xf32> -> vector<21x96xf32>
    %51 = arith.addf %47, %50 : vector<21x96xf32>
    %52 = vector.extract_strided_slice %36 {offsets = [4, 0], sizes = [21, 128], strides = [1, 1]} : vector<33x128xf32> to vector<21x128xf32>
    %c512 = arith.constant 512 : index
    %c0_27 = arith.constant 0 : index
    %53 = vector.load %arg6[%c512, %c0_27] : memref<1664x96xf32, #tpu.memory_space<vmem>>, vector<128x96xf32>
    %cst_28 = arith.constant dense<0.000000e+00> : vector<21x96xf32>
    %54 = tpu.matmul %52, %53, %cst_28 {dimension_numbers = #tpu.dot_dimension_numbers<[1], [0], [0], [1], [0, 0, 1, 1], [], []>} : vector<21x128xf32>, vector<128x96xf32>, vector<21x96xf32> -> vector<21x96xf32>
    %55 = arith.addf %51, %54 : vector<21x96xf32>
    %56 = vector.extract_strided_slice %36 {offsets = [5, 0], sizes = [21, 128], strides = [1, 1]} : vector<33x128xf32> to vector<21x128xf32>
    %c640_29 = arith.constant 640 : index
    %c0_30 = arith.constant 0 : index
    %57 = vector.load %arg6[%c640_29, %c0_30] : memref<1664x96xf32, #tpu.memory_space<vmem>>, vector<128x96xf32>
    %cst_31 = arith.constant dense<0.000000e+00> : vector<21x96xf32>
    %58 = tpu.matmul %56, %57, %cst_31 {dimension_numbers = #tpu.dot_dimension_numbers<[1], [0], [0], [1], [0, 0, 1, 1], [], []>} : vector<21x128xf32>, vector<128x96xf32>, vector<21x96xf32> -> vector<21x96xf32>
    %59 = arith.addf %55, %58 : vector<21x96xf32>
    %60 = vector.extract_strided_slice %36 {offsets = [6, 0], sizes = [21, 128], strides = [1, 1]} : vector<33x128xf32> to vector<21x128xf32>
    %c768 = arith.constant 768 : index
    %c0_32 = arith.constant 0 : index
    %61 = vector.load %arg6[%c768, %c0_32] : memref<1664x96xf32, #tpu.memory_space<vmem>>, vector<128x96xf32>
    %cst_33 = arith.constant dense<0.000000e+00> : vector<21x96xf32>
    %62 = tpu.matmul %60, %61, %cst_33 {dimension_numbers = #tpu.dot_dimension_numbers<[1], [0], [0], [1], [0, 0, 1, 1], [], []>} : vector<21x128xf32>, vector<128x96xf32>, vector<21x96xf32> -> vector<21x96xf32>
    %63 = arith.addf %59, %62 : vector<21x96xf32>
    %64 = vector.extract_strided_slice %36 {offsets = [7, 0], sizes = [21, 128], strides = [1, 1]} : vector<33x128xf32> to vector<21x128xf32>
    %c896 = arith.constant 896 : index
    %c0_34 = arith.constant 0 : index
    %65 = vector.load %arg6[%c896, %c0_34] : memref<1664x96xf32, #tpu.memory_space<vmem>>, vector<128x96xf32>
    %cst_35 = arith.constant dense<0.000000e+00> : vector<21x96xf32>
    %66 = tpu.matmul %64, %65, %cst_35 {dimension_numbers = #tpu.dot_dimension_numbers<[1], [0], [0], [1], [0, 0, 1, 1], [], []>} : vector<21x128xf32>, vector<128x96xf32>, vector<21x96xf32> -> vector<21x96xf32>
    %67 = arith.addf %63, %66 : vector<21x96xf32>
    %68 = vector.extract_strided_slice %36 {offsets = [8, 0], sizes = [21, 128], strides = [1, 1]} : vector<33x128xf32> to vector<21x128xf32>
    %c1024 = arith.constant 1024 : index
    %c0_36 = arith.constant 0 : index
    %69 = vector.load %arg6[%c1024, %c0_36] : memref<1664x96xf32, #tpu.memory_space<vmem>>, vector<128x96xf32>
    %cst_37 = arith.constant dense<0.000000e+00> : vector<21x96xf32>
    %70 = tpu.matmul %68, %69, %cst_37 {dimension_numbers = #tpu.dot_dimension_numbers<[1], [0], [0], [1], [0, 0, 1, 1], [], []>} : vector<21x128xf32>, vector<128x96xf32>, vector<21x96xf32> -> vector<21x96xf32>
    %71 = arith.addf %67, %70 : vector<21x96xf32>
    %72 = vector.extract_strided_slice %36 {offsets = [9, 0], sizes = [21, 128], strides = [1, 1]} : vector<33x128xf32> to vector<21x128xf32>
    %c1152 = arith.constant 1152 : index
    %c0_38 = arith.constant 0 : index
    %73 = vector.load %arg6[%c1152, %c0_38] : memref<1664x96xf32, #tpu.memory_space<vmem>>, vector<128x96xf32>
    %cst_39 = arith.constant dense<0.000000e+00> : vector<21x96xf32>
    %74 = tpu.matmul %72, %73, %cst_39 {dimension_numbers = #tpu.dot_dimension_numbers<[1], [0], [0], [1], [0, 0, 1, 1], [], []>} : vector<21x128xf32>, vector<128x96xf32>, vector<21x96xf32> -> vector<21x96xf32>
    %75 = arith.addf %71, %74 : vector<21x96xf32>
    %76 = vector.extract_strided_slice %36 {offsets = [10, 0], sizes = [21, 128], strides = [1, 1]} : vector<33x128xf32> to vector<21x128xf32>
    %c1280 = arith.constant 1280 : index
    %c0_40 = arith.constant 0 : index
    %77 = vector.load %arg6[%c1280, %c0_40] : memref<1664x96xf32, #tpu.memory_space<vmem>>, vector<128x96xf32>
    %cst_41 = arith.constant dense<0.000000e+00> : vector<21x96xf32>
    %78 = tpu.matmul %76, %77, %cst_41 {dimension_numbers = #tpu.dot_dimension_numbers<[1], [0], [0], [1], [0, 0, 1, 1], [], []>} : vector<21x128xf32>, vector<128x96xf32>, vector<21x96xf32> -> vector<21x96xf32>
    %79 = arith.addf %75, %78 : vector<21x96xf32>
    %80 = vector.extract_strided_slice %36 {offsets = [11, 0], sizes = [21, 128], strides = [1, 1]} : vector<33x128xf32> to vector<21x128xf32>
    %c1408 = arith.constant 1408 : index
    %c0_42 = arith.constant 0 : index
    %81 = vector.load %arg6[%c1408, %c0_42] : memref<1664x96xf32, #tpu.memory_space<vmem>>, vector<128x96xf32>
    %cst_43 = arith.constant dense<0.000000e+00> : vector<21x96xf32>
    %82 = tpu.matmul %80, %81, %cst_43 {dimension_numbers = #tpu.dot_dimension_numbers<[1], [0], [0], [1], [0, 0, 1, 1], [], []>} : vector<21x128xf32>, vector<128x96xf32>, vector<21x96xf32> -> vector<21x96xf32>
    %83 = arith.addf %79, %82 : vector<21x96xf32>
    %84 = vector.extract_strided_slice %36 {offsets = [12, 0], sizes = [21, 128], strides = [1, 1]} : vector<33x128xf32> to vector<21x128xf32>
    %c1536 = arith.constant 1536 : index
    %c0_44 = arith.constant 0 : index
    %85 = vector.load %arg6[%c1536, %c0_44] : memref<1664x96xf32, #tpu.memory_space<vmem>>, vector<128x96xf32>
    %cst_45 = arith.constant dense<0.000000e+00> : vector<21x96xf32>
    %86 = tpu.matmul %84, %85, %cst_45 {dimension_numbers = #tpu.dot_dimension_numbers<[1], [0], [0], [1], [0, 0, 1, 1], [], []>} : vector<21x128xf32>, vector<128x96xf32>, vector<21x96xf32> -> vector<21x96xf32>
    %87 = arith.addf %83, %86 : vector<21x96xf32>
    %88 = vector.extract_strided_slice %87 {offsets = [0, 0], sizes = [21, 48], strides = [1, 1]} : vector<21x96xf32> to vector<21x48xf32>
    %89 = vector.extract_strided_slice %87 {offsets = [0, 48], sizes = [21, 48], strides = [1, 1]} : vector<21x96xf32> to vector<21x48xf32>
    %90 = arith.maximumf %88, %89 : vector<21x48xf32>
    %c0_46 = arith.constant 0 : index
    %c0_47 = arith.constant 0 : index
    %91 = vector.load %arg7[%c0_46, %c0_47] : memref<1x48xf32, #tpu.memory_space<vmem>>, vector<1x48xf32>
    %92 = vector.broadcast %91 : vector<1x48xf32> to vector<21x48xf32>
    %93 = arith.addf %90, %92 : vector<21x48xf32>
    %cst_48 = arith.constant 0.000000e+00 : f32
    %94 = vector.broadcast %cst_48 : f32 to vector<21x48xf32>
    %95 = arith.maximumf %93, %94 : vector<21x48xf32>
    %cst_49 = arith.constant 0.000000e+00 : f32
    %96 = vector.broadcast %cst_49 : f32 to vector<1x48xf32>
    %cst_50 = arith.constant 0.000000e+00 : f32
    %97 = vector.broadcast %cst_50 : f32 to vector<2x48xf32>
    %98 = tpu.concatenate %96, %95, %97 in 0 : vector<1x48xf32>, vector<21x48xf32>, vector<2x48xf32> -> vector<24x48xf32>
    %c0_51 = arith.constant 0 : index
    %c0_52 = arith.constant 0 : index
    %99 = vector.load %arg3[%c0_51, %c0_52] : memref<24x24xf32, #tpu.memory_space<vmem>>, vector<24x24xf32>
    %cst_53 = arith.constant dense<0.000000e+00> : vector<24x48xf32>
    %100 = tpu.matmul %99, %98, %cst_53 {dimension_numbers = #tpu.dot_dimension_numbers<[1], [0], [0], [1], [0, 0, 1, 1], [], []>} : vector<24x24xf32>, vector<24x48xf32>, vector<24x48xf32> -> vector<24x48xf32>
    %101 = vector.extract_strided_slice %100 {offsets = [0, 0], sizes = [6, 48], strides = [1, 1]} : vector<24x48xf32> to vector<6x48xf32>
    %102 = vector.extract_strided_slice %100 {offsets = [6, 0], sizes = [6, 48], strides = [1, 1]} : vector<24x48xf32> to vector<6x48xf32>
    %103 = vector.extract_strided_slice %100 {offsets = [12, 0], sizes = [6, 48], strides = [1, 1]} : vector<24x48xf32> to vector<6x48xf32>
    %104 = vector.extract_strided_slice %100 {offsets = [18, 0], sizes = [6, 48], strides = [1, 1]} : vector<24x48xf32> to vector<6x48xf32>
    %105 = tpu.concatenate %101, %102, %103, %104 in 1 : vector<6x48xf32>, vector<6x48xf32>, vector<6x48xf32>, vector<6x48xf32> -> vector<6x192xf32>
    %106 = vector.extract_strided_slice %105 {offsets = [0, 0], sizes = [5, 192], strides = [1, 1]} : vector<6x192xf32> to vector<5x192xf32>
    %c0_54 = arith.constant 0 : index
    %c0_55 = arith.constant 0 : index
    %107 = vector.load %arg8[%c0_54, %c0_55] : memref<384x128xf32, #tpu.memory_space<vmem>>, vector<192x128xf32>
    %cst_56 = arith.constant dense<0.000000e+00> : vector<5x128xf32>
    %108 = tpu.matmul %106, %107, %cst_56 {dimension_numbers = #tpu.dot_dimension_numbers<[1], [0], [0], [1], [0, 0, 1, 1], [], []>} : vector<5x192xf32>, vector<192x128xf32>, vector<5x128xf32> -> vector<5x128xf32>
    %109 = vector.extract_strided_slice %105 {offsets = [1, 0], sizes = [5, 192], strides = [1, 1]} : vector<6x192xf32> to vector<5x192xf32>
    %c192 = arith.constant 192 : index
    %c0_57 = arith.constant 0 : index
    %110 = vector.load %arg8[%c192, %c0_57] : memref<384x128xf32, #tpu.memory_space<vmem>>, vector<192x128xf32>
    %cst_58 = arith.constant dense<0.000000e+00> : vector<5x128xf32>
    %111 = tpu.matmul %109, %110, %cst_58 {dimension_numbers = #tpu.dot_dimension_numbers<[1], [0], [0], [1], [0, 0, 1, 1], [], []>} : vector<5x192xf32>, vector<192x128xf32>, vector<5x128xf32> -> vector<5x128xf32>
    %112 = arith.addf %108, %111 : vector<5x128xf32>
    %113 = vector.extract_strided_slice %112 {offsets = [0, 0], sizes = [5, 64], strides = [1, 1]} : vector<5x128xf32> to vector<5x64xf32>
    %114 = vector.extract_strided_slice %112 {offsets = [0, 64], sizes = [5, 64], strides = [1, 1]} : vector<5x128xf32> to vector<5x64xf32>
    %115 = arith.maximumf %113, %114 : vector<5x64xf32>
    %c0_59 = arith.constant 0 : index
    %c0_60 = arith.constant 0 : index
    %116 = vector.load %arg9[%c0_59, %c0_60] : memref<1x64xf32, #tpu.memory_space<vmem>>, vector<1x64xf32>
    %117 = vector.broadcast %116 : vector<1x64xf32> to vector<5x64xf32>
    %118 = arith.addf %115, %117 : vector<5x64xf32>
    %cst_61 = arith.constant 0.000000e+00 : f32
    %119 = vector.broadcast %cst_61 : f32 to vector<5x64xf32>
    %120 = arith.maximumf %118, %119 : vector<5x64xf32>
    %121 = vector.extract_strided_slice %120 {offsets = [0, 0], sizes = [1, 64], strides = [1, 1]} : vector<5x64xf32> to vector<1x64xf32>
    %122 = vector.extract_strided_slice %120 {offsets = [1, 0], sizes = [1, 64], strides = [1, 1]} : vector<5x64xf32> to vector<1x64xf32>
    %123 = vector.extract_strided_slice %120 {offsets = [2, 0], sizes = [1, 64], strides = [1, 1]} : vector<5x64xf32> to vector<1x64xf32>
    %124 = vector.extract_strided_slice %120 {offsets = [3, 0], sizes = [1, 64], strides = [1, 1]} : vector<5x64xf32> to vector<1x64xf32>
    %125 = vector.extract_strided_slice %120 {offsets = [4, 0], sizes = [1, 64], strides = [1, 1]} : vector<5x64xf32> to vector<1x64xf32>
    %126 = tpu.concatenate %121, %122, %123, %124, %125 in 1 : vector<1x64xf32>, vector<1x64xf32>, vector<1x64xf32>, vector<1x64xf32>, vector<1x64xf32> -> vector<1x320xf32>
    %c0_62 = arith.constant 0 : index
    %c0_63 = arith.constant 0 : index
    %127 = vector.load %arg10[%c0_62, %c0_63] : memref<320x32xf32, #tpu.memory_space<vmem>>, vector<320x32xf32>
    %cst_64 = arith.constant dense<0.000000e+00> : vector<1x32xf32>
    %128 = tpu.matmul %126, %127, %cst_64 {dimension_numbers = #tpu.dot_dimension_numbers<[1], [0], [0], [1], [0, 0, 1, 1], [], []>} : vector<1x320xf32>, vector<320x32xf32>, vector<1x32xf32> -> vector<1x32xf32>
    %c0_65 = arith.constant 0 : index
    %c0_66 = arith.constant 0 : index
    %129 = vector.load %arg11[%c0_65, %c0_66] : memref<1x32xf32, #tpu.memory_space<vmem>>, vector<1x32xf32>
    %130 = arith.addf %128, %129 : vector<1x32xf32>
    %cst_67 = arith.constant 0.000000e+00 : f32
    %131 = vector.broadcast %cst_67 : f32 to vector<1x32xf32>
    %132 = arith.maximumf %130, %131 : vector<1x32xf32>
    %c0_68 = arith.constant 0 : index
    %c0_69 = arith.constant 0 : index
    %133 = vector.load %arg12[%c0_68, %c0_69] : memref<32x16xf32, #tpu.memory_space<vmem>>, vector<32x16xf32>
    %cst_70 = arith.constant dense<0.000000e+00> : vector<1x16xf32>
    %134 = tpu.matmul %132, %133, %cst_70 {dimension_numbers = #tpu.dot_dimension_numbers<[1], [0], [0], [1], [0, 0, 1, 1], [], []>} : vector<1x32xf32>, vector<32x16xf32>, vector<1x16xf32> -> vector<1x16xf32>
    %c0_71 = arith.constant 0 : index
    %c0_72 = arith.constant 0 : index
    %135 = vector.load %arg13[%c0_71, %c0_72] : memref<1x16xf32, #tpu.memory_space<vmem>>, vector<1x16xf32>
    %136 = arith.addf %134, %135 : vector<1x16xf32>
    %cst_73 = arith.constant 0.000000e+00 : f32
    %137 = vector.broadcast %cst_73 : f32 to vector<1x16xf32>
    %138 = arith.maximumf %136, %137 : vector<1x16xf32>
    %c0_74 = arith.constant 0 : index
    %c0_75 = arith.constant 0 : index
    %139 = vector.load %arg14[%c0_74, %c0_75] : memref<16x128xf32, #tpu.memory_space<vmem>>, vector<16x128xf32>
    %cst_76 = arith.constant dense<0.000000e+00> : vector<1x128xf32>
    %140 = tpu.matmul %138, %139, %cst_76 {dimension_numbers = #tpu.dot_dimension_numbers<[1], [0], [0], [1], [0, 0, 1, 1], [], []>} : vector<1x16xf32>, vector<16x128xf32>, vector<1x128xf32> -> vector<1x128xf32>
    %c0_77 = arith.constant 0 : index
    %c0_78 = arith.constant 0 : index
    %141 = vector.load %arg15[%c0_77, %c0_78] : memref<1x128xf32, #tpu.memory_space<vmem>>, vector<1x128xf32>
    %142 = arith.addf %140, %141 : vector<1x128xf32>
    %c0_79 = arith.constant 0 : index
    %c0_80 = arith.constant 0 : index
    %143 = vector.load %arg16[%c0_79, %c0_80] : memref<1x128xf32, #tpu.memory_space<vmem>>, vector<1x128xf32>
    tpu.vector_store %arg16[%c0_79, %c0_80], %142 {strides = array<i32>} : memref<1x128xf32, #tpu.memory_space<vmem>>, vector<1x128xf32>,
    return
  }
  func.func @transform_0(%arg0: i32) -> (i32, i32) {
    %c0_i32 = arith.constant 0 : i32
    %c0_i32_0 = arith.constant 0 : i32
    %c0_i32_1 = arith.constant 0 : i32
    return %c0_i32, %c0_i32_0 : i32, i32
  }
  func.func @transform_1(%arg0: i32) -> (i32, i32) {
    %c0_i32 = arith.constant 0 : i32
    %c0_i32_0 = arith.constant 0 : i32
    %c0_i32_1 = arith.constant 0 : i32
    return %c0_i32, %c0_i32_0 : i32, i32
  }
  func.func @transform_2(%arg0: i32) -> (i32, i32) {
    %c0_i32 = arith.constant 0 : i32
    %c0_i32_0 = arith.constant 0 : i32
    %c0_i32_1 = arith.constant 0 : i32
    return %c0_i32, %c0_i32_0 : i32, i32
  }
  func.func @transform_3(%arg0: i32) -> (i32, i32) {
    %c0_i32 = arith.constant 0 : i32
    %c0_i32_0 = arith.constant 0 : i32
    %c0_i32_1 = arith.constant 0 : i32
    return %c0_i32, %c0_i32_0 : i32, i32
  }
  func.func @transform_4(%arg0: i32) -> (i32, i32) {
    %c0_i32 = arith.constant 0 : i32
    %c0_i32_0 = arith.constant 0 : i32
    %c0_i32_1 = arith.constant 0 : i32
    return %c0_i32, %c0_i32_0 : i32, i32
  }
  func.func @transform_5(%arg0: i32) -> (i32, i32) {
    %c0_i32 = arith.constant 0 : i32
    %c0_i32_0 = arith.constant 0 : i32
    %c0_i32_1 = arith.constant 0 : i32
    return %c0_i32, %c0_i32_0 : i32, i32
  }
  func.func @transform_6(%arg0: i32) -> (i32, i32) {
    %c0_i32 = arith.constant 0 : i32
    %c0_i32_0 = arith.constant 0 : i32
    %c0_i32_1 = arith.constant 0 : i32
    return %c0_i32, %c0_i32_0 : i32, i32
  }
  func.func @transform_7(%arg0: i32) -> (i32, i32) {
    %c0_i32 = arith.constant 0 : i32
    %c0_i32_0 = arith.constant 0 : i32
    %c0_i32_1 = arith.constant 0 : i32
    return %c0_i32, %c0_i32_0 : i32, i32
  }
  func.func @transform_8(%arg0: i32) -> (i32, i32) {
    %c0_i32 = arith.constant 0 : i32
    %c0_i32_0 = arith.constant 0 : i32
    %c0_i32_1 = arith.constant 0 : i32
    return %c0_i32, %c0_i32_0 : i32, i32
  }
  func.func @transform_9(%arg0: i32) -> (i32, i32) {
    %c0_i32 = arith.constant 0 : i32
    %c0_i32_0 = arith.constant 0 : i32
    %c0_i32_1 = arith.constant 0 : i32
    return %c0_i32, %c0_i32_0 : i32, i32
  }
  func.func @transform_10(%arg0: i32) -> (i32, i32) {
    %c0_i32 = arith.constant 0 : i32
    %c0_i32_0 = arith.constant 0 : i32
    %c0_i32_1 = arith.constant 0 : i32
    return %c0_i32, %c0_i32_0 : i32, i32
  }
  func.func @transform_11(%arg0: i32) -> (i32, i32) {
    %c0_i32 = arith.constant 0 : i32
    %c0_i32_0 = arith.constant 0 : i32
    %c0_i32_1 = arith.constant 0 : i32
    return %c0_i32, %c0_i32_0 : i32, i32
  }
  func.func @transform_12(%arg0: i32) -> (i32, i32) {
    %c0_i32 = arith.constant 0 : i32
    %c0_i32_0 = arith.constant 0 : i32
    %c0_i32_1 = arith.constant 0 : i32
    return %c0_i32, %c0_i32_0 : i32, i32
  }
  func.func @transform_13(%arg0: i32) -> (i32, i32) {
    %c0_i32 = arith.constant 0 : i32
    %c0_i32_0 = arith.constant 0 : i32
    %c0_i32_1 = arith.constant 0 : i32
    return %c0_i32, %c0_i32_0 : i32, i32
  }
  func.func @transform_14(%arg0: i32) -> (i32, i32) {
    %c0_i32 = arith.constant 0 : i32
    %c0_i32_0 = arith.constant 0 : i32
    %c0_i32_1 = arith.constant 0 : i32
    return %c0_i32, %c0_i32_0 : i32, i32
  }
  func.func @transform_15(%arg0: i32) -> (i32, i32) {
    %c0_i32 = arith.constant 0 : i32
    %c0_i32_0 = arith.constant 0 : i32
    %c0_i32_1 = arith.constant 0 : i32
    return %c0_i32, %c0_i32_0 : i32, i32
  }
}

</mosaic_0001>

<bundles_post_ra>
// kernel: forward.2
= control target key start
LH: loop header
LB: loop body
LE: loop exit
PB: predicated region body
PF: predicated region fallthrough
CT: control target
= control target key end

     0   :  { %9 = vsyncpa [#allocation3], 0  ;;  %s4788_s0 = inlined_call_operand.vmem [shape: f32[152,800], index: 0, kind: input, shape index: {}, may-alias: {0,1}]   ;;  %s4789_s1 = inlined_call_operand.vmem [shape: f32[152,800], index: 1, kind: input, shape index: {}, may-alias: {0,1}]   ;;  %s4790_s2 = inlined_call_operand.hbm [shape: f32[1600,640], index: 2, kind: input, shape index: {}]   ;;  %s4791_s3 = inlined_call_operand.hbm [shape: f32[1,320], index: 3, kind: input, shape index: {}]   ;;  %s4792_s4 = inlined_call_operand.vmem [shape: f32[144,320], index: 4, kind: output, shape index: {}]  }
   0x1   :  { %10 = vsyncpa [#allocation5], 0  ;;  %s4111_s15 = smov 0  }
   0x2 LB: > { %s4117_s16 = sadd.s32 4294967295, %s4077_s15   ;;  %p3608_p0 = scmp.ge.s32.totalorder %s4077_s15, 1  ;;  %s4077_s15 = sphi %s4111_s15, %s16_s15  }
   0x3   : > { %p145_p1 = scmp.lt.s32.totalorder %s4077_s15, 7  ;;  %s4079_s17 = smov [#allocation2]  }
   0x4   : > { %s157_s18 = sshll.u32 %s4079_s17, 4  ;;  %p3950_p3 = scmp.eq.s32.totalorder %s4117_s16, 0  ;;  %s158_s18 = int_to_ptr.vmem [resolvable:$true] %s157_s18 }
   0x5   : > { %p4121_p2 = pnand %p3608_p0, %p145_p1  ;;  %s4080_s20 = smov [#allocation4]  }
   0x6   : > { %s171_s21 = sshll.u32 %s4080_s20, 4  ;;  %s4022_s23 = scalar_lea.vmem %s158_s18, 128000  ;;  %s172_s21 = int_to_ptr.vmem [resolvable:$true] %s171_s21 }
   0x7   : > { %p3943_p4 = pneg %p4121_p2  ;;  %p4023_p7 = scmp.ne.s32.totalorder %s158_s18, %s4022_s23 }
   0x8   : > { %p4030_p10 = scmp.lt.s32.totalorder %s158_s18, %s158_s18  ;;  %p4031_p11 = scmp.lt.s32.totalorder %s4022_s23, %s4022_s23 }
   0x9   : > { %p4130_p5 = pnand %p3950_p3, %p3943_p4 }
   0xa   : > { %p4032_p12 = por %p4031_p11, %p4030_p10 }
   0xb   : > { %p4013_p6 = pneg %p4130_p5 }
   0xd   : > { %p4025_p8 = pnand %p4023_p7, %p4013_p6 }
   0xf   : > { %p4026_p9 = pneg %p4025_p8 }
  0x11   : > { %p4033_p13 = pnand %p4032_p12, %p4026_p9 }
  0x13   : > { %4036 = shalt.err (!%p4033_p13)
}
  0x14   : > { %s4081_s24 = smov 640   ;;  %s4082_s25 = smov 40  }
  0x15   : > { %3946 = dma.hbm_to_vmem [thread:$0]  (!%p4130_p5), %s4790_s2, 128000, %s158_s18, [#allocation3], %s4081_s24, %s4081_s24, %s4082_s25  }
  0x16   : > { %s4048_s28 = scalar_lea.vmem %s172_s21, 48  ;;  %s4055_s29 = scalar_lea.vmem %s172_s21, 64 }
  0x17   : > { %p4049_p0 = scmp.ne.s32.totalorder %s172_s21, %s4048_s28  ;;  %p4056_p7 = scmp.lt.s32.totalorder %s172_s21, %s172_s21 }
  0x18   : > { %p4057_p8 = scmp.lt.s32.totalorder %s4055_s29, %s4048_s28 }
  0x19   : > { %p4051_p1 = pnand %p4049_p0, %p4013_p6 }
  0x1a   : > { %p4058_p9 = por %p4057_p8, %p4056_p7 }
  0x1b   : > { %p4052_p4 = pneg %p4051_p1 }
  0x1d   : > { %p4059_p10 = pnand %p4058_p9, %p4052_p4 }
  0x1f   : > { %4062 = shalt.err (!%p4059_p10)
}
  0x20   : > { %3949 = dma.hbm_to_vmem [thread:$0]  (!%p4130_p5), %s4791_s3, 48, %s172_s21, [#allocation5]  }
  0x21   : > { %216 = sbr.rel (%p4121_p2) target bundleno = 944 (0x3b0), region = 36 }
  0x26   : > { %4068 = dma.done.wait (%p3950_p3), [#allocation3], 128000  }
  0x27   : > { %4070 = vsyncadd (%p3950_p3), [#allocation3], 4294839296 }
  0x28   : > { %4072 = dma.done.wait (%p3950_p3), [#allocation5], 48  }
  0x29   : > { %4074 = vsyncadd (%p3950_p3), [#allocation5], 4294967248  ;;  %v1012_v0 = vld [vmem:[#allocation2 + $0x1200] sm:$0xff]  ;;  %v1011_v2 = vld [vmem:[#allocation2 + $0x11f8] sm:$0xff]  ;;  %s277_s6 = sadd.s32 1, %s4117_s16  ;;  %s4166_s8 = smul.u32 3, %s4117_s16 }
  0x2a   : > { %v1172_v1 = vld [vmem:[#allocation2 + $0x1700] sm:$0xff]  ;;  %1444 = vmatprep.subr.mxu0 %v1012_v0  ;;  %v1171_v3 = vld [vmem:[#allocation2 + $0x16f8] sm:$0xff]  ;;  %v1006_v6 = vld [vmem:[#allocation2 + $0x11d0] sm:$0xff]  ;;  %s4163_s7 = smul.u32 3, %s277_s6  ;;  %vm338_vm0 = vcmask 1046528   ;;  %vm1436_vm1 = vcmask 261120  }
  0x2b   : > { %1527 = vmatprep.subr.mxu1 %v1172_v1  ;;  %v1007_v4 = vld [vmem:[#allocation2 + $0x11d8] sm:$0xff]  ;;  %1445 = vmatpush1.msra.mxu0 %v1011_v2  ;;  %v1166_v7 = vld [vmem:[#allocation2 + $0x16d0] sm:$0xff]  ;;  %v1001_v10 = vld [vmem:[#allocation2 + $0x11a8] sm:$0xff]  ;;  %p266_p3 = scmp.lt.s32.totalorder %s4166_s8, 18  ;;  %vm4084_vm2 = vmmov 0   ;;  %s4085_s19 = smov 64  }
  0x2c   : > { %v1167_v5 = vld [vmem:[#allocation2 + $0x16d8] sm:$0xff]  ;;  %1528 = vmatpush1.msra.mxu1 %v1171_v3  ;;  %v1002_v8 = vld [vmem:[#allocation2 + $0x11b0] sm:$0xff]  ;;  %1446 = vmatprep.subr.mxu0 %v1007_v4  ;;  %v1161_v11 = vld [vmem:[#allocation2 + $0x16a8] sm:$0xff]  ;;  %p279_p2 = scmp.lt.s32.totalorder %s4163_s7, 18  ;;  %p287_p5 = scmp.lt.s32.totalorder %s4166_s8, 17  ;;  %vm3445_vm3 = vcmask 523264  }
  0x2d   : > { %1529 = vmatprep.subr.mxu1 %v1167_v5  ;;  %v1162_v9 = vld [vmem:[#allocation2 + $0x16b0] sm:$0xff]  ;;  %1447 = vmatpush1.msra.mxu0 %v1006_v6  ;;  %v997_v12 = vld [vmem:[#allocation2 + $0x1188] sm:$0xff]  ;;  %v996_v14 = vld [vmem:[#allocation2 + $0x1180] sm:$0xff]  ;;  %s4178_s9 = scalar_select %p266_p3, %s4166_s8, 18 }
  0x2e   : > { %1530 = vmatpush1.msra.mxu1 %v1166_v7  ;;  %v1157_v13 = vld [vmem:[#allocation2 + $0x1688] sm:$0xff]  ;;  %1448 = vmatprep.subr.mxu0 %v1002_v8  ;;  %v1156_v15 = vld [vmem:[#allocation2 + $0x1680] sm:$0xff]  ;;  %v991_v18 = vld [vmem:[#allocation2 + $0x1158] sm:$0xff]  ;;  %s4796_s7 = smov (!%p279_p2, %s4163_s7), 18  ;;  %s4798_s8 = smov (!%p287_p5, %s4166_s8), 17 }
  0x2f   : > { %1531 = vmatprep.subr.mxu1 %v1162_v9  ;;  %1449 = vmatpush1.msra.mxu0 %v1001_v10  ;;  %v992_v16 = vld [vmem:[#allocation2 + $0x1160] sm:$0xff]  ;;  %v1151_v19 = vld [vmem:[#allocation2 + $0x1658] sm:$0xff]  ;;  %v986_v22 = vld [vmem:[#allocation2 + $0x1130] sm:$0xff]  ;;  %s3933_s10 = smul.u32 56, %s4796_s7 }
  0x30   : > { %1532 = vmatpush1.msra.mxu1 %v1161_v11  ;;  %v1152_v17 = vld [vmem:[#allocation2 + $0x1660] sm:$0xff]  ;;  %1450 = vmatprep.subr.mxu0 %v997_v12  ;;  %v987_v20 = vld [vmem:[#allocation2 + $0x1138] sm:$0xff]  ;;  %v1146_v23 = vld [vmem:[#allocation2 + $0x1630] sm:$0xff]  ;;  %s3932_s11 = smul.u32 56, %s4178_s9 }
  0x31   : > { %1533 = vmatprep.subr.mxu1 %v1157_v13  ;;  %1451 = vmatpush1.msra.mxu0 %v996_v14  ;;  %v1147_v21 = vld [vmem:[#allocation2 + $0x1638] sm:$0xff]  ;;  %v982_v24 = vld [vmem:[#allocation2 + $0x1110] sm:$0xff]  ;;  %v981_v26 = vld [vmem:[#allocation2 + $0x1108] sm:$0xff]  ;;  %s283_s14 = scalar_lea.vmem %s4789_s1, %s3933_s10  ;;  %s3934_s20 = smul.u32 24, %s4798_s8 }
  0x32   : > { %1534 = vmatpush1.msra.mxu1 %v1156_v15  ;;  %1452 = vmatprep.subr.mxu0 %v992_v16  ;;  %v1142_v25 = vld [vmem:[#allocation2 + $0x1610] sm:$0xff]  ;;  %v1141_v27 = vld [vmem:[#allocation2 + $0x1608] sm:$0xff]  ;;  %v976_v30 = vld [vmem:[#allocation2 + $0x10e0] sm:$0xff]  ;;  %s4191_s18 = scalar_lea.vmem %s4788_s0, %s3932_s11 }
  0x33   : > { %1535 = vmatprep.subr.mxu1 %v1152_v17  ;;  %1453 = vmatpush1.msra.mxu0 %v991_v18  ;;  %v977_v28 = vld [vmem:[#allocation2 + $0x10e8] sm:$0xff]  ;;  %v1136_v31 = vld [vmem:[#allocation2 + $0x15e0] sm:$0xff]  ;;  %v971_v34 = vld [vmem:[#allocation2 + $0x10b8] sm:$0xff]  ;;  %s4754_s23 = scalar_lea.vmem %s4792_s4, %s3934_s20 }
  0x34   : > { %1536 = vmatpush1.msra.mxu1 %v1151_v19  ;;  %1454 = vmatprep.subr.mxu0 %v987_v20  ;;  %v1137_v29 = vld [vmem:[#allocation2 + $0x15e8] sm:$0xff]  ;;  %v972_v32 = vld [vmem:[#allocation2 + $0x10c0] sm:$0xff]  ;;  %v1131_v35 = vld [vmem:[#allocation2 + $0x15b8] sm:$0xff] }
  0x35   : > { %1537 = vmatprep.subr.mxu1 %v1147_v21  ;;  %1455 = vmatpush1.msra.mxu0 %v986_v22  ;;  %v1132_v33 = vld [vmem:[#allocation2 + $0x15c0] sm:$0xff]  ;;  %v967_v36 = vld [vmem:[#allocation2 + $0x1098] sm:$0xff]  ;;  %v966_v38 = vld [vmem:[#allocation2 + $0x1090] sm:$0xff] }
  0x36   : > { %1538 = vmatpush1.msra.mxu1 %v1146_v23  ;;  %1456 = vmatprep.subr.mxu0 %v982_v24  ;;  %v1127_v37 = vld [vmem:[#allocation2 + $0x1598] sm:$0xff]  ;;  %v1126_v39 = vld [vmem:[#allocation2 + $0x1590] sm:$0xff]  ;;  %v961_v42 = vld [vmem:[#allocation2 + $0x1068] sm:$0xff] }
  0x37   : > { %1539 = vmatprep.subr.mxu1 %v1142_v25  ;;  %1457 = vmatpush1.msra.mxu0 %v981_v26  ;;  %v962_v40 = vld [vmem:[#allocation2 + $0x1070] sm:$0xff]  ;;  %v1121_v43 = vld [vmem:[#allocation2 + $0x1568] sm:$0xff]  ;;  %v956_v46 = vld [vmem:[#allocation2 + $0x1040] sm:$0xff] }
  0x38   : > { %1540 = vmatpush1.msra.mxu1 %v1141_v27  ;;  %1458 = vmatprep.subr.mxu0 %v977_v28  ;;  %v1122_v41 = vld [vmem:[#allocation2 + $0x1570] sm:$0xff]  ;;  %v957_v44 = vld [vmem:[#allocation2 + $0x1048] sm:$0xff]  ;;  %v1116_v47 = vld [vmem:[#allocation2 + $0x1540] sm:$0xff] }
  0x39   : > { %1541 = vmatprep.subr.mxu1 %v1137_v29  ;;  %1459 = vmatpush1.msra.mxu0 %v976_v30  ;;  %v1117_v45 = vld [vmem:[#allocation2 + $0x1548] sm:$0xff]  ;;  %v952_v48 = vld [vmem:[#allocation2 + $0x1020] sm:$0xff]  ;;  %v951_v50 = vld [vmem:[#allocation2 + $0x1018] sm:$0xff]  ;;  %v394_v30 = vlaneseq }
  0x3a   : > { %1542 = vmatpush1.msra.mxu1 %v1136_v31  ;;  %1460 = vmatprep.subr.mxu0 %v972_v32  ;;  %v1112_v49 = vld [vmem:[#allocation2 + $0x1520] sm:$0xff]  ;;  %v1111_v51 = vld [vmem:[#allocation2 + $0x1518] sm:$0xff]  ;;  %v946_v54 = vld [vmem:[#allocation2 + $0xff0] sm:$0xff] }
  0x3b   : > { %1543 = vmatprep.subr.mxu1 %v1132_v33  ;;  %1461 = vmatpush1.msra.mxu0 %v971_v34  ;;  %v947_v52 = vld [vmem:[#allocation2 + $0xff8] sm:$0xff]  ;;  %v1106_v55 = vld [vmem:[#allocation2 + $0x14f0] sm:$0xff]  ;;  %v941_v58 = vld [vmem:[#allocation2 + $0xfc8] sm:$0xff] }
  0x3c   : > { %1544 = vmatpush1.msra.mxu1 %v1131_v35  ;;  %1462 = vmatprep.subr.mxu0 %v967_v36  ;;  %v1107_v53 = vld [vmem:[#allocation2 + $0x14f8] sm:$0xff]  ;;  %v942_v56 = vld [vmem:[#allocation2 + $0xfd0] sm:$0xff]  ;;  %v1101_v59 = vld [vmem:[#allocation2 + $0x14c8] sm:$0xff] }
  0x3d   : > { %1545 = vmatprep.subr.mxu1 %v1127_v37  ;;  %1463 = vmatpush1.msra.mxu0 %v966_v38  ;;  %v1102_v57 = vld [vmem:[#allocation2 + $0x14d0] sm:$0xff]  ;;  %v937_v60 = vld [vmem:[#allocation2 + $0xfa8] sm:$0xff]  ;;  %v936_v62 = vld [vmem:[#allocation2 + $0xfa0] sm:$0xff] }
  0x3e   : > { %1546 = vmatpush1.msra.mxu1 %v1126_v39  ;;  %1464 = vmatprep.subr.mxu0 %v962_v40  ;;  %v1097_v61 = vld [vmem:[#allocation2 + $0x14a8] sm:$0xff]  ;;  %v1096_v63 = vld [vmem:[#allocation2 + $0x14a0] sm:$0xff]  ;;  %v1091_v2 = vld [vmem:[#allocation2 + $0x1478] sm:$0xff]  ;;  %v4185_v40 = vshrl.u32 %v394_v30, 7 }
  0x3f   : > { %1547 = vmatprep.subr.mxu1 %v1122_v41  ;;  %1465 = vmatpush1.msra.mxu0 %v961_v42  ;;  %v1092_v0 = vld [vmem:[#allocation2 + $0x1480] sm:$0xff]  ;;  %v1251_v3 = vld [vmem:[#allocation2 + $0x1978] sm:$0xff]  ;;  %v1086_v6 = vld [vmem:[#allocation2 + $0x1450] sm:$0xff] }
  0x40   : > { %1548 = vmatpush1.msra.mxu1 %v1121_v43  ;;  %1466 = vmatprep.subr.mxu0 %v957_v44  ;;  %v1252_v1 = vld [vmem:[#allocation2 + $0x1980] sm:$0xff]  ;;  %v1087_v4 = vld [vmem:[#allocation2 + $0x1458] sm:$0xff]  ;;  %v1246_v7 = vld [vmem:[#allocation2 + $0x1950] sm:$0xff] }
  0x41   : > { %1549 = vmatprep.subr.mxu1 %v1117_v45  ;;  %1467 = vmatpush1.msra.mxu0 %v956_v46  ;;  %v1247_v5 = vld [vmem:[#allocation2 + $0x1958] sm:$0xff]  ;;  %v1082_v8 = vld [vmem:[#allocation2 + $0x1430] sm:$0xff]  ;;  %v1081_v10 = vld [vmem:[#allocation2 + $0x1428] sm:$0xff] }
  0x42   : > { %1550 = vmatpush1.msra.mxu1 %v1116_v47  ;;  %1468 = vmatprep.subr.mxu0 %v952_v48  ;;  %v1242_v9 = vld [vmem:[#allocation2 + $0x1930] sm:$0xff]  ;;  %v1241_v11 = vld [vmem:[#allocation2 + $0x1928] sm:$0xff]  ;;  %v1076_v14 = vld [vmem:[#allocation2 + $0x1400] sm:$0xff]  ;;  %v420_v47 = vsub.s32 6, %v4185_v40 }
  0x43   : > { %1551 = vmatprep.subr.mxu1 %v1112_v49  ;;  %1469 = vmatpush1.msra.mxu0 %v951_v50  ;;  %v1077_v12 = vld [vmem:[#allocation2 + $0x1408] sm:$0xff]  ;;  %v1236_v15 = vld [vmem:[#allocation2 + $0x1900] sm:$0xff]  ;;  %v1071_v18 = vld [vmem:[#allocation2 + $0x13d8] sm:$0xff] }
  0x44   : > { %1552 = vmatpush1.msra.mxu1 %v1111_v51  ;;  %1470 = vmatprep.subr.mxu0 %v947_v52  ;;  %v1237_v13 = vld [vmem:[#allocation2 + $0x1908] sm:$0xff]  ;;  %v1072_v16 = vld [vmem:[#allocation2 + $0x13e0] sm:$0xff]  ;;  %v1231_v19 = vld [vmem:[#allocation2 + $0x18d8] sm:$0xff]  ;;  %v416_v51 = vsub.s32 5, %v4185_v40 }
  0x45   : > { %1553 = vmatprep.subr.mxu1 %v1107_v53  ;;  %1471 = vmatpush1.msra.mxu0 %v946_v54  ;;  %v1232_v17 = vld [vmem:[#allocation2 + $0x18e0] sm:$0xff]  ;;  %v1067_v20 = vld [vmem:[#allocation2 + $0x13b8] sm:$0xff]  ;;  %v1066_v22 = vld [vmem:[#allocation2 + $0x13b0] sm:$0xff] }
  0x46   : > { %1554 = vmatpush1.msra.mxu1 %v1106_v55  ;;  %1472 = vmatprep.subr.mxu0 %v942_v56  ;;  %v1227_v21 = vld [vmem:[#allocation2 + $0x18b8] sm:$0xff]  ;;  %v1226_v23 = vld [vmem:[#allocation2 + $0x18b0] sm:$0xff]  ;;  %v1061_v26 = vld [vmem:[#allocation2 + $0x1388] sm:$0xff] }
  0x47   : > { %1555 = vmatprep.subr.mxu1 %v1102_v57  ;;  %1473 = vmatpush1.msra.mxu0 %v941_v58  ;;  %v1062_v24 = vld [vmem:[#allocation2 + $0x1390] sm:$0xff]  ;;  %v1221_v27 = vld [vmem:[#allocation2 + $0x1888] sm:$0xff]  ;;  %v1056_v31 = vld [vmem:[#allocation2 + $0x1360] sm:$0xff] }
  0x48   : > { %1556 = vmatpush1.msra.mxu1 %v1101_v59  ;;  %1474 = vmatprep.subr.mxu0 %v937_v60  ;;  %v1222_v25 = vld [vmem:[#allocation2 + $0x1890] sm:$0xff]  ;;  %v1057_v28 = vld [vmem:[#allocation2 + $0x1368] sm:$0xff]  ;;  %v1216_v32 = vld [vmem:[#allocation2 + $0x1860] sm:$0xff]  ;;  %v412_v59 = vsub.s32 4, %v4185_v40 }
  0x49   : > { %1557 = vmatprep.subr.mxu1 %v1097_v61  ;;  %1475 = vmatpush1.msra.mxu0 %v936_v62  ;;  %v1217_v29 = vld [vmem:[#allocation2 + $0x1868] sm:$0xff]  ;;  %v1052_v33 = vld [vmem:[#allocation2 + $0x1340] sm:$0xff]  ;;  %v1051_v35 = vld [vmem:[#allocation2 + $0x1338] sm:$0xff] }
  0x4a   : > { %1558 = vmatpush1.msra.mxu1 %v1096_v63  ;;  %1476 = vmatprep.subr.mxu0 %v1092_v0  ;;  %v1212_v34 = vld [vmem:[#allocation2 + $0x1840] sm:$0xff]  ;;  %v1211_v36 = vld [vmem:[#allocation2 + $0x1838] sm:$0xff]  ;;  %v1046_v39 = vld [vmem:[#allocation2 + $0x1310] sm:$0xff] }
  0x4b   : > { %1559 = vmatprep.subr.mxu1 %v1252_v1  ;;  %1477 = vmatpush2.msra.mxu0 %v1091_v2  ;;  %v1047_v37 = vld [vmem:[#allocation2 + $0x1318] sm:$0xff]  ;;  %v1206_v41 = vld [vmem:[#allocation2 + $0x1810] sm:$0xff]  ;;  %v1041_v44 = vld [vmem:[#allocation2 + $0x12e8] sm:$0xff] }
  0x4c   : > { %1560 = vmatpush2.msra.mxu1 %v1251_v3  ;;  %1478 = vmatprep.subr.mxu0 %v1087_v4  ;;  %v1207_v38 = vld [vmem:[#allocation2 + $0x1818] sm:$0xff]  ;;  %v1042_v42 = vld [vmem:[#allocation2 + $0x12f0] sm:$0xff]  ;;  %v1201_v45 = vld [vmem:[#allocation2 + $0x17e8] sm:$0xff] }
  0x4d   : > { %1561 = vmatprep.subr.mxu1 %v1247_v5  ;;  %1479 = vmatpush2.msra.mxu0 %v1086_v6  ;;  %v1202_v43 = vld [vmem:[#allocation2 + $0x17f0] sm:$0xff]  ;;  %v1037_v48 = vld [vmem:[#allocation2 + $0x12c8] sm:$0xff]  ;;  %v1036_v52 = vld [vmem:[#allocation2 + $0x12c0] sm:$0xff] }
  0x4e   : > { %1562 = vmatpush2.msra.mxu1 %v1246_v7  ;;  %1480 = vmatprep.subr.mxu0 %v1082_v8  ;;  %v314_v46 = vld [vmem:[%s283_s14] ss:$8 sm:$0xf] }
  0x4f   : > { %1563 = vmatprep.subr.mxu1 %v1242_v9  ;;  %1481 = vmatpush2.msra.mxu0 %v1081_v10  ;;  %v1197_v49 = vld [vmem:[#allocation2 + $0x17c8] sm:$0xff]  ;;  %v1196_v53 = vld [vmem:[#allocation2 + $0x17c0] sm:$0xff]  ;;  %v1031_v56 = vld [vmem:[#allocation2 + $0x1298] sm:$0xff] }
  0x50   : > { %1564 = vmatpush2.msra.mxu1 %v1241_v11  ;;  %1482 = vmatprep.subr.mxu0 %v1077_v12  ;;  %v315_v50 = vld [vmem:[%s283_s14] ss:$8 sm:$0x70]  ;;  %v1191_v57 = vld [vmem:[#allocation2 + $0x1798] sm:$0xff] }
  0x51   : > { %1565 = vmatprep.subr.mxu1 %v1237_v13  ;;  %1483 = vmatpush2.msra.mxu0 %v1076_v14  ;;  %v1032_v54 = vld [vmem:[#allocation2 + $0x12a0] sm:$0xff]  ;;  %v4194_v58 = vor.u32 %v315_v50, %v314_v46  ;;  %v1027_v60 = vld [vmem:[#allocation2 + $0x1278] sm:$0xff]  ;;  %v294_v62 = vld [vmem:[%s4191_s18 + $0x8] sm:$0xff] }
  0x52   : > { %1566 = vmatpush2.msra.mxu1 %v1236_v15  ;;  %1484 = vmatprep.subr.mxu0 %v1072_v16  ;;  %v1192_v55 = vld [vmem:[#allocation2 + $0x17a0] sm:$0xff]  ;;  %v1187_v61 = vld [vmem:[#allocation2 + $0x1778] sm:$0xff]  ;;  %v4203_v1 = vld [vmem:[%s4191_s18 + $0x50] sm:$0xff]  ;;  %v342_v10 = vrot.slane %v294_v62, 1 }
  0x53   : > { %1567 = vmatprep.subr.mxu1 %v1232_v17  ;;  %1485 = vmatpush2.msra.mxu0 %v1071_v18  ;;  %v4199_v63 = vld [vmem:[%s4191_s18 + $0x40] sm:$0xff]  ;;  %v296_v0 = vld [vmem:[%s4191_s18 + $0x18] sm:$0xff]  ;;  %v4207_v3 = vrot.slane %v4194_v58, %v420_v47  ;;  %v4210_v4 = vrot.slane %v4194_v58, %v416_v51  ;;  %v295_v6 = vld [vmem:[%s4191_s18 + $0x10] sm:$0xff]  ;;  %v4221_v12 = vrot.slane %v4194_v58, %v412_v59  ;;  %v349_v17 = vrot.slane %v4203_v1, 1 }
  0x54   : > { %1568 = vmatpush2.msra.mxu1 %v1231_v19  ;;  %1486 = vmatprep.subr.mxu0 %v1067_v20  ;;  %v293_v2 = vld [vmem:[%s4191_s18] sm:$0xff]  ;;  %v4213_v5 = vld [vmem:[%s4191_s18 + $0x38] sm:$0xff]  ;;  %v4217_v7 = vld [vmem:[%s4191_s18 + $0x48] sm:$0xff]  ;;  %v343_v11 = vrot.slane %v4199_v63, 1  ;;  %v348_v16 = vrot.slane %v296_v0, 1 }
  0x55   : > { %1569 = vmatprep.subr.mxu1 %v1227_v21  ;;  %1487 = vmatpush2.msra.mxu0 %v1066_v22  ;;  %v1026_v8 = vld [vmem:[#allocation2 + $0x1270] sm:$0xff]  ;;  %v1021_v15 = vld [vmem:[#allocation2 + $0x1248] sm:$0xff]  ;;  %v339_v19 = vrot.slane %v293_v2, 1  ;;  %v340_v20 = vrot.slane %v4213_v5, 1  ;;  %v345_v21 = vrot.slane %v295_v6, 1  ;;  %v346_v22 = vrot.slane %v4217_v7, 1 }
  0x56   : > { %1570 = vmatpush2.msra.mxu1 %v1226_v23  ;;  %1488 = vmatprep.subr.mxu0 %v1062_v24  ;;  %v1186_v9 = vld [vmem:[#allocation2 + $0x1770] sm:$0xff]  ;;  %v1181_v18 = vld [vmem:[#allocation2 + $0x1748] sm:$0xff]  ;;  %v4227_v23 = vld [vmem:[%s4191_s18 + $0x78] sm:$0xff] }
  0x57   : > { %1571 = vmatprep.subr.mxu1 %v1222_v25  ;;  %1489 = vmatpush2.msra.mxu0 %v1061_v26  ;;  %v1022_v13 = vld [vmem:[#allocation2 + $0x1250] sm:$0xff]  ;;  %v1017_v24 = vld [vmem:[#allocation2 + $0x1228] sm:$0xff]  ;;  %v1176_v30 = vld [vmem:[#allocation2 + $0x1720] sm:$0xff] }
  0x58   : > { %1572 = vmatpush2.msra.mxu1 %v1221_v27  ;;  %1490 = vmatprep.subr.mxu0 %v1057_v28  ;;  %v1182_v14 = vld [vmem:[#allocation2 + $0x1750] sm:$0xff]  ;;  %v1177_v25 = vld [vmem:[#allocation2 + $0x1728] sm:$0xff]  ;;  %v1016_v27 = vld [vmem:[#allocation2 + $0x1220] sm:$0xff]  ;;  %v4233_v28 = vsel %vm338_vm0, %v342_v10, %v343_v11 }
  0x59   : > { %1573 = vmatprep.subr.mxu1 %v1217_v29  ;;  %1491 = vmatpush2.msra.mxu0 %v1056_v31  ;;  %v4230_v26 = vld [vmem:[%s4191_s18 + $0x88] sm:$0xff]  ;;  %v4236_v29 = vld [vmem:[%s4191_s18 + $0x70] sm:$0xff]  ;;  %v4239_v31 = vsel %vm338_vm0, %v348_v16, %v349_v17  ;;  %v1327_v46 = vld [vmem:[#allocation2 + $0x1bd8] sm:$0xff] }
  0x5a   : > { %1574 = vmatpush2.msra.mxu1 %v1216_v32  ;;  %1492 = vmatprep.subr.mxu0 %v1052_v33  ;;  %v362_v32 = vrot.slane %v4227_v23, 1  ;;  %v4243_v33 = vld [vmem:[%s4191_s18 + $0x80] sm:$0xff]  ;;  %v1326_v51 = vld [vmem:[#allocation2 + $0x1bd0] sm:$0xff]  ;;  %v1317_v63 = vld [vmem:[#allocation2 + $0x1b88] sm:$0xff] }
  0x5b   : > { %1575 = vmatprep.subr.mxu1 %v1212_v34  ;;  %1493 = vmatpush2.msra.mxu0 %v1051_v35  ;;  %v4246_v34 = vsel %vm338_vm0, %v339_v19, %v340_v20  ;;  %v4249_v35 = vsel %vm338_vm0, %v345_v21, %v346_v22  ;;  %v1426_v59 = vld [vmem:[#allocation2 + $0x1ef0] sm:$0xff]  ;;  %v4296_v6 = vld [vmem:[%s4191_s18 + $0x68] sm:$0xff]  ;;  %v1312_v10 = vld [vmem:[#allocation2 + $0x1b60] sm:$0xff] }
  0x5c   : > { %1576 = vmatpush2.msra.mxu1 %v1211_v36  ;;  %1494 = vmatprep.subr.mxu0 %v1047_v37  ;;  %v366_v36 = vrot.slane %v4230_v26, 1  ;;  %v1332_v37 = vld [vmem:[#allocation2 + $0x1c00] sm:$0xff]  ;;  %v4261_v47 = vsel %vm338_vm0, %v343_v11, %v362_v32  ;;  %v1422_v0 = vld [vmem:[#allocation2 + $0x1ed0] sm:$0xff]  ;;  %v1421_v7 = vld [vmem:[#allocation2 + $0x1ec8] sm:$0xff] }
  0x5d   : > { %1577 = vmatprep.subr.mxu1 %v1207_v38  ;;  %1495 = vmatpush2.msra.mxu0 %v1046_v39  ;;  %v1432_v38 = vld [vmem:[#allocation2 + $0x1f20] sm:$0xff]  ;;  %v360_v39 = vrot.slane %v4236_v29, 1  ;;  %v299_v5 = vld [vmem:[%s4191_s18 + $0x30] sm:$0xff]  ;;  %v1417_v11 = vld [vmem:[#allocation2 + $0x1ea8] sm:$0xff] }
  0x5e   : > { %1578 = vmatpush2.msra.mxu1 %v1206_v41  ;;  %1496 = vmatprep.subr.mxu0 %v1042_v42  ;;  %v400_v41 = vsub.s32 1, %v4185_v40  ;;  %v408_v42 = vsub.s32 3, %v4185_v40  ;;  %v4266_v50 = vsel %vm338_vm0, %v349_v17, %v366_v36  ;;  %v1416_v16 = vld [vmem:[#allocation2 + $0x1ea0] sm:$0xff]  ;;  %v1307_v17 = vld [vmem:[#allocation2 + $0x1b38] sm:$0xff]  ;;  %v1014_v19 = vld [vmem:[#allocation2 + $0x1210] sm:$0xff] }
  0x5f   : > { %1579 = vmatprep.subr.mxu1 %v1202_v43  ;;  %1497 = vmatpush2.msra.mxu0 %v1041_v44  ;;  %v1331_v43 = vld [vmem:[#allocation2 + $0x1bf8] sm:$0xff]  ;;  %v1013_v23 = vld [vmem:[#allocation2 + $0x1208] sm:$0xff]  ;;  %v1296_v29 = vld [vmem:[#allocation2 + $0x1ae0] sm:$0xff] }
  0x60   : > { %1580 = vmatpush2.msra.mxu1 %v1201_v45  ;;  %1498 = vmatprep.subr.mxu0 %v1037_v48  ;;  %v1431_v44 = vld [vmem:[#allocation2 + $0x1f18] sm:$0xff]  ;;  %v364_v45 = vrot.slane %v4243_v33, 1  ;;  %v396_v48 = vsub.s32 0, %v4185_v40  ;;  %v1297_v26 = vld [vmem:[#allocation2 + $0x1ae8] sm:$0xff] }
  0x61   : > { %1581 = vmatprep.subr.mxu1 %v1197_v49  ;;  %1499 = vmatpush2.msra.mxu0 %v1036_v52  ;;  %v404_v49 = vsub.s32 2, %v4185_v40  ;;  %v1427_v52 = vld [vmem:[#allocation2 + $0x1ef8] sm:$0xff] }
  0x62   : > { %1582 = vmatpush2.msra.mxu1 %v1196_v53  ;;  %1500 = vmatprep.subr.mxu0 %v1032_v54  ;;  %v4269_v53 = vsel %vm338_vm0, %v340_v20, %v360_v39  ;;  %v401_v54 = vrot.slane %v4194_v58, %v400_v41  ;;  %v1302_v20 = vld [vmem:[#allocation2 + $0x1b10] sm:$0xff]  ;;  %v1003_v33 = vld [vmem:[#allocation2 + $0x11b8] sm:$0xff] }
  0x63   : > { %1583 = vmatprep.subr.mxu1 %v1192_v55  ;;  %1501 = vmatpush2.msra.mxu0 %v1031_v56  ;;  %v409_v55 = vrot.slane %v4194_v58, %v408_v42  ;;  %v4277_v56 = vsel %vm338_vm0, %v346_v22, %v364_v45  ;;  %v405_v62 = vrot.slane %v4194_v58, %v404_v49  ;;  %v4083_v22 = vmov 0.0   ;;  %v1286_v42 = vld [vmem:[#allocation2 + $0x1a90] sm:$0xff] }
  0x64   : > { %1584 = vmatpush2.msra.mxu1 %v1191_v57  ;;  %1502 = vmatprep.subr.mxu0 %v1027_v60  ;;  %v1322_v57 = vld [vmem:[#allocation2 + $0x1bb0] sm:$0xff]  ;;  %v1321_v60 = vld [vmem:[#allocation2 + $0x1ba8] sm:$0xff]  ;;  %v4289_v1 = vsel %vm338_vm0, %v362_v32, %v401_v54  ;;  %v1292_v32 = vld [vmem:[#allocation2 + $0x1ac0] sm:$0xff] }
  0x65   : > { %1585 = vmatprep.subr.mxu1 %v1187_v61  ;;  %1503 = vmatpush2.msra.mxu0 %v1026_v8  ;;  %v397_v61 = vrot.slane %v4194_v58, %v396_v48  ;;  %v4292_v2 = vsel %vm338_vm0, %v366_v36, %v409_v55  ;;  %v1316_v58 = vld [vmem:[#allocation2 + $0x1b80] sm:$0xff]  ;;  %v1291_v36 = vld [vmem:[#allocation2 + $0x1ab8] sm:$0xff] }
  0x66   : > { %1586 = vmatpush2.msra.mxu1 %v1186_v9  ;;  %1504 = vmatprep.subr.mxu0 %v1022_v13  ;;  %v4302_v9 = vsel %vm338_vm0, %v364_v45, %v405_v62  ;;  %v357_v13 = vrot.slane %v299_v5, 1  ;;  %v993_v45 = vld [vmem:[#allocation2 + $0x1168] sm:$0xff]  ;;  %v988_v54 = vld [vmem:[#allocation2 + $0x1140] sm:$0xff] }
  0x67   : > { %1587 = vmatprep.subr.mxu1 %v1182_v14  ;;  %1505 = vmatpush2.msra.mxu0 %v1021_v15  ;;  %v4299_v8 = vsel %vm338_vm0, %v360_v39, %v397_v61  ;;  %v358_v14 = vrot.slane %v4296_v6, 1  ;;  %v1311_v15 = vld [vmem:[#allocation2 + $0x1b58] sm:$0xff]  ;;  %v998_v39 = vld [vmem:[#allocation2 + $0x1190] sm:$0xff]  ;;  %v1276_v55 = vld [vmem:[#allocation2 + $0x1a40] sm:$0xff] }
  0x68   : > { %1588 = vmatpush2.msra.mxu1 %v1181_v18  ;;  %1506 = vmatprep.subr.mxu0 %v1017_v24  ;;  %v1306_v18 = vld [vmem:[#allocation2 + $0x1b30] sm:$0xff]  ;;  %v1301_v24 = vld [vmem:[#allocation2 + $0x1b08] sm:$0xff]  ;;  %v1271_v61 = vld [vmem:[#allocation2 + $0x1a18] sm:$0xff] }
  0x69   : > { %1589 = vmatprep.subr.mxu1 %v1177_v25  ;;  %1507 = vmatpush2.msra.mxu0 %v1016_v27  ;;  %v4312_v21 = vsel %vm338_vm0, %v357_v13, %v358_v14  ;;  %v1009_v25 = vld [vmem:[#allocation2 + $0x11e8] sm:$0xff]  ;;  %v1008_v27 = vld [vmem:[#allocation2 + $0x11e0] sm:$0xff]  ;;  %v4326_v13 = vld [vmem:[%s4191_s18 + $0x90] sm:$0xff] }
  0x6a   : > { %1508 = vmatprep.mubr.f32.mxu0 %v4233_v28  ;;  %1590 = vmatpush2.msra.mxu1 %v1176_v30  ;;  %v1004_v30 = vld [vmem:[#allocation2 + $0x11c0] sm:$0xff] }
  0x6b   : > { %1591 = vmatprep.mubr.f32.mxu1 %v4239_v31  ;;  %1509 = vmatmul.mubr.f32.vlgmr.msra.gmra.mxu0 %v4246_v34  ;;  %v4318_v62 = vld [vmem:[%s4191_s18 + $0xa0] sm:$0xff] }
  0x6c   : > { %1592 = vmatmul.mubr.f32.vlgmr.msra.gmra.mxu1 %v4249_v35  ;;  %1610 = vmatprep.subr.mxu0 %v1332_v37  ;;  %v999_v37 = vld [vmem:[#allocation2 + $0x1198] sm:$0xff]  ;;  %v372_v5 = vrot.slane %v4318_v62, 1  ;;  %v1164_v62 = vld [vmem:[#allocation2 + $0x16c0] sm:$0xff] }
  0x6d   : > { %1717 = vmatprep.subr.mxu1 %v1432_v38  ;;  %1611 = vmatpush1.msra.mxu0 %v1331_v43  ;;  %v1287_v38 = vld [vmem:[#allocation2 + $0x1a98] sm:$0xff]  ;;  %v994_v43 = vld [vmem:[#allocation2 + $0x1170] sm:$0xff] }
  0x6e   : > { %1718 = vmatpush1.msra.mxu1 %v1431_v44  ;;  %1612 = vmatprep.subr.mxu0 %v1327_v46  ;;  %v1282_v44 = vld [vmem:[#allocation2 + $0x1a70] sm:$0xff]  ;;  %v1281_v46 = vld [vmem:[#allocation2 + $0x1a68] sm:$0xff] }
  0x6f   : > { %1514 = vmatprep.mubr.f32.mxu0 %v4261_v47  ;;  %1597 = vmatprep.mubr.f32.mxu1 %v4266_v50 }
  0x70   : > { %1613 = vmatpush1.msra.mxu0 %v1326_v51  ;;  %1719 = vmatprep.subr.mxu1 %v1427_v52  ;;  %v989_v51 = vld [vmem:[#allocation2 + $0x1148] sm:$0xff] }
  0x71   : > { %1515 = vmatmul.mubr.f32.gmra.mxu0 %v4269_v53  ;;  %1598 = vmatmul.mubr.f32.gmra.mxu1 %v4277_v56  ;;  %v1277_v52 = vld [vmem:[#allocation2 + $0x1a48] sm:$0xff] }
  0x72   : > { %1614 = vmatprep.subr.mxu0 %v1322_v57  ;;  %1720 = vmatpush1.msra.mxu1 %v1426_v59  ;;  %v984_v57 = vld [vmem:[#allocation2 + $0x1120] sm:$0xff] }
  0x73   : > { %1615 = vmatpush1.msra.mxu0 %v1321_v60  ;;  %1721 = vmatprep.subr.mxu1 %v1422_v0  ;;  %v1272_v59 = vld [vmem:[#allocation2 + $0x1a20] sm:$0xff]  ;;  %v983_v60 = vld [vmem:[#allocation2 + $0x1118] sm:$0xff] }
  0x74   : > { %1616 = vmatprep.subr.mxu0 %v1317_v63  ;;  %1520 = vmatprep.mubr.f32.mxu0 %v4289_v1  ;;  %v979_v63 = vld [vmem:[#allocation2 + $0x10f8] sm:$0xff] }
  0x75   : > { %1603 = vmatprep.mubr.f32.mxu1 %v4292_v2  ;;  %1617 = vmatpush1.msra.mxu0 %v1316_v58  ;;  %v1267_v0 = vld [vmem:[#allocation2 + $0x19f8] sm:$0xff] }
  0x76   : > { %1722 = vmatpush1.msra.mxu1 %v1421_v7  ;;  %1521 = vmatmul.mubr.f32.gmra.mxu0 %v4299_v8  ;;  %v4322_v58 = vld [vmem:[%s4191_s18 + $0x98] sm:$0xff]  ;;  %v978_v7 = vld [vmem:[#allocation2 + $0x10f0] sm:$0xff] }
  0x77   : > { %1604 = vmatmul.mubr.f32.gmra.mxu1 %v4302_v9  ;;  %1618 = vmatprep.subr.mxu0 %v1312_v10  ;;  %v1266_v10 = vld [vmem:[#allocation2 + $0x19f0] sm:$0xff] }
  0x78   : > { %1723 = vmatprep.subr.mxu1 %v1417_v11  ;;  %1619 = vmatpush1.msra.mxu0 %v1311_v15  ;;  %v370_v11 = vrot.slane %v4322_v58, 1  ;;  %v974_v15 = vld [vmem:[#allocation2 + $0x10d0] sm:$0xff]  ;;  %v1163_v58 = vld [vmem:[#allocation2 + $0x16b8] sm:$0xff] }
  0x79   : > { %1724 = vmatpush1.msra.mxu1 %v1416_v16  ;;  %1620 = vmatprep.subr.mxu0 %v1307_v17  ;;  %v1262_v16 = vld [vmem:[#allocation2 + $0x19d0] sm:$0xff]  ;;  %v368_v17 = vrot.slane %v4326_v13, 1  ;;  %v1028_v13 = vld [vmem:[#allocation2 + $0x1280] sm:$0xff] }
  0x7a   : > { %1757 = vmatprep.mubr.f32.mxu1 %v4083_v22  ;;  %1621 = vmatpush1.msra.mxu0 %v1306_v18  ;;  %v4333_v18 = vsel %vm338_vm0, %v372_v5, %v4207_v3 }
  0x7b   : > { %1776 = vmatprep.subr.mxu1 %v1014_v19  ;;  %1622 = vmatprep.subr.mxu0 %v1302_v20  ;;  %v973_v19 = vld [vmem:[#allocation2 + $0x10c8] sm:$0xff]  ;;  %v4345_v3 = vsel %vm338_vm0, %v368_v17, %v4221_v12  ;;  %v958_v12 = vld [vmem:[#allocation2 + $0x1050] sm:$0xff] }
  0x7c   : > { %3618 = vmatmul.mubr.msk.f32.vlgmr.msra.gmra.mxu1 %vm1436_vm1, %v4312_v21  ;;  %1623 = vmatpush1.msra.mxu0 %v1301_v24  ;;  %v1261_v20 = vld [vmem:[#allocation2 + $0x19c8] sm:$0xff] }
  0x7d   : > { %1777 = vmatpush1.msra.mxu1 %v1013_v23  ;;  %1624 = vmatprep.subr.mxu0 %v1297_v26  ;;  %v4339_v23 = vsel %vm338_vm0, %v370_v11, %v4210_v4  ;;  %v969_v24 = vld [vmem:[#allocation2 + $0x10a8] sm:$0xff]  ;;  %v968_v26 = vld [vmem:[#allocation2 + $0x10a0] sm:$0xff]  ;;  %v963_v4 = vld [vmem:[#allocation2 + $0x1078] sm:$0xff] }
  0x7e   : > { %1778 = vmatprep.subr.mxu1 %v1009_v25  ;;  %1625 = vmatpush1.msra.mxu0 %v1296_v29  ;;  %v1257_v25 = vld [vmem:[#allocation2 + $0x19a8] sm:$0xff]  ;;  %v964_v29 = vld [vmem:[#allocation2 + $0x1080] sm:$0xff] }
  0x7f   : > { %1779 = vmatpush1.msra.mxu1 %v1008_v27  ;;  %1626 = vmatprep.subr.mxu0 %v1292_v32  ;;  %v1256_v27 = vld [vmem:[#allocation2 + $0x19a0] sm:$0xff]  ;;  %v1411_v32 = vld [vmem:[#allocation2 + $0x1e78] sm:$0xff] }
  0x80   : > { %1780 = vmatprep.subr.mxu1 %v1004_v30  ;;  %1627 = vmatpush1.msra.mxu0 %v1291_v36  ;;  %v1412_v30 = vld [vmem:[#allocation2 + $0x1e80] sm:$0xff]  ;;  %v1407_v36 = vld [vmem:[#allocation2 + $0x1e58] sm:$0xff] }
  0x81   : > { %1781 = vmatpush1.msra.mxu1 %v1003_v33  ;;  %1628 = vmatprep.subr.mxu0 %v1287_v38  ;;  %v959_v33 = vld [vmem:[#allocation2 + $0x1058] sm:$0xff]  ;;  %v954_v38 = vld [vmem:[#allocation2 + $0x1030] sm:$0xff] }
  0x82   : > { %1782 = vmatprep.subr.mxu1 %v999_v37  ;;  %1629 = vmatpush1.msra.mxu0 %v1286_v42  ;;  %v1406_v37 = vld [vmem:[#allocation2 + $0x1e50] sm:$0xff]  ;;  %v953_v42 = vld [vmem:[#allocation2 + $0x1028] sm:$0xff] }
  0x83   : > { %1783 = vmatpush1.msra.mxu1 %v998_v39  ;;  %1630 = vmatprep.subr.mxu0 %v1282_v44  ;;  %v1402_v39 = vld [vmem:[#allocation2 + $0x1e30] sm:$0xff]  ;;  %v949_v44 = vld [vmem:[#allocation2 + $0x1008] sm:$0xff] }
  0x84   : > { %1784 = vmatprep.subr.mxu1 %v994_v43  ;;  %1631 = vmatpush1.msra.mxu0 %v1281_v46  ;;  %v1401_v43 = vld [vmem:[#allocation2 + $0x1e28] sm:$0xff]  ;;  %v948_v46 = vld [vmem:[#allocation2 + $0x1000] sm:$0xff] }
  0x85   : > { %1785 = vmatpush1.msra.mxu1 %v993_v45  ;;  %1632 = vmatprep.subr.mxu0 %v1277_v52  ;;  %v1397_v45 = vld [vmem:[#allocation2 + $0x1e08] sm:$0xff]  ;;  %v944_v52 = vld [vmem:[#allocation2 + $0xfe0] sm:$0xff] }
  0x86   : > { %1786 = vmatprep.subr.mxu1 %v989_v51  ;;  %1633 = vmatpush1.msra.mxu0 %v1276_v55  ;;  %v1396_v51 = vld [vmem:[#allocation2 + $0x1e00] sm:$0xff]  ;;  %v943_v55 = vld [vmem:[#allocation2 + $0xfd8] sm:$0xff] }
  0x87   : > { %1787 = vmatpush1.msra.mxu1 %v988_v54  ;;  %1634 = vmatprep.subr.mxu0 %v1272_v59  ;;  %v1392_v54 = vld [vmem:[#allocation2 + $0x1de0] sm:$0xff]  ;;  %v939_v59 = vld [vmem:[#allocation2 + $0xfb8] sm:$0xff] }
  0x88   : > { %1788 = vmatprep.subr.mxu1 %v984_v57  ;;  %1635 = vmatpush1.msra.mxu0 %v1271_v61  ;;  %v1391_v57 = vld [vmem:[#allocation2 + $0x1dd8] sm:$0xff]  ;;  %v938_v61 = vld [vmem:[#allocation2 + $0xfb0] sm:$0xff] }
  0x89   : > { %1789 = vmatpush1.msra.mxu1 %v983_v60  ;;  %1636 = vmatprep.subr.mxu0 %v1267_v0  ;;  %v1387_v60 = vld [vmem:[#allocation2 + $0x1db8] sm:$0xff]  ;;  %v1094_v0 = vld [vmem:[#allocation2 + $0x1490] sm:$0xff] }
  0x8a   : > { %1790 = vmatprep.subr.mxu1 %v979_v63  ;;  %1637 = vmatpush1.msra.mxu0 %v1266_v10  ;;  %v1386_v63 = vld [vmem:[#allocation2 + $0x1db0] sm:$0xff]  ;;  %v1093_v10 = vld [vmem:[#allocation2 + $0x1488] sm:$0xff] }
  0x8b   : > { %1791 = vmatpush1.msra.mxu1 %v978_v7  ;;  %1638 = vmatprep.subr.mxu0 %v1262_v16  ;;  %v1382_v7 = vld [vmem:[#allocation2 + $0x1d90] sm:$0xff]  ;;  %v1089_v16 = vld [vmem:[#allocation2 + $0x1468] sm:$0xff] }
  0x8c   : > { %1792 = vmatprep.subr.mxu1 %v974_v15  ;;  %1639 = vmatpush1.msra.mxu0 %v1261_v20  ;;  %v1381_v15 = vld [vmem:[#allocation2 + $0x1d88] sm:$0xff]  ;;  %v1088_v20 = vld [vmem:[#allocation2 + $0x1460] sm:$0xff] }
  0x8d   : > { %1793 = vmatpush1.msra.mxu1 %v973_v19  ;;  %1640 = vmatprep.subr.mxu0 %v1257_v25  ;;  %v1377_v19 = vld [vmem:[#allocation2 + $0x1d68] sm:$0xff]  ;;  %v1084_v25 = vld [vmem:[#allocation2 + $0x1440] sm:$0xff] }
  0x8e   : > { %1794 = vmatprep.subr.mxu1 %v969_v24  ;;  %1641 = vmatpush1.msra.mxu0 %v1256_v27  ;;  %v1376_v24 = vld [vmem:[#allocation2 + $0x1d60] sm:$0xff]  ;;  %v1083_v27 = vld [vmem:[#allocation2 + $0x1438] sm:$0xff] }
  0x8f   : > { %1795 = vmatpush1.msra.mxu1 %v968_v26  ;;  %1642 = vmatprep.subr.mxu0 %v1412_v30  ;;  %v1372_v26 = vld [vmem:[#allocation2 + $0x1d40] sm:$0xff]  ;;  %v1079_v30 = vld [vmem:[#allocation2 + $0x1418] sm:$0xff] }
  0x90   : > { %1796 = vmatprep.subr.mxu1 %v964_v29  ;;  %1643 = vmatpush2.msra.mxu0 %v1411_v32  ;;  %v1371_v29 = vld [vmem:[#allocation2 + $0x1d38] sm:$0xff]  ;;  %v1078_v32 = vld [vmem:[#allocation2 + $0x1410] sm:$0xff] }
  0x91   : > { %1797 = vmatpush1.msra.mxu1 %v963_v4  ;;  %1644 = vmatprep.subr.mxu0 %v1407_v36  ;;  %v1367_v4 = vld [vmem:[#allocation2 + $0x1d18] sm:$0xff]  ;;  %v1074_v36 = vld [vmem:[#allocation2 + $0x13f0] sm:$0xff] }
  0x92   : > { %1798 = vmatprep.subr.mxu1 %v959_v33  ;;  %1645 = vmatpush2.msra.mxu0 %v1406_v37  ;;  %v1366_v33 = vld [vmem:[#allocation2 + $0x1d10] sm:$0xff]  ;;  %v1073_v37 = vld [vmem:[#allocation2 + $0x13e8] sm:$0xff] }
  0x93   : > { %1799 = vmatpush1.msra.mxu1 %v958_v12  ;;  %1646 = vmatprep.subr.mxu0 %v1402_v39  ;;  %v1362_v12 = vld [vmem:[#allocation2 + $0x1cf0] sm:$0xff]  ;;  %v1069_v39 = vld [vmem:[#allocation2 + $0x13c8] sm:$0xff] }
  0x94   : > { %1800 = vmatprep.subr.mxu1 %v954_v38  ;;  %1647 = vmatpush2.msra.mxu0 %v1401_v43  ;;  %v1361_v38 = vld [vmem:[#allocation2 + $0x1ce8] sm:$0xff]  ;;  %v1068_v43 = vld [vmem:[#allocation2 + $0x13c0] sm:$0xff] }
  0x95   : > { %1801 = vmatpush1.msra.mxu1 %v953_v42  ;;  %1648 = vmatprep.subr.mxu0 %v1397_v45  ;;  %v1357_v42 = vld [vmem:[#allocation2 + $0x1cc8] sm:$0xff]  ;;  %v1064_v45 = vld [vmem:[#allocation2 + $0x13a0] sm:$0xff] }
  0x96   : > { %1802 = vmatprep.subr.mxu1 %v949_v44  ;;  %1649 = vmatpush2.msra.mxu0 %v1396_v51  ;;  %v1356_v44 = vld [vmem:[#allocation2 + $0x1cc0] sm:$0xff]  ;;  %v1063_v51 = vld [vmem:[#allocation2 + $0x1398] sm:$0xff] }
  0x97   : > { %1803 = vmatpush1.msra.mxu1 %v948_v46  ;;  %1650 = vmatprep.subr.mxu0 %v1392_v54  ;;  %v1352_v46 = vld [vmem:[#allocation2 + $0x1ca0] sm:$0xff]  ;;  %v1059_v54 = vld [vmem:[#allocation2 + $0x1378] sm:$0xff] }
  0x98   : > { %1804 = vmatprep.subr.mxu1 %v944_v52  ;;  %1651 = vmatpush2.msra.mxu0 %v1391_v57  ;;  %v1351_v52 = vld [vmem:[#allocation2 + $0x1c98] sm:$0xff]  ;;  %v305_v57 = vld [vmem:[%s4191_s18 + $0x60] sm:$0xff] }
  0x99   : > { %1805 = vmatpush1.msra.mxu1 %v943_v55  ;;  %1652 = vmatprep.subr.mxu0 %v1387_v60  ;;  %v298_v55 = vld [vmem:[%s4191_s18 + $0x28] sm:$0xff]  ;;  %v297_v60 = vld [vmem:[%s4191_s18 + $0x20] sm:$0xff] }
  0x9a   : > { %1806 = vmatprep.subr.mxu1 %v939_v59  ;;  %1653 = vmatpush2.msra.mxu0 %v1386_v63  ;;  %v1347_v59 = vld [vmem:[#allocation2 + $0x1c78] sm:$0xff]  ;;  %v1058_v63 = vld [vmem:[#allocation2 + $0x1370] sm:$0xff] }
  0x9b   : > { %1807 = vmatpush1.msra.mxu1 %v938_v61  ;;  %1654 = vmatprep.subr.mxu0 %v1382_v7  ;;  %v304_v61 = vld [vmem:[%s4191_s18 + $0x58] sm:$0xff]  ;;  %v1054_v7 = vld [vmem:[#allocation2 + $0x1350] sm:$0xff] }
  0x9c   : > { %1808 = vmatprep.subr.mxu1 %v1094_v0  ;;  %1655 = vmatpush2.msra.mxu0 %v1381_v15  ;;  %v1346_v0 = vld [vmem:[#allocation2 + $0x1c70] sm:$0xff]  ;;  %v354_v15 = vrot.slane %v298_v55, 1  ;;  %v1019_v55 = vld [vmem:[#allocation2 + $0x1238] sm:$0xff] }
  0x9d   : > { %1809 = vmatpush2.msra.mxu1 %v1093_v10  ;;  %1656 = vmatprep.subr.mxu0 %v1377_v19  ;;  %v1342_v10 = vld [vmem:[#allocation2 + $0x1c50] sm:$0xff]  ;;  %v1053_v19 = vld [vmem:[#allocation2 + $0x1348] sm:$0xff] }
  0x9e   : > { %1810 = vmatprep.subr.mxu1 %v1089_v16  ;;  %1657 = vmatpush2.msra.mxu0 %v1376_v24  ;;  %v355_v16 = vrot.slane %v305_v57, 1  ;;  %v351_v24 = vrot.slane %v297_v60, 1  ;;  %v1153_v57 = vld [vmem:[#allocation2 + $0x1668] sm:$0xff] }
  0x9f   : > { %1811 = vmatpush2.msra.mxu1 %v1088_v20  ;;  %1658 = vmatprep.subr.mxu0 %v1372_v26  ;;  %v1341_v20 = vld [vmem:[#allocation2 + $0x1c48] sm:$0xff] }
  0xa0   : > { %1812 = vmatprep.subr.mxu1 %v1084_v25  ;;  %1659 = vmatpush2.msra.mxu0 %v1371_v29  ;;  %v352_v25 = vrot.slane %v304_v61, 1  ;;  %v1049_v26 = vld [vmem:[#allocation2 + $0x1328] sm:$0xff]  ;;  %v1048_v29 = vld [vmem:[#allocation2 + $0x1320] sm:$0xff] }
  0xa1   : > { %1813 = vmatpush2.msra.mxu1 %v1083_v27  ;;  %1660 = vmatprep.subr.mxu0 %v1367_v4  ;;  %v1337_v27 = vld [vmem:[#allocation2 + $0x1c28] sm:$0xff]  ;;  %v4352_v4 = vsel %vm338_vm0, %v354_v15, %v355_v16  ;;  %v1148_v61 = vld [vmem:[#allocation2 + $0x1640] sm:$0xff] }
  0xa2   : > { %1814 = vmatprep.subr.mxu1 %v1079_v30  ;;  %1661 = vmatpush2.msra.mxu0 %v1366_v33  ;;  %v1336_v30 = vld [vmem:[#allocation2 + $0x1c20] sm:$0xff]  ;;  %v4355_v33 = vsel %vm338_vm0, %v351_v24, %v352_v25  ;;  %v4377_v6 = vsel %vm338_vm0, %v352_v25, %v368_v17  ;;  %v1149_v60 = vld [vmem:[#allocation2 + $0x1648] sm:$0xff]  ;;  %v1134_v25 = vld [vmem:[#allocation2 + $0x15d0] sm:$0xff] }
  0xa3   : > { %1815 = vmatpush2.msra.mxu1 %v1078_v32  ;;  %1662 = vmatprep.subr.mxu0 %v1362_v12  ;;  %v1044_v32 = vld [vmem:[#allocation2 + $0x1300] sm:$0xff]  ;;  %v1174_v12 = vld [vmem:[#allocation2 + $0x1710] sm:$0xff]  ;;  %v1329_v15 = vld [vmem:[#allocation2 + $0x1be8] sm:$0xff] }
  0xa4   : > { %1816 = vmatprep.subr.mxu1 %v1074_v36  ;;  %1663 = vmatpush2.msra.mxu0 %v1361_v38  ;;  %v1043_v36 = vld [vmem:[#allocation2 + $0x12f8] sm:$0xff]  ;;  %v1173_v38 = vld [vmem:[#allocation2 + $0x1708] sm:$0xff]  ;;  %v1024_v17 = vld [vmem:[#allocation2 + $0x1260] sm:$0xff] }
  0xa5   : > { %1817 = vmatpush2.msra.mxu1 %v1073_v37  ;;  %1664 = vmatprep.subr.mxu0 %v1357_v42  ;;  %v1039_v37 = vld [vmem:[#allocation2 + $0x12d8] sm:$0xff]  ;;  %v1169_v42 = vld [vmem:[#allocation2 + $0x16e8] sm:$0xff]  ;;  %v1324_v24 = vld [vmem:[#allocation2 + $0x1bc0] sm:$0xff] }
  0xa6   : > { %1818 = vmatprep.subr.mxu1 %v1069_v39  ;;  %1665 = vmatpush2.msra.mxu0 %v1356_v44  ;;  %v4364_v39 = vsel %vm338_vm0, %v358_v14, %v372_v5  ;;  %v4370_v44 = vsel %vm338_vm0, %v355_v16, %v370_v11  ;;  %v1033_v14 = vld [vmem:[#allocation2 + $0x12a8] sm:$0xff]  ;;  %v1159_v11 = vld [vmem:[#allocation2 + $0x1698] sm:$0xff] }
  0xa7   : > { %1819 = vmatpush2.msra.mxu1 %v1068_v43  ;;  %1666 = vmatprep.subr.mxu0 %v1352_v46  ;;  %v1038_v43 = vld [vmem:[#allocation2 + $0x12d0] sm:$0xff]  ;;  %v1168_v46 = vld [vmem:[#allocation2 + $0x16e0] sm:$0xff]  ;;  %v1029_v5 = vld [vmem:[#allocation2 + $0x1288] sm:$0xff] }
  0xa8   : > { %1820 = vmatprep.subr.mxu1 %v1064_v45  ;;  %1667 = vmatpush2.msra.mxu0 %v1351_v52  ;;  %v1034_v45 = vld [vmem:[#allocation2 + $0x12b0] sm:$0xff]  ;;  %v1023_v52 = vld [vmem:[#allocation2 + $0x1258] sm:$0xff] }
  0xa9   : > { %1821 = vmatpush2.msra.mxu1 %v1063_v51  ;;  %1668 = vmatprep.subr.mxu0 %v1347_v59  ;;  %v1158_v51 = vld [vmem:[#allocation2 + $0x1690] sm:$0xff]  ;;  %v1139_v16 = vld [vmem:[#allocation2 + $0x15f8] sm:$0xff] }
  0xaa   : > { %1822 = vmatprep.subr.mxu1 %v1059_v54  ;;  %1669 = vmatpush2.msra.mxu0 %v1346_v0  ;;  %v1154_v54 = vld [vmem:[#allocation2 + $0x1670] sm:$0xff]  ;;  %v1144_v0 = vld [vmem:[#allocation2 + $0x1620] sm:$0xff] }
  0xab   : > { %1823 = vmatpush2.msra.mxu1 %v1058_v63  ;;  %1670 = vmatprep.subr.mxu0 %v1342_v10  ;;  %v1018_v59 = vld [vmem:[#allocation2 + $0x1230] sm:$0xff]  ;;  %v1143_v10 = vld [vmem:[#allocation2 + $0x1618] sm:$0xff] }
  0xac   : > { %1824 = vmatprep.subr.mxu1 %v1054_v7  ;;  %1671 = vmatpush2.msra.mxu0 %v1341_v20  ;;  %v1334_v63 = vld [vmem:[#allocation2 + $0x1c10] sm:$0xff]  ;;  %v1333_v7 = vld [vmem:[#allocation2 + $0x1c08] sm:$0xff] }
  0xad   : > { %1825 = vmatpush2.msra.mxu1 %v1053_v19  ;;  %1672 = vmatprep.subr.mxu0 %v1337_v27  ;;  %v1328_v19 = vld [vmem:[#allocation2 + $0x1be0] sm:$0xff]  ;;  %v1138_v20 = vld [vmem:[#allocation2 + $0x15f0] sm:$0xff]  ;;  %v1133_v27 = vld [vmem:[#allocation2 + $0x15c8] sm:$0xff] }
  0xae   : > { %1826 = vmatprep.subr.mxu1 %v1049_v26  ;;  %1673 = vmatpush2.msra.mxu0 %v1336_v30  ;;  %v1323_v26 = vld [vmem:[#allocation2 + $0x1bb8] sm:$0xff]  ;;  %v1129_v30 = vld [vmem:[#allocation2 + $0x15a8] sm:$0xff] }
  0xaf   : > { %1827 = vmatpush2.msra.mxu1 %v1048_v29  ;;  %1674 = vmatprep.mubr.f32.mxu0 %v4352_v4  ;;  %v1319_v29 = vld [vmem:[#allocation2 + $0x1b98] sm:$0xff] }
  0xb0   : > { %1828 = vmatprep.subr.mxu1 %v1044_v32  ;;  %1675 = vmatmul.mubr.f32.vlgmr.msra.gmra.mxu0 %v4355_v33  ;;  %v1318_v32 = vld [vmem:[#allocation2 + $0x1b90] sm:$0xff] }
  0xb1   : > { %1829 = vmatpush2.msra.mxu1 %v1043_v36  ;;  %1859 = vmatprep.subr.mxu0 %v1174_v12  ;;  %v1128_v36 = vld [vmem:[#allocation2 + $0x15a0] sm:$0xff]  ;;  %v1314_v12 = vld [vmem:[#allocation2 + $0x1b70] sm:$0xff] }
  0xb2   : > { %1763 = vmatprep.mubr.f32.mxu1 %v4083_v22  ;;  %1830 = vmatprep.subr.mxu1 %v1039_v37  ;;  %v1124_v37 = vld [vmem:[#allocation2 + $0x1580] sm:$0xff] }
  0xb3   : > { %1860 = vmatpush1.msra.mxu0 %v1173_v38  ;;  %3619 = vmatmul.mubr.msk.f32.gmra.mxu1 %vm1436_vm1, %v4364_v39  ;;  %v1313_v38 = vld [vmem:[#allocation2 + $0x1b68] sm:$0xff] }
  0xb4   : > { %1861 = vmatprep.subr.mxu0 %v1169_v42  ;;  %1831 = vmatpush2.msra.mxu1 %v1038_v43  ;;  %v1123_v42 = vld [vmem:[#allocation2 + $0x1578] sm:$0xff]  ;;  %v1309_v43 = vld [vmem:[#allocation2 + $0x1b48] sm:$0xff] }
  0xb5   : > { %1680 = vmatprep.mubr.f32.mxu0 %v4370_v44  ;;  %1832 = vmatprep.subr.mxu1 %v1034_v45  ;;  %v1119_v45 = vld [vmem:[#allocation2 + $0x1558] sm:$0xff] }
  0xb6   : > { %1862 = vmatpush1.msra.mxu0 %v1168_v46  ;;  %1833 = vmatpush2.msra.mxu1 %v1033_v14  ;;  %v1308_v46 = vld [vmem:[#allocation2 + $0x1b40] sm:$0xff]  ;;  %v1118_v14 = vld [vmem:[#allocation2 + $0x1550] sm:$0xff] }
  0xb7   : > { %1681 = vmatmul.mubr.f32.gmra.mxu0 %v4377_v6  ;;  %1863 = vmatprep.subr.mxu0 %v1164_v62  ;;  %v1304_v62 = vld [vmem:[#allocation2 + $0x1b20] sm:$0xff] }
  0xb8   : > { %1769 = vmatprep.mubr.f32.mxu1 %v4083_v22  ;;  %1834 = vmatprep.subr.mxu1 %v1029_v5  ;;  %v1114_v5 = vld [vmem:[#allocation2 + $0x1530] sm:$0xff] }
  0xb9   : > { %1864 = vmatpush1.msra.mxu0 %v1163_v58  ;;  %3620 = vmatmul.mubr.msk.f32.gmra.mxu1 %vm1436_vm1, %v4333_v18  ;;  %v1303_v58 = vld [vmem:[#allocation2 + $0x1b18] sm:$0xff] }
  0xba   : > { %1865 = vmatprep.subr.mxu0 %v1159_v11  ;;  %1835 = vmatpush2.msra.mxu1 %v1028_v13  ;;  %v1113_v11 = vld [vmem:[#allocation2 + $0x1528] sm:$0xff]  ;;  %v1299_v13 = vld [vmem:[#allocation2 + $0x1af8] sm:$0xff] }
  0xbb   : > { %1686 = vmatprep.mubr.f32.mxu0 %v4339_v23  ;;  %1836 = vmatprep.subr.mxu1 %v1024_v17  ;;  %v1109_v17 = vld [vmem:[#allocation2 + $0x1508] sm:$0xff] }
  0xbc   : > { %1866 = vmatpush1.msra.mxu0 %v1158_v51  ;;  %1837 = vmatpush2.msra.mxu1 %v1023_v52  ;;  %v1298_v51 = vld [vmem:[#allocation2 + $0x1af0] sm:$0xff]  ;;  %v1108_v52 = vld [vmem:[#allocation2 + $0x1500] sm:$0xff] }
  0xbd   : > { %1687 = vmatmul.mubr.f32.gmra.mxu0 %v4345_v3  ;;  %1867 = vmatprep.subr.mxu0 %v1154_v54  ;;  %v1294_v54 = vld [vmem:[#allocation2 + $0x1ad0] sm:$0xff] }
  0xbe   : > { %1838 = vmatprep.subr.mxu1 %v1019_v55  ;;  %1868 = vmatpush1.msra.mxu0 %v1153_v57  ;;  %v1104_v55 = vld [vmem:[#allocation2 + $0x14e0] sm:$0xff]  ;;  %v1293_v57 = vld [vmem:[#allocation2 + $0x1ac8] sm:$0xff] }
  0xbf   : > { %1839 = vmatpush2.msra.mxu1 %v1018_v59  ;;  %1840 = vmatprep.mubr.f32.mxu1 %v4233_v28  ;;  %v1103_v59 = vld [vmem:[#allocation2 + $0x14d8] sm:$0xff] }
  0xc0   : > { %1869 = vmatprep.subr.mxu0 %v1149_v60  ;;  %1841 = vmatmul.mubr.f32.vlgmr.msra.gmra.mxu1 %v4246_v34  ;;  %v1289_v60 = vld [vmem:[#allocation2 + $0x1aa8] sm:$0xff] }
  0xc1   : > { %1870 = vmatpush1.msra.mxu0 %v1148_v61  ;;  %1942 = vmatprep.subr.mxu1 %v1334_v63  ;;  %v1099_v61 = vld [vmem:[#allocation2 + $0x14b8] sm:$0xff]  ;;  %v1288_v63 = vld [vmem:[#allocation2 + $0x1aa0] sm:$0xff] }
  0xc2   : > { %1871 = vmatprep.subr.mxu0 %v1144_v0  ;;  %1943 = vmatpush1.msra.mxu1 %v1333_v7  ;;  %v1098_v0 = vld [vmem:[#allocation2 + $0x14b0] sm:$0xff]  ;;  %v1284_v7 = vld [vmem:[#allocation2 + $0x1a80] sm:$0xff] }
  0xc3   : > { %1872 = vmatpush1.msra.mxu0 %v1143_v10  ;;  %1944 = vmatprep.subr.mxu1 %v1329_v15  ;;  %v1254_v10 = vld [vmem:[#allocation2 + $0x1990] sm:$0xff]  ;;  %v1283_v15 = vld [vmem:[#allocation2 + $0x1a78] sm:$0xff] }
  0xc4   : > { %1873 = vmatprep.subr.mxu0 %v1139_v16  ;;  %1945 = vmatpush1.msra.mxu1 %v1328_v19  ;;  %v1253_v16 = vld [vmem:[#allocation2 + $0x1988] sm:$0xff]  ;;  %v1279_v19 = vld [vmem:[#allocation2 + $0x1a58] sm:$0xff] }
  0xc5   : > { %1874 = vmatpush1.msra.mxu0 %v1138_v20  ;;  %1946 = vmatprep.subr.mxu1 %v1324_v24  ;;  %v1249_v20 = vld [vmem:[#allocation2 + $0x1968] sm:$0xff]  ;;  %v1278_v24 = vld [vmem:[#allocation2 + $0x1a50] sm:$0xff] }
  0xc6   : > { %1875 = vmatprep.subr.mxu0 %v1134_v25  ;;  %1947 = vmatpush1.msra.mxu1 %v1323_v26  ;;  %v1248_v25 = vld [vmem:[#allocation2 + $0x1960] sm:$0xff]  ;;  %v1274_v26 = vld [vmem:[#allocation2 + $0x1a30] sm:$0xff] }
  0xc7   : > { %1876 = vmatpush1.msra.mxu0 %v1133_v27  ;;  %1948 = vmatprep.subr.mxu1 %v1319_v29  ;;  %v1244_v27 = vld [vmem:[#allocation2 + $0x1940] sm:$0xff]  ;;  %v1273_v29 = vld [vmem:[#allocation2 + $0x1a28] sm:$0xff] }
  0xc8   : > { %1877 = vmatprep.subr.mxu0 %v1129_v30  ;;  %1949 = vmatpush1.msra.mxu1 %v1318_v32  ;;  %v1243_v30 = vld [vmem:[#allocation2 + $0x1938] sm:$0xff]  ;;  %v1269_v32 = vld [vmem:[#allocation2 + $0x1a08] sm:$0xff] }
  0xc9   : > { %1878 = vmatpush1.msra.mxu0 %v1128_v36  ;;  %1950 = vmatprep.subr.mxu1 %v1314_v12  ;;  %v1239_v36 = vld [vmem:[#allocation2 + $0x1918] sm:$0xff]  ;;  %v1268_v12 = vld [vmem:[#allocation2 + $0x1a00] sm:$0xff] }
  0xca   : > { %1879 = vmatprep.subr.mxu0 %v1124_v37  ;;  %1951 = vmatpush1.msra.mxu1 %v1313_v38  ;;  %v1238_v37 = vld [vmem:[#allocation2 + $0x1910] sm:$0xff]  ;;  %v1264_v38 = vld [vmem:[#allocation2 + $0x19e0] sm:$0xff] }
  0xcb   : > { %1880 = vmatpush1.msra.mxu0 %v1123_v42  ;;  %1952 = vmatprep.subr.mxu1 %v1309_v43  ;;  %v1234_v42 = vld [vmem:[#allocation2 + $0x18f0] sm:$0xff]  ;;  %v1263_v43 = vld [vmem:[#allocation2 + $0x19d8] sm:$0xff] }
  0xcc   : > { %1881 = vmatprep.subr.mxu0 %v1119_v45  ;;  %1953 = vmatpush1.msra.mxu1 %v1308_v46  ;;  %v1233_v45 = vld [vmem:[#allocation2 + $0x18e8] sm:$0xff]  ;;  %v1259_v46 = vld [vmem:[#allocation2 + $0x19b8] sm:$0xff] }
  0xcd   : > { %1882 = vmatpush1.msra.mxu0 %v1118_v14  ;;  %1954 = vmatprep.subr.mxu1 %v1304_v62  ;;  %v1229_v14 = vld [vmem:[#allocation2 + $0x18c8] sm:$0xff]  ;;  %v1258_v62 = vld [vmem:[#allocation2 + $0x19b0] sm:$0xff] }
  0xce   : > { %1883 = vmatprep.subr.mxu0 %v1114_v5  ;;  %1955 = vmatpush1.msra.mxu1 %v1303_v58  ;;  %v1228_v5 = vld [vmem:[#allocation2 + $0x18c0] sm:$0xff]  ;;  %v1414_v58 = vld [vmem:[#allocation2 + $0x1e90] sm:$0xff] }
  0xcf   : > { %1884 = vmatpush1.msra.mxu0 %v1113_v11  ;;  %1956 = vmatprep.subr.mxu1 %v1299_v13  ;;  %v1224_v11 = vld [vmem:[#allocation2 + $0x18a0] sm:$0xff]  ;;  %v1413_v13 = vld [vmem:[#allocation2 + $0x1e88] sm:$0xff] }
  0xd0   : > { %1885 = vmatprep.subr.mxu0 %v1109_v17  ;;  %1957 = vmatpush1.msra.mxu1 %v1298_v51  ;;  %v1223_v17 = vld [vmem:[#allocation2 + $0x1898] sm:$0xff]  ;;  %v1409_v51 = vld [vmem:[#allocation2 + $0x1e68] sm:$0xff] }
  0xd1   : > { %1886 = vmatpush1.msra.mxu0 %v1108_v52  ;;  %1958 = vmatprep.subr.mxu1 %v1294_v54  ;;  %v1219_v52 = vld [vmem:[#allocation2 + $0x1878] sm:$0xff]  ;;  %v1408_v54 = vld [vmem:[#allocation2 + $0x1e60] sm:$0xff] }
  0xd2   : > { %1887 = vmatprep.subr.mxu0 %v1104_v55  ;;  %1959 = vmatpush1.msra.mxu1 %v1293_v57  ;;  %v1218_v55 = vld [vmem:[#allocation2 + $0x1870] sm:$0xff]  ;;  %v1404_v57 = vld [vmem:[#allocation2 + $0x1e40] sm:$0xff] }
  0xd3   : > { %1888 = vmatpush1.msra.mxu0 %v1103_v59  ;;  %1960 = vmatprep.subr.mxu1 %v1289_v60  ;;  %v1214_v59 = vld [vmem:[#allocation2 + $0x1850] sm:$0xff]  ;;  %v1403_v60 = vld [vmem:[#allocation2 + $0x1e38] sm:$0xff] }
  0xd4   : > { %1889 = vmatprep.subr.mxu0 %v1099_v61  ;;  %1961 = vmatpush1.msra.mxu1 %v1288_v63  ;;  %v1213_v61 = vld [vmem:[#allocation2 + $0x1848] sm:$0xff]  ;;  %v1399_v63 = vld [vmem:[#allocation2 + $0x1e18] sm:$0xff] }
  0xd5   : > { %1890 = vmatpush1.msra.mxu0 %v1098_v0  ;;  %1962 = vmatprep.subr.mxu1 %v1284_v7  ;;  %v1209_v0 = vld [vmem:[#allocation2 + $0x1828] sm:$0xff]  ;;  %v1398_v7 = vld [vmem:[#allocation2 + $0x1e10] sm:$0xff] }
  0xd6   : > { %1891 = vmatprep.subr.mxu0 %v1254_v10  ;;  %1963 = vmatpush1.msra.mxu1 %v1283_v15  ;;  %v1208_v10 = vld [vmem:[#allocation2 + $0x1820] sm:$0xff]  ;;  %v1394_v15 = vld [vmem:[#allocation2 + $0x1df0] sm:$0xff] }
  0xd7   : > { %1892 = vmatpush2.msra.mxu0 %v1253_v16  ;;  %1964 = vmatprep.subr.mxu1 %v1279_v19  ;;  %v1204_v16 = vld [vmem:[#allocation2 + $0x1800] sm:$0xff]  ;;  %v1393_v19 = vld [vmem:[#allocation2 + $0x1de8] sm:$0xff] }
  0xd8   : > { %1893 = vmatprep.subr.mxu0 %v1249_v20  ;;  %1965 = vmatpush1.msra.mxu1 %v1278_v24  ;;  %v1203_v20 = vld [vmem:[#allocation2 + $0x17f8] sm:$0xff]  ;;  %v1389_v24 = vld [vmem:[#allocation2 + $0x1dc8] sm:$0xff] }
  0xd9   : > { %1894 = vmatpush2.msra.mxu0 %v1248_v25  ;;  %1966 = vmatprep.subr.mxu1 %v1274_v26  ;;  %v1199_v25 = vld [vmem:[#allocation2 + $0x17d8] sm:$0xff]  ;;  %v1388_v26 = vld [vmem:[#allocation2 + $0x1dc0] sm:$0xff] }
  0xda   : > { %1895 = vmatprep.subr.mxu0 %v1244_v27  ;;  %1967 = vmatpush1.msra.mxu1 %v1273_v29  ;;  %v1198_v27 = vld [vmem:[#allocation2 + $0x17d0] sm:$0xff]  ;;  %v1384_v29 = vld [vmem:[#allocation2 + $0x1da0] sm:$0xff] }
  0xdb   : > { %1896 = vmatpush2.msra.mxu0 %v1243_v30  ;;  %1968 = vmatprep.subr.mxu1 %v1269_v32  ;;  %v1194_v30 = vld [vmem:[#allocation2 + $0x17b0] sm:$0xff]  ;;  %v1383_v32 = vld [vmem:[#allocation2 + $0x1d98] sm:$0xff] }
  0xdc   : > { %1897 = vmatprep.subr.mxu0 %v1239_v36  ;;  %1969 = vmatpush1.msra.mxu1 %v1268_v12  ;;  %v1193_v36 = vld [vmem:[#allocation2 + $0x17a8] sm:$0xff]  ;;  %v1379_v12 = vld [vmem:[#allocation2 + $0x1d78] sm:$0xff] }
  0xdd   : > { %1898 = vmatpush2.msra.mxu0 %v1238_v37  ;;  %1970 = vmatprep.subr.mxu1 %v1264_v38  ;;  %v1189_v37 = vld [vmem:[#allocation2 + $0x1788] sm:$0xff]  ;;  %v1378_v38 = vld [vmem:[#allocation2 + $0x1d70] sm:$0xff] }
  0xde   : > { %1899 = vmatprep.subr.mxu0 %v1234_v42  ;;  %1971 = vmatpush1.msra.mxu1 %v1263_v43  ;;  %v1188_v42 = vld [vmem:[#allocation2 + $0x1780] sm:$0xff]  ;;  %v1374_v43 = vld [vmem:[#allocation2 + $0x1d50] sm:$0xff] }
  0xdf   : > { %1900 = vmatpush2.msra.mxu0 %v1233_v45  ;;  %1972 = vmatprep.subr.mxu1 %v1259_v46  ;;  %v1184_v45 = vld [vmem:[#allocation2 + $0x1760] sm:$0xff]  ;;  %v1373_v46 = vld [vmem:[#allocation2 + $0x1d48] sm:$0xff] }
  0xe0   : > { %1901 = vmatprep.subr.mxu0 %v1229_v14  ;;  %1973 = vmatpush1.msra.mxu1 %v1258_v62  ;;  %v1183_v14 = vld [vmem:[#allocation2 + $0x1758] sm:$0xff]  ;;  %v1369_v62 = vld [vmem:[#allocation2 + $0x1d28] sm:$0xff] }
  0xe1   : > { %1902 = vmatpush2.msra.mxu0 %v1228_v5  ;;  %1974 = vmatprep.subr.mxu1 %v1414_v58  ;;  %v1179_v5 = vld [vmem:[#allocation2 + $0x1738] sm:$0xff]  ;;  %v1368_v58 = vld [vmem:[#allocation2 + $0x1d20] sm:$0xff] }
  0xe2   : > { %1903 = vmatprep.subr.mxu0 %v1224_v11  ;;  %1975 = vmatpush2.msra.mxu1 %v1413_v13  ;;  %v1178_v11 = vld [vmem:[#allocation2 + $0x1730] sm:$0xff]  ;;  %v1364_v13 = vld [vmem:[#allocation2 + $0x1d00] sm:$0xff] }
  0xe3   : > { %1904 = vmatpush2.msra.mxu0 %v1223_v17  ;;  %1976 = vmatprep.subr.mxu1 %v1409_v51  ;;  %v1363_v17 = vld [vmem:[#allocation2 + $0x1cf8] sm:$0xff] }
  0xe4   : > { %1905 = vmatprep.subr.mxu0 %v1219_v52  ;;  %1977 = vmatpush2.msra.mxu1 %v1408_v54  ;;  %v1359_v51 = vld [vmem:[#allocation2 + $0x1cd8] sm:$0xff]  ;;  %v1358_v52 = vld [vmem:[#allocation2 + $0x1cd0] sm:$0xff] }
  0xe5   : > { %1906 = vmatpush2.msra.mxu0 %v1218_v55  ;;  %1978 = vmatprep.subr.mxu1 %v1404_v57  ;;  %v1434_v54 = vld [vmem:[#allocation2 + $0x1f30] sm:$0xff]  ;;  %v1353_v57 = vld [vmem:[#allocation2 + $0x1ca8] sm:$0xff] }
  0xe6   : > { %1907 = vmatprep.subr.mxu0 %v1214_v59  ;;  %1979 = vmatpush2.msra.mxu1 %v1403_v60  ;;  %v1354_v55 = vld [vmem:[#allocation2 + $0x1cb0] sm:$0xff]  ;;  %v1433_v59 = vld [vmem:[#allocation2 + $0x1f28] sm:$0xff] }
  0xe7   : > { %1908 = vmatpush2.msra.mxu0 %v1213_v61  ;;  %1980 = vmatprep.subr.mxu1 %v1399_v63  ;;  %v1349_v60 = vld [vmem:[#allocation2 + $0x1c88] sm:$0xff]  ;;  %v1348_v63 = vld [vmem:[#allocation2 + $0x1c80] sm:$0xff] }
  0xe8   : > { %1909 = vmatprep.subr.mxu0 %v1209_v0  ;;  %1981 = vmatpush2.msra.mxu1 %v1398_v7  ;;  %v1429_v61 = vld [vmem:[#allocation2 + $0x1f08] sm:$0xff]  ;;  %v1428_v0 = vld [vmem:[#allocation2 + $0x1f00] sm:$0xff] }
  0xe9   : > { %1910 = vmatpush2.msra.mxu0 %v1208_v10  ;;  %1982 = vmatprep.subr.mxu1 %v1394_v15  ;;  %v1344_v7 = vld [vmem:[#allocation2 + $0x1c60] sm:$0xff]  ;;  %v1343_v15 = vld [vmem:[#allocation2 + $0x1c58] sm:$0xff] }
  0xea   : > { %1911 = vmatprep.subr.mxu0 %v1204_v16  ;;  %1983 = vmatpush2.msra.mxu1 %v1393_v19  ;;  %v1424_v10 = vld [vmem:[#allocation2 + $0x1ee0] sm:$0xff]  ;;  %v1423_v16 = vld [vmem:[#allocation2 + $0x1ed8] sm:$0xff] }
  0xeb   : > { %1912 = vmatpush2.msra.mxu0 %v1203_v20  ;;  %1984 = vmatprep.subr.mxu1 %v1389_v24  ;;  %v1339_v19 = vld [vmem:[#allocation2 + $0x1c38] sm:$0xff]  ;;  %v1338_v24 = vld [vmem:[#allocation2 + $0x1c30] sm:$0xff] }
  0xec   : > { %1913 = vmatprep.subr.mxu0 %v1199_v25  ;;  %1985 = vmatpush2.msra.mxu1 %v1388_v26  ;;  %v1419_v20 = vld [vmem:[#allocation2 + $0x1eb8] sm:$0xff]  ;;  %v1418_v25 = vld [vmem:[#allocation2 + $0x1eb0] sm:$0xff] }
  0xed   : > { %1914 = vmatpush2.msra.mxu0 %v1198_v27  ;;  %1986 = vmatprep.subr.mxu1 %v1384_v29  ;;  %v1095_v26 = vld [vmem:[#allocation2 + $0x1498] sm:$0xff] }
  0xee   : > { %1915 = vmatprep.subr.mxu0 %v1194_v30  ;;  %1987 = vmatpush2.msra.mxu1 %v1383_v32  ;;  %v1255_v27 = vld [vmem:[#allocation2 + $0x1998] sm:$0xff]  ;;  %v1090_v32 = vld [vmem:[#allocation2 + $0x1470] sm:$0xff] }
  0xef   : > { %1916 = vmatpush2.msra.mxu0 %v1193_v36  ;;  %1988 = vmatprep.subr.mxu1 %v1379_v12  ;;  %v1015_v29 = vld [vmem:[#allocation2 + $0x1218] sm:$0xff]  ;;  %v1250_v36 = vld [vmem:[#allocation2 + $0x1970] sm:$0xff] }
  0xf0   : > { %1917 = vmatprep.subr.mxu0 %v1189_v37  ;;  %1989 = vmatpush2.msra.mxu1 %v1378_v38  ;;  %v1175_v30 = vld [vmem:[#allocation2 + $0x1718] sm:$0xff]  ;;  %v1010_v12 = vld [vmem:[#allocation2 + $0x11f0] sm:$0xff]  ;;  %v1085_v38 = vld [vmem:[#allocation2 + $0x1448] sm:$0xff] }
  0xf1   : > { %1918 = vmatpush2.msra.mxu0 %v1188_v42  ;;  %1990 = vmatprep.subr.mxu1 %v1374_v43  ;;  %v1170_v37 = vld [vmem:[#allocation2 + $0x16f0] sm:$0xff]  ;;  %v1245_v42 = vld [vmem:[#allocation2 + $0x1948] sm:$0xff] }
  0xf2   : > { %1919 = vmatprep.subr.mxu0 %v1184_v45  ;;  %1991 = vmatpush2.msra.mxu1 %v1373_v46  ;;  %v1005_v43 = vld [vmem:[#allocation2 + $0x11c8] sm:$0xff]  ;;  %v1080_v46 = vld [vmem:[#allocation2 + $0x1420] sm:$0xff] }
  0xf3   : > { %1920 = vmatpush2.msra.mxu0 %v1183_v14  ;;  %1992 = vmatprep.subr.mxu1 %v1369_v62  ;;  %v1165_v45 = vld [vmem:[#allocation2 + $0x16c8] sm:$0xff]  ;;  %v1240_v14 = vld [vmem:[#allocation2 + $0x1920] sm:$0xff] }
  0xf4   : > { %1921 = vmatprep.subr.mxu0 %v1179_v5  ;;  %1993 = vmatpush2.msra.mxu1 %v1368_v58  ;;  %v1000_v62 = vld [vmem:[#allocation2 + $0x11a0] sm:$0xff]  ;;  %v1075_v58 = vld [vmem:[#allocation2 + $0x13f8] sm:$0xff] }
  0xf5   : > { %1922 = vmatpush2.msra.mxu0 %v1178_v11  ;;  %1923 = vmatprep.mubr.f32.mxu0 %v4239_v31  ;;  %v1160_v5 = vld [vmem:[#allocation2 + $0x16a0] sm:$0xff]  ;;  %v1235_v11 = vld [vmem:[#allocation2 + $0x18f8] sm:$0xff] }
  0xf6   : > { %1994 = vmatprep.subr.mxu1 %v1364_v13  ;;  %1924 = vmatmul.mubr.f32.vlgmr.msra.gmra.mxu0 %v4249_v35  ;;  %v995_v13 = vld [vmem:[#allocation2 + $0x1178] sm:$0xff] }
  0xf7   : > { %1995 = vmatpush2.msra.mxu1 %v1363_v17  ;;  %1846 = vmatprep.mubr.f32.mxu1 %v4261_v47  ;;  %v1155_v17 = vld [vmem:[#allocation2 + $0x1678] sm:$0xff] }
  0xf8   : > { %1996 = vmatprep.subr.mxu1 %v1359_v51  ;;  %1847 = vmatmul.mubr.f32.gmra.mxu1 %v4269_v53  ;;  %v1070_v51 = vld [vmem:[#allocation2 + $0x13d0] sm:$0xff] }
  0xf9   : > { %1929 = vmatprep.mubr.f32.mxu0 %v4266_v50  ;;  %1997 = vmatpush2.msra.mxu1 %v1358_v52  ;;  %v1230_v52 = vld [vmem:[#allocation2 + $0x18d0] sm:$0xff] }
  0xfa   : > { %2049 = vmatprep.subr.mxu0 %v1434_v54  ;;  %1998 = vmatprep.subr.mxu1 %v1354_v55  ;;  %v990_v54 = vld [vmem:[#allocation2 + $0x1150] sm:$0xff] }
  0xfb   : > { %1930 = vmatmul.mubr.f32.gmra.mxu0 %v4277_v56  ;;  %1999 = vmatpush2.msra.mxu1 %v1353_v57  ;;  %v1150_v55 = vld [vmem:[#allocation2 + $0x1650] sm:$0xff]  ;;  %v1065_v57 = vld [vmem:[#allocation2 + $0x13a8] sm:$0xff] }
  0xfc   : > { %2050 = vmatpush1.msra.mxu0 %v1433_v59  ;;  %1852 = vmatprep.mubr.f32.mxu1 %v4289_v1  ;;  %v1225_v59 = vld [vmem:[#allocation2 + $0x18a8] sm:$0xff] }
  0xfd   : > { %2000 = vmatprep.subr.mxu1 %v1349_v60  ;;  %2051 = vmatprep.subr.mxu0 %v1429_v61  ;;  %v985_v60 = vld [vmem:[#allocation2 + $0x1128] sm:$0xff] }
  0xfe   : > { %1853 = vmatmul.mubr.f32.gmra.mxu1 %v4299_v8  ;;  %2052 = vmatpush1.msra.mxu0 %v1428_v0  ;;  %v1145_v61 = vld [vmem:[#allocation2 + $0x1628] sm:$0xff]  ;;  %v1220_v0 = vld [vmem:[#allocation2 + $0x1880] sm:$0xff] }
  0xff   : > { %2001 = vmatpush2.msra.mxu1 %v1348_v63  ;;  %1935 = vmatprep.mubr.f32.mxu0 %v4292_v2  ;;  %v1060_v63 = vld [vmem:[#allocation2 + $0x1380] sm:$0xff] }
 0x100   : > { %2002 = vmatprep.subr.mxu1 %v1344_v7  ;;  %2053 = vmatprep.subr.mxu0 %v1424_v10  ;;  %v980_v7 = vld [vmem:[#allocation2 + $0x1100] sm:$0xff] }
 0x101   : > { %1936 = vmatmul.mubr.f32.gmra.mxu0 %v4302_v9  ;;  %2003 = vmatpush2.msra.mxu1 %v1343_v15  ;;  %v1140_v10 = vld [vmem:[#allocation2 + $0x1600] sm:$0xff]  ;;  %v1055_v15 = vld [vmem:[#allocation2 + $0x1358] sm:$0xff] }
 0x102   : > { %2054 = vmatpush1.msra.mxu0 %v1423_v16  ;;  %2004 = vmatprep.subr.mxu1 %v1339_v19  ;;  %v1215_v16 = vld [vmem:[#allocation2 + $0x1858] sm:$0xff] }
 0x103   : > { %2055 = vmatprep.subr.mxu0 %v1419_v20  ;;  %2005 = vmatpush2.msra.mxu1 %v1338_v24  ;;  %v975_v19 = vld [vmem:[#allocation2 + $0x10d8] sm:$0xff]  ;;  %v1050_v24 = vld [vmem:[#allocation2 + $0x1330] sm:$0xff] }
 0x104   : > { %2006 = vmatprep.mubr.f32.mxu1 %v4352_v4  ;;  %2056 = vmatpush1.msra.mxu0 %v1418_v25  ;;  %v1135_v20 = vld [vmem:[#allocation2 + $0x15d8] sm:$0xff]  ;;  %v1210_v25 = vld [vmem:[#allocation2 + $0x1830] sm:$0xff] }
 0x105   : > { %2007 = vmatmul.mubr.f32.vlgmr.msra.gmra.mxu1 %v4355_v33  ;;  %2089 = vmatprep.mubr.f32.mxu0 %v4083_v22 }
 0x106   : > { %3638 = vmatprep.subr.mxu0 %v1095_v26  ;;  %3679 = vmatprep.subr.mxu1 %v1255_v27  ;;  %v970_v26 = vld [vmem:[#allocation2 + $0x10b0] sm:$0xff] }
 0x107   : > { %3621 = vmatmul.mubr.msk.f32.vlgmr.msra.gmra.mxu0 %vm1436_vm1, %v4312_v21  ;;  %3680 = vmatpush3.msra.mxu1 %v1175_v30  ;;  %v1130_v27 = vld [vmem:[#allocation2 + $0x15b0] sm:$0xff]  ;;  %v1205_v30 = vld [vmem:[#allocation2 + $0x1808] sm:$0xff] }
 0x108   : > { %3639 = vmatpush3.msra.mxu0 %v1015_v29  ;;  %3681 = vmatprep.subr.mxu1 %v1250_v36  ;;  %v1045_v29 = vld [vmem:[#allocation2 + $0x1308] sm:$0xff] }
 0x109   : > { %3640 = vmatprep.subr.mxu0 %v1090_v32  ;;  %2012 = vmatprep.mubr.f32.mxu1 %v4370_v44  ;;  %v965_v32 = vld [vmem:[#allocation2 + $0x1088] sm:$0xff] }
 0x10a   : > { %3641 = vmatpush3.msra.mxu0 %v1010_v12  ;;  %3682 = vmatpush3.msra.mxu1 %v1170_v37  ;;  %v1125_v36 = vld [vmem:[#allocation2 + $0x1588] sm:$0xff]  ;;  %v1040_v12 = vld [vmem:[#allocation2 + $0x12e0] sm:$0xff] }
 0x10b   : > { %3642 = vmatprep.subr.mxu0 %v1085_v38  ;;  %2013 = vmatmul.mubr.f32.gmra.mxu1 %v4377_v6  ;;  %v1200_v37 = vld [vmem:[#allocation2 + $0x17e0] sm:$0xff] }
 0x10c   : > { %3683 = vmatprep.subr.mxu1 %v1245_v42  ;;  %2095 = vmatprep.mubr.f32.mxu0 %v4083_v22  ;;  %v960_v38 = vld [vmem:[#allocation2 + $0x1060] sm:$0xff] }
 0x10d   : > { %3643 = vmatpush3.msra.mxu0 %v1005_v43  ;;  %3684 = vmatpush3.msra.mxu1 %v1165_v45  ;;  %v1120_v42 = vld [vmem:[#allocation2 + $0x1560] sm:$0xff]  ;;  %v1035_v43 = vld [vmem:[#allocation2 + $0x12b8] sm:$0xff] }
 0x10e   : > { %3622 = vmatmul.mubr.msk.f32.gmra.mxu0 %vm1436_vm1, %v4364_v39  ;;  %3644 = vmatprep.subr.mxu0 %v1080_v46  ;;  %v1195_v45 = vld [vmem:[#allocation2 + $0x17b8] sm:$0xff] }
 0x10f   : > { %3685 = vmatprep.subr.mxu1 %v1240_v14  ;;  %2018 = vmatprep.mubr.f32.mxu1 %v4339_v23  ;;  %v955_v46 = vld [vmem:[#allocation2 + $0x1038] sm:$0xff] }
 0x110   : > { %3645 = vmatpush3.msra.mxu0 %v1000_v62  ;;  %3686 = vmatpush3.msra.mxu1 %v1160_v5  ;;  %v1115_v14 = vld [vmem:[#allocation2 + $0x1538] sm:$0xff]  ;;  %v1030_v62 = vld [vmem:[#allocation2 + $0x1290] sm:$0xff] }
 0x111   : > { %3646 = vmatprep.subr.mxu0 %v1075_v58  ;;  %2019 = vmatmul.mubr.f32.gmra.mxu1 %v4345_v3  ;;  %v1190_v5 = vld [vmem:[#allocation2 + $0x1790] sm:$0xff] }
 0x112   : > { %3687 = vmatprep.subr.mxu1 %v1235_v11  ;;  %2101 = vmatprep.mubr.f32.mxu0 %v4083_v22  ;;  %v950_v58 = vld [vmem:[#allocation2 + $0x1010] sm:$0xff] }
 0x113   : > { %3647 = vmatpush3.msra.mxu0 %v995_v13  ;;  %3688 = vmatpush3.msra.mxu1 %v1155_v17  ;;  %v1110_v11 = vld [vmem:[#allocation2 + $0x1510] sm:$0xff]  ;;  %v1025_v13 = vld [vmem:[#allocation2 + $0x1268] sm:$0xff] }
 0x114   : > { %3623 = vmatmul.mubr.msk.f32.gmra.mxu0 %vm1436_vm1, %v4333_v18  ;;  %3648 = vmatprep.subr.mxu0 %v1070_v51  ;;  %v1185_v17 = vld [vmem:[#allocation2 + $0x1768] sm:$0xff] }
 0x115   : > { %3689 = vmatprep.subr.mxu1 %v1230_v52  ;;  %3649 = vmatpush3.msra.mxu0 %v990_v54  ;;  %v945_v51 = vld [vmem:[#allocation2 + $0xfe8] sm:$0xff]  ;;  %v1020_v54 = vld [vmem:[#allocation2 + $0x1240] sm:$0xff] }
 0x116   : > { %3690 = vmatpush3.msra.mxu1 %v1150_v55  ;;  %3650 = vmatprep.subr.mxu0 %v1065_v57  ;;  %v1105_v52 = vld [vmem:[#allocation2 + $0x14e8] sm:$0xff]  ;;  %v1180_v55 = vld [vmem:[#allocation2 + $0x1740] sm:$0xff] }
 0x117   : > { %3691 = vmatprep.subr.mxu1 %v1225_v59  ;;  %3651 = vmatpush3.msra.mxu0 %v985_v60  ;;  %v940_v57 = vld [vmem:[#allocation2 + $0xfc0] sm:$0xff]  ;;  %v1415_v60 = vld [vmem:[#allocation2 + $0x1e98] sm:$0xff] }
 0x118   : > { %3692 = vmatpush3.msra.mxu1 %v1145_v61  ;;  %3652 = vmatprep.subr.mxu0 %v1060_v63  ;;  %v1100_v59 = vld [vmem:[#allocation2 + $0x14c0] sm:$0xff]  ;;  %v1335_v61 = vld [vmem:[#allocation2 + $0x1c18] sm:$0xff] }
 0x119   : > { %3693 = vmatprep.subr.mxu1 %v1220_v0  ;;  %3653 = vmatpush3.msra.mxu0 %v980_v7  ;;  %v1435_v63 = vld [vmem:[#allocation2 + $0x1f38] sm:$0xff]  ;;  %v1410_v0 = vld [vmem:[#allocation2 + $0x1e70] sm:$0xff] }
 0x11a   : > { %3694 = vmatpush3.msra.mxu1 %v1140_v10  ;;  %3654 = vmatprep.subr.mxu0 %v1055_v15  ;;  %v1330_v15 = vld [vmem:[#allocation2 + $0x1bf0] sm:$0xff] }
 0x11b   : > { %3695 = vmatprep.subr.mxu1 %v1215_v16  ;;  %3655 = vmatpush3.msra.mxu0 %v975_v19 }
 0x11c   : > { %3696 = vmatpush3.msra.mxu1 %v1135_v20  ;;  %3656 = vmatprep.subr.mxu0 %v1050_v24  ;;  %v1325_v20 = vld [vmem:[#allocation2 + $0x1bc8] sm:$0xff]  ;;  %v1400_v24 = vld [vmem:[#allocation2 + $0x1e20] sm:$0xff] }
 0x11d   : > { %3697 = vmatprep.subr.mxu1 %v1210_v25  ;;  %3657 = vmatpush3.msra.mxu0 %v970_v26 }
 0x11e   : > { %3698 = vmatpush3.msra.mxu1 %v1130_v27  ;;  %3658 = vmatprep.subr.mxu0 %v1045_v29  ;;  %v1425_v27 = vld [vmem:[#allocation2 + $0x1ee8] sm:$0xff] }
 0x11f   : > { %3699 = vmatprep.subr.mxu1 %v1205_v30  ;;  %3659 = vmatpush3.msra.mxu0 %v965_v32 }
 0x120   : > { %3700 = vmatpush3.msra.mxu1 %v1125_v36  ;;  %3660 = vmatprep.subr.mxu0 %v1040_v12  ;;  %v1420_v36 = vld [vmem:[#allocation2 + $0x1ec0] sm:$0xff]  ;;  %v1390_v12 = vld [vmem:[#allocation2 + $0x1dd0] sm:$0xff] }
 0x121   : > { %3701 = vmatprep.subr.mxu1 %v1200_v37  ;;  %3661 = vmatpush3.msra.mxu0 %v960_v38 }
 0x122   : > { %3702 = vmatpush3.msra.mxu1 %v1120_v42  ;;  %3662 = vmatprep.subr.mxu0 %v1035_v43  ;;  %v512_v42 = vld [vmem:[#allocation2 + $0x260] sm:$0xff]  ;;  %v1385_v43 = vld [vmem:[#allocation2 + $0x1da8] sm:$0xff] }
 0x123   : > { %3703 = vmatprep.subr.mxu1 %v1195_v45  ;;  %3663 = vmatpush3.msra.mxu0 %v955_v46 }
 0x124   : > { %3704 = vmatpush3.msra.mxu1 %v1115_v14  ;;  %3664 = vmatprep.subr.mxu0 %v1030_v62  ;;  %v507_v62 = vld [vmem:[#allocation2 + $0x238] sm:$0xff] }
 0x125   : > { %3705 = vmatprep.subr.mxu1 %v1190_v5  ;;  %3665 = vmatpush3.msra.mxu0 %v950_v58  ;;  %v1380_v5 = vld [vmem:[#allocation2 + $0x1d80] sm:$0xff]  ;;  %v506_v58 = vld [vmem:[#allocation2 + $0x230] sm:$0xff] }
 0x126   : > { %3706 = vmatpush3.msra.mxu1 %v1110_v11  ;;  %3666 = vmatprep.subr.mxu0 %v1025_v13  ;;  %v1300_v11 = vld [vmem:[#allocation2 + $0x1b00] sm:$0xff]  ;;  %v502_v13 = vld [vmem:[#allocation2 + $0x210] sm:$0xff] }
 0x127   : > { %3707 = vmatprep.subr.mxu1 %v1185_v17  ;;  %3667 = vmatpush3.msra.mxu0 %v945_v51  ;;  %v1375_v17 = vld [vmem:[#allocation2 + $0x1d58] sm:$0xff]  ;;  %v501_v51 = vld [vmem:[#allocation2 + $0x208] sm:$0xff] }
 0x128   : > { %3708 = vmatpush3.msra.mxu1 %v1105_v52  ;;  %3668 = vmatprep.subr.mxu0 %v1020_v54  ;;  %v1295_v52 = vld [vmem:[#allocation2 + $0x1ad8] sm:$0xff]  ;;  %v497_v54 = vld [vmem:[#allocation2 + $0x1e8] sm:$0xff] }
 0x129   : > { %3709 = vmatprep.subr.mxu1 %v1180_v55  ;;  %3669 = vmatpush3.msra.mxu0 %v940_v57  ;;  %v1370_v55 = vld [vmem:[#allocation2 + $0x1d30] sm:$0xff]  ;;  %v496_v57 = vld [vmem:[#allocation2 + $0x1e0] sm:$0xff] }
 0x12a   : > { %2172 = vmatprep.mubr.f32.mxu0 %v4233_v28  ;;  %3710 = vmatpush3.msra.mxu1 %v1100_v59  ;;  %v1290_v59 = vld [vmem:[#allocation2 + $0x1ab0] sm:$0xff] }
 0x12b   : > { %2252 = vmatprep.mubr.f32.mxu1 %v4239_v31  ;;  %2173 = vmatmul.mubr.f32.vlgmr.msra.gmra.mxu0 %v4246_v34  ;;  %v1510_v7 = vpop.f32.mrf.mxu0  ;;  %v1405_v31 = vld [vmem:[#allocation2 + $0x1e48] sm:$0xff] }
 0x12c   : > { %2253 = vmatmul.mubr.f32.vlgmr.msra.gmra.mxu1 %v4249_v35  ;;  %v1593_v10 = vpop.f32.mrf.mxu1  ;;  %3720 = vmatprep.subr.mxu0 %v1415_v60  ;;  %v1430_v35 = vld [vmem:[#allocation2 + $0x1f10] sm:$0xff]  ;;  %v1365_v60 = vld [vmem:[#allocation2 + $0x1d08] sm:$0xff] }
 0x12d   : > { %3898 = vmatprep.subr.mxu1 %v4083_v22  ;;  %v4418_v16 = vadd.f32 %v1593_v10, %v1510_v7  ;;  %3721 = vmatpush3.msra.mxu0 %v1335_v61  ;;  %v1512_v28 = vpop.f32.mrf.mxu0  ;;  %v491_v61 = vld [vmem:[#allocation2 + $0x1b8] sm:$0xff]  ;;  %v1360_v7 = vld [vmem:[#allocation2 + $0x1ce0] sm:$0xff]  ;;  %v486_v10 = vld [vmem:[#allocation2 + $0x190] sm:$0xff] }
 0x12e   : > { %3899 = vmatpush3.msra.mxu1 %v1435_v63  ;;  %v1595_v19 = vpop.f32.mrf.mxu1  ;;  %3722 = vmatprep.subr.mxu0 %v1410_v0  ;;  %v1285_v63 = vld [vmem:[#allocation2 + $0x1a88] sm:$0xff]  ;;  %v487_v0 = vld [vmem:[#allocation2 + $0x198] sm:$0xff] }
 0x12f   : > { %2177 = vmatprep.mubr.f32.mxu0 %v4261_v47  ;;  %v4421_v34 = vadd.f32 %v1595_v19, %v1512_v28  ;;  %2257 = vmatprep.mubr.f32.mxu1 %v4266_v50  ;;  %v1320_v47 = vld [vmem:[#allocation2 + $0x1ba0] sm:$0xff]  ;;  %v482_v28 = vld [vmem:[#allocation2 + $0x170] sm:$0xff]  ;;  %v1355_v19 = vld [vmem:[#allocation2 + $0x1cb8] sm:$0xff] }
 0x130   : > { %3723 = vmatpush3.msra.mxu0 %v1330_v15  ;;  %3900 = vmatprep.subr.mxu1 %v4083_v22  ;;  %v1280_v15 = vld [vmem:[#allocation2 + $0x1a60] sm:$0xff] }
 0x131   : > { %2178 = vmatmul.mubr.f32.gmra.mxu0 %v4269_v53  ;;  %v1516_v25 = vpop.f32.mrf.mxu0  ;;  %2258 = vmatmul.mubr.f32.gmra.mxu1 %v4277_v56  ;;  %v1599_v26 = vpop.f32.mrf.mxu1  ;;  %v1395_v53 = vld [vmem:[#allocation2 + $0x1df8] sm:$0xff] }
 0x132   : > { %3724 = vmatprep.subr.mxu0 %v1405_v31  ;;  %3901 = vmatpush3.msra.mxu1 %v1430_v35  ;;  %v4427_v29 = vadd.f32 %v1599_v26, %v1516_v25  ;;  %v1315_v56 = vld [vmem:[#allocation2 + $0x1b78] sm:$0xff]  ;;  %v481_v31 = vld [vmem:[#allocation2 + $0x168] sm:$0xff]  ;;  %v476_v25 = vld [vmem:[#allocation2 + $0x140] sm:$0xff] }
 0x133   : > { %3725 = vmatpush3.msra.mxu0 %v1325_v20  ;;  %v1518_v50 = vpop.f32.mrf.mxu0  ;;  %3902 = vmatprep.subr.mxu1 %v4083_v22  ;;  %v1601_v30 = vpop.f32.mrf.mxu1  ;;  %v1275_v35 = vld [vmem:[#allocation2 + $0x1a38] sm:$0xff]  ;;  %v477_v20 = vld [vmem:[#allocation2 + $0x148] sm:$0xff]  ;;  %v1270_v26 = vld [vmem:[#allocation2 + $0x1a10] sm:$0xff] }
 0x134   : > { %3726 = vmatprep.subr.mxu0 %v1400_v24  ;;  %2182 = vmatprep.mubr.f32.mxu0 %v4289_v1  ;;  %v4432_v32 = vadd.f32 %v1601_v30, %v1518_v50  ;;  %v1310_v1 = vld [vmem:[#allocation2 + $0x1b50] sm:$0xff]  ;;  %v471_v50 = vld [vmem:[#allocation2 + $0x118] sm:$0xff]  ;;  %v1265_v30 = vld [vmem:[#allocation2 + $0x19e8] sm:$0xff] }
 0x135   : > { %2262 = vmatprep.mubr.f32.mxu1 %v4292_v2  ;;  %3727 = vmatpush3.msra.mxu0 %v1320_v47  ;;  %v1350_v24 = vld [vmem:[#allocation2 + $0x1c90] sm:$0xff]  ;;  %v472_v47 = vld [vmem:[#allocation2 + $0x120] sm:$0xff] }
 0x136   : > { %3903 = vmatpush3.msra.mxu1 %v1425_v27  ;;  %2183 = vmatmul.mubr.f32.gmra.mxu0 %v4299_v8  ;;  %v1522_v37 = vpop.f32.mrf.mxu0  ;;  %v511_v8 = vld [vmem:[#allocation2 + $0x258] sm:$0xff]  ;;  %v1345_v27 = vld [vmem:[#allocation2 + $0x1c68] sm:$0xff] }
 0x137   : > { %2263 = vmatmul.mubr.f32.gmra.mxu1 %v4302_v9  ;;  %v1605_v38 = vpop.f32.mrf.mxu1  ;;  %3728 = vmatprep.subr.mxu0 %v1395_v53  ;;  %v1305_v9 = vld [vmem:[#allocation2 + $0x1b28] sm:$0xff]  ;;  %v467_v53 = vld [vmem:[#allocation2 + $0xf8] sm:$0xff] }
 0x138   : > { %3904 = vmatprep.subr.mxu1 %v4083_v22  ;;  %v4437_v2 = vadd.f32 %v1605_v38, %v1522_v37  ;;  %3729 = vmatpush3.msra.mxu0 %v1315_v56  ;;  %v1524_v45 = vpop.f32.mrf.mxu0  ;;  %v1340_v56 = vld [vmem:[#allocation2 + $0x1c40] sm:$0xff]  ;;  %v462_v37 = vld [vmem:[#allocation2 + $0xd0] sm:$0xff]  ;;  %v461_v38 = vld [vmem:[#allocation2 + $0xc8] sm:$0xff] }
 0x139   : > { %3905 = vmatpush3.msra.mxu1 %v1420_v36  ;;  %v1607_v46 = vpop.f32.mrf.mxu1  ;;  %3730 = vmatprep.subr.mxu0 %v1390_v12  ;;  %v466_v36 = vld [vmem:[#allocation2 + $0xf0] sm:$0xff]  ;;  %v1260_v12 = vld [vmem:[#allocation2 + $0x19c0] sm:$0xff] }
 0x13a   : > { %3906 = vmatprep.mubr.msk.f32.mxu1 %vm4084_vm2, %v4083_v22  ;;  %v4441_v14 = vadd.f32 %v1607_v46, %v1524_v45  ;;  %3731 = vmatpush3.msra.mxu0 %v1310_v1  ;;  %v672_v1 = vld [vmem:[#allocation2 + $0x760] sm:$0xff]  ;;  %v667_v46 = vld [vmem:[#allocation2 + $0x738] sm:$0xff] }
 0x13b   : > { %2434 = vmatprep.subr.mxu1 %v512_v42  ;;  %3732 = vmatprep.subr.mxu0 %v1385_v43  ;;  %v457_v42 = vld [vmem:[#allocation2 + $0xa8] sm:$0xff]  ;;  %v671_v43 = vld [vmem:[#allocation2 + $0x758] sm:$0xff]  ;;  %v456_v45 = vld [vmem:[#allocation2 + $0xa0] sm:$0xff] }
 0x13c   : > { %3907 = vmatmul.mubr.msk.f32.vlgmr.msra.gmra.mxu1 %vm1436_vm1, %v4312_v21  ;;  %3733 = vmatpush3.msra.mxu0 %v1305_v9  ;;  %v492_v21 = vld [vmem:[#allocation2 + $0x1c0] sm:$0xff]  ;;  %v666_v9 = vld [vmem:[#allocation2 + $0x730] sm:$0xff] }
 0x13d   : > { %2435 = vmatpush1.msra.mxu1 %v511_v8  ;;  %3734 = vmatprep.subr.mxu0 %v1380_v5  ;;  %v452_v8 = vld [vmem:[#allocation2 + $0x80] sm:$0xff]  ;;  %v662_v5 = vld [vmem:[#allocation2 + $0x710] sm:$0xff] }
 0x13e   : > { %2436 = vmatprep.subr.mxu1 %v507_v62  ;;  %3735 = vmatpush3.msra.mxu0 %v1300_v11  ;;  %v451_v62 = vld [vmem:[#allocation2 + $0x78] sm:$0xff]  ;;  %v446_v11 = vld [vmem:[#allocation2 + $0x50] sm:$0xff] }
 0x13f   : > { %2437 = vmatpush1.msra.mxu1 %v506_v58  ;;  %3736 = vmatprep.subr.mxu0 %v1375_v17  ;;  %v447_v58 = vld [vmem:[#allocation2 + $0x58] sm:$0xff]  ;;  %v656_v17 = vld [vmem:[#allocation2 + $0x6e0] sm:$0xff] }
 0x140   : > { %2438 = vmatprep.subr.mxu1 %v502_v13  ;;  %3737 = vmatpush3.msra.mxu0 %v1295_v52  ;;  %v442_v13 = vld [vmem:[#allocation2 + $0x30] sm:$0xff]  ;;  %v437_v52 = vld [vmem:[#allocation2 + $0x8] sm:$0xff] }
 0x141   : > { %2439 = vmatpush1.msra.mxu1 %v501_v51  ;;  %3738 = vmatprep.subr.mxu0 %v1370_v55  ;;  %v441_v51 = vld [vmem:[#allocation2 + $0x28] sm:$0xff]  ;;  %v436_v55 = vld [vmem:[#allocation2] sm:$0xff] }
 0x142   : > { %2440 = vmatprep.subr.mxu1 %v497_v54  ;;  %3739 = vmatpush3.msra.mxu0 %v1290_v59  ;;  %v651_v54 = vld [vmem:[#allocation2 + $0x6b8] sm:$0xff]  ;;  %v592_v59 = vld [vmem:[#allocation2 + $0x4e0] sm:$0xff] }
 0x143   : > { %2441 = vmatpush1.msra.mxu1 %v496_v57  ;;  %3740 = vmatprep.subr.mxu0 %v1365_v60  ;;  %v646_v57 = vld [vmem:[#allocation2 + $0x690] sm:$0xff]  ;;  %v641_v60 = vld [vmem:[#allocation2 + $0x668] sm:$0xff] }
 0x144   : > { %2442 = vmatprep.subr.mxu1 %v492_v21  ;;  %3741 = vmatpush3.msra.mxu0 %v1285_v63  ;;  %v642_v21 = vld [vmem:[#allocation2 + $0x670] sm:$0xff] }
 0x145   : > { %2443 = vmatpush1.msra.mxu1 %v491_v61  ;;  %3742 = vmatprep.subr.mxu0 %v1360_v7  ;;  %v637_v61 = vld [vmem:[#allocation2 + $0x648] sm:$0xff]  ;;  %v586_v63 = vld [vmem:[#allocation2 + $0x4b0] sm:$0xff] }
 0x146   : > { %2444 = vmatprep.subr.mxu1 %v487_v0  ;;  %3743 = vmatpush3.msra.mxu0 %v1280_v15  ;;  %v636_v0 = vld [vmem:[#allocation2 + $0x640] sm:$0xff]  ;;  %v582_v7 = vld [vmem:[#allocation2 + $0x490] sm:$0xff]  ;;  %v631_v15 = vld [vmem:[#allocation2 + $0x618] sm:$0xff] }
 0x147   : > { %2445 = vmatpush1.msra.mxu1 %v486_v10  ;;  %3744 = vmatprep.subr.mxu0 %v1355_v19  ;;  %v632_v10 = vld [vmem:[#allocation2 + $0x620] sm:$0xff]  ;;  %v627_v19 = vld [vmem:[#allocation2 + $0x5f8] sm:$0xff] }
 0x148   : > { %2446 = vmatprep.subr.mxu1 %v482_v28  ;;  %3745 = vmatpush3.msra.mxu0 %v1275_v35  ;;  %v577_v28 = vld [vmem:[#allocation2 + $0x468] sm:$0xff]  ;;  %v626_v35 = vld [vmem:[#allocation2 + $0x5f0] sm:$0xff] }
 0x149   : > { %2447 = vmatpush1.msra.mxu1 %v481_v31  ;;  %3746 = vmatprep.subr.mxu0 %v1350_v24  ;;  %v576_v31 = vld [vmem:[#allocation2 + $0x460] sm:$0xff]  ;;  %v622_v24 = vld [vmem:[#allocation2 + $0x5d0] sm:$0xff] }
 0x14a   : > { %2448 = vmatprep.subr.mxu1 %v477_v20  ;;  %3747 = vmatpush3.msra.mxu0 %v1270_v26  ;;  %v572_v20 = vld [vmem:[#allocation2 + $0x440] sm:$0xff]  ;;  %v621_v26 = vld [vmem:[#allocation2 + $0x5c8] sm:$0xff] }
 0x14b   : > { %2449 = vmatpush1.msra.mxu1 %v476_v25  ;;  %3748 = vmatprep.subr.mxu0 %v1345_v27  ;;  %v571_v25 = vld [vmem:[#allocation2 + $0x438] sm:$0xff]  ;;  %v566_v27 = vld [vmem:[#allocation2 + $0x410] sm:$0xff] }
 0x14c   : > { %2450 = vmatprep.subr.mxu1 %v472_v47  ;;  %3749 = vmatpush3.msra.mxu0 %v1265_v30  ;;  %v617_v47 = vld [vmem:[#allocation2 + $0x5a8] sm:$0xff]  ;;  %v562_v30 = vld [vmem:[#allocation2 + $0x3f0] sm:$0xff] }
 0x14d   : > { %2451 = vmatpush1.msra.mxu1 %v471_v50  ;;  %3750 = vmatprep.subr.mxu0 %v1340_v56  ;;  %v616_v50 = vld [vmem:[#allocation2 + $0x5a0] sm:$0xff]  ;;  %v561_v56 = vld [vmem:[#allocation2 + $0x3e8] sm:$0xff] }
 0x14e   : > { %2452 = vmatprep.subr.mxu1 %v467_v53  ;;  %3751 = vmatpush3.msra.mxu0 %v1260_v12  ;;  %v612_v53 = vld [vmem:[#allocation2 + $0x580] sm:$0xff]  ;;  %v557_v12 = vld [vmem:[#allocation2 + $0x3c8] sm:$0xff] }
 0x14f   : > { %2453 = vmatpush1.msra.mxu1 %v466_v36  ;;  %2332 = vmatprep.mubr.f32.mxu0 %v4352_v4  ;;  %v661_v4 = vld [vmem:[#allocation2 + $0x708] sm:$0xff]  ;;  %v611_v36 = vld [vmem:[#allocation2 + $0x578] sm:$0xff] }
 0x150   : > { %2454 = vmatprep.subr.mxu1 %v462_v37  ;;  %2333 = vmatmul.mubr.f32.vlgmr.msra.gmra.mxu0 %v4355_v33  ;;  %v657_v33 = vld [vmem:[#allocation2 + $0x6e8] sm:$0xff]  ;;  %v607_v37 = vld [vmem:[#allocation2 + $0x558] sm:$0xff] }
 0x151   : > { %2455 = vmatpush1.msra.mxu1 %v461_v38  ;;  %2517 = vmatprep.subr.mxu0 %v672_v1  ;;  %v556_v38 = vld [vmem:[#allocation2 + $0x3c0] sm:$0xff]  ;;  %v606_v1 = vld [vmem:[#allocation2 + $0x550] sm:$0xff] }
 0x152   : > { %2456 = vmatprep.subr.mxu1 %v457_v42  ;;  %2518 = vmatpush1.msra.mxu0 %v671_v43  ;;  %v552_v42 = vld [vmem:[#allocation2 + $0x3a0] sm:$0xff]  ;;  %v602_v43 = vld [vmem:[#allocation2 + $0x530] sm:$0xff] }
 0x153   : > { %2457 = vmatpush1.msra.mxu1 %v456_v45  ;;  %2519 = vmatprep.subr.mxu0 %v667_v46  ;;  %v1759_v45 = vpop.f32.mrf.mxu1  ;;  %v551_v46 = vld [vmem:[#allocation2 + $0x398] sm:$0xff] }
 0x154   : > { %2337 = vmatprep.mubr.f32.mxu0 %v4370_v44  ;;  %2458 = vmatprep.subr.mxu1 %v452_v8  ;;  %v652_v44 = vld [vmem:[#allocation2 + $0x6c0] sm:$0xff]  ;;  %v601_v8 = vld [vmem:[#allocation2 + $0x528] sm:$0xff] }
 0x155   : > { %2520 = vmatpush1.msra.mxu0 %v666_v9  ;;  %2459 = vmatpush1.msra.mxu1 %v451_v62  ;;  %v547_v9 = vld [vmem:[#allocation2 + $0x378] sm:$0xff]  ;;  %v597_v62 = vld [vmem:[#allocation2 + $0x508] sm:$0xff] }
 0x156   : > { %2338 = vmatmul.mubr.f32.gmra.mxu0 %v4377_v6  ;;  %2521 = vmatprep.subr.mxu0 %v662_v5  ;;  %v647_v6 = vld [vmem:[#allocation2 + $0x698] sm:$0xff]  ;;  %v546_v5 = vld [vmem:[#allocation2 + $0x370] sm:$0xff] }
 0x157   : > { %2460 = vmatprep.subr.mxu1 %v447_v58  ;;  %2522 = vmatpush1.msra.mxu0 %v661_v4  ;;  %v596_v58 = vld [vmem:[#allocation2 + $0x500] sm:$0xff] }
 0x158   : > { %2461 = vmatpush1.msra.mxu1 %v446_v11  ;;  %2523 = vmatprep.subr.mxu0 %v657_v33  ;;  %v542_v11 = vld [vmem:[#allocation2 + $0x350] sm:$0xff]  ;;  %v752_v33 = vld [vmem:[#allocation2 + $0x9e0] sm:$0xff] }
 0x159   : > { %2342 = vmatprep.mubr.f32.mxu0 %v4339_v23  ;;  %2462 = vmatprep.subr.mxu1 %v442_v13  ;;  %v591_v23 = vld [vmem:[#allocation2 + $0x4d8] sm:$0xff] }
 0x15a   : > { %2524 = vmatpush1.msra.mxu0 %v656_v17  ;;  %2463 = vmatpush1.msra.mxu1 %v441_v51  ;;  %v1761_v17 = vpop.f32.mrf.mxu1  ;;  %v541_v51 = vld [vmem:[#allocation2 + $0x348] sm:$0xff] }
 0x15b   : > { %2343 = vmatmul.mubr.f32.gmra.mxu0 %v4345_v3  ;;  %2525 = vmatprep.subr.mxu0 %v652_v44  ;;  %v587_v3 = vld [vmem:[#allocation2 + $0x4b8] sm:$0xff] }
 0x15c   : > { %3909 = vmatprep.mubr.msk.f32.mxu1 %vm4084_vm2, %v4083_v22  ;;  %2464 = vmatprep.subr.mxu1 %v437_v52  ;;  %v751_v44 = vld [vmem:[#allocation2 + $0x9d8] sm:$0xff] }
 0x15d   : > { %2526 = vmatpush1.msra.mxu0 %v651_v54  ;;  %3910 = vmatmul.mubr.msk.f32.gmra.mxu1 %vm1436_vm1, %v4364_v39  ;;  %v581_v39 = vld [vmem:[#allocation2 + $0x488] sm:$0xff] }
 0x15e   : > { %2527 = vmatprep.subr.mxu0 %v647_v6  ;;  %2465 = vmatpush1.msra.mxu1 %v436_v55  ;;  %v537_v54 = vld [vmem:[#allocation2 + $0x328] sm:$0xff]  ;;  %v747_v6 = vld [vmem:[#allocation2 + $0x9b8] sm:$0xff] }
 0x15f   : > { %2528 = vmatpush1.msra.mxu0 %v646_v57  ;;  %2466 = vmatprep.subr.mxu1 %v592_v59  ;;  %v536_v59 = vld [vmem:[#allocation2 + $0x320] sm:$0xff] }
 0x160   : > { %2529 = vmatprep.subr.mxu0 %v642_v21  ;;  %2467 = vmatpush2.msra.mxu1 %v591_v23  ;;  %v746_v21 = vld [vmem:[#allocation2 + $0x9b0] sm:$0xff] }
 0x161   : > { %3912 = vmatprep.mubr.msk.f32.mxu1 %vm4084_vm2, %v4083_v22  ;;  %2468 = vmatprep.subr.mxu1 %v587_v3  ;;  %v742_v3 = vld [vmem:[#allocation2 + $0x990] sm:$0xff] }
 0x162   : > { %2530 = vmatpush1.msra.mxu0 %v641_v60  ;;  %3913 = vmatmul.mubr.msk.f32.gmra.mxu1 %vm1436_vm1, %v4333_v18  ;;  %v567_v18 = vld [vmem:[#allocation2 + $0x418] sm:$0xff] }
 0x163   : > { %2531 = vmatprep.subr.mxu0 %v637_v61  ;;  %2469 = vmatpush2.msra.mxu1 %v586_v63  ;;  %v531_v61 = vld [vmem:[#allocation2 + $0x2f8] sm:$0xff]  ;;  %v741_v63 = vld [vmem:[#allocation2 + $0x988] sm:$0xff] }
 0x164   : > { %2532 = vmatpush1.msra.mxu0 %v636_v0  ;;  %2470 = vmatprep.subr.mxu1 %v582_v7  ;;  %v737_v7 = vld [vmem:[#allocation2 + $0x968] sm:$0xff] }
 0x165   : > { %2533 = vmatprep.subr.mxu0 %v632_v10  ;;  %2471 = vmatpush2.msra.mxu1 %v581_v39  ;;  %v526_v39 = vld [vmem:[#allocation2 + $0x2d0] sm:$0xff] }
 0x166   : > { %2534 = vmatpush1.msra.mxu0 %v631_v15  ;;  %2472 = vmatprep.subr.mxu1 %v577_v28  ;;  %v736_v15 = vld [vmem:[#allocation2 + $0x960] sm:$0xff] }
 0x167   : > { %2535 = vmatprep.subr.mxu0 %v627_v19  ;;  %2473 = vmatpush2.msra.mxu1 %v576_v31  ;;  %v522_v31 = vld [vmem:[#allocation2 + $0x2b0] sm:$0xff] }
 0x168   : > { %2536 = vmatpush1.msra.mxu0 %v626_v35  ;;  %2474 = vmatprep.subr.mxu1 %v572_v20  ;;  %v732_v35 = vld [vmem:[#allocation2 + $0x940] sm:$0xff] }
 0x169   : > { %2537 = vmatprep.subr.mxu0 %v622_v24  ;;  %2475 = vmatpush2.msra.mxu1 %v571_v25  ;;  %v521_v25 = vld [vmem:[#allocation2 + $0x2a8] sm:$0xff] }
 0x16a   : > { %2538 = vmatpush1.msra.mxu0 %v621_v26  ;;  %2476 = vmatprep.subr.mxu1 %v567_v18  ;;  %v731_v26 = vld [vmem:[#allocation2 + $0x938] sm:$0xff] }
 0x16b   : > { %2539 = vmatprep.subr.mxu0 %v617_v47  ;;  %2477 = vmatpush2.msra.mxu1 %v566_v27  ;;  %v516_v47 = vld [vmem:[#allocation2 + $0x280] sm:$0xff]  ;;  %v727_v27 = vld [vmem:[#allocation2 + $0x918] sm:$0xff] }
 0x16c   : > { %2540 = vmatpush1.msra.mxu0 %v616_v50  ;;  %2478 = vmatprep.subr.mxu1 %v562_v30 }
 0x16d   : > { %2541 = vmatprep.subr.mxu0 %v612_v53  ;;  %2479 = vmatpush2.msra.mxu1 %v561_v56  ;;  %v4473_v56 = vld [vmem:[%s4191_s18 + $0x8] sm:$0xff] }
 0x16e   : > { %2542 = vmatpush1.msra.mxu0 %v611_v36  ;;  %2480 = vmatprep.subr.mxu1 %v557_v12  ;;  %v832_v36 = vld [vmem:[#allocation2 + $0xc60] sm:$0xff]  ;;  %v722_v12 = vld [vmem:[#allocation2 + $0x8f0] sm:$0xff] }
 0x16f   : > { %2543 = vmatprep.subr.mxu0 %v607_v37  ;;  %2481 = vmatpush2.msra.mxu1 %v556_v38  ;;  %v831_v38 = vld [vmem:[#allocation2 + $0xc58] sm:$0xff] }
 0x170   : > { %2544 = vmatpush1.msra.mxu0 %v606_v1  ;;  %2482 = vmatprep.subr.mxu1 %v552_v42  ;;  %v1676_v4 = vpop.f32.mrf.mxu0  ;;  %v721_v1 = vld [vmem:[#allocation2 + $0x8e8] sm:$0xff] }
 0x171   : > { %2545 = vmatprep.subr.mxu0 %v602_v43  ;;  %2483 = vmatpush2.msra.mxu1 %v551_v46  ;;  %v1677_v13 = vadd.f32 %v1676_v4, %v4418_v16  ;;  %v532_v16 = vld [vmem:[#allocation2 + $0x300] sm:$0xff] }
 0x172   : > { %2546 = vmatpush1.msra.mxu0 %v601_v8  ;;  %2484 = vmatprep.subr.mxu1 %v547_v9  ;;  %v1678_v52 = vpop.f32.mrf.mxu0  ;;  %v717_v8 = vld [vmem:[#allocation2 + $0x8c8] sm:$0xff]  ;;  %v826_v9 = vld [vmem:[#allocation2 + $0xc30] sm:$0xff]  ;;  %v712_v4 = vld [vmem:[#allocation2 + $0x8a0] sm:$0xff] }
 0x173   : > { %2547 = vmatprep.subr.mxu0 %v597_v62  ;;  %2485 = vmatpush2.msra.mxu1 %v546_v5  ;;  %v1679_v55 = vadd.f32 %v1678_v52, %v4421_v34  ;;  %v4461_v57 = vadd.f32 %v1759_v45, %v1677_v13  ;;  %v1765_v23 = vpop.f32.mrf.mxu1  ;;  %v527_v34 = vld [vmem:[#allocation2 + $0x2d8] sm:$0xff]  ;;  %v4480_v45 = vld [vmem:[%s4191_s18] sm:$0xff]  ;;  %v706_v52 = vld [vmem:[#allocation2 + $0x870] sm:$0xff] }
 0x174   : > { %2548 = vmatpush1.msra.mxu0 %v596_v58  ;;  %2486 = vmatprep.subr.mxu1 %v542_v11  ;;  %v4486_v5 = vld [vmem:[%s4191_s18 + $0x40] sm:$0xff]  ;;  %v822_v58 = vld [vmem:[#allocation2 + $0xc10] sm:$0xff]  ;;  %v821_v11 = vld [vmem:[#allocation2 + $0xc08] sm:$0xff] }
 0x175   : > { %2549 = vmatprep.subr.mxu0 %v752_v33  ;;  %2487 = vmatpush2.msra.mxu1 %v541_v51  ;;  %v4463_v60 = vadd.f32 %v1761_v17, %v1679_v55  ;;  %v1767_v28 = vpop.f32.mrf.mxu1  ;;  %v711_v33 = vld [vmem:[#allocation2 + $0x898] sm:$0xff]  ;;  %v817_v17 = vld [vmem:[#allocation2 + $0xbe8] sm:$0xff]  ;;  %v702_v55 = vld [vmem:[#allocation2 + $0x850] sm:$0xff] }
 0x176   : > { %2550 = vmatpush2.msra.mxu0 %v751_v44  ;;  %2488 = vmatprep.subr.mxu1 %v537_v54  ;;  %v4490_v13 = vld [vmem:[%s4191_s18 + $0x38] sm:$0xff]  ;;  %v816_v44 = vld [vmem:[#allocation2 + $0xbe0] sm:$0xff] }
 0x177   : > { %2551 = vmatprep.subr.mxu0 %v747_v6  ;;  %v1682_v0 = vpop.f32.mrf.mxu0  ;;  %2489 = vmatpush2.msra.mxu1 %v536_v59  ;;  %v707_v51 = vld [vmem:[#allocation2 + $0x878] sm:$0xff]  ;;  %v812_v6 = vld [vmem:[#allocation2 + $0xbc0] sm:$0xff] }
 0x178   : > { %2552 = vmatpush2.msra.mxu0 %v746_v21  ;;  %v1683_v10 = vadd.f32 %v1682_v0, %v4427_v29  ;;  %2490 = vmatprep.subr.mxu1 %v532_v16  ;;  %v517_v29 = vld [vmem:[#allocation2 + $0x288] sm:$0xff]  ;;  %v4494_v54 = vld [vmem:[%s4191_s18 + $0x78] sm:$0xff]  ;;  %v802_v0 = vld [vmem:[#allocation2 + $0xb70] sm:$0xff] }
 0x179   : > { %2553 = vmatprep.subr.mxu0 %v742_v3  ;;  %v1684_v19 = vpop.f32.mrf.mxu0  ;;  %2491 = vmatpush2.msra.mxu1 %v531_v61  ;;  %v1771_v50 = vpop.f32.mrf.mxu1  ;;  %v811_v59 = vld [vmem:[#allocation2 + $0xbb8] sm:$0xff]  ;;  %v701_v21 = vld [vmem:[#allocation2 + $0x848] sm:$0xff]  ;;  %v806_v61 = vld [vmem:[#allocation2 + $0xb90] sm:$0xff] }
 0x17a   : > { %2554 = vmatpush2.msra.mxu0 %v741_v63  ;;  %v1685_v20 = vadd.f32 %v1684_v19, %v4432_v32  ;;  %v4467_v24 = vadd.f32 %v1765_v23, %v1683_v10  ;;  %2492 = vmatprep.subr.mxu1 %v527_v34  ;;  %v726_v32 = vld [vmem:[#allocation2 + $0x910] sm:$0xff]  ;;  %v807_v16 = vld [vmem:[#allocation2 + $0xb98] sm:$0xff]  ;;  %v697_v3 = vld [vmem:[#allocation2 + $0x828] sm:$0xff] }
 0x17b   : > { %2555 = vmatprep.subr.mxu0 %v737_v7  ;;  %2493 = vmatpush2.msra.mxu1 %v526_v39  ;;  %v1773_v46 = vpop.f32.mrf.mxu1  ;;  %v4498_v23 = vld [vmem:[%s4191_s18 + $0x70] sm:$0xff]  ;;  %v696_v63 = vld [vmem:[#allocation2 + $0x820] sm:$0xff]  ;;  %v801_v7 = vld [vmem:[#allocation2 + $0xb68] sm:$0xff] }
 0x17c   : > { %2556 = vmatpush2.msra.mxu0 %v736_v15  ;;  %v4469_v18 = vadd.f32 %v1767_v28, %v1685_v20  ;;  %2494 = vmatprep.subr.mxu1 %v522_v31  ;;  %v692_v34 = vld [vmem:[#allocation2 + $0x800] sm:$0xff]  ;;  %v691_v10 = vld [vmem:[#allocation2 + $0x7f8] sm:$0xff]  ;;  %v797_v39 = vld [vmem:[#allocation2 + $0xb48] sm:$0xff] }
 0x17d   : > { %2557 = vmatprep.subr.mxu0 %v732_v35  ;;  %v1688_v30 = vpop.f32.mrf.mxu0  ;;  %2495 = vmatpush2.msra.mxu1 %v521_v25  ;;  %v687_v15 = vld [vmem:[#allocation2 + $0x7d8] sm:$0xff]  ;;  %v796_v28 = vld [vmem:[#allocation2 + $0xb40] sm:$0xff]  ;;  %v686_v19 = vld [vmem:[#allocation2 + $0x7d0] sm:$0xff] }
 0x17e   : > { %2558 = vmatpush2.msra.mxu0 %v731_v26  ;;  %v1689_v53 = vadd.f32 %v1688_v30, %v4437_v2  ;;  %2496 = vmatprep.subr.mxu1 %v517_v29  ;;  %v827_v2 = vld [vmem:[#allocation2 + $0xc38] sm:$0xff]  ;;  %v792_v31 = vld [vmem:[#allocation2 + $0xb20] sm:$0xff]  ;;  %v682_v35 = vld [vmem:[#allocation2 + $0x7b0] sm:$0xff] }
 0x17f   : > { %2498 = vmatprep.mubr.f32.mxu1 %v4473_v56  ;;  %v1690_v37 = vpop.f32.mrf.mxu0  ;;  %2497 = vmatpush2.msra.mxu1 %v516_v47  ;;  %v791_v20 = vld [vmem:[#allocation2 + $0xb18] sm:$0xff]  ;;  %v681_v25 = vld [vmem:[#allocation2 + $0x7a8] sm:$0xff]  ;;  %v786_v47 = vld [vmem:[#allocation2 + $0xaf0] sm:$0xff] }
 0x180   : > { %2559 = vmatprep.subr.mxu0 %v727_v27  ;;  %v1691_v42 = vadd.f32 %v1690_v37, %v4441_v14  ;;  %v4477_v43 = vadd.f32 %v1771_v50, %v1689_v53  ;;  %2499 = vmatmul.mubr.f32.vlgmr.msra.gmra.mxu1 %v4480_v45  ;;  %v716_v14 = vld [vmem:[#allocation2 + $0x8c0] sm:$0xff]  ;;  %v787_v26 = vld [vmem:[#allocation2 + $0xaf8] sm:$0xff]  ;;  %v677_v29 = vld [vmem:[#allocation2 + $0x788] sm:$0xff] }
 0x181   : > { %2560 = vmatpush2.msra.mxu0 %v726_v32  ;;  %2600 = vmatprep.subr.mxu1 %v832_v36  ;;  %v676_v27 = vld [vmem:[#allocation2 + $0x780] sm:$0xff]  ;;  %v782_v50 = vld [vmem:[#allocation2 + $0xad0] sm:$0xff]  ;;  %v781_v30 = vld [vmem:[#allocation2 + $0xac8] sm:$0xff] }
 0x182   : > { %2561 = vmatprep.subr.mxu0 %v722_v12  ;;  %v4483_v62 = vadd.f32 %v1773_v46, %v1691_v42  ;;  %2601 = vmatpush1.msra.mxu1 %v831_v38  ;;  %v777_v32 = vld [vmem:[#allocation2 + $0xaa8] sm:$0xff]  ;;  %v4502_v53 = vld [vmem:[%s4191_s18 + $0x18] sm:$0xff]  ;;  %v776_v36 = vld [vmem:[#allocation2 + $0xaa0] sm:$0xff] }
 0x183   : > { %2562 = vmatpush2.msra.mxu0 %v721_v1  ;;  %2602 = vmatprep.subr.mxu1 %v827_v2  ;;  %v932_v12 = vld [vmem:[#allocation2 + $0xf80] sm:$0xff]  ;;  %v4506_v37 = vld [vmem:[%s4191_s18 + $0x10] sm:$0xff]  ;;  %v931_v1 = vld [vmem:[#allocation2 + $0xf78] sm:$0xff] }
 0x184   : > { %2504 = vmatprep.mubr.f32.mxu1 %v4486_v5  ;;  %2563 = vmatprep.subr.mxu0 %v717_v8  ;;  %v772_v38 = vld [vmem:[#allocation2 + $0xa80] sm:$0xff]  ;;  %v3977_v42 = vld [vmem:[%s4191_s18 + $0x50] sm:$0xff]  ;;  %v771_v2 = vld [vmem:[#allocation2 + $0xa78] sm:$0xff] }
 0x185   : > { %2603 = vmatpush1.msra.mxu1 %v826_v9  ;;  %2564 = vmatpush2.msra.mxu0 %v716_v14  ;;  %v767_v46 = vld [vmem:[#allocation2 + $0xa58] sm:$0xff]  ;;  %v766_v9 = vld [vmem:[#allocation2 + $0xa50] sm:$0xff] }
 0x186   : > { %2505 = vmatmul.mubr.f32.gmra.mxu1 %v4490_v13  ;;  %2604 = vmatprep.subr.mxu1 %v822_v58  ;;  %v927_v8 = vld [vmem:[#allocation2 + $0xf58] sm:$0xff]  ;;  %v926_v14 = vld [vmem:[#allocation2 + $0xf50] sm:$0xff]  ;;  %v3978_v58 = vld [vmem:[%s4191_s18 + $0x48] sm:$0xff] }
 0x187   : > { %2565 = vmatprep.subr.mxu0 %v712_v4  ;;  %2605 = vmatpush1.msra.mxu1 %v821_v11  ;;  %v762_v4 = vld [vmem:[#allocation2 + $0xa30] sm:$0xff] }
 0x188   : > { %2566 = vmatpush2.msra.mxu0 %v711_v33  ;;  %2606 = vmatprep.subr.mxu1 %v817_v17  ;;  %v922_v11 = vld [vmem:[#allocation2 + $0xf30] sm:$0xff]  ;;  %v761_v33 = vld [vmem:[#allocation2 + $0xa28] sm:$0xff] }
 0x189   : > { %2510 = vmatprep.mubr.f32.mxu1 %v4494_v54  ;;  %2567 = vmatprep.subr.mxu0 %v707_v51  ;;  %v921_v17 = vld [vmem:[#allocation2 + $0xf28] sm:$0xff] }
 0x18a   : > { %2607 = vmatpush1.msra.mxu1 %v816_v44  ;;  %2568 = vmatpush2.msra.mxu0 %v706_v52  ;;  %v3979_v51 = vld [vmem:[%s4191_s18 + $0x88] sm:$0xff] }
 0x18b   : > { %2511 = vmatmul.mubr.f32.gmra.mxu1 %v4498_v23  ;;  %2608 = vmatprep.subr.mxu1 %v812_v6  ;;  %v757_v44 = vld [vmem:[#allocation2 + $0xa08] sm:$0xff]  ;;  %v3980_v6 = vld [vmem:[%s4191_s18 + $0x80] sm:$0xff] }
 0x18c   : > { %2569 = vmatprep.subr.mxu0 %v702_v55  ;;  %2609 = vmatpush1.msra.mxu1 %v811_v59  ;;  %v917_v52 = vld [vmem:[#allocation2 + $0xf08] sm:$0xff]  ;;  %v756_v55 = vld [vmem:[#allocation2 + $0xa00] sm:$0xff] }
 0x18d   : > { %2570 = vmatpush2.msra.mxu0 %v701_v21  ;;  %2610 = vmatprep.subr.mxu1 %v807_v16  ;;  %v916_v59 = vld [vmem:[#allocation2 + $0xf00] sm:$0xff]  ;;  %v514_v16 = vld [vmem:[#allocation2 + $0x270] sm:$0xff] }
 0x18e   : > { %2571 = vmatprep.subr.mxu0 %v697_v3  ;;  %2611 = vmatpush1.msra.mxu1 %v806_v61  ;;  %v912_v21 = vld [vmem:[#allocation2 + $0xee0] sm:$0xff]  ;;  %v911_v3 = vld [vmem:[#allocation2 + $0xed8] sm:$0xff] }
 0x18f   : > { %2572 = vmatpush2.msra.mxu0 %v696_v63  ;;  %2612 = vmatprep.subr.mxu1 %v802_v0  ;;  %v907_v61 = vld [vmem:[#allocation2 + $0xeb8] sm:$0xff]  ;;  %v513_v63 = vld [vmem:[#allocation2 + $0x268] sm:$0xff]  ;;  %v906_v0 = vld [vmem:[#allocation2 + $0xeb0] sm:$0xff] }
 0x190   : > { %2573 = vmatprep.subr.mxu0 %v692_v34  ;;  %2613 = vmatpush1.msra.mxu1 %v801_v7  ;;  %v509_v34 = vld [vmem:[#allocation2 + $0x248] sm:$0xff]  ;;  %v902_v7 = vld [vmem:[#allocation2 + $0xe90] sm:$0xff] }
 0x191   : > { %2574 = vmatpush2.msra.mxu0 %v691_v10  ;;  %2614 = vmatprep.subr.mxu1 %v797_v39  ;;  %v3981_v10 = vld [vmem:[%s4191_s18 + $0x30] sm:$0xff]  ;;  %v508_v39 = vld [vmem:[#allocation2 + $0x240] sm:$0xff] }
 0x192   : > { %2575 = vmatprep.subr.mxu0 %v687_v15  ;;  %2615 = vmatpush1.msra.mxu1 %v796_v28  ;;  %v901_v15 = vld [vmem:[#allocation2 + $0xe88] sm:$0xff]  ;;  %v504_v28 = vld [vmem:[#allocation2 + $0x220] sm:$0xff] }
 0x193   : > { %2576 = vmatpush2.msra.mxu0 %v686_v19  ;;  %2616 = vmatprep.subr.mxu1 %v792_v31  ;;  %v897_v19 = vld [vmem:[#allocation2 + $0xe68] sm:$0xff]  ;;  %v503_v31 = vld [vmem:[#allocation2 + $0x218] sm:$0xff] }
 0x194   : > { %2577 = vmatprep.subr.mxu0 %v682_v35  ;;  %2617 = vmatpush1.msra.mxu1 %v791_v20  ;;  %v896_v35 = vld [vmem:[#allocation2 + $0xe60] sm:$0xff]  ;;  %v499_v20 = vld [vmem:[#allocation2 + $0x1f8] sm:$0xff] }
 0x195   : > { %2578 = vmatpush2.msra.mxu0 %v681_v25  ;;  %2618 = vmatprep.subr.mxu1 %v787_v26  ;;  %v892_v25 = vld [vmem:[#allocation2 + $0xe40] sm:$0xff]  ;;  %v498_v26 = vld [vmem:[#allocation2 + $0x1f0] sm:$0xff] }
 0x196   : > { %2579 = vmatprep.subr.mxu0 %v677_v29  ;;  %2619 = vmatpush1.msra.mxu1 %v786_v47  ;;  %v891_v29 = vld [vmem:[#allocation2 + $0xe38] sm:$0xff]  ;;  %v494_v47 = vld [vmem:[#allocation2 + $0x1d0] sm:$0xff] }
 0x197   : > { %2580 = vmatpush2.msra.mxu0 %v676_v27  ;;  %2581 = vmatprep.mubr.f32.mxu0 %v4502_v53  ;;  %v887_v27 = vld [vmem:[#allocation2 + $0xe18] sm:$0xff] }
 0x198   : > { %2620 = vmatprep.subr.mxu1 %v782_v50  ;;  %2582 = vmatmul.mubr.f32.vlgmr.msra.gmra.mxu0 %v4506_v37  ;;  %v493_v50 = vld [vmem:[#allocation2 + $0x1c8] sm:$0xff] }
 0x199   : > { %2621 = vmatpush1.msra.mxu1 %v781_v30  ;;  %2587 = vmatprep.mubr.f32.mxu0 %v3977_v42  ;;  %v886_v30 = vld [vmem:[#allocation2 + $0xe10] sm:$0xff]  ;;  %v877_v42 = vld [vmem:[#allocation2 + $0xdc8] sm:$0xff] }
 0x19a   : > { %2622 = vmatprep.subr.mxu1 %v777_v32  ;;  %2707 = vmatprep.subr.mxu0 %v932_v12  ;;  %v489_v32 = vld [vmem:[#allocation2 + $0x1a8] sm:$0xff]  ;;  %v488_v12 = vld [vmem:[#allocation2 + $0x1a0] sm:$0xff] }
 0x19b   : > { %2623 = vmatpush1.msra.mxu1 %v776_v36  ;;  %2708 = vmatpush1.msra.mxu0 %v931_v1  ;;  %v882_v36 = vld [vmem:[#allocation2 + $0xdf0] sm:$0xff]  ;;  %v484_v1 = vld [vmem:[#allocation2 + $0x180] sm:$0xff] }
 0x19c   : > { %2624 = vmatprep.subr.mxu1 %v772_v38  ;;  %2588 = vmatmul.mubr.f32.gmra.mxu0 %v3978_v58  ;;  %v881_v38 = vld [vmem:[#allocation2 + $0xde8] sm:$0xff]  ;;  %v478_v58 = vld [vmem:[#allocation2 + $0x150] sm:$0xff] }
 0x19d   : > { %2625 = vmatpush1.msra.mxu1 %v771_v2  ;;  %2709 = vmatprep.subr.mxu0 %v927_v8  ;;  %v483_v2 = vld [vmem:[#allocation2 + $0x178] sm:$0xff] }
 0x19e   : > { %2626 = vmatprep.subr.mxu1 %v767_v46  ;;  %2710 = vmatpush1.msra.mxu0 %v926_v14  ;;  %v876_v46 = vld [vmem:[#allocation2 + $0xdc0] sm:$0xff]  ;;  %v479_v8 = vld [vmem:[#allocation2 + $0x158] sm:$0xff]  ;;  %v1842_v14 = vpop.f32.mrf.mxu1 }
 0x19f   : > { %2627 = vmatpush1.msra.mxu1 %v766_v9  ;;  %2593 = vmatprep.mubr.f32.mxu0 %v3979_v51  ;;  %v872_v9 = vld [vmem:[#allocation2 + $0xda0] sm:$0xff]  ;;  %v866_v51 = vld [vmem:[#allocation2 + $0xd70] sm:$0xff] }
 0x1a0   : > { %2628 = vmatprep.subr.mxu1 %v762_v4  ;;  %2711 = vmatprep.subr.mxu0 %v922_v11  ;;  %v871_v4 = vld [vmem:[#allocation2 + $0xd98] sm:$0xff]  ;;  %v474_v11 = vld [vmem:[#allocation2 + $0x130] sm:$0xff] }
 0x1a1   : > { %2594 = vmatmul.mubr.f32.gmra.mxu0 %v3980_v6  ;;  %2629 = vmatpush1.msra.mxu1 %v761_v33  ;;  %v867_v33 = vld [vmem:[#allocation2 + $0xd78] sm:$0xff]  ;;  %v1844_v6 = vpop.f32.mrf.mxu1 }
 0x1a2   : > { %2712 = vmatpush1.msra.mxu0 %v921_v17  ;;  %2630 = vmatprep.subr.mxu1 %v757_v44  ;;  %v473_v17 = vld [vmem:[#allocation2 + $0x128] sm:$0xff] }
 0x1a3   : > { %2713 = vmatprep.subr.mxu0 %v917_v52  ;;  %2631 = vmatpush1.msra.mxu1 %v756_v55  ;;  %v469_v44 = vld [vmem:[#allocation2 + $0x108] sm:$0xff]  ;;  %v862_v52 = vld [vmem:[#allocation2 + $0xd50] sm:$0xff]  ;;  %v468_v55 = vld [vmem:[#allocation2 + $0x100] sm:$0xff] }
 0x1a4   : > { %2714 = vmatpush1.msra.mxu0 %v916_v59  ;;  %2632 = vmatprep.subr.mxu1 %v912_v21  ;;  %v861_v59 = vld [vmem:[#allocation2 + $0xd48] sm:$0xff] }
 0x1a5   : > { %2747 = vmatprep.mubr.f32.mxu0 %v4083_v22  ;;  %2766 = vmatprep.subr.mxu0 %v514_v16  ;;  %v464_v16 = vld [vmem:[#allocation2 + $0xe0] sm:$0xff] }
 0x1a6   : > { %2633 = vmatpush2.msra.mxu1 %v911_v3  ;;  %3627 = vmatmul.mubr.msk.f32.vlgmr.msra.gmra.mxu0 %vm1436_vm1, %v3981_v10  ;;  %v857_v3 = vld [vmem:[#allocation2 + $0xd28] sm:$0xff]  ;;  %v459_v10 = vld [vmem:[#allocation2 + $0xb8] sm:$0xff] }
 0x1a7   : > { %2634 = vmatprep.subr.mxu1 %v907_v61  ;;  %2767 = vmatpush1.msra.mxu0 %v513_v63  ;;  %v463_v63 = vld [vmem:[#allocation2 + $0xd8] sm:$0xff] }
 0x1a8   : > { %2635 = vmatpush2.msra.mxu1 %v906_v0  ;;  %2768 = vmatprep.subr.mxu0 %v509_v34  ;;  %v856_v0 = vld [vmem:[#allocation2 + $0xd20] sm:$0xff] }
 0x1a9   : > { %2636 = vmatprep.subr.mxu1 %v902_v7  ;;  %2769 = vmatpush1.msra.mxu0 %v508_v39  ;;  %v852_v39 = vld [vmem:[#allocation2 + $0xd00] sm:$0xff] }
 0x1aa   : > { %2637 = vmatpush2.msra.mxu1 %v901_v15  ;;  %2770 = vmatprep.subr.mxu0 %v504_v28  ;;  %v458_v28 = vld [vmem:[#allocation2 + $0xb0] sm:$0xff] }
 0x1ab   : > { %2638 = vmatprep.subr.mxu1 %v897_v19  ;;  %2771 = vmatpush1.msra.mxu0 %v503_v31  ;;  %v851_v19 = vld [vmem:[#allocation2 + $0xcf8] sm:$0xff] }
 0x1ac   : > { %2639 = vmatpush2.msra.mxu1 %v896_v35  ;;  %2772 = vmatprep.subr.mxu0 %v499_v20  ;;  %v454_v20 = vld [vmem:[#allocation2 + $0x90] sm:$0xff] }
 0x1ad   : > { %2640 = vmatprep.subr.mxu1 %v892_v25  ;;  %2773 = vmatpush1.msra.mxu0 %v498_v26  ;;  %v847_v25 = vld [vmem:[#allocation2 + $0xcd8] sm:$0xff] }
 0x1ae   : > { %2641 = vmatpush2.msra.mxu1 %v891_v29  ;;  %2774 = vmatprep.subr.mxu0 %v494_v47  ;;  %v453_v29 = vld [vmem:[#allocation2 + $0x88] sm:$0xff]  ;;  %v846_v47 = vld [vmem:[#allocation2 + $0xcd0] sm:$0xff] }
 0x1af   : > { %2642 = vmatprep.subr.mxu1 %v887_v27  ;;  %2775 = vmatpush1.msra.mxu0 %v493_v50  ;;  %v449_v50 = vld [vmem:[#allocation2 + $0x68] sm:$0xff] }
 0x1b0   : > { %2643 = vmatpush2.msra.mxu1 %v886_v30  ;;  %2776 = vmatprep.subr.mxu0 %v489_v32  ;;  %v842_v30 = vld [vmem:[#allocation2 + $0xcb0] sm:$0xff] }
 0x1b1   : > { %2644 = vmatprep.subr.mxu1 %v882_v36  ;;  %2777 = vmatpush1.msra.mxu0 %v488_v12  ;;  %v448_v12 = vld [vmem:[#allocation2 + $0x60] sm:$0xff] }
 0x1b2   : > { %2645 = vmatpush2.msra.mxu1 %v881_v38  ;;  %2778 = vmatprep.subr.mxu0 %v484_v1  ;;  %v841_v38 = vld [vmem:[#allocation2 + $0xca8] sm:$0xff]  ;;  %v444_v1 = vld [vmem:[#allocation2 + $0x40] sm:$0xff] }
 0x1b3   : > { %2646 = vmatprep.subr.mxu1 %v877_v42  ;;  %2779 = vmatpush1.msra.mxu0 %v483_v2  ;;  %v837_v42 = vld [vmem:[#allocation2 + $0xc88] sm:$0xff]  ;;  %v443_v2 = vld [vmem:[#allocation2 + $0x38] sm:$0xff] }
 0x1b4   : > { %2647 = vmatpush2.msra.mxu1 %v876_v46  ;;  %2780 = vmatprep.subr.mxu0 %v479_v8  ;;  %v836_v46 = vld [vmem:[#allocation2 + $0xc80] sm:$0xff] }
 0x1b5   : > { %2648 = vmatprep.subr.mxu1 %v872_v9  ;;  %2781 = vmatpush1.msra.mxu0 %v478_v58 }
 0x1b6   : > { %2649 = vmatpush2.msra.mxu1 %v871_v4  ;;  %2782 = vmatprep.subr.mxu0 %v474_v11  ;;  %v1925_v21 = vpop.f32.mrf.mxu0  ;;  %v438_v4 = vld [vmem:[#allocation2 + $0x10] sm:$0xff] }
 0x1b7   : > { %2650 = vmatprep.subr.mxu1 %v867_v33  ;;  %2783 = vmatpush1.msra.mxu0 %v473_v17  ;;  %v4516_v61 = vadd.f32 %v1925_v21, %v1842_v14  ;;  %v439_v14 = vld [vmem:[#allocation2 + $0x18] sm:$0xff]  ;;  %v594_v33 = vld [vmem:[#allocation2 + $0x4f0] sm:$0xff]  ;;  %v589_v21 = vld [vmem:[#allocation2 + $0x4c8] sm:$0xff] }
 0x1b8   : > { %2651 = vmatpush2.msra.mxu1 %v866_v51  ;;  %2784 = vmatprep.subr.mxu0 %v469_v44  ;;  %v1848_v34 = vpop.f32.mrf.mxu1  ;;  %v1927_v7 = vpop.f32.mrf.mxu0  ;;  %v674_v17 = vld [vmem:[#allocation2 + $0x770] sm:$0xff]  ;;  %v4529_v44 = vld [vmem:[%s4191_s18 + $0x28] sm:$0xff] }
 0x1b9   : > { %2652 = vmatprep.subr.mxu1 %v862_v52  ;;  %2785 = vmatpush1.msra.mxu0 %v468_v55  ;;  %v4518_v15 = vadd.f32 %v1927_v7, %v1844_v6  ;;  %v593_v52 = vld [vmem:[#allocation2 + $0x4e8] sm:$0xff]  ;;  %v668_v7 = vld [vmem:[#allocation2 + $0x740] sm:$0xff] }
 0x1ba   : > { %2653 = vmatpush2.msra.mxu1 %v861_v59  ;;  %2786 = vmatprep.subr.mxu0 %v464_v16  ;;  %v1850_v31 = vpop.f32.mrf.mxu1  ;;  %v673_v6 = vld [vmem:[#allocation2 + $0x768] sm:$0xff]  ;;  %v4533_v59 = vld [vmem:[%s4191_s18 + $0x20] sm:$0xff] }
 0x1bb   : > { %2654 = vmatprep.subr.mxu1 %v857_v3  ;;  %v1931_v35 = vpop.f32.mrf.mxu0  ;;  %2787 = vmatpush1.msra.mxu0 %v463_v63  ;;  %v669_v16 = vld [vmem:[#allocation2 + $0x748] sm:$0xff]  ;;  %v588_v63 = vld [vmem:[#allocation2 + $0x4c0] sm:$0xff] }
 0x1bc   : > { %2655 = vmatpush2.msra.mxu1 %v856_v0  ;;  %v4520_v26 = vadd.f32 %v1931_v35, %v1848_v34  ;;  %2788 = vmatprep.subr.mxu0 %v459_v10  ;;  %v584_v10 = vld [vmem:[#allocation2 + $0x4a0] sm:$0xff]  ;;  %v583_v35 = vld [vmem:[#allocation2 + $0x498] sm:$0xff] }
 0x1bd   : > { %2656 = vmatprep.subr.mxu1 %v852_v39  ;;  %v1933_v27 = vpop.f32.mrf.mxu0  ;;  %2789 = vmatpush1.msra.mxu0 %v458_v28 }
 0x1be   : > { %2657 = vmatpush2.msra.mxu1 %v851_v19  ;;  %v1854_v32 = vpop.f32.mrf.mxu1  ;;  %v4522_v36 = vadd.f32 %v1933_v27, %v1850_v31  ;;  %2790 = vmatprep.subr.mxu0 %v454_v20  ;;  %v664_v19 = vld [vmem:[#allocation2 + $0x720] sm:$0xff] }
 0x1bf   : > { %2658 = vmatprep.subr.mxu1 %v847_v25  ;;  %2791 = vmatpush1.msra.mxu0 %v453_v29  ;;  %v663_v25 = vld [vmem:[#allocation2 + $0x718] sm:$0xff] }
 0x1c0   : > { %2659 = vmatpush2.msra.mxu1 %v846_v47  ;;  %2792 = vmatprep.subr.mxu0 %v449_v50  ;;  %v1856_v8 = vpop.f32.mrf.mxu1  ;;  %v4547_v29 = vld [vmem:[%s4191_s18 + $0x58] sm:$0xff]  ;;  %v578_v50 = vld [vmem:[#allocation2 + $0x470] sm:$0xff] }
 0x1c1   : > { %2660 = vmatprep.subr.mxu1 %v842_v30  ;;  %v1937_v9 = vpop.f32.mrf.mxu0  ;;  %2793 = vmatpush1.msra.mxu0 %v448_v12  ;;  %v659_v47 = vld [vmem:[#allocation2 + $0x6f8] sm:$0xff]  ;;  %v658_v12 = vld [vmem:[#allocation2 + $0x6f0] sm:$0xff] }
 0x1c2   : > { %2661 = vmatpush2.msra.mxu1 %v841_v38  ;;  %v4524_v58 = vadd.f32 %v1937_v9, %v1854_v32  ;;  %2794 = vmatprep.subr.mxu0 %v444_v1  ;;  %v4553_v32 = vld [vmem:[%s4191_s18 + $0x68] sm:$0xff]  ;;  %v574_v38 = vld [vmem:[#allocation2 + $0x450] sm:$0xff]  ;;  %v4561_v9 = vld [vmem:[%s4191_s18 + $0x98] sm:$0xff] }
 0x1c3   : > { %2662 = vmatprep.subr.mxu1 %v837_v42  ;;  %v1939_v11 = vpop.f32.mrf.mxu0  ;;  %2795 = vmatpush1.msra.mxu0 %v443_v2  ;;  %v654_v2 = vld [vmem:[#allocation2 + $0x6d0] sm:$0xff] }
 0x1c4   : > { %2663 = vmatpush2.msra.mxu1 %v836_v46  ;;  %v4526_v51 = vadd.f32 %v1939_v11, %v1856_v8  ;;  %2796 = vmatprep.subr.mxu0 %v439_v14 }
 0x1c5   : > { %2664 = vmatprep.mubr.f32.mxu1 %v4529_v44  ;;  %v2008_v55 = vpop.f32.mrf.mxu1  ;;  %2797 = vmatpush1.msra.mxu0 %v438_v4  ;;  %v653_v4 = vld [vmem:[#allocation2 + $0x6c8] sm:$0xff] }
 0x1c6   : > { %2665 = vmatmul.mubr.f32.vlgmr.msra.gmra.mxu1 %v4533_v59  ;;  %v2009_v3 = vadd.f32 %v2008_v55, %v4516_v61  ;;  %2798 = vmatprep.subr.mxu0 %v594_v33  ;;  %v4541_v61 = vld [vmem:[%s4191_s18 + $0x60] sm:$0xff]  ;;  %v4567_v33 = vld [vmem:[%s4191_s18 + $0x90] sm:$0xff] }
 0x1c7   : > { %2849 = vmatprep.subr.mxu1 %v674_v17  ;;  %v2010_v0 = vpop.f32.mrf.mxu1  ;;  %v2091_v34 = vpop.f32.mrf.mxu0  ;;  %2799 = vmatpush2.msra.mxu0 %v593_v52  ;;  %v649_v17 = vld [vmem:[#allocation2 + $0x6a8] sm:$0xff]  ;;  %v648_v55 = vld [vmem:[#allocation2 + $0x6a0] sm:$0xff] }
 0x1c8   : > { %2850 = vmatpush1.msra.mxu1 %v673_v6  ;;  %v2011_v39 = vadd.f32 %v2010_v0, %v4518_v15  ;;  %v4538_v28 = vadd.f32 %v2091_v34, %v2009_v3  ;;  %2800 = vmatprep.subr.mxu0 %v589_v21  ;;  %v579_v15 = vld [vmem:[#allocation2 + $0x478] sm:$0xff]  ;;  %v568_v6 = vld [vmem:[#allocation2 + $0x420] sm:$0xff] }
 0x1c9   : > { %2851 = vmatprep.subr.mxu1 %v669_v16  ;;  %v2093_v31 = vpop.f32.mrf.mxu0  ;;  %2670 = vmatprep.mubr.f32.mxu1 %v4541_v61  ;;  %v4573_v16 = vld [vmem:[%s4191_s18 + $0xa0] sm:$0xff] }
 0x1ca   : > { %2801 = vmatpush2.msra.mxu0 %v588_v63  ;;  %v4544_v20 = vadd.f32 %v2093_v31, %v2011_v39  ;;  %2852 = vmatpush1.msra.mxu1 %v668_v7  ;;  %v564_v3 = vld [vmem:[#allocation2 + $0x400] sm:$0xff]  ;;  %v563_v7 = vld [vmem:[#allocation2 + $0x3f8] sm:$0xff] }
 0x1cb   : > { %2802 = vmatprep.subr.mxu0 %v584_v10  ;;  %2671 = vmatmul.mubr.f32.gmra.mxu1 %v4547_v29  ;;  %v2014_v27 = vpop.f32.mrf.mxu1  ;;  %v644_v63 = vld [vmem:[#allocation2 + $0x680] sm:$0xff]  ;;  %v643_v10 = vld [vmem:[#allocation2 + $0x678] sm:$0xff] }
 0x1cc   : > { %2853 = vmatprep.subr.mxu1 %v664_v19  ;;  %2753 = vmatprep.mubr.f32.mxu0 %v4083_v22  ;;  %v2015_v30 = vadd.f32 %v2014_v27, %v4520_v26  ;;  %v573_v26 = vld [vmem:[#allocation2 + $0x448] sm:$0xff]  ;;  %v639_v31 = vld [vmem:[#allocation2 + $0x658] sm:$0xff]  ;;  %v554_v27 = vld [vmem:[#allocation2 + $0x3b0] sm:$0xff] }
 0x1cd   : > { %2803 = vmatpush2.msra.mxu0 %v583_v35  ;;  %2854 = vmatpush1.msra.mxu1 %v663_v25  ;;  %v2016_v1 = vpop.f32.mrf.mxu1  ;;  %v558_v25 = vld [vmem:[#allocation2 + $0x3d0] sm:$0xff] }
 0x1ce   : > { %3628 = vmatmul.mubr.msk.f32.gmra.mxu0 %vm1436_vm1, %v4553_v32  ;;  %v2097_v42 = vpop.f32.mrf.mxu0  ;;  %2804 = vmatprep.subr.mxu0 %v579_v15  ;;  %v2017_v46 = vadd.f32 %v2016_v1, %v4522_v36  ;;  %v569_v36 = vld [vmem:[#allocation2 + $0x428] sm:$0xff]  ;;  %v638_v15 = vld [vmem:[#allocation2 + $0x650] sm:$0xff]  ;;  %v548_v1 = vld [vmem:[#allocation2 + $0x380] sm:$0xff] }
 0x1cf   : > { %2855 = vmatprep.subr.mxu1 %v659_v47  ;;  %v4558_v8 = vadd.f32 %v2097_v42, %v2015_v30  ;;  %2676 = vmatprep.mubr.f32.mxu1 %v4561_v9  ;;  %v633_v30 = vld [vmem:[#allocation2 + $0x628] sm:$0xff]  ;;  %v628_v42 = vld [vmem:[#allocation2 + $0x600] sm:$0xff] }
 0x1d0   : > { %2805 = vmatpush2.msra.mxu0 %v578_v50  ;;  %v2099_v14 = vpop.f32.mrf.mxu0  ;;  %2856 = vmatpush1.msra.mxu1 %v658_v12  ;;  %v634_v50 = vld [vmem:[#allocation2 + $0x630] sm:$0xff]  ;;  %v549_v12 = vld [vmem:[#allocation2 + $0x388] sm:$0xff] }
 0x1d1   : > { %2806 = vmatprep.subr.mxu0 %v574_v38  ;;  %v4564_v11 = vadd.f32 %v2099_v14, %v2017_v46  ;;  %2677 = vmatmul.mubr.f32.gmra.mxu1 %v4567_v33  ;;  %v2020_v52 = vpop.f32.mrf.mxu1  ;;  %v629_v38 = vld [vmem:[#allocation2 + $0x608] sm:$0xff]  ;;  %v624_v46 = vld [vmem:[#allocation2 + $0x5e0] sm:$0xff]  ;;  %v623_v14 = vld [vmem:[#allocation2 + $0x5d8] sm:$0xff] }
 0x1d2   : > { %2857 = vmatprep.subr.mxu1 %v654_v2  ;;  %2759 = vmatprep.mubr.f32.mxu0 %v4083_v22  ;;  %v2021_v21 = vadd.f32 %v2020_v52, %v4524_v58  ;;  %v559_v58 = vld [vmem:[#allocation2 + $0x3d8] sm:$0xff]  ;;  %v544_v2 = vld [vmem:[#allocation2 + $0x360] sm:$0xff]  ;;  %v618_v52 = vld [vmem:[#allocation2 + $0x5b0] sm:$0xff] }
 0x1d3   : > { %2807 = vmatpush2.msra.mxu0 %v573_v26  ;;  %2858 = vmatpush1.msra.mxu1 %v653_v4  ;;  %v2022_v0 = vpop.f32.mrf.mxu1  ;;  %v543_v26 = vld [vmem:[#allocation2 + $0x358] sm:$0xff] }
 0x1d4   : > { %3629 = vmatmul.mubr.msk.f32.gmra.mxu0 %vm1436_vm1, %v4573_v16  ;;  %v2103_v34 = vpop.f32.mrf.mxu0  ;;  %2808 = vmatprep.subr.mxu0 %v569_v36  ;;  %v2023_v39 = vadd.f32 %v2022_v0, %v4526_v51  ;;  %v553_v51 = vld [vmem:[#allocation2 + $0x3a8] sm:$0xff]  ;;  %v539_v4 = vld [vmem:[#allocation2 + $0x338] sm:$0xff] }
 0x1d5   : > { %2859 = vmatprep.subr.mxu1 %v649_v17  ;;  %v4578_v19 = vadd.f32 %v2103_v34, %v2021_v21  ;;  %2809 = vmatpush2.msra.mxu0 %v568_v6  ;;  %v619_v36 = vld [vmem:[#allocation2 + $0x5b8] sm:$0xff]  ;;  %v538_v17 = vld [vmem:[#allocation2 + $0x330] sm:$0xff]  ;;  %v533_v21 = vld [vmem:[#allocation2 + $0x308] sm:$0xff] }
 0x1d6   : > { %2860 = vmatpush1.msra.mxu1 %v648_v55  ;;  %v2105_v35 = vpop.f32.mrf.mxu0  ;;  %2810 = vmatprep.subr.mxu0 %v564_v3  ;;  %v534_v6 = vld [vmem:[#allocation2 + $0x310] sm:$0xff]  ;;  %v613_v3 = vld [vmem:[#allocation2 + $0x588] sm:$0xff]  ;;  %v528_v34 = vld [vmem:[#allocation2 + $0x2e0] sm:$0xff] }
 0x1d7   : > { %2861 = vmatprep.subr.mxu1 %v644_v63  ;;  %v4580_v47 = vadd.f32 %v2105_v35, %v2023_v39  ;;  %2811 = vmatpush2.msra.mxu0 %v563_v7  ;;  %v614_v55 = vld [vmem:[#allocation2 + $0x590] sm:$0xff]  ;;  %v529_v63 = vld [vmem:[#allocation2 + $0x2e8] sm:$0xff]  ;;  %v608_v7 = vld [vmem:[#allocation2 + $0x560] sm:$0xff] }
 0x1d8   : > { %2862 = vmatpush1.msra.mxu1 %v643_v10  ;;  %2812 = vmatprep.subr.mxu0 %v559_v58  ;;  %v609_v0 = vld [vmem:[#allocation2 + $0x568] sm:$0xff]  ;;  %v524_v10 = vld [vmem:[#allocation2 + $0x2c0] sm:$0xff]  ;;  %v523_v58 = vld [vmem:[#allocation2 + $0x2b8] sm:$0xff] }
 0x1d9   : > { %2863 = vmatprep.subr.mxu1 %v639_v31  ;;  %2813 = vmatpush2.msra.mxu0 %v558_v25  ;;  %v604_v39 = vld [vmem:[#allocation2 + $0x540] sm:$0xff]  ;;  %v603_v31 = vld [vmem:[#allocation2 + $0x538] sm:$0xff] }
 0x1da   : > { %2864 = vmatpush1.msra.mxu1 %v638_v15  ;;  %2814 = vmatprep.subr.mxu0 %v554_v27  ;;  %v519_v35 = vld [vmem:[#allocation2 + $0x298] sm:$0xff]  ;;  %v518_v15 = vld [vmem:[#allocation2 + $0x290] sm:$0xff] }
 0x1db   : > { %2865 = vmatprep.subr.mxu1 %v634_v50  ;;  %2815 = vmatpush2.msra.mxu0 %v553_v51  ;;  %v599_v25 = vld [vmem:[#allocation2 + $0x518] sm:$0xff]  ;;  %v598_v27 = vld [vmem:[#allocation2 + $0x510] sm:$0xff] }
 0x1dc   : > { %2866 = vmatpush1.msra.mxu1 %v633_v30  ;;  %2816 = vmatprep.subr.mxu0 %v549_v12  ;;  %v754_v50 = vld [vmem:[#allocation2 + $0x9f0] sm:$0xff]  ;;  %v753_v30 = vld [vmem:[#allocation2 + $0x9e8] sm:$0xff] }
 0x1dd   : > { %2867 = vmatprep.subr.mxu1 %v629_v38  ;;  %2817 = vmatpush2.msra.mxu0 %v548_v1  ;;  %v834_v51 = vld [vmem:[#allocation2 + $0xc70] sm:$0xff]  ;;  %v833_v12 = vld [vmem:[#allocation2 + $0xc68] sm:$0xff] }
 0x1de   : > { %2868 = vmatpush1.msra.mxu1 %v628_v42  ;;  %2818 = vmatprep.subr.mxu0 %v544_v2  ;;  %v749_v38 = vld [vmem:[#allocation2 + $0x9c8] sm:$0xff]  ;;  %v748_v42 = vld [vmem:[#allocation2 + $0x9c0] sm:$0xff] }
 0x1df   : > { %2869 = vmatprep.subr.mxu1 %v624_v46  ;;  %2819 = vmatpush2.msra.mxu0 %v543_v26  ;;  %v829_v1 = vld [vmem:[#allocation2 + $0xc48] sm:$0xff]  ;;  %v828_v26 = vld [vmem:[#allocation2 + $0xc40] sm:$0xff] }
 0x1e0   : > { %2870 = vmatpush1.msra.mxu1 %v623_v14  ;;  %2820 = vmatprep.subr.mxu0 %v539_v4  ;;  %v744_v14 = vld [vmem:[#allocation2 + $0x9a0] sm:$0xff] }
 0x1e1   : > { %2871 = vmatprep.subr.mxu1 %v619_v36  ;;  %2821 = vmatpush2.msra.mxu0 %v538_v17  ;;  %v824_v4 = vld [vmem:[#allocation2 + $0xc20] sm:$0xff]  ;;  %v823_v17 = vld [vmem:[#allocation2 + $0xc18] sm:$0xff] }
 0x1e2   : > { %2872 = vmatpush1.msra.mxu1 %v618_v52  ;;  %2822 = vmatprep.subr.mxu0 %v534_v6 }
 0x1e3   : > { %2873 = vmatprep.subr.mxu1 %v614_v55  ;;  %2823 = vmatpush2.msra.mxu0 %v533_v21  ;;  %v739_v55 = vld [vmem:[#allocation2 + $0x978] sm:$0xff] }
 0x1e4   : > { %2874 = vmatpush1.msra.mxu1 %v613_v3  ;;  %2824 = vmatprep.subr.mxu0 %v529_v63  ;;  %v819_v21 = vld [vmem:[#allocation2 + $0xbf8] sm:$0xff]  ;;  %v738_v3 = vld [vmem:[#allocation2 + $0x970] sm:$0xff] }
 0x1e5   : > { %2875 = vmatprep.subr.mxu1 %v609_v0  ;;  %2825 = vmatpush2.msra.mxu0 %v528_v34  ;;  %v818_v34 = vld [vmem:[#allocation2 + $0xbf0] sm:$0xff] }
 0x1e6   : > { %2876 = vmatpush1.msra.mxu1 %v608_v7  ;;  %2826 = vmatprep.subr.mxu0 %v524_v10  ;;  %v814_v10 = vld [vmem:[#allocation2 + $0xbd0] sm:$0xff] }
 0x1e7   : > { %2877 = vmatprep.subr.mxu1 %v604_v39  ;;  %2827 = vmatpush2.msra.mxu0 %v523_v58  ;;  %v733_v58 = vld [vmem:[#allocation2 + $0x948] sm:$0xff] }
 0x1e8   : > { %2878 = vmatpush1.msra.mxu1 %v603_v31  ;;  %2828 = vmatprep.subr.mxu0 %v519_v35  ;;  %v813_v31 = vld [vmem:[#allocation2 + $0xbc8] sm:$0xff] }
 0x1e9   : > { %2879 = vmatprep.subr.mxu1 %v599_v25  ;;  %2829 = vmatpush2.msra.mxu0 %v518_v15  ;;  %v729_v25 = vld [vmem:[#allocation2 + $0x928] sm:$0xff] }
 0x1ea   : > { %2830 = vmatprep.mubr.f32.mxu0 %v4473_v56  ;;  %2880 = vmatpush1.msra.mxu1 %v598_v27  ;;  %v809_v15 = vld [vmem:[#allocation2 + $0xba8] sm:$0xff] }
 0x1eb   : > { %2831 = vmatmul.mubr.f32.vlgmr.msra.gmra.mxu0 %v4480_v45  ;;  %2881 = vmatprep.subr.mxu1 %v754_v50  ;;  %v3670_v2 = vpop.f32.mrf.mxu0  ;;  %v743_v45 = vld [vmem:[#allocation2 + $0x998] sm:$0xff]  ;;  %v728_v50 = vld [vmem:[#allocation2 + $0x920] sm:$0xff] }
 0x1ec   : > { %2932 = vmatprep.subr.mxu0 %v834_v51  ;;  %v3711_v46 = vpop.f32.mrf.mxu1  ;;  %2882 = vmatpush2.msra.mxu1 %v753_v30  ;;  %v808_v51 = vld [vmem:[#allocation2 + $0xba0] sm:$0xff] }
 0x1ed   : > { %2933 = vmatpush1.msra.mxu0 %v833_v12  ;;  %2883 = vmatprep.subr.mxu1 %v749_v38  ;;  %v3671_v56 = vpop.f32.mrf.mxu0  ;;  %v724_v30 = vld [vmem:[#allocation2 + $0x900] sm:$0xff] }
 0x1ee   : > { %2934 = vmatprep.subr.mxu0 %v829_v1  ;;  %v3712_v36 = vpop.f32.mrf.mxu1  ;;  %2836 = vmatprep.mubr.f32.mxu0 %v4486_v5  ;;  %v3672_v52 = vadd.f32 %v3671_v56, %v3670_v2  ;;  %v734_v5 = vld [vmem:[#allocation2 + $0x950] sm:$0xff]  ;;  %v804_v12 = vld [vmem:[#allocation2 + $0xb80] sm:$0xff]  ;;  %v803_v2 = vld [vmem:[#allocation2 + $0xb78] sm:$0xff] }
 0x1ef   : > { %2884 = vmatpush2.msra.mxu1 %v748_v42  ;;  %v3713_v6 = vadd.f32 %v3712_v36, %v3711_v46  ;;  %2935 = vmatpush1.msra.mxu0 %v828_v26  ;;  %v723_v42 = vld [vmem:[#allocation2 + $0x8f8] sm:$0xff]  ;;  %v798_v56 = vld [vmem:[#allocation2 + $0xb50] sm:$0xff] }
 0x1f0   : > { %2885 = vmatprep.subr.mxu1 %v744_v14  ;;  %2837 = vmatmul.mubr.f32.gmra.mxu0 %v4490_v13  ;;  %v719_v46 = vld [vmem:[#allocation2 + $0x8d8] sm:$0xff] }
 0x1f1   : > { %2936 = vmatprep.subr.mxu0 %v824_v4  ;;  %v4586_v63 = vadd.f32 %v3713_v6, %v3672_v52  ;;  %v3673_v0 = vpop.f32.mrf.mxu0  ;;  %2886 = vmatpush2.msra.mxu1 %v743_v45  ;;  %v3714_v7 = vpop.f32.mrf.mxu1  ;;  %v799_v26 = vld [vmem:[#allocation2 + $0xb58] sm:$0xff]  ;;  %v718_v4 = vld [vmem:[#allocation2 + $0x8d0] sm:$0xff]  ;;  %v713_v6 = vld [vmem:[#allocation2 + $0x8a8] sm:$0xff] }
 0x1f2   : > { %2937 = vmatpush1.msra.mxu0 %v823_v17  ;;  %2887 = vmatprep.subr.mxu1 %v739_v55  ;;  %v714_v17 = vld [vmem:[#allocation2 + $0x8b0] sm:$0xff]  ;;  %v793_v55 = vld [vmem:[#allocation2 + $0xb28] sm:$0xff] }
 0x1f3   : > { %2938 = vmatprep.subr.mxu0 %v819_v21  ;;  %v3674_v39 = vpop.f32.mrf.mxu0  ;;  %2842 = vmatprep.mubr.f32.mxu0 %v4494_v54  ;;  %v3715_v35 = vpop.f32.mrf.mxu1  ;;  %v794_v52 = vld [vmem:[#allocation2 + $0xb30] sm:$0xff] }
 0x1f4   : > { %2888 = vmatpush2.msra.mxu1 %v738_v3  ;;  %v3675_v13 = vadd.f32 %v3674_v39, %v3673_v0  ;;  %2939 = vmatpush1.msra.mxu0 %v818_v34  ;;  %v3716_v27 = vadd.f32 %v3715_v35, %v3714_v7  ;;  %v709_v0 = vld [vmem:[#allocation2 + $0x888] sm:$0xff]  ;;  %v788_v7 = vld [vmem:[#allocation2 + $0xb00] sm:$0xff]  ;;  %v699_v35 = vld [vmem:[#allocation2 + $0x838] sm:$0xff] }
 0x1f5   : > { %2889 = vmatprep.subr.mxu1 %v734_v5  ;;  %2843 = vmatmul.mubr.f32.gmra.mxu0 %v4498_v23  ;;  %v789_v34 = vld [vmem:[#allocation2 + $0xb08] sm:$0xff]  ;;  %v708_v5 = vld [vmem:[#allocation2 + $0x880] sm:$0xff] }
 0x1f6   : > { %2940 = vmatprep.subr.mxu0 %v814_v10  ;;  %2890 = vmatpush2.msra.mxu1 %v733_v58  ;;  %v4590_v54 = vadd.f32 %v3716_v27, %v3675_v13  ;;  %v3676_v38 = vpop.f32.mrf.mxu0  ;;  %v704_v39 = vld [vmem:[#allocation2 + $0x860] sm:$0xff]  ;;  %v783_v13 = vld [vmem:[#allocation2 + $0xad8] sm:$0xff]  ;;  %v778_v27 = vld [vmem:[#allocation2 + $0xab0] sm:$0xff] }
 0x1f7   : > { %2941 = vmatpush1.msra.mxu0 %v813_v31  ;;  %v3717_v1 = vpop.f32.mrf.mxu1  ;;  %2891 = vmatprep.subr.mxu1 %v729_v25  ;;  %v784_v58 = vld [vmem:[#allocation2 + $0xae0] sm:$0xff]  ;;  %v703_v31 = vld [vmem:[#allocation2 + $0x858] sm:$0xff] }
 0x1f8   : > { %2942 = vmatprep.subr.mxu0 %v809_v15  ;;  %2892 = vmatpush2.msra.mxu1 %v728_v50  ;;  %v3677_v23 = vpop.f32.mrf.mxu0  ;;  %v779_v25 = vld [vmem:[#allocation2 + $0xab8] sm:$0xff]  ;;  %v698_v15 = vld [vmem:[#allocation2 + $0x830] sm:$0xff] }
 0x1f9   : > { %2943 = vmatpush1.msra.mxu0 %v808_v51  ;;  %v3718_v14 = vpop.f32.mrf.mxu1  ;;  %2893 = vmatprep.subr.mxu1 %v724_v30  ;;  %v3678_v36 = vadd.f32 %v3677_v23, %v3676_v38  ;;  %v694_v50 = vld [vmem:[#allocation2 + $0x810] sm:$0xff]  ;;  %v693_v30 = vld [vmem:[#allocation2 + $0x808] sm:$0xff]  ;;  %v683_v23 = vld [vmem:[#allocation2 + $0x7b8] sm:$0xff] }
 0x1fa   : > { %2944 = vmatprep.subr.mxu0 %v804_v12  ;;  %v3719_v45 = vadd.f32 %v3718_v14, %v3717_v1  ;;  %2894 = vmatpush2.msra.mxu1 %v723_v42  ;;  %v774_v51 = vld [vmem:[#allocation2 + $0xa90] sm:$0xff]  ;;  %v773_v12 = vld [vmem:[#allocation2 + $0xa88] sm:$0xff]  ;;  %v688_v42 = vld [vmem:[#allocation2 + $0x7e0] sm:$0xff] }
 0x1fb   : > { %2945 = vmatpush1.msra.mxu0 %v803_v2  ;;  %2895 = vmatprep.subr.mxu1 %v719_v46  ;;  %v689_v38 = vld [vmem:[#allocation2 + $0x7e8] sm:$0xff]  ;;  %v768_v2 = vld [vmem:[#allocation2 + $0xa60] sm:$0xff]  ;;  %v763_v14 = vld [vmem:[#allocation2 + $0xa38] sm:$0xff] }
 0x1fc   : > { %2946 = vmatprep.subr.mxu0 %v799_v26  ;;  %v4592_v21 = vadd.f32 %v3719_v45, %v3678_v36  ;;  %v4594_v3 = vpop.f32.mrf.mxu1  ;;  %2896 = vmatpush2.msra.mxu1 %v718_v4  ;;  %v769_v1 = vld [vmem:[#allocation2 + $0xa68] sm:$0xff]  ;;  %v684_v46 = vld [vmem:[#allocation2 + $0x7c0] sm:$0xff]  ;;  %v679_v4 = vld [vmem:[#allocation2 + $0x798] sm:$0xff] }
 0x1fd   : > { %2947 = vmatpush1.msra.mxu0 %v798_v56  ;;  %2897 = vmatprep.subr.mxu1 %v714_v17  ;;  %v764_v26 = vld [vmem:[#allocation2 + $0xa40] sm:$0xff]  ;;  %v759_v56 = vld [vmem:[#allocation2 + $0xa18] sm:$0xff]  ;;  %v678_v36 = vld [vmem:[#allocation2 + $0x790] sm:$0xff] }
 0x1fe   : > { %2948 = vmatprep.subr.mxu0 %v794_v52  ;;  %v3908_v10 = vpop.f32.mrf.mxu1  ;;  %2898 = vmatpush2.msra.mxu1 %v713_v6  ;;  %v758_v45 = vld [vmem:[#allocation2 + $0xa10] sm:$0xff]  ;;  %v913_v6 = vld [vmem:[#allocation2 + $0xee8] sm:$0xff] }
 0x1ff   : > { %2949 = vmatpush1.msra.mxu0 %v793_v55  ;;  %2899 = vmatprep.subr.mxu1 %v709_v0  ;;  %v914_v17 = vld [vmem:[#allocation2 + $0xef0] sm:$0xff]  ;;  %v933_v55 = vld [vmem:[#allocation2 + $0xf88] sm:$0xff] }
 0x200   : > { %2950 = vmatprep.subr.mxu0 %v789_v34  ;;  %2900 = vmatpush2.msra.mxu1 %v708_v5  ;;  %v934_v52 = vld [vmem:[#allocation2 + $0xf90] sm:$0xff]  ;;  %v909_v0 = vld [vmem:[#allocation2 + $0xec8] sm:$0xff]  ;;  %v908_v34 = vld [vmem:[#allocation2 + $0xec0] sm:$0xff] }
 0x201   : > { %2951 = vmatpush1.msra.mxu0 %v788_v7  ;;  %2901 = vmatprep.subr.mxu1 %v704_v39  ;;  %v929_v5 = vld [vmem:[#allocation2 + $0xf68] sm:$0xff]  ;;  %v904_v7 = vld [vmem:[#allocation2 + $0xea0] sm:$0xff]  ;;  %v4599_v10 = vld [vmem:[%s4191_s18 + $0x50] sm:$0xff] }
 0x202   : > { %2952 = vmatprep.subr.mxu0 %v784_v58  ;;  %2902 = vmatpush2.msra.mxu1 %v703_v31  ;;  %v903_v39 = vld [vmem:[#allocation2 + $0xe98] sm:$0xff]  ;;  %v924_v31 = vld [vmem:[#allocation2 + $0xf40] sm:$0xff] }
 0x203   : > { %2953 = vmatpush1.msra.mxu0 %v783_v13  ;;  %2903 = vmatprep.subr.mxu1 %v699_v35  ;;  %v4603_v13 = vld [vmem:[%s4191_s18 + $0x48] sm:$0xff]  ;;  %v898_v35 = vld [vmem:[#allocation2 + $0xe70] sm:$0xff] }
 0x204   : > { %2954 = vmatprep.subr.mxu0 %v779_v25  ;;  %2904 = vmatpush2.msra.mxu1 %v698_v15  ;;  %v923_v15 = vld [vmem:[#allocation2 + $0xf38] sm:$0xff] }
 0x205   : > { %2955 = vmatpush1.msra.mxu0 %v778_v27  ;;  %2905 = vmatprep.subr.mxu1 %v694_v50  ;;  %v894_v27 = vld [vmem:[#allocation2 + $0xe50] sm:$0xff] }
 0x206   : > { %2956 = vmatprep.subr.mxu0 %v774_v51  ;;  %2906 = vmatpush2.msra.mxu1 %v693_v30  ;;  %v893_v51 = vld [vmem:[#allocation2 + $0xe48] sm:$0xff] }
 0x207   : > { %2957 = vmatpush1.msra.mxu0 %v773_v12  ;;  %2907 = vmatprep.subr.mxu1 %v689_v38  ;;  %v4607_v30 = vld [vmem:[%s4191_s18 + $0x88] sm:$0xff]  ;;  %v919_v12 = vld [vmem:[#allocation2 + $0xf18] sm:$0xff] }
 0x208   : > { %2958 = vmatprep.subr.mxu0 %v769_v1  ;;  %2908 = vmatpush2.msra.mxu1 %v688_v42  ;;  %v889_v38 = vld [vmem:[#allocation2 + $0xe28] sm:$0xff] }
 0x209   : > { %2959 = vmatpush1.msra.mxu0 %v768_v2  ;;  %2909 = vmatprep.subr.mxu1 %v684_v46  ;;  %v918_v2 = vld [vmem:[#allocation2 + $0xf10] sm:$0xff]  ;;  %v888_v46 = vld [vmem:[#allocation2 + $0xe20] sm:$0xff] }
 0x20a   : > { %2960 = vmatprep.subr.mxu0 %v764_v26  ;;  %2910 = vmatpush2.msra.mxu1 %v683_v23  ;;  %v4612_v26 = vld [vmem:[%s4191_s18 + $0x80] sm:$0xff]  ;;  %v595_v23 = vld [vmem:[#allocation2 + $0x4f8] sm:$0xff] }
 0x20b   : > { %2961 = vmatpush1.msra.mxu0 %v763_v14  ;;  %2911 = vmatprep.subr.mxu1 %v679_v4 }
 0x20c   : > { %2962 = vmatprep.subr.mxu0 %v759_v56  ;;  %2912 = vmatpush2.msra.mxu1 %v678_v36  ;;  %v884_v56 = vld [vmem:[#allocation2 + $0xe00] sm:$0xff]  ;;  %v515_v36 = vld [vmem:[#allocation2 + $0x278] sm:$0xff] }
 0x20d   : > { %2913 = vmatprep.mubr.f32.mxu1 %v4502_v53  ;;  %2963 = vmatpush1.msra.mxu0 %v758_v45  ;;  %v928_v53 = vld [vmem:[#allocation2 + $0xf60] sm:$0xff]  ;;  %v883_v45 = vld [vmem:[#allocation2 + $0xdf8] sm:$0xff] }
 0x20e   : > { %2914 = vmatmul.mubr.f32.vlgmr.msra.gmra.mxu1 %v4506_v37  ;;  %2964 = vmatprep.subr.mxu0 %v914_v17  ;;  %v899_v37 = vld [vmem:[#allocation2 + $0xe78] sm:$0xff]  ;;  %v590_v17 = vld [vmem:[#allocation2 + $0x4d0] sm:$0xff] }
 0x20f   : > { %3039 = vmatprep.subr.mxu1 %v934_v52  ;;  %2965 = vmatpush2.msra.mxu0 %v913_v6  ;;  %v879_v52 = vld [vmem:[#allocation2 + $0xdd8] sm:$0xff] }
 0x210   : > { %3040 = vmatpush1.msra.mxu1 %v933_v55  ;;  %2966 = vmatprep.subr.mxu0 %v909_v0  ;;  %v3752_v58 = vpop.f32.mrf.mxu0  ;;  %v510_v0 = vld [vmem:[#allocation2 + $0x250] sm:$0xff] }
 0x211   : > { %2919 = vmatprep.mubr.f32.mxu1 %v4599_v10  ;;  %2967 = vmatpush2.msra.mxu0 %v908_v34  ;;  %v878_v34 = vld [vmem:[#allocation2 + $0xdd0] sm:$0xff] }
 0x212   : > { %3041 = vmatprep.subr.mxu1 %v929_v5  ;;  %2920 = vmatmul.mubr.f32.gmra.mxu1 %v4603_v13  ;;  %v3753_v25 = vpop.f32.mrf.mxu0  ;;  %v585_v5 = vld [vmem:[#allocation2 + $0x4a8] sm:$0xff] }
 0x213   : > { %2968 = vmatprep.subr.mxu0 %v904_v7  ;;  %3042 = vmatpush1.msra.mxu1 %v928_v53  ;;  %v3754_v50 = vadd.f32 %v3753_v25, %v3752_v58  ;;  %v874_v7 = vld [vmem:[#allocation2 + $0xdb0] sm:$0xff]  ;;  %v873_v58 = vld [vmem:[#allocation2 + $0xda8] sm:$0xff] }
 0x214   : > { %2969 = vmatpush2.msra.mxu0 %v903_v39  ;;  %3043 = vmatprep.subr.mxu1 %v924_v31  ;;  %v505_v39 = vld [vmem:[#allocation2 + $0x228] sm:$0xff] }
 0x215   : > { %2970 = vmatprep.subr.mxu0 %v899_v37  ;;  %2925 = vmatprep.mubr.f32.mxu1 %v4607_v30  ;;  %v2335_v1 = vadd.f32 %v3754_v50, %v4586_v63 }
 0x216   : > { %2971 = vmatpush2.msra.mxu0 %v898_v35  ;;  %v3755_v42 = vpop.f32.mrf.mxu0  ;;  %3044 = vmatpush1.msra.mxu1 %v923_v15  ;;  %v869_v35 = vld [vmem:[#allocation2 + $0xd88] sm:$0xff]  ;;  %v500_v15 = vld [vmem:[#allocation2 + $0x200] sm:$0xff] }
 0x217   : > { %2972 = vmatprep.subr.mxu0 %v894_v27  ;;  %2926 = vmatmul.mubr.f32.gmra.mxu1 %v4612_v26  ;;  %v4616_v4 = vadd.f32 %v4594_v3, %v2335_v1  ;;  %v4621_v3 = vld [vmem:[%s4191_s18 + $0x30] sm:$0xff]  ;;  %v868_v27 = vld [vmem:[#allocation2 + $0xd80] sm:$0xff]  ;;  %v495_v1 = vld [vmem:[#allocation2 + $0x1d8] sm:$0xff] }
 0x218   : > { %2973 = vmatpush2.msra.mxu0 %v893_v51  ;;  %v3756_v14 = vpop.f32.mrf.mxu0  ;;  %3045 = vmatprep.subr.mxu1 %v919_v12  ;;  %v575_v12 = vld [vmem:[#allocation2 + $0x458] sm:$0xff] }
 0x219   : > { %2974 = vmatprep.subr.mxu0 %v889_v38  ;;  %v3757_v63 = vadd.f32 %v3756_v14, %v3755_v42  ;;  %3046 = vmatpush1.msra.mxu1 %v918_v2  ;;  %v864_v38 = vld [vmem:[#allocation2 + $0xd60] sm:$0xff]  ;;  %v863_v42 = vld [vmem:[#allocation2 + $0xd58] sm:$0xff]  ;;  %v570_v2 = vld [vmem:[#allocation2 + $0x430] sm:$0xff] }
 0x21a   : > { %2975 = vmatpush2.msra.mxu0 %v888_v46  ;;  %3079 = vmatprep.mubr.f32.mxu1 %v4083_v22  ;;  %v859_v46 = vld [vmem:[#allocation2 + $0xd38] sm:$0xff]  ;;  %v490_v14 = vld [vmem:[#allocation2 + $0x1b0] sm:$0xff] }
 0x21b   : > { %3768 = vmatprep.subr.mxu1 %v595_v23  ;;  %v3758_v6 = vpop.f32.mrf.mxu0  ;;  %v2340_v55 = vadd.f32 %v3757_v63, %v4590_v54  ;;  %2976 = vmatprep.subr.mxu0 %v884_v56  ;;  %v580_v54 = vld [vmem:[#allocation2 + $0x480] sm:$0xff]  ;;  %v858_v56 = vld [vmem:[#allocation2 + $0xd30] sm:$0xff] }
 0x21c   : > { %3630 = vmatmul.mubr.msk.f32.vlgmr.msra.gmra.mxu1 %vm1436_vm1, %v4621_v3  ;;  %2977 = vmatpush2.msra.mxu0 %v883_v45 }
 0x21d   : > { %3769 = vmatpush3.msra.mxu1 %v515_v36  ;;  %v3759_v53 = vpop.f32.mrf.mxu0  ;;  %2978 = vmatprep.subr.mxu0 %v879_v52  ;;  %v2419_v31 = vpop.f32.mrf.mxu1  ;;  %v854_v36 = vld [vmem:[#allocation2 + $0xd10] sm:$0xff]  ;;  %v853_v52 = vld [vmem:[#allocation2 + $0xd08] sm:$0xff] }
 0x21e   : > { %3770 = vmatprep.subr.mxu1 %v590_v17  ;;  %v3760_v37 = vadd.f32 %v3759_v53, %v3758_v6  ;;  %2979 = vmatpush2.msra.mxu0 %v878_v34  ;;  %v4625_v25 = vadd.f32 %v2419_v31, %v2340_v55  ;;  %v485_v17 = vld [vmem:[#allocation2 + $0x188] sm:$0xff]  ;;  %v560_v6 = vld [vmem:[#allocation2 + $0x3e0] sm:$0xff]  ;;  %v475_v53 = vld [vmem:[#allocation2 + $0x138] sm:$0xff] }
 0x21f   : > { %3771 = vmatpush3.msra.mxu1 %v510_v0  ;;  %2980 = vmatprep.subr.mxu0 %v874_v7  ;;  %v3911_v50 = vpop.f32.mrf.mxu1  ;;  %v849_v55 = vld [vmem:[#allocation2 + $0xce8] sm:$0xff]  ;;  %v480_v0 = vld [vmem:[#allocation2 + $0x160] sm:$0xff]  ;;  %v470_v31 = vld [vmem:[#allocation2 + $0x110] sm:$0xff] }
 0x220   : > { %3772 = vmatprep.subr.mxu1 %v585_v5  ;;  %v2345_v51 = vadd.f32 %v3760_v37, %v4592_v21  ;;  %2981 = vmatpush2.msra.mxu0 %v873_v58  ;;  %v565_v21 = vld [vmem:[#allocation2 + $0x408] sm:$0xff]  ;;  %v848_v34 = vld [vmem:[#allocation2 + $0xce0] sm:$0xff]  ;;  %v555_v5 = vld [vmem:[#allocation2 + $0x3b8] sm:$0xff] }
 0x221   : > { %3773 = vmatpush3.msra.mxu1 %v505_v39  ;;  %2982 = vmatprep.subr.mxu0 %v869_v35  ;;  %v844_v7 = vld [vmem:[#allocation2 + $0xcc0] sm:$0xff]  ;;  %v843_v39 = vld [vmem:[#allocation2 + $0xcb8] sm:$0xff]  ;;  %v550_v58 = vld [vmem:[#allocation2 + $0x390] sm:$0xff] }
 0x222   : > { %3774 = vmatprep.subr.mxu1 %v580_v54  ;;  %2983 = vmatpush2.msra.mxu0 %v868_v27  ;;  %v2424_v23 = vpop.f32.mrf.mxu1  ;;  %v839_v37 = vld [vmem:[#allocation2 + $0xc98] sm:$0xff]  ;;  %v838_v54 = vld [vmem:[#allocation2 + $0xc90] sm:$0xff]  ;;  %v545_v35 = vld [vmem:[#allocation2 + $0x368] sm:$0xff] }
 0x223   : > { %3775 = vmatpush3.msra.mxu1 %v500_v15  ;;  %2984 = vmatprep.subr.mxu0 %v864_v38  ;;  %v4628_v63 = vadd.f32 %v2424_v23, %v2345_v51  ;;  %v465_v15 = vld [vmem:[#allocation2 + $0xe8] sm:$0xff]  ;;  %v755_v27 = vld [vmem:[#allocation2 + $0x9f8] sm:$0xff]  ;;  %v540_v50 = vld [vmem:[#allocation2 + $0x340] sm:$0xff] }
 0x224   : > { %3776 = vmatprep.subr.mxu1 %v575_v12  ;;  %2985 = vmatpush2.msra.mxu0 %v863_v42  ;;  %v3914_v45 = vpop.f32.mrf.mxu1  ;;  %v675_v51 = vld [vmem:[#allocation2 + $0x778] sm:$0xff]  ;;  %v460_v12 = vld [vmem:[#allocation2 + $0xc0] sm:$0xff]  ;;  %v750_v38 = vld [vmem:[#allocation2 + $0x9d0] sm:$0xff] }
 0x225   : > { %3777 = vmatpush3.msra.mxu1 %v495_v1  ;;  %2986 = vmatprep.subr.mxu0 %v859_v46  ;;  %v535_v1 = vld [vmem:[#allocation2 + $0x318] sm:$0xff]  ;;  %v670_v42 = vld [vmem:[#allocation2 + $0x750] sm:$0xff]  ;;  %v665_v46 = vld [vmem:[#allocation2 + $0x728] sm:$0xff] }
 0x226   : > { %3778 = vmatprep.subr.mxu1 %v570_v2  ;;  %2987 = vmatpush2.msra.mxu0 %v858_v56  ;;  %v455_v2 = vld [vmem:[#allocation2 + $0x98] sm:$0xff]  ;;  %v450_v23 = vld [vmem:[#allocation2 + $0x70] sm:$0xff]  ;;  %v525_v56 = vld [vmem:[#allocation2 + $0x2c8] sm:$0xff] }
 0x227   : > { %3779 = vmatpush3.msra.mxu1 %v490_v14  ;;  %2988 = vmatprep.subr.mxu0 %v854_v36  ;;  %v740_v14 = vld [vmem:[#allocation2 + $0x980] sm:$0xff]  ;;  %v655_v36 = vld [vmem:[#allocation2 + $0x6d8] sm:$0xff] }
 0x228   : > { %3780 = vmatprep.subr.mxu1 %v565_v21  ;;  %2989 = vmatpush2.msra.mxu0 %v853_v52  ;;  %v735_v21 = vld [vmem:[#allocation2 + $0x958] sm:$0xff]  ;;  %v440_v45 = vld [vmem:[#allocation2 + $0x20] sm:$0xff]  ;;  %v650_v52 = vld [vmem:[#allocation2 + $0x6b0] sm:$0xff] }
 0x229   : > { %3781 = vmatpush3.msra.mxu1 %v485_v17  ;;  %2990 = vmatprep.subr.mxu0 %v849_v55  ;;  %v730_v17 = vld [vmem:[#allocation2 + $0x930] sm:$0xff]  ;;  %v835_v55 = vld [vmem:[#allocation2 + $0xc78] sm:$0xff] }
 0x22a   : > { %3782 = vmatprep.subr.mxu1 %v560_v6  ;;  %2991 = vmatpush2.msra.mxu0 %v848_v34  ;;  %v725_v6 = vld [vmem:[#allocation2 + $0x908] sm:$0xff]  ;;  %v3996_v34 = vld [vmem:[%s4191_s18] sm:$0xff] }
 0x22b   : > { %3783 = vmatpush3.msra.mxu1 %v480_v0  ;;  %2992 = vmatprep.subr.mxu0 %v844_v7  ;;  %v645_v0 = vld [vmem:[#allocation2 + $0x688] sm:$0xff]  ;;  %v720_v7 = vld [vmem:[#allocation2 + $0x8e0] sm:$0xff] }
 0x22c   : > { %3784 = vmatprep.subr.mxu1 %v555_v5  ;;  %2993 = vmatpush2.msra.mxu0 %v843_v39  ;;  %v910_v5 = vld [vmem:[#allocation2 + $0xed0] sm:$0xff] }
 0x22d   : > { %3785 = vmatpush3.msra.mxu1 %v475_v53  ;;  %2994 = vmatprep.subr.mxu0 %v839_v37  ;;  %v830_v53 = vld [vmem:[#allocation2 + $0xc50] sm:$0xff] }
 0x22e   : > { %3786 = vmatprep.subr.mxu1 %v550_v58  ;;  %2995 = vmatpush2.msra.mxu0 %v838_v54  ;;  %v640_v58 = vld [vmem:[#allocation2 + $0x660] sm:$0xff]  ;;  %v905_v54 = vld [vmem:[#allocation2 + $0xea8] sm:$0xff] }
 0x22f   : > { %3787 = vmatpush3.msra.mxu1 %v470_v31  ;;  %2996 = vmatprep.mubr.f32.mxu0 %v4529_v44  ;;  %v745_v44 = vld [vmem:[#allocation2 + $0x9a8] sm:$0xff]  ;;  %v3997_v31 = vld [vmem:[%s4191_s18 + $0x40] sm:$0xff] }
 0x230   : > { %3788 = vmatprep.subr.mxu1 %v545_v35  ;;  %2997 = vmatmul.mubr.f32.vlgmr.msra.gmra.mxu0 %v4533_v59  ;;  %v530_v59 = vld [vmem:[#allocation2 + $0x2f0] sm:$0xff]  ;;  %v715_v35 = vld [vmem:[#allocation2 + $0x8b8] sm:$0xff] }
 0x231   : > { %3789 = vmatpush3.msra.mxu1 %v465_v15  ;;  %3809 = vmatprep.subr.mxu0 %v755_v27  ;;  %v825_v27 = vld [vmem:[#allocation2 + $0xc28] sm:$0xff] }
 0x232   : > { %3790 = vmatprep.subr.mxu1 %v540_v50  ;;  %3810 = vmatpush3.msra.mxu0 %v675_v51  ;;  %v635_v50 = vld [vmem:[#allocation2 + $0x638] sm:$0xff] }
 0x233   : > { %3085 = vmatprep.mubr.f32.mxu1 %v4083_v22  ;;  %3791 = vmatpush3.msra.mxu1 %v460_v12  ;;  %v3998_v51 = vld [vmem:[%s4191_s18 + $0x38] sm:$0xff] }
 0x234   : > { %3811 = vmatprep.subr.mxu0 %v750_v38  ;;  %3002 = vmatprep.mubr.f32.mxu0 %v4541_v61  ;;  %v660_v61 = vld [vmem:[#allocation2 + $0x700] sm:$0xff]  ;;  %v710_v38 = vld [vmem:[#allocation2 + $0x890] sm:$0xff] }
 0x235   : > { %3631 = vmatmul.mubr.msk.f32.gmra.mxu1 %vm1436_vm1, %v4553_v32  ;;  %3792 = vmatprep.subr.mxu1 %v535_v1  ;;  %v445_v32 = vld [vmem:[#allocation2 + $0x48] sm:$0xff]  ;;  %v820_v1 = vld [vmem:[#allocation2 + $0xc00] sm:$0xff] }
 0x236   : > { %3812 = vmatpush3.msra.mxu0 %v670_v42  ;;  %3793 = vmatpush3.msra.mxu1 %v455_v2 }
 0x237   : > { %3003 = vmatmul.mubr.f32.gmra.mxu0 %v4547_v29  ;;  %3813 = vmatprep.subr.mxu0 %v745_v44  ;;  %v520_v29 = vld [vmem:[#allocation2 + $0x2a0] sm:$0xff]  ;;  %v3999_v44 = vld [vmem:[%s4191_s18 + $0x78] sm:$0xff] }
 0x238   : > { %3794 = vmatprep.subr.mxu1 %v530_v59  ;;  %3814 = vmatpush3.msra.mxu0 %v665_v46  ;;  %v895_v59 = vld [vmem:[#allocation2 + $0xe58] sm:$0xff]  ;;  %v705_v46 = vld [vmem:[#allocation2 + $0x868] sm:$0xff] }
 0x239   : > { %3091 = vmatprep.mubr.f32.mxu1 %v4083_v22  ;;  %3795 = vmatpush3.msra.mxu1 %v450_v23 }
 0x23a   : > { %3815 = vmatprep.subr.mxu0 %v740_v14  ;;  %3008 = vmatprep.mubr.f32.mxu0 %v4561_v9  ;;  %v915_v9 = vld [vmem:[#allocation2 + $0xef8] sm:$0xff] }
 0x23b   : > { %3632 = vmatmul.mubr.msk.f32.gmra.mxu1 %vm1436_vm1, %v4573_v16  ;;  %3796 = vmatprep.subr.mxu1 %v525_v56  ;;  %v3995_v16 = vld [vmem:[%s4191_s18 + $0x8] sm:$0xff]  ;;  %v815_v14 = vld [vmem:[#allocation2 + $0xbd8] sm:$0xff] }
 0x23c   : > { %3816 = vmatpush3.msra.mxu0 %v660_v61  ;;  %3797 = vmatpush3.msra.mxu1 %v445_v32  ;;  %v625_v56 = vld [vmem:[#allocation2 + $0x5e8] sm:$0xff]  ;;  %v4000_v61 = vld [vmem:[%s4191_s18 + $0x70] sm:$0xff]  ;;  %v700_v32 = vld [vmem:[#allocation2 + $0x840] sm:$0xff] }
 0x23d   : > { %3009 = vmatmul.mubr.f32.gmra.mxu0 %v4567_v33  ;;  %3817 = vmatprep.subr.mxu0 %v735_v21 }
 0x23e   : > { %3798 = vmatprep.subr.mxu1 %v520_v29  ;;  %3818 = vmatpush3.msra.mxu0 %v655_v36  ;;  %v810_v29 = vld [vmem:[#allocation2 + $0xbb0] sm:$0xff]  ;;  %v620_v36 = vld [vmem:[#allocation2 + $0x5c0] sm:$0xff] }
 0x23f   : > { %3799 = vmatpush3.msra.mxu1 %v440_v45  ;;  %3162 = vmatprep.mubr.f32.mxu1 %v3995_v16 }
 0x240   : > { %3819 = vmatprep.subr.mxu0 %v730_v17  ;;  %3163 = vmatmul.mubr.f32.vlgmr.msra.gmra.mxu1 %v3996_v34  ;;  %v2500_v33 = vpop.f32.mrf.mxu1  ;;  %v695_v17 = vld [vmem:[#allocation2 + $0x818] sm:$0xff]  ;;  %v610_v34 = vld [vmem:[#allocation2 + $0x570] sm:$0xff] }
 0x241   : > { %3820 = vmatpush3.msra.mxu0 %v650_v52  ;;  %3850 = vmatprep.subr.mxu1 %v915_v9  ;;  %v4645_v39 = vadd.f32 %v2500_v33, %v4461_v57  ;;  %v900_v57 = vld [vmem:[#allocation2 + $0xe80] sm:$0xff]  ;;  %v805_v9 = vld [vmem:[#allocation2 + $0xb88] sm:$0xff] }
 0x242   : > { %3821 = vmatprep.subr.mxu0 %v725_v6  ;;  %3851 = vmatpush3.msra.mxu1 %v835_v55  ;;  %v2502_v37 = vpop.f32.mrf.mxu1  ;;  %v615_v6 = vld [vmem:[#allocation2 + $0x598] sm:$0xff]  ;;  %v880_v55 = vld [vmem:[#allocation2 + $0xde0] sm:$0xff]  ;;  %v685_v33 = vld [vmem:[#allocation2 + $0x7c8] sm:$0xff] }
 0x243   : > { %3822 = vmatpush3.msra.mxu0 %v645_v0  ;;  %3852 = vmatprep.subr.mxu1 %v910_v5  ;;  %v4649_v15 = vadd.f32 %v2502_v37, %v4463_v60  ;;  %v630_v60 = vld [vmem:[#allocation2 + $0x610] sm:$0xff]  ;;  %v875_v5 = vld [vmem:[#allocation2 + $0xdb8] sm:$0xff] }
 0x244   : > { %3167 = vmatprep.mubr.f32.mxu1 %v3997_v31  ;;  %3823 = vmatprep.subr.mxu0 %v720_v7  ;;  %v690_v0 = vld [vmem:[#allocation2 + $0x7f0] sm:$0xff]  ;;  %v795_v7 = vld [vmem:[#allocation2 + $0xb38] sm:$0xff]  ;;  %v600_v31 = vld [vmem:[#allocation2 + $0x520] sm:$0xff] }
 0x245   : > { %3853 = vmatpush3.msra.mxu1 %v830_v53  ;;  %3824 = vmatpush3.msra.mxu0 %v640_v58  ;;  %v605_v53 = vld [vmem:[#allocation2 + $0x548] sm:$0xff]  ;;  %v680_v58 = vld [vmem:[#allocation2 + $0x7a0] sm:$0xff]  ;;  %v790_v37 = vld [vmem:[#allocation2 + $0xb10] sm:$0xff] }
 0x246   : > { %3168 = vmatmul.mubr.f32.gmra.mxu1 %v3998_v51  ;;  %v2506_v12 = vpop.f32.mrf.mxu1  ;;  %3854 = vmatprep.subr.mxu1 %v905_v54  ;;  %v865_v54 = vld [vmem:[#allocation2 + $0xd68] sm:$0xff]  ;;  %v780_v51 = vld [vmem:[#allocation2 + $0xac0] sm:$0xff] }
 0x247   : > { %3825 = vmatprep.subr.mxu0 %v715_v35  ;;  %v4653_v42 = vadd.f32 %v2506_v12, %v4467_v24  ;;  %3855 = vmatpush3.msra.mxu1 %v825_v27  ;;  %v890_v24 = vld [vmem:[#allocation2 + $0xe30] sm:$0xff]  ;;  %v785_v35 = vld [vmem:[#allocation2 + $0xae8] sm:$0xff]  ;;  %v860_v27 = vld [vmem:[#allocation2 + $0xd40] sm:$0xff] }
 0x248   : > { %3826 = vmatpush3.msra.mxu0 %v635_v50  ;;  %v2508_v2 = vpop.f32.mrf.mxu1  ;;  %3856 = vmatprep.subr.mxu1 %v900_v57  ;;  %v4001_v50 = vld [vmem:[%s4191_s18 + $0x18] sm:$0xff]  ;;  %v4002_v57 = vld [vmem:[%s4191_s18 + $0x10] sm:$0xff] }
 0x249   : > { %3172 = vmatprep.mubr.f32.mxu1 %v3999_v44  ;;  %v4657_v23 = vadd.f32 %v2508_v2, %v4469_v18  ;;  %3827 = vmatprep.subr.mxu0 %v710_v38  ;;  %v885_v18 = vld [vmem:[#allocation2 + $0xe08] sm:$0xff]  ;;  %v855_v12 = vld [vmem:[#allocation2 + $0xd18] sm:$0xff]  ;;  %v850_v44 = vld [vmem:[#allocation2 + $0xcf0] sm:$0xff] }
 0x24a   : > { %3857 = vmatpush3.msra.mxu1 %v820_v1  ;;  %3828 = vmatpush3.msra.mxu0 %v630_v60  ;;  %v935_v38 = vld [vmem:[#allocation2 + $0xf98] sm:$0xff] }
 0x24b   : > { %3173 = vmatmul.mubr.f32.gmra.mxu1 %v4000_v61  ;;  %v2512_v21 = vpop.f32.mrf.mxu1  ;;  %3858 = vmatprep.subr.mxu1 %v895_v59  ;;  %v775_v60 = vld [vmem:[#allocation2 + $0xa98] sm:$0xff]  ;;  %v930_v61 = vld [vmem:[#allocation2 + $0xf70] sm:$0xff] }
 0x24c   : > { %3829 = vmatprep.subr.mxu0 %v705_v46  ;;  %v4661_v45 = vadd.f32 %v2512_v21, %v4477_v43  ;;  %3859 = vmatpush3.msra.mxu1 %v815_v14  ;;  %v800_v43 = vld [vmem:[#allocation2 + $0xb60] sm:$0xff]  ;;  %v770_v46 = vld [vmem:[#allocation2 + $0xa70] sm:$0xff] }
 0x24d   : > { %3830 = vmatpush3.msra.mxu0 %v625_v56  ;;  %v2514_v52 = vpop.f32.mrf.mxu1  ;;  %3860 = vmatprep.subr.mxu1 %v890_v24  ;;  %v845_v56 = vld [vmem:[#allocation2 + $0xcc8] sm:$0xff] }
 0x24e   : > { %3831 = vmatprep.subr.mxu0 %v700_v32  ;;  %v4664_v16 = vadd.f32 %v2514_v52, %v4483_v62  ;;  %3861 = vmatpush3.msra.mxu1 %v810_v29  ;;  %v870_v62 = vld [vmem:[#allocation2 + $0xd90] sm:$0xff]  ;;  %v840_v32 = vld [vmem:[#allocation2 + $0xca0] sm:$0xff] }
 0x24f   : > { %3832 = vmatpush3.msra.mxu0 %v620_v36  ;;  %3862 = vmatprep.subr.mxu1 %v885_v18  ;;  %v4003_v36 = vld [vmem:[%s4191_s18 + $0x28] sm:$0xff]  ;;  %v920_v18 = vld [vmem:[#allocation2 + $0xf20] sm:$0xff] }
 0x250   : > { %3833 = vmatprep.subr.mxu0 %v695_v17  ;;  %3863 = vmatpush3.msra.mxu1 %v805_v9  ;;  %v4005_v52 = vld [vmem:[%s4191_s18 + $0x60] sm:$0xff]  ;;  %v4007_v9 = vld [vmem:[%s4191_s18 + $0x98] sm:$0xff] }
 0x251   : > { %3834 = vmatpush3.msra.mxu0 %v615_v6  ;;  %3864 = vmatprep.subr.mxu1 %v880_v55  ;;  %v4008_v6 = vld [vmem:[%s4191_s18 + $0x68] sm:$0xff]  ;;  %v4010_v55 = vld [vmem:[%s4191_s18 + $0xa0] sm:$0xff] }
 0x252   : > { %3835 = vmatprep.subr.mxu0 %v690_v0  ;;  %3865 = vmatpush3.msra.mxu1 %v800_v43 }
 0x253   : > { %3836 = vmatpush3.msra.mxu0 %v610_v34  ;;  %3866 = vmatprep.subr.mxu1 %v875_v5 }
 0x254   : > { %3837 = vmatprep.subr.mxu0 %v685_v33  ;;  %3867 = vmatpush3.msra.mxu1 %v795_v7 }
 0x255   : > { %3838 = vmatpush3.msra.mxu0 %v605_v53  ;;  %3868 = vmatprep.subr.mxu1 %v870_v62 }
 0x256   : > { %3839 = vmatprep.subr.mxu0 %v680_v58  ;;  %3869 = vmatpush3.msra.mxu1 %v790_v37 }
 0x257   : > { %3840 = vmatpush3.msra.mxu0 %v600_v31  ;;  %3242 = vmatprep.mubr.f32.mxu0 %v4001_v50 }
 0x258   : > { %3870 = vmatprep.subr.mxu1 %v865_v54  ;;  %3243 = vmatmul.mubr.f32.vlgmr.msra.gmra.mxu0 %v4002_v57  ;;  %v2583_v1 = vpop.f32.mrf.mxu0 }
 0x259   : > { %3871 = vmatpush3.msra.mxu1 %v785_v35  ;;  %3247 = vmatprep.mubr.f32.mxu0 %v4599_v10  ;;  %v2584_v2 = vadd.f32 %v2583_v1, %v4645_v39  ;;  %v765_v10 = vld [vmem:[#allocation2 + $0xa48] sm:$0xff] }
 0x25a   : > { %3872 = vmatprep.subr.mxu1 %v860_v27  ;;  %3915 = vmatprep.subr.mxu0 %v4083_v22  ;;  %v2585_v59 = vpop.f32.mrf.mxu0 }
 0x25b   : > { %3873 = vmatpush3.msra.mxu1 %v780_v51  ;;  %3916 = vmatpush3.msra.mxu0 %v935_v38  ;;  %v2586_v14 = vadd.f32 %v2585_v59, %v4649_v15 }
 0x25c   : > { %3874 = vmatprep.subr.mxu1 %v855_v12  ;;  %3248 = vmatmul.mubr.f32.gmra.mxu0 %v4603_v13  ;;  %v2589_v24 = vpop.f32.mrf.mxu0  ;;  %v760_v13 = vld [vmem:[#allocation2 + $0xa20] sm:$0xff] }
 0x25d   : > { %3875 = vmatpush3.msra.mxu1 %v775_v60  ;;  %3252 = vmatprep.mubr.f32.mxu0 %v4607_v30  ;;  %v2590_v39 = vadd.f32 %v2589_v24, %v4653_v42  ;;  %v925_v30 = vld [vmem:[#allocation2 + $0xf48] sm:$0xff] }
 0x25e   : > { %3876 = vmatprep.subr.mxu1 %v850_v44  ;;  %3917 = vmatprep.subr.mxu0 %v4083_v22  ;;  %v2591_v21 = vpop.f32.mrf.mxu0 }
 0x25f   : > { %3877 = vmatpush3.msra.mxu1 %v770_v46  ;;  %3918 = vmatpush3.msra.mxu0 %v930_v61  ;;  %v2592_v15 = vadd.f32 %v2591_v21, %v4657_v23  ;;  %v4004_v23 = vld [vmem:[%s4191_s18 + $0x20] sm:$0xff] }
 0x260   : > { %3878 = vmatprep.subr.mxu1 %v845_v56  ;;  %3253 = vmatmul.mubr.f32.gmra.mxu0 %v4612_v26 }
 0x261   : > { %3879 = vmatpush3.msra.mxu1 %v765_v10  ;;  %v2595_v29 = vpop.f32.mrf.mxu0  ;;  %3322 = vmatprep.mubr.f32.mxu1 %v4003_v36 }
 0x262   : > { %3880 = vmatprep.subr.mxu1 %v840_v32  ;;  %v2596_v42 = vadd.f32 %v2595_v29, %v4661_v45  ;;  %3919 = vmatprep.subr.mxu0 %v4083_v22  ;;  %v4006_v45 = vld [vmem:[%s4191_s18 + $0x58] sm:$0xff] }
 0x263   : > { %3881 = vmatpush3.msra.mxu1 %v760_v13  ;;  %v2597_v17 = vpop.f32.mrf.mxu0  ;;  %3920 = vmatpush3.msra.mxu0 %v925_v30 }
 0x264   : > { %3323 = vmatmul.mubr.f32.vlgmr.msra.gmra.mxu1 %v4004_v23  ;;  %v2598_v26 = vadd.f32 %v2597_v17, %v4664_v16  ;;  %3921 = vmatprep.subr.mxu0 %v4083_v22  ;;  %v4009_v16 = vld [vmem:[%s4191_s18 + $0x90] sm:$0xff] }
 0x265   : > { %3327 = vmatprep.mubr.f32.mxu1 %v4005_v52  ;;  %3922 = vmatpush3.msra.mxu0 %v920_v18 }
 0x266   : > { %3923 = vmatprep.mubr.msk.f32.mxu0 %vm4084_vm2, %v4083_v22  ;;  %v2749_v0 = vpop.f32.mrf.mxu0 }
 0x267   : > { %3924 = vmatmul.mubr.msk.f32.vlgmr.msra.gmra.mxu0 %vm1436_vm1, %v4621_v3 }
 0x268   : > { %3328 = vmatmul.mubr.f32.gmra.mxu1 %v4006_v45  ;;  %3926 = vmatprep.mubr.msk.f32.mxu0 %vm4084_vm2, %v4083_v22  ;;  %v2751_v7 = vpop.f32.mrf.mxu0 }
 0x269   : > { %3332 = vmatprep.mubr.f32.mxu1 %v4007_v9 }
 0x26b   : > { %3927 = vmatmul.mubr.msk.f32.gmra.mxu0 %vm1436_vm1, %v4008_v6 }
 0x26c   : > { %3333 = vmatmul.mubr.f32.gmra.mxu1 %v4009_v16  ;;  %3929 = vmatprep.mubr.msk.f32.mxu0 %vm4084_vm2, %v4083_v22 }
 0x26f   : > { %3930 = vmatmul.mubr.msk.f32.gmra.mxu0 %vm1436_vm1, %v4010_v55 }
 0x286   : > { %v2666_v3 = vpop.f32.mrf.mxu1 }
 0x287   : > { %v2667_v43 = vadd.f32 %v2666_v3, %v2584_v2 }
 0x288   : > { %v2668_v34 = vpop.f32.mrf.mxu1 }
 0x289   : > { %v4700_v5 = vadd.f32 %v2749_v0, %v2667_v43  ;;  %v2669_v33 = vadd.f32 %v2668_v34, %v2586_v14 }
 0x28b   : > { %v4702_v53 = vadd.f32 %v2751_v7, %v2669_v33  ;;  %v2672_v62 = vpop.f32.mrf.mxu1 }
 0x28c   : > { %v2673_v58 = vadd.f32 %v2672_v62, %v2590_v39 }
 0x28d   : > { %v2674_v37 = vpop.f32.mrf.mxu1 }
 0x28e   : > { %v2755_v31 = vpop.f32.mrf.mxu0  ;;  %v2675_v54 = vadd.f32 %v2674_v37, %v2592_v15 }
 0x28f   : > { %v4704_v35 = vadd.f32 %v2755_v31, %v2673_v58 }
 0x290   : > { %v2757_v22 = vpop.f32.mrf.mxu0 }
 0x291   : > { %v4706_v27 = vadd.f32 %v2757_v22, %v2675_v54  ;;  %v2678_v50 = vpop.f32.mrf.mxu1 }
 0x292   : > { %v2679_v51 = vadd.f32 %v2678_v50, %v2596_v42 }
 0x293   : > { %v2680_v57 = vpop.f32.mrf.mxu1 }
 0x294   : > { %v2761_v12 = vpop.f32.mrf.mxu0  ;;  %v2681_v38 = vadd.f32 %v2680_v57, %v2598_v26 }
 0x295   : > { %v4708_v1 = vadd.f32 %v2761_v12, %v2679_v51 }
 0x296   : > { %v2763_v60 = vpop.f32.mrf.mxu0 }
 0x297   : > { %v4710_v2 = vadd.f32 %v2763_v60, %v2681_v38 }
 0x2ab   : > { %v2832_v59 = vpop.f32.mrf.mxu0 }
 0x2ac   : > { %v2833_v13 = vadd.f32 %v2832_v59, %v4538_v28 }
 0x2ad   : > { %v2834_v14 = vpop.f32.mrf.mxu0 }
 0x2ae   : > { %v2835_v30 = vadd.f32 %v2834_v14, %v4544_v20 }
 0x2b0   : > { %v2838_v61 = vpop.f32.mrf.mxu0 }
 0x2b1   : > { %v2839_v26 = vadd.f32 %v2838_v61, %v4558_v8 }
 0x2b2   : > { %v2840_v10 = vpop.f32.mrf.mxu0 }
 0x2b3   : > { %v2841_v6 = vadd.f32 %v2840_v10, %v4564_v11 }
 0x2b5   : > { %v2844_v32 = vpop.f32.mrf.mxu0 }
 0x2b6   : > { %v2845_v34 = vadd.f32 %v2844_v32, %v4578_v19 }
 0x2b7   : > { %v4715_v15 = vpop.f32.mrf.mxu0 }
 0x2ce   : > { %v2915_v44 = vpop.f32.mrf.mxu1 }
 0x2cf   : > { %v2916_v29 = vadd.f32 %v2915_v44, %v2833_v13 }
 0x2d0   : > { %v2917_v46 = vpop.f32.mrf.mxu1 }
 0x2d1   : > { %v2918_v18 = vadd.f32 %v2917_v46, %v2835_v30 }
 0x2d2   : > { %v2921_v56 = vpop.f32.mrf.mxu1 }
 0x2d3   : > { %v2922_v16 = vadd.f32 %v2921_v56, %v2839_v26 }
 0x2d4   : > { %v2923_v24 = vpop.f32.mrf.mxu1 }
 0x2d5   : > { %v2924_v55 = vadd.f32 %v2923_v24, %v2841_v6  ;;  %v2847_v6 = vadd.f32 %v4715_v15, %v4580_v47 }
 0x2d7   : > { %v2927_v39 = vpop.f32.mrf.mxu1 }
 0x2d8   : > { %v2928_v11 = vadd.f32 %v2927_v39, %v2845_v34 }
 0x2d9   : > { %v4712_v21 = vpop.f32.mrf.mxu1 }
 0x2dc   : > { %v3081_v36 = vpop.f32.mrf.mxu1 }
 0x2de   : > { %v3083_v9 = vpop.f32.mrf.mxu1 }
 0x2f0   : > { %v2998_v42 = vpop.f32.mrf.mxu0 }
 0x2f1   : > { %v2999_v17 = vadd.f32 %v2998_v42, %v2916_v29 }
 0x2f2   : > { %v3000_v23 = vpop.f32.mrf.mxu0 }
 0x2f3   : > { %v3001_v52 = vadd.f32 %v3000_v23, %v2918_v18  ;;  %v4719_v45 = vadd.f32 %v3081_v36, %v2999_v17 }
 0x2f5   : > { %3427 = vrot.lane.b32.xlu0 %v4719_v45, %s4085_s19  ;;  %v3087_v28 = vpop.f32.mrf.mxu1  ;;  %v3084_v0 = vadd.f32 %v3083_v9, %v3001_v52 }
 0x2f7   : > { %v3004_v20 = vpop.f32.mrf.mxu0  ;;  %v3089_v7 = vpop.f32.mrf.mxu1 }
 0x2f8   : > { %v3005_v3 = vadd.f32 %v3004_v20, %v2922_v16 }
 0x2f9   : > { %v3006_v43 = vpop.f32.mrf.mxu0  ;;  %3429 = vrot.lane.b32.xlu0 %v3084_v0, %s4085_s19 }
 0x2fa   : > { %v3007_v8 = vadd.f32 %v3006_v43, %v2924_v55  ;;  %v4725_v33 = vadd.f32 %v3087_v28, %v3005_v3  ;;  %v2930_v43 = vadd.f32 %v4712_v21, %v2847_v6 }
 0x2fb   : > { %v3093_v31 = vpop.f32.mrf.mxu1 }
 0x2fc   : > { %v3090_v62 = vadd.f32 %v3089_v7, %v3007_v8  ;;  %3433 = vrot.lane.b32.xlu1 %v4725_v33, %s4085_s19 }
 0x2fd   : > { %v3010_v58 = vpop.f32.mrf.mxu0  ;;  %v3095_v19 = vpop.f32.mrf.mxu1 }
 0x2fe   : > { %v3011_v37 = vadd.f32 %v3010_v58, %v2928_v11  ;;  %3435 = vrot.lane.b32.xlu0 %v3090_v62, %s4085_s19 }
 0x2ff   : > { %v3012_v57 = vpop.f32.mrf.mxu0 }
 0x300   : > { %v4731_v54 = vadd.f32 %v3093_v31, %v3011_v37  ;;  %v3800_v22 = vpop.f32.mrf.mxu1  ;;  %v3013_v11 = vadd.f32 %v3012_v57, %v2930_v43 }
 0x302   : > { %3439 = vrot.lane.b32.xlu0 %v4731_v54, %s4085_s19  ;;  %v3801_v50 = vpop.f32.mrf.mxu1 }
 0x303   : > { %v3802_v14 = vadd.f32 %v3801_v50, %v3800_v22  ;;  %v3096_v22 = vadd.f32 %v3095_v19, %v3013_v11  ;;  %v3470_v50 = vld [vmem:[#allocation4] sm:$0x7] }
 0x305   : > { %v3165_v39 = vadd.f32 %v3802_v14, %v4616_v4 }
 0x306   : > { %v3803_v51 = vpop.f32.mrf.mxu1 }
 0x308   : > { %v3804_v38 = vpop.f32.mrf.mxu1 }
 0x309   : > { %v3805_v32 = vadd.f32 %v3804_v38, %v3803_v51  ;;  %v3475_v51 = vrot.slane %v3470_v50, %v396_v48 }
 0x30b   : > { %v3806_v59 = vpop.f32.mrf.mxu1  ;;  %v3170_v23 = vadd.f32 %v3805_v32, %v4625_v25 }
 0x30d   : > { %v3807_v61 = vpop.f32.mrf.mxu1 }
 0x30e   : > { %v3808_v26 = vadd.f32 %v3807_v61, %v3806_v59  ;;  %v3479_v61 = vrot.slane %v3470_v50, %v400_v41 }
 0x310   : > { %v3175_v34 = vadd.f32 %v3808_v26, %v4628_v63 }
 0x318   : > { %v3841_v12 = vpop.f32.mrf.mxu0 }
 0x31a   : > { %v3842_v60 = vpop.f32.mrf.mxu0 }
 0x31b   : > { %v3843_v24 = vadd.f32 %v3842_v60, %v3841_v12 }
 0x31c   : > { %v3844_v44 = vpop.f32.mrf.mxu0 }
 0x31d   : > { %v3245_v29 = vadd.f32 %v3843_v24, %v3165_v39 }
 0x31e   : > { %v3845_v46 = vpop.f32.mrf.mxu0 }
 0x31f   : > { %v3846_v36 = vadd.f32 %v3845_v46, %v3844_v44 }
 0x320   : > { %v3847_v56 = vpop.f32.mrf.mxu0 }
 0x321   : > { %v3250_v28 = vadd.f32 %v3846_v36, %v3170_v23 }
 0x322   : > { %v3848_v13 = vpop.f32.mrf.mxu0 }
 0x323   : > { %v3849_v20 = vadd.f32 %v3848_v13, %v3847_v56 }
 0x324   : > { %v3882_v10 = vpop.f32.mrf.mxu1 }
 0x325   : > { %v3255_v47 = vadd.f32 %v3849_v20, %v3175_v34 }
 0x326   : > { %v3883_v30 = vpop.f32.mrf.mxu1 }
 0x327   : > { %v3884_v42 = vadd.f32 %v3883_v30, %v3882_v10  ;;  %v3404_v18 = vpop.f32.mrf.mxu0 }
 0x328   : > { %v3885_v17 = vpop.f32.mrf.mxu1 }
 0x329   : > { %v3325_v52 = vadd.f32 %v3884_v42, %v3245_v29  ;;  %v3925_v9 = vpop.f32.mrf.mxu0 }
 0x32a   : > { %v3886_v16 = vpop.f32.mrf.mxu1 }
 0x32b   : > { %v3405_v4 = vadd.f32 %v3404_v18, %v3325_v52  ;;  %v3887_v55 = vadd.f32 %v3886_v16, %v3885_v17  ;;  %v3409_v0 = vpop.f32.mrf.mxu0 }
 0x32c   : > { %v3888_v3 = vpop.f32.mrf.mxu1 }
 0x32d   : > { %v3330_v8 = vadd.f32 %v3887_v55, %v3250_v28  ;;  %3431 = vrot.lane.b32.xlu1 %v3405_v4, %s4085_s19  ;;  %v3928_v25 = vpop.f32.mrf.mxu0 }
 0x32e   : > { %v3889_v7 = vpop.f32.mrf.mxu1 }
 0x32f   : > { %v3410_v15 = vadd.f32 %v3409_v0, %v3330_v8  ;;  %v3890_v62 = vadd.f32 %v3889_v7, %v3888_v3  ;;  %v3414_v58 = vpop.f32.mrf.mxu0 }
 0x331   : > { %v3335_v37 = vadd.f32 %v3890_v62, %v3255_v47  ;;  %3437 = vrot.lane.b32.xlu1 %v3410_v15, %s4085_s19  ;;  %v3931_v31 = vpop.f32.mrf.mxu0 }
 0x333   : > { %v3415_v21 = vadd.f32 %v3414_v58, %v3335_v37 }
 0x335   : > { %3441 = vrot.lane.b32.xlu1 %v3096_v22, %s4085_s19  ;;  %3443 = vrot.lane.b32.xlu0 %v3415_v21, %s4085_s19 }
 0x367   : > { %v3428_v63 = vpop.permute.xlu0 %3427 }
 0x36b   : > { %v3430_v57 = vpop.permute.xlu0 %3429 }
 0x36c   : > { %v3446_v12 = vsel %vm3445_vm3, %v3428_v63, %v3430_v57 }
 0x36d   : > { %v3461_v38 = vmax.f32 %v4700_v5, %v3446_v12  ;;  %v3483_v5 = vrot.slane %v3470_v50, %v404_v49 }
 0x36e   : > { %v3434_v19 = vpop.permute.xlu1 %3433 }
 0x36f   : > { %v3487_v60 = vadd.f32 %v3475_v51, %v3461_v38 }
 0x370   : > { %v3436_v44 = vpop.permute.xlu0 %3435 }
 0x371   : > { %v3448_v59 = vsel %vm3445_vm3, %v3434_v19, %v3436_v44  ;;  %v3496_v46 = vmax.f32 %v3487_v60, 0.0 }
 0x372   : > { %v3464_v48 = vmax.f32 %v4704_v35, %v3448_v59 }
 0x373   : > { %3505 = vst [vmem:[%s4754_s23] sm:$0xff] %v3496_v46 }
 0x374   : > { %v3490_v14 = vadd.f32 %v3475_v51, %v3464_v48  ;;  %v3440_v13 = vpop.permute.xlu0 %3439 }
 0x376   : > { %v3499_v56 = vmax.f32 %v3490_v14, 0.0 }
 0x378   : > { %3508 = vst [vmem:[%s4754_s23 + $0x18] sm:$0xff] %v3499_v56 }
 0x39f   : > { %v3432_v24 = vpop.permute.xlu1 %3431 }
 0x3a0   : > { %v3447_v10 = vsel %vm3445_vm3, %v3430_v57, %v3432_v24  ;;  %v3463_v39 = vmax.f32 %v4719_v45, %v3432_v24 }
 0x3a1   : > { %v3462_v32 = vmax.f32 %v4702_v53, %v3447_v10 }
 0x3a2   : > { %v3489_v35 = vadd.f32 %v3483_v5, %v3463_v39 }
 0x3a3   : > { %v3488_v30 = vadd.f32 %v3479_v61, %v3462_v32  ;;  %v3438_v29 = vpop.permute.xlu1 %3437 }
 0x3a4   : > { %v3498_v36 = vmax.f32 %v3489_v35, 0.0  ;;  %v3449_v42 = vsel %vm3445_vm3, %v3436_v44, %v3438_v29  ;;  %v3466_v49 = vmax.f32 %v4725_v33, %v3438_v29 }
 0x3a5   : > { %v3497_v40 = vmax.f32 %v3488_v30, 0.0  ;;  %v3465_v41 = vmax.f32 %v4706_v27, %v3449_v42 }
 0x3a6   : > { %3507 = vst.msk [vmem:[%s4754_s23 + $0x10] sm:$0xff] %vm3445_vm3, %v3498_v36  ;;  %v3492_v18 = vadd.f32 %v3483_v5, %v3466_v49 }
 0x3a7   : > { %3506 = vst [vmem:[%s4754_s23 + $0x8] sm:$0xff] %v3497_v40  ;;  %v3491_v45 = vadd.f32 %v3479_v61, %v3465_v41  ;;  %v3442_v53 = vpop.permute.xlu1 %3441  ;;  %v3444_v17 = vpop.permute.xlu0 %3443 }
 0x3a8   : > { %v3501_v23 = vmax.f32 %v3492_v18, 0.0  ;;  %v3450_v26 = vsel %vm3445_vm3, %v3440_v13, %v3442_v53  ;;  %v3451_v33 = vsel %vm3445_vm3, %v3442_v53, %v3444_v17  ;;  %v3469_v52 = vmax.f32 %v4731_v54, %v3444_v17 }
 0x3a9   : > { %v3500_v9 = vmax.f32 %v3491_v45, 0.0  ;;  %v3467_v27 = vmax.f32 %v4708_v1, %v3450_v26  ;;  %v3468_v6 = vmax.f32 %v4710_v2, %v3451_v33 }
 0x3aa   : > { %3510 = vst.msk [vmem:[%s4754_s23 + $0x28] sm:$0xff] %vm3445_vm3, %v3501_v23  ;;  %v3495_v16 = vadd.f32 %v3483_v5, %v3469_v52 }
 0x3ab   : > { %3509 = vst [vmem:[%s4754_s23 + $0x20] sm:$0xff] %v3500_v9  ;;  %v3493_v28 = vadd.f32 %v3475_v51, %v3467_v27  ;;  %v3494_v20 = vadd.f32 %v3479_v61, %v3468_v6 }
 0x3ac   : > { %v3504_v4 = vmax.f32 %v3495_v16, 0.0 }
 0x3ad   : > { %v3502_v55 = vmax.f32 %v3493_v28, 0.0  ;;  %v3503_v0 = vmax.f32 %v3494_v20, 0.0 }
 0x3ae   : > { %3513 = vst.msk [vmem:[%s4754_s23 + $0x40] sm:$0xff] %vm3445_vm3, %v3504_v4 }
 0x3af   : > { %3511 = vst [vmem:[%s4754_s23 + $0x30] sm:$0xff] %v3502_v55  ;;  %3512 = vst [vmem:[%s4754_s23 + $0x38] sm:$0xff] %v3503_v0 }
 0x3b0 PF: > { %s16_s15 = sadd.s32 1, %s4077_s15  }
 0x3b1   : > { %p13_p6 = scmp.ge.s32.totalorder %s16_s15, 8  }
 0x3b3   :  { %15 = sbr.rel (!%p13_p6) target bundleno = 2 (0x2), region = 78 }
 0x3b8   :  { %3538 = vsyncpa [#allocation3], 1 }
 0x3b9   :  { %3540 = vsyncpa [#allocation3 + $0x1], 1 }
 0x3ba   :  { %3541 = vsyncpa [#allocation5], 1 }

// kernel: forward.3
= control target key start
LH: loop header
LB: loop body
LE: loop exit
PB: predicated region body
PF: predicated region fallthrough
CT: control target
= control target key end

     0   :  { %v9900_v2 = vmov 0.0   ;;  %vm153_vm0 = vcmask 1040384   ;;  %vm374_vm1 = vcmask 1046528   ;;  %vm508_vm2 = vcmask 523264   ;;  %s9884_s0 = inlined_call_operand.vmem [shape: f32[144,320], index: 0, kind: input, shape index: {}]   ;;  %s9885_s1 = inlined_call_operand.vmem [shape: f32[132,132], index: 1, kind: input, shape index: {}]   ;;  %s9886_s2 = inlined_call_operand.vmem [shape: f32[24,24], index: 2, kind: input, shape index: {}]   ;;  %s9887_s3 = inlined_call_operand.vmem [shape: f32[1280,64], index: 3, kind: input, shape index: {}]   ;;  %s9888_s4 = inlined_call_operand.vmem [shape: f32[1,32], index: 4, kind: input, shape index: {}]   ;;  %s9889_s5 = inlined_call_operand.vmem [shape: f32[1664,96], index: 5, kind: input, shape index: {}]   ;;  %s9890_s6 = inlined_call_operand.vmem [shape: f32[1,48], index: 6, kind: input, shape index: {}]   ;;  %s9891_s7 = inlined_call_operand.vmem [shape: f32[384,128], index: 7, kind: input, shape index: {}]   ;;  %s9892_s8 = inlined_call_operand.vmem [shape: f32[1,64], index: 8, kind: input, shape index: {}]   ;;  %s9893_s9 = inlined_call_operand.vmem [shape: f32[320,32], index: 9, kind: input, shape index: {}]   ;;  %s9894_s10 = inlined_call_operand.vmem [shape: f32[1,32], index: 10, kind: input, shape index: {}]   ;;  %s9895_s11 = inlined_call_operand.vmem [shape: f32[32,16], index: 11, kind: input, shape index: {}]   ;;  %s9896_s12 = inlined_call_operand.vmem [shape: f32[1,16], index: 12, kind: input, shape index: {}]   ;;  %s9897_s13 = inlined_call_operand.vmem [shape: f32[16,128], index: 13, kind: input, shape index: {}]   ;;  %s9898_s14 = inlined_call_operand.vmem [shape: f32[1,128], index: 14, kind: input, shape index: {}]   ;;  %s9899_s15 = inlined_call_operand.hbm [shape: f32[1,128], index: 15, kind: output, shape index: {}]  }
   0x1   :  { %v346_v0 = vld [vmem:[%s9887_s3 + $0x1b8] sm:$0xff]  ;;  %543 = vmatprep.subr.mxu0 %v9900_v2  ;;  %5379 = vmatprep.subr.mxu1 %v9900_v2  ;;  %v345_v3 = vld [vmem:[%s9887_s3 + $0x1b0] sm:$0xff]  ;;  %v344_v5 = vld [vmem:[%s9887_s3 + $0x1a8] sm:$0xff]  ;;  %vm6284_vm3 = vmmov 0  }
   0x2   :  { %v370_v1 = vld [vmem:[%s9887_s3 + $0x278] sm:$0xff]  ;;  %v369_v4 = vld [vmem:[%s9887_s3 + $0x270] sm:$0xff]  ;;  %544 = vmatpush1.msra.mxu0 %v346_v0  ;;  %v368_v6 = vld [vmem:[%s9887_s3 + $0x268] sm:$0xff]  ;;  %5395 = vmatprep.mubr.msk.f32.mxu1 %vm6284_vm3, %v9900_v2 }
   0x3   :  { %5380 = vmatpush3.msra.mxu1 %v370_v1  ;;  %545 = vmatprep.subr.mxu0 %v9900_v2  ;;  %v343_v7 = vld [vmem:[%s9887_s3 + $0x1a0] sm:$0xff]  ;;  %v53_v9 = vld [vmem:[%s9884_s0 + $0x10] sm:$0xff]  ;;  %v56_v10 = vld [vmem:[%s9884_s0 + $0x28] sm:$0xff] }
   0x4   :  { %5381 = vmatprep.subr.mxu1 %v9900_v2  ;;  %546 = vmatpush1.msra.mxu0 %v345_v3  ;;  %v367_v8 = vld [vmem:[%s9887_s3 + $0x260] sm:$0xff]  ;;  %v156_v11 = vrot.slane %v53_v9, 7  ;;  %v161_v12 = vrot.slane %v56_v10, 7  ;;  %v342_v14 = vld [vmem:[%s9887_s3 + $0x198] sm:$0xff]  ;;  %v341_v19 = vld [vmem:[%s9887_s3 + $0x190] sm:$0xff] }
   0x5   :  { %5382 = vmatpush3.msra.mxu1 %v369_v4  ;;  %547 = vmatprep.subr.mxu0 %v9900_v2  ;;  %v59_v13 = vld [vmem:[%s9884_s0 + $0x40] sm:$0xff]  ;;  %v366_v15 = vld [vmem:[%s9887_s3 + $0x258] sm:$0xff]  ;;  %v365_v20 = vld [vmem:[%s9887_s3 + $0x250] sm:$0xff] }
   0x6   :  { %5383 = vmatprep.subr.mxu1 %v9900_v2  ;;  %548 = vmatpush1.msra.mxu0 %v344_v5  ;;  %v6420_v16 = vsel %vm153_vm0, %v156_v11, %v161_v12  ;;  %v6423_v17 = vsel %vm153_vm0, 0.0, %v156_v11  ;;  %v167_v18 = vrot.slane %v59_v13, 7  ;;  %v62_v21 = vld [vmem:[%s9884_s0 + $0x58] sm:$0xff]  ;;  %v340_v22 = vld [vmem:[%s9887_s3 + $0x188] sm:$0xff]  ;;  %v339_v28 = vld [vmem:[%s9887_s3 + $0x180] sm:$0xff] }
   0x7   :  { %5384 = vmatpush3.msra.mxu1 %v368_v6  ;;  %549 = vmatprep.subr.mxu0 %v9900_v2  ;;  %v364_v23 = vld [vmem:[%s9887_s3 + $0x248] sm:$0xff]  ;;  %v381_v24 = vrot.slane %v6423_v17, 1  ;;  %v382_v25 = vrot.slane %v6420_v16, 1  ;;  %v173_v27 = vrot.slane %v62_v21, 7  ;;  %v363_v29 = vld [vmem:[%s9887_s3 + $0x240] sm:$0xff]  ;;  %v65_v30 = vld [vmem:[%s9884_s0 + $0x70] sm:$0xff] }
   0x8   :  { %5385 = vmatprep.subr.mxu1 %v9900_v2  ;;  %550 = vmatpush1.msra.mxu0 %v343_v7  ;;  %v6447_v26 = vsel %vm153_vm0, %v161_v12, %v167_v18  ;;  %v338_v32 = vld [vmem:[%s9887_s3 + $0x178] sm:$0xff]  ;;  %v337_v35 = vld [vmem:[%s9887_s3 + $0x170] sm:$0xff]  ;;  %v179_v36 = vrot.slane %v65_v30, 7  ;;  %v336_v39 = vld [vmem:[%s9887_s3 + $0x168] sm:$0xff] }
   0x9   :  { %5386 = vmatpush3.msra.mxu1 %v367_v8  ;;  %551 = vmatprep.subr.mxu0 %v9900_v2  ;;  %9921 = vst [vmem:[#allocation5_spill] sm:$0xff] %v6447_v26  ;;  %v383_v31 = vsel %vm374_vm1, %v381_v24, %v382_v25  ;;  %v388_v33 = vrot.slane %v6447_v26, 1  ;;  %v6468_v34 = vsel %vm153_vm0, %v167_v18, %v173_v27  ;;  %v306_v37 = vld [vmem:[%s9887_s3 + $0x78] sm:$0xff]  ;;  %v68_v41 = vld [vmem:[%s9884_s0 + $0x88] sm:$0xff]  ;;  %v335_v42 = vld [vmem:[%s9887_s3 + $0x160] sm:$0xff] }
   0xa   :  { %5387 = vmatprep.subr.mxu1 %v9900_v2  ;;  %552 = vmatpush1.msra.mxu0 %v342_v14  ;;  %v394_v40 = vrot.slane %v6468_v34, 1  ;;  %v6497_v43 = vsel %vm153_vm0, %v173_v27, %v179_v36  ;;  %v305_v44 = vld [vmem:[%s9887_s3 + $0x70] sm:$0xff]  ;;  %v185_v45 = vrot.slane %v68_v41, 7  ;;  %v334_v47 = vld [vmem:[%s9887_s3 + $0x158] sm:$0xff]  ;;  %v304_v48 = vld [vmem:[%s9887_s3 + $0x68] sm:$0xff] }
   0xb   :  { %5388 = vmatpush3.msra.mxu1 %v366_v15  ;;  %553 = vmatprep.subr.mxu0 %v9900_v2  ;;  %v389_v38 = vsel %vm374_vm1, %v382_v25, %v388_v33  ;;  %v400_v49 = vrot.slane %v6497_v43, 1  ;;  %v71_v50 = vld [vmem:[%s9884_s0 + $0xa0] sm:$0xff]  ;;  %v333_v51 = vld [vmem:[%s9887_s3 + $0x150] sm:$0xff]  ;;  %v332_v56 = vld [vmem:[%s9887_s3 + $0x148] sm:$0xff] }
   0xc   :  { %5389 = vmatprep.subr.mxu1 %v9900_v2  ;;  %554 = vmatpush1.msra.mxu0 %v341_v19  ;;  %v395_v46 = vsel %vm374_vm1, %v388_v33, %v394_v40  ;;  %v6525_v52 = vsel %vm153_vm0, %v179_v36, %v185_v45  ;;  %v303_v53 = vld [vmem:[%s9887_s3 + $0x60] sm:$0xff]  ;;  %v191_v54 = vrot.slane %v71_v50, 7  ;;  %v302_v57 = vld [vmem:[%s9887_s3 + $0x58] sm:$0xff]  ;;  %v301_v62 = vld [vmem:[%s9887_s3 + $0x50] sm:$0xff] }
   0xd   :  { %5390 = vmatpush3.msra.mxu1 %v365_v20  ;;  %555 = vmatprep.subr.mxu0 %v9900_v2  ;;  %v401_v55 = vsel %vm374_vm1, %v394_v40, %v400_v49  ;;  %v406_v58 = vrot.slane %v6525_v52, 1  ;;  %v74_v59 = vld [vmem:[%s9884_s0 + $0xb8] sm:$0xff]  ;;  %v331_v60 = vld [vmem:[%s9887_s3 + $0x140] sm:$0xff]  ;;  %v300_v3 = vld [vmem:[%s9887_s3 + $0x48] sm:$0xff] }
   0xe   :  { %5391 = vmatprep.subr.mxu1 %v9900_v2  ;;  %556 = vmatpush1.msra.mxu0 %v340_v22  ;;  %v6552_v61 = vsel %vm153_vm0, %v185_v45, %v191_v54  ;;  %v197_v63 = vrot.slane %v74_v59, 7  ;;  %v362_v1 = vld [vmem:[%s9887_s3 + $0x238] sm:$0xff]  ;;  %v77_v5 = vld [vmem:[%s9884_s0 + $0xd0] sm:$0xff]  ;;  %v299_v8 = vld [vmem:[%s9887_s3 + $0x40] sm:$0xff] }
   0xf   :  { %5392 = vmatpush3.msra.mxu1 %v364_v23  ;;  %557 = vmatprep.subr.mxu0 %v9900_v2  ;;  %v407_v0 = vsel %vm374_vm1, %v400_v49, %v406_v58  ;;  %v412_v4 = vrot.slane %v6552_v61, 1  ;;  %v361_v6 = vld [vmem:[%s9887_s3 + $0x230] sm:$0xff]  ;;  %v203_v9 = vrot.slane %v77_v5, 7  ;;  %v360_v11 = vld [vmem:[%s9887_s3 + $0x228] sm:$0xff]  ;;  %v298_v12 = vld [vmem:[%s9887_s3 + $0x38] sm:$0xff] }
  0x10   :  { %5393 = vmatprep.subr.mxu1 %v9900_v2  ;;  %558 = vmatpush1.msra.mxu0 %v339_v28  ;;  %v6579_v7 = vsel %vm153_vm0, %v191_v54, %v197_v63  ;;  %v80_v14 = vld [vmem:[%s9884_s0 + $0xe8] sm:$0xff]  ;;  %v359_v15 = vld [vmem:[%s9887_s3 + $0x220] sm:$0xff]  ;;  %v297_v19 = vld [vmem:[%s9887_s3 + $0x30] sm:$0xff] }
  0x11   :  { %5394 = vmatpush3.msra.mxu1 %v363_v29  ;;  %559 = vmatprep.subr.mxu0 %v9900_v2  ;;  %v413_v10 = vsel %vm374_vm1, %v406_v58, %v412_v4  ;;  %v418_v13 = vrot.slane %v6579_v7, 1  ;;  %v6606_v18 = vsel %vm153_vm0, %v197_v63, %v203_v9  ;;  %v209_v20 = vrot.slane %v80_v14, 7  ;;  %v358_v22 = vld [vmem:[%s9887_s3 + $0x218] sm:$0xff]  ;;  %v296_v23 = vld [vmem:[%s9887_s3 + $0x28] sm:$0xff]  ;;  %v83_v25 = vld [vmem:[%s9884_s0 + $0x100] sm:$0xff] }
  0x12   :  { %5396 = vmatmul.mubr.msk.f32.vlgmr.msra.gmra.mxu1 %vm508_vm2, %v383_v31  ;;  %560 = vmatpush1.msra.mxu0 %v338_v32  ;;  %v424_v24 = vrot.slane %v6606_v18, 1  ;;  %v357_v27 = vld [vmem:[%s9887_s3 + $0x210] sm:$0xff]  ;;  %v295_v29 = vld [vmem:[%s9887_s3 + $0x20] sm:$0xff]  ;;  %v215_v30 = vrot.slane %v83_v25, 7  ;;  %v356_v32 = vld [vmem:[%s9887_s3 + $0x208] sm:$0xff] }
  0x13   :  { %561 = vmatprep.subr.mxu0 %v9900_v2  ;;  %5398 = vmatprep.mubr.msk.f32.mxu1 %vm6284_vm3, %v9900_v2  ;;  %v419_v21 = vsel %vm374_vm1, %v412_v4, %v418_v13  ;;  %v6633_v28 = vsel %vm153_vm0, %v203_v9, %v209_v20  ;;  %v294_v33 = vld [vmem:[%s9887_s3 + $0x18] sm:$0xff] }
  0x14   :  { %562 = vmatpush1.msra.mxu0 %v337_v35  ;;  %877 = vmatprep.subr.mxu1 %v9900_v2  ;;  %v425_v31 = vsel %vm374_vm1, %v418_v13, %v424_v24  ;;  %v430_v35 = vrot.slane %v6633_v28, 1  ;;  %v86_v36 = vld [vmem:[%s9884_s0 + $0x118] sm:$0xff] }
  0x15   :  { %563 = vmatprep.subr.mxu0 %v9900_v2  ;;  %878 = vmatpush1.msra.mxu1 %v306_v37 }
  0x16   :  { %5399 = vmatmul.mubr.msk.f32.gmra.mxu1 %vm508_vm2, %v389_v38  ;;  %564 = vmatpush1.msra.mxu0 %v336_v39 }
  0x17   :  { %565 = vmatprep.subr.mxu0 %v9900_v2  ;;  %879 = vmatprep.subr.mxu1 %v9900_v2 }
  0x18   :  { %566 = vmatpush1.msra.mxu0 %v335_v42  ;;  %5401 = vmatprep.mubr.msk.f32.mxu1 %vm6284_vm3, %v9900_v2 }
  0x19   :  { %880 = vmatpush1.msra.mxu1 %v305_v44  ;;  %567 = vmatprep.subr.mxu0 %v9900_v2 }
  0x1a   :  { %5402 = vmatmul.mubr.msk.f32.gmra.mxu1 %vm508_vm2, %v395_v46  ;;  %881 = vmatprep.subr.mxu1 %v9900_v2 }
  0x1b   :  { %568 = vmatpush1.msra.mxu0 %v334_v47  ;;  %882 = vmatpush1.msra.mxu1 %v304_v48 }
  0x1c   :  { %569 = vmatprep.subr.mxu0 %v9900_v2  ;;  %883 = vmatprep.subr.mxu1 %v9900_v2 }
  0x1d   :  { %570 = vmatpush1.msra.mxu0 %v333_v51  ;;  %5404 = vmatprep.mubr.msk.f32.mxu1 %vm6284_vm3, %v9900_v2 }
  0x1e   :  { %884 = vmatpush1.msra.mxu1 %v303_v53  ;;  %571 = vmatprep.subr.mxu0 %v9900_v2 }
  0x1f   :  { %5405 = vmatmul.mubr.msk.f32.gmra.mxu1 %vm508_vm2, %v401_v55  ;;  %885 = vmatprep.subr.mxu1 %v9900_v2 }
  0x20   :  { %572 = vmatpush1.msra.mxu0 %v332_v56  ;;  %886 = vmatpush1.msra.mxu1 %v302_v57 }
  0x21   :  { %573 = vmatprep.subr.mxu0 %v9900_v2  ;;  %887 = vmatprep.subr.mxu1 %v9900_v2 }
  0x22   :  { %574 = vmatpush1.msra.mxu0 %v331_v60  ;;  %5407 = vmatprep.mubr.msk.f32.mxu1 %vm6284_vm3, %v9900_v2 }
  0x23   :  { %888 = vmatpush1.msra.mxu1 %v301_v62  ;;  %575 = vmatprep.subr.mxu0 %v9900_v2 }
  0x24   :  { %5408 = vmatmul.mubr.msk.f32.gmra.mxu1 %vm508_vm2, %v407_v0  ;;  %889 = vmatprep.subr.mxu1 %v9900_v2 }
  0x25   :  { %576 = vmatpush2.msra.mxu0 %v362_v1  ;;  %890 = vmatpush1.msra.mxu1 %v300_v3 }
  0x26   :  { %577 = vmatprep.subr.mxu0 %v9900_v2  ;;  %891 = vmatprep.subr.mxu1 %v9900_v2 }
  0x27   :  { %578 = vmatpush2.msra.mxu0 %v361_v6  ;;  %5410 = vmatprep.mubr.msk.f32.mxu1 %vm6284_vm3, %v9900_v2 }
  0x28   :  { %892 = vmatpush1.msra.mxu1 %v299_v8  ;;  %579 = vmatprep.subr.mxu0 %v9900_v2 }
  0x29   :  { %5411 = vmatmul.mubr.msk.f32.gmra.mxu1 %vm508_vm2, %v413_v10  ;;  %893 = vmatprep.subr.mxu1 %v9900_v2 }
  0x2a   :  { %580 = vmatpush2.msra.mxu0 %v360_v11  ;;  %894 = vmatpush1.msra.mxu1 %v298_v12 }
  0x2b   :  { %581 = vmatprep.subr.mxu0 %v9900_v2  ;;  %895 = vmatprep.subr.mxu1 %v9900_v2 }
  0x2c   :  { %582 = vmatpush2.msra.mxu0 %v359_v15  ;;  %5413 = vmatprep.mubr.msk.f32.mxu1 %vm6284_vm3, %v9900_v2 }
  0x2d   :  { %896 = vmatpush1.msra.mxu1 %v297_v19  ;;  %583 = vmatprep.subr.mxu0 %v9900_v2 }
  0x2e   :  { %5414 = vmatmul.mubr.msk.f32.gmra.mxu1 %vm508_vm2, %v419_v21  ;;  %897 = vmatprep.subr.mxu1 %v9900_v2 }
  0x2f   :  { %584 = vmatpush2.msra.mxu0 %v358_v22  ;;  %898 = vmatpush1.msra.mxu1 %v296_v23 }
  0x30   :  { %585 = vmatprep.subr.mxu0 %v9900_v2  ;;  %899 = vmatprep.subr.mxu1 %v9900_v2 }
  0x31   :  { %586 = vmatpush2.msra.mxu0 %v357_v27  ;;  %5416 = vmatprep.mubr.msk.f32.mxu1 %vm6284_vm3, %v9900_v2 }
  0x32   :  { %900 = vmatpush1.msra.mxu1 %v295_v29  ;;  %587 = vmatprep.subr.mxu0 %v9900_v2 }
  0x33   :  { %20 = vsyncpa [#allocation3], 0  ;;  %5417 = vmatmul.mubr.msk.f32.gmra.mxu1 %vm508_vm2, %v425_v31  ;;  %901 = vmatprep.subr.mxu1 %v9900_v2  ;;  %v355_v37 = vld [vmem:[%s9887_s3 + $0x200] sm:$0xff]  ;;  %v6660_v38 = vsel %vm153_vm0, %v209_v20, %v215_v30  ;;  %v293_v39 = vld [vmem:[%s9887_s3 + $0x10] sm:$0xff]  ;;  %v221_v40 = vrot.slane %v86_v36, 7  ;;  %v431_v41 = vsel %vm374_vm1, %v424_v24, %v430_v35  ;;  %vm1217_vm5 = vcmask 1045504  }
  0x34   :  { %588 = vmatpush2.msra.mxu0 %v356_v32  ;;  %902 = vmatpush1.msra.mxu1 %v294_v33  ;;  %v354_v42 = vld [vmem:[%s9887_s3 + $0x1f8] sm:$0xff]  ;;  %v292_v44 = vld [vmem:[%s9887_s3 + $0x8] sm:$0xff]  ;;  %v436_v45 = vrot.slane %v6660_v38, 1  ;;  %v89_v46 = vld [vmem:[%s9884_s0 + $0x130] sm:$0xff]  ;;  %vm1742_vm6 = vcmask 1044480   ;;  %vm2457_vm7 = vcmask 31744  }
  0x35   :  { %589 = vmatprep.subr.mxu0 %v9900_v2  ;;  %903 = vmatprep.subr.mxu1 %v9900_v2  ;;  %v353_v47 = vld [vmem:[%s9887_s3 + $0x1f0] sm:$0xff]  ;;  %v6687_v48 = vsel %vm153_vm0, %v215_v30, %v221_v40  ;;  %v291_v49 = vld [vmem:[%s9887_s3] sm:$0xff]  ;;  %v227_v50 = vrot.slane %v89_v46, 7  ;;  %v52_v51 = vld [vmem:[%s9884_s0 + $0x8] sm:$0xff]  ;;  %vm2421_vm8 = vcmask 1042432   ;;  %vm2509_vm9 = vcmask 1043456  }
  0x36   :  { %590 = vmatpush2.msra.mxu0 %v355_v37  ;;  %5419 = vmatprep.mubr.msk.f32.mxu1 %vm6284_vm3, %v9900_v2  ;;  %v55_v53 = vld [vmem:[%s9884_s0 + $0x20] sm:$0xff]  ;;  %v437_v54 = vsel %vm374_vm1, %v430_v35, %v436_v45  ;;  %v352_v55 = vld [vmem:[%s9887_s3 + $0x1e8] sm:$0xff]  ;;  %v322_v56 = vld [vmem:[%s9887_s3 + $0xf8] sm:$0xff]  ;;  %v442_v57 = vrot.slane %v6687_v48, 1  ;;  %v6724_v62 = vrot.slane %v52_v51, 7  ;;  %s6286_s16 = smov 32  }
  0x37   :  { %904 = vmatpush1.msra.mxu1 %v293_v39  ;;  %591 = vmatprep.subr.mxu0 %v9900_v2  ;;  %v51_v58 = vld [vmem:[%s9884_s0] sm:$0xff]  ;;  %v6716_v59 = vld [vmem:[%s9884_s0 + $0x18] sm:$0xff]  ;;  %v6721_v60 = vld [vmem:[%s9884_s0 + $0x148] sm:$0xff]  ;;  %v159_v63 = vrot.slane %v55_v53, 7  ;;  %v6737_v3 = vsel %vm153_vm0, %v221_v40, %v227_v50  ;;  %s6287_s28 = smov 64   ;;  %vm2748_vm10 = vcmask 261120  }
  0x38   :  { %5420 = vmatmul.mubr.msk.f32.gmra.mxu1 %vm508_vm2, %v431_v41  ;;  %905 = vmatprep.subr.mxu1 %v9900_v2  ;;  %v6729_v0 = vld [vmem:[%s9884_s0 + $0x38] sm:$0xff]  ;;  %v351_v1 = vld [vmem:[%s9887_s3 + $0x1e0] sm:$0xff]  ;;  %v321_v4 = vld [vmem:[%s9887_s3 + $0xf0] sm:$0xff]  ;;  %v6742_v5 = vrot.slane %v51_v58, 7  ;;  %v157_v6 = vrot.slane %v6716_v59, 7  ;;  %v233_v8 = vrot.slane %v6721_v60, 7  ;;  %v443_v9 = vsel %vm374_vm1, %v436_v45, %v442_v57 }
  0x39   :  { %592 = vmatpush2.msra.mxu0 %v354_v42  ;;  %906 = vmatpush1.msra.mxu1 %v292_v44  ;;  %v165_v10 = vrot.slane %v6729_v0, 7  ;;  %v6753_v11 = vld [vmem:[%s9884_s0 + $0x30] sm:$0xff]  ;;  %v350_v12 = vld [vmem:[%s9887_s3 + $0x1d8] sm:$0xff]  ;;  %v320_v13 = vld [vmem:[%s9887_s3 + $0xe8] sm:$0xff]  ;;  %v448_v14 = vrot.slane %v6737_v3, 1  ;;  %v6766_v15 = vsel %vm153_vm0, %v6724_v62, %v159_v63  ;;  %v6770_v19 = vsel %vm153_vm0, 0.0, %v6724_v62 }
  0x3a   :  { %593 = vmatprep.subr.mxu0 %v9900_v2  ;;  %907 = vmatprep.subr.mxu1 %v9900_v2  ;;  %v6775_v20 = vld [vmem:[%s9884_s0 + $0x160] sm:$0xff]  ;;  %v6781_v21 = vld [vmem:[%s9884_s0 + $0x50] sm:$0xff]  ;;  %v6790_v23 = vsel %vm153_vm0, %v6742_v5, %v157_v6  ;;  %v6794_v24 = vsel %vm153_vm0, 0.0, %v6742_v5  ;;  %v6797_v25 = vsel %vm153_vm0, %v227_v50, %v233_v8  ;;  %v163_v27 = vrot.slane %v6753_v11, 7  ;;  %v6812_v35 = vld [vmem:[%s9884_s0 + $0x48] sm:$0xff] }
  0x3b   :  { %594 = vmatpush2.msra.mxu0 %v353_v47  ;;  %5422 = vmatprep.mubr.msk.f32.mxu1 %vm6284_vm3, %v9900_v2  ;;  %v349_v22 = vld [vmem:[%s9887_s3 + $0x1d0] sm:$0xff]  ;;  %v319_v29 = vld [vmem:[%s9887_s3 + $0xe0] sm:$0xff]  ;;  %v378_v30 = vrot.slane %v6770_v19, 1  ;;  %v379_v31 = vrot.slane %v6766_v15, 1  ;;  %v6806_v32 = vsel %vm153_vm0, %v159_v63, %v165_v10  ;;  %v239_v33 = vrot.slane %v6775_v20, 7  ;;  %v6821_v39 = vld [vmem:[%s9884_s0 + $0x178] sm:$0xff] }
  0x3c   :  { %908 = vmatpush1.msra.mxu1 %v291_v49  ;;  %595 = vmatprep.subr.mxu0 %v9900_v2  ;;  %v449_v36 = vsel %vm374_vm1, %v442_v57, %v448_v14  ;;  %v171_v37 = vrot.slane %v6781_v21, 7  ;;  %v348_v40 = vld [vmem:[%s9887_s3 + $0x1c8] sm:$0xff]  ;;  %v318_v41 = vld [vmem:[%s9887_s3 + $0xd8] sm:$0xff]  ;;  %v375_v42 = vrot.slane %v6794_v24, 1  ;;  %v376_v44 = vrot.slane %v6790_v23, 1  ;;  %v347_v51 = vld [vmem:[%s9887_s3 + $0x1c0] sm:$0xff] }
  0x3d   :  { %5423 = vmatmul.mubr.msk.f32.gmra.mxu1 %vm508_vm2, %v437_v54  ;;  %909 = vmatprep.subr.mxu1 %v9900_v2  ;;  %v454_v45 = vrot.slane %v6797_v25, 1  ;;  %v6837_v46 = vld [vmem:[%s9884_s0 + $0x68] sm:$0xff]  ;;  %v386_v47 = vrot.slane %v6806_v32, 1  ;;  %v6842_v49 = vsel %vm153_vm0, %v157_v6, %v163_v27  ;;  %v169_v50 = vrot.slane %v6812_v35, 7  ;;  %v317_v57 = vld [vmem:[%s9887_s3 + $0xd0] sm:$0xff]  ;;  %v66_v20 = vld [vmem:[%s9884_s0 + $0x78] sm:$0xff] }
  0x3e   :  { %596 = vmatpush2.msra.mxu0 %v352_v55  ;;  %910 = vmatpush2.msra.mxu1 %v322_v56  ;;  %v380_v53 = vsel %vm374_vm1, %v378_v30, %v379_v31  ;;  %v6852_v54 = vsel %vm153_vm0, %v233_v8, %v239_v33  ;;  %v245_v55 = vrot.slane %v6821_v39, 7  ;;  %v6858_v56 = vld [vmem:[%s9884_s0 + $0x60] sm:$0xff]  ;;  %v6864_v58 = vsel %vm153_vm0, %v165_v10, %v171_v37  ;;  %v101_v60 = vld [vmem:[%s9884_s0 + $0x190] sm:$0xff]  ;;  %v316_v11 = vld [vmem:[%s9887_s3 + $0xc8] sm:$0xff] }
  0x3f   :  { %597 = vmatprep.subr.mxu0 %v9900_v2  ;;  %911 = vmatprep.subr.mxu1 %v9900_v2  ;;  %9922 = vst [vmem:[#allocation6_spill] sm:$0xff] %v6852_v54  ;;  %v177_v59 = vrot.slane %v6837_v46, 7  ;;  %v377_v63 = vsel %vm374_vm1, %v375_v42, %v376_v44  ;;  %v455_v0 = vsel %vm374_vm1, %v448_v14, %v454_v45  ;;  %v460_v8 = vrot.slane %v6852_v54, 1  ;;  %v314_v39 = vld [vmem:[%s9887_s3 + $0xb8] sm:$0xff]  ;;  %vm7020_vm4 = vmneg %vm153_vm0  ;;  %v99_v54 = vld [vmem:[%s9884_s0 + $0x180] sm:$0xff] }
  0x40   :  { %598 = vmatpush2.msra.mxu0 %v351_v1  ;;  %5425 = vmatprep.mubr.msk.f32.mxu1 %vm6284_vm3, %v9900_v2  ;;  %v384_v1 = vrot.slane %v6842_v49, 1  ;;  %v387_v6 = vsel %vm374_vm1, %v379_v31, %v386_v47  ;;  %v175_v10 = vrot.slane %v6858_v56, 7  ;;  %v251_v14 = vrot.slane %v101_v60, 7  ;;  %v70_v31 = vld [vmem:[%s9884_s0 + $0x98] sm:$0xff]  ;;  %v312_v60 = vld [vmem:[%s9887_s3 + $0xa8] sm:$0xff] }
  0x41   :  { %912 = vmatpush2.msra.mxu1 %v321_v4  ;;  %599 = vmatprep.subr.mxu0 %v9900_v2  ;;  %v6878_v4 = vld [vmem:[%s9884_s0 + $0x80] sm:$0xff]  ;;  %v6900_v21 = vsel %vm153_vm0, %v171_v37, %v177_v59  ;;  %v181_v37 = vrot.slane %v66_v20, 7  ;;  %v189_v46 = vrot.slane %v70_v31, 7  ;;  %vm2759_vm11 = vcmask 785408  }
  0x42   :  { %5426 = vmatmul.mubr.msk.f32.gmra.mxu1 %vm508_vm2, %v443_v9  ;;  %913 = vmatprep.subr.mxu1 %v9900_v2  ;;  %v6883_v9 = vsel %vm153_vm0, %v163_v27, %v169_v50  ;;  %v315_v27 = vld [vmem:[%s9887_s3 + $0xc0] sm:$0xff]  ;;  %v6926_v42 = vsel %vm153_vm0, %v245_v55, %v251_v14  ;;  %vm3417_vm12 = vcmask 1041408   ;;  %vm4175_vm13 = vcmask 195584  }
  0x43   :  { %600 = vmatpush2.msra.mxu0 %v350_v12  ;;  %914 = vmatpush2.msra.mxu1 %v320_v13  ;;  %v392_v12 = vrot.slane %v6864_v58, 1  ;;  %v6893_v13 = vsel %vm153_vm0, %v239_v33, %v245_v55  ;;  %v390_v30 = vrot.slane %v6883_v9, 1  ;;  %v461_v33 = vsel %vm374_vm1, %v454_v45, %v460_v8  ;;  %9924 = vst [vmem:[#allocation8_spill] sm:$0xff] %v6926_v42 }
  0x44   :  { %601 = vmatprep.subr.mxu0 %v9900_v2  ;;  %915 = vmatprep.subr.mxu1 %v9900_v2  ;;  %9923 = vst [vmem:[#allocation7_spill] sm:$0xff] %v6893_v13  ;;  %v466_v35 = vrot.slane %v6893_v13, 1  ;;  %v472_v56 = vrot.slane %v6926_v42, 1  ;;  %v9936_v42 = vmov 0.0   ;;  %vm4284_vm14 = vcmask 392192  }
  0x45   :  { %602 = vmatpush2.msra.mxu0 %v349_v22  ;;  %5428 = vmatprep.mubr.msk.f32.mxu1 %vm6284_vm3, %v9900_v2  ;;  %v183_v22 = vrot.slane %v6878_v4, 7  ;;  %v72_v4 = vld [vmem:[%s9884_s0 + $0xa8] sm:$0xff]  ;;  %vm4287_vm15 = vcmask 130048  }
  0x46   :  { %916 = vmatpush2.msra.mxu1 %v319_v29  ;;  %603 = vmatprep.subr.mxu0 %v9900_v2  ;;  %v385_v29 = vsel %vm374_vm1, %v376_v44, %v384_v1  ;;  %v69_v44 = vld [vmem:[%s9884_s0 + $0x90] sm:$0xff]  ;;  %v467_v55 = vsel %vm374_vm1, %v460_v8, %v466_v35  ;;  %v76_v8 = vld [vmem:[%s9884_s0 + $0xc8] sm:$0xff]  ;;  %v473_v14 = vsel %vm374_vm1, %v466_v35, %v472_v56  ;;  %v75_v35 = vld [vmem:[%s9884_s0 + $0xc0] sm:$0xff] }
  0x47   :  { %5429 = vmatmul.mubr.msk.f32.gmra.mxu1 %vm508_vm2, %v449_v36  ;;  %917 = vmatprep.subr.mxu1 %v9900_v2  ;;  %v6917_v36 = vsel %vm153_vm0, %v169_v50, %v175_v10  ;;  %v6933_v45 = vsel %vm153_vm0, %v177_v59, %v183_v22  ;;  %v313_v50 = vld [vmem:[%s9887_s3 + $0xb0] sm:$0xff]  ;;  %v187_v59 = vrot.slane %v69_v44, 7 }
  0x48   :  { %604 = vmatpush2.msra.mxu0 %v348_v40  ;;  %918 = vmatpush2.msra.mxu1 %v318_v41  ;;  %v393_v40 = vsel %vm374_vm1, %v386_v47, %v392_v12  ;;  %v398_v41 = vrot.slane %v6900_v21, 1  ;;  %v73_v47 = vld [vmem:[%s9884_s0 + $0xb0] sm:$0xff] }
  0x49   :  { %605 = vmatprep.subr.mxu0 %v9900_v2  ;;  %919 = vmatprep.subr.mxu1 %v9900_v2  ;;  %v6976_v20 = vsel %vm153_vm0, %v181_v37, %v187_v59 }
  0x4a   :  { %606 = vmatpush2.msra.mxu0 %v347_v51  ;;  %607 = vmatprep.mubr.f32.mxu0 %v380_v53  ;;  %v391_v51 = vsel %vm374_vm1, %v384_v1, %v390_v30  ;;  %v396_v53 = vrot.slane %v6917_v36, 1  ;;  %v195_v1 = vrot.slane %v73_v47, 7  ;;  %v199_v47 = vrot.slane %v75_v35, 7 }
  0x4b   :  { %5431 = vmatprep.mubr.msk.f32.mxu1 %vm6284_vm3, %v9900_v2  ;;  %920 = vmatpush2.msra.mxu1 %v317_v57  ;;  %v6948_v57 = vsel %vm153_vm0, %v175_v10, %v181_v37  ;;  %v311_v10 = vld [vmem:[%s9887_s3 + $0xa0] sm:$0xff] }
  0x4c   :  { %608 = vmatmul.mubr.f32.vlgmr.msra.gmra.mxu0 %v377_v63  ;;  %5432 = vmatmul.mubr.msk.f32.gmra.mxu1 %vm508_vm2, %v455_v0  ;;  %v399_v63 = vsel %vm374_vm1, %v392_v12, %v398_v41  ;;  %v404_v0 = vrot.slane %v6933_v45, 1  ;;  %v402_v12 = vrot.slane %v6948_v57, 1  ;;  %v6987_v31 = vsel %vm153_vm0, %v189_v46, %v195_v1  ;;  %v79_v37 = vld [vmem:[%s9884_s0 + $0xe0] sm:$0xff] }
  0x4d   :  { %921 = vmatprep.subr.mxu1 %v9900_v2  ;;  %612 = vmatprep.mubr.f32.mxu0 %v387_v6  ;;  %v6962_v6 = vsel %vm153_vm0, %v183_v22, %v189_v46  ;;  %v193_v22 = vrot.slane %v72_v4, 7  ;;  %v416_v44 = vrot.slane %v6987_v31, 1 }
  0x4e   :  { %922 = vmatpush2.msra.mxu1 %v316_v11  ;;  %5434 = vmatprep.mubr.msk.f32.mxu1 %vm6284_vm3, %v9900_v2  ;;  %v397_v11 = vsel %vm374_vm1, %v390_v30, %v396_v53  ;;  %v410_v30 = vrot.slane %v6962_v6, 1 }
  0x4f   :  { %923 = vmatprep.subr.mxu1 %v9900_v2  ;;  %5446 = vmatprep.subr.mxu0 %v9900_v2  ;;  %v7004_v46 = vsel %vm153_vm0, %v187_v59, %v193_v22  ;;  %v78_v59 = vld [vmem:[%s9884_s0 + $0xd8] sm:$0xff] }
  0x50   :  { %924 = vmatpush2.msra.mxu1 %v315_v27  ;;  %613 = vmatmul.mubr.f32.gmra.mxu0 %v385_v29  ;;  %v310_v27 = vld [vmem:[%s9887_s3 + $0x98] sm:$0xff]  ;;  %v405_v29 = vsel %vm374_vm1, %v398_v41, %v404_v0  ;;  %v408_v41 = vrot.slane %v6976_v20, 1  ;;  %9925 = vst [vmem:[#allocation9_spill] sm:$0xff] %v7004_v46  ;;  %v414_v4 = vrot.slane %v7004_v46, 1 }
  0x51   :  { %5435 = vmatmul.mubr.msk.f32.gmra.mxu1 %vm508_vm2, %v461_v33  ;;  %925 = vmatprep.subr.mxu1 %v9900_v2  ;;  %v201_v33 = vrot.slane %v76_v8, 7  ;;  %v417_v8 = vsel %vm374_vm1, %v410_v30, %v416_v44 }
  0x52   :  { %926 = vmatpush2.msra.mxu1 %v314_v39  ;;  %617 = vmatprep.mubr.f32.mxu0 %v393_v40  ;;  %v309_v39 = vld [vmem:[%s9887_s3 + $0x90] sm:$0xff]  ;;  %v403_v40 = vsel %vm374_vm1, %v396_v53, %v402_v12 }
  0x53   :  { %927 = vmatprep.subr.mxu1 %v9900_v2  ;;  %5437 = vmatprep.mubr.msk.f32.mxu1 %vm6284_vm3, %v9900_v2  ;;  %v7014_v53 = vsel %vm153_vm0, %v195_v1, %v201_v33  ;;  %v409_v1 = vsel %vm374_vm1, %v402_v12, %v408_v41 }
  0x54   :  { %928 = vmatpush2.msra.mxu1 %v313_v50  ;;  %618 = vmatmul.mubr.f32.gmra.mxu0 %v391_v51  ;;  %v308_v50 = vld [vmem:[%s9887_s3 + $0x88] sm:$0xff]  ;;  %v411_v51 = vsel %vm374_vm1, %v404_v0, %v410_v30  ;;  %9926 = vst [vmem:[#allocation10_spill] sm:$0xff] %v7014_v53  ;;  %v307_v0 = vld [vmem:[%s9887_s3 + $0x80] sm:$0xff] }
  0x55   :  { %5438 = vmatmul.mubr.msk.f32.gmra.mxu1 %vm508_vm2, %v467_v55  ;;  %929 = vmatprep.subr.mxu1 %v9900_v2  ;;  %v207_v55 = vrot.slane %v79_v37, 7 }
  0x56   :  { %930 = vmatpush2.msra.mxu1 %v312_v60  ;;  %622 = vmatprep.mubr.f32.mxu0 %v399_v63  ;;  %v9927_v60 = vmov 0  ;;  %v82_v63 = vld [vmem:[%s9884_s0 + $0xf8] sm:$0xff] }
  0x57   :  { %931 = vmatprep.subr.mxu1 %v9900_v2  ;;  %5440 = vmatprep.mubr.msk.f32.mxu1 %vm6284_vm3, %v9900_v2  ;;  %v9928_v60 = vsel %vm7020_vm4, 4294967295, %v9927_v60  ;;  %v7044_v12 = vsel %vm153_vm0, %v201_v33, %v207_v55  ;;  %v1192_v33 = vld [vmem:[%s9887_s3 + $0x2f8] sm:$0xff] }
  0x58   :  { %932 = vmatpush2.msra.mxu1 %v311_v10  ;;  %623 = vmatmul.mubr.f32.gmra.mxu0 %v397_v11  ;;  %9929 = vst [vmem:[#allocation11_spill] sm:$0xff] %v9928_v60  ;;  %v422_v10 = vrot.slane %v7014_v53, 1  ;;  %v7037_v11 = vsel %vm153_vm0, %v193_v22, %v199_v47  ;;  %9931 = vst [vmem:[#allocation13_spill] sm:$0xff] %v7044_v12  ;;  %v81_v22 = vld [vmem:[%s9884_s0 + $0xf0] sm:$0xff]  ;;  %v428_v37 = vrot.slane %v7044_v12, 1  ;;  %v96_v60 = vld [vmem:[%s9884_s0 + $0x168] sm:$0xff] }
  0x59   :  { %5441 = vmatmul.mubr.msk.f32.gmra.mxu1 %vm508_vm2, %v473_v14  ;;  %933 = vmatprep.subr.mxu1 %v9900_v2  ;;  %9930 = vst [vmem:[#allocation12_spill] sm:$0xff] %v7037_v11  ;;  %v213_v14 = vrot.slane %v82_v63, 7  ;;  %v420_v30 = vrot.slane %v7037_v11, 1 }
  0x5a   :  { %934 = vmatpush2.msra.mxu1 %v310_v27  ;;  %627 = vmatprep.mubr.f32.mxu0 %v405_v29  ;;  %v330_v27 = vld [vmem:[%s9887_s3 + $0x138] sm:$0xff]  ;;  %v85_v29 = vld [vmem:[%s9884_s0 + $0x110] sm:$0xff]  ;;  %v423_v35 = vsel %vm374_vm1, %v416_v44, %v422_v10  ;;  %v429_v63 = vsel %vm374_vm1, %v422_v10, %v428_v37  ;;  %v328_v10 = vld [vmem:[%s9887_s3 + $0x128] sm:$0xff] }
  0x5b   :  { %935 = vmatprep.subr.mxu1 %v9900_v2  ;;  %5443 = vmatprep.mubr.msk.f32.mxu1 %vm6284_vm3, %v9900_v2  ;;  %v329_v44 = vld [vmem:[%s9887_s3 + $0x130] sm:$0xff] }
  0x5c   :  { %936 = vmatpush2.msra.mxu1 %v309_v39  ;;  %628 = vmatmul.mubr.f32.gmra.mxu0 %v403_v40  ;;  %v7070_v40 = vsel %vm153_vm0, %v207_v55, %v213_v14 }
  0x5d   :  { %5444 = vmatmul.mubr.msk.f32.gmra.mxu1 %vm508_vm2, %v472_v56  ;;  %937 = vmatprep.subr.mxu1 %v9900_v2  ;;  %v205_v56 = vrot.slane %v78_v59, 7  ;;  %9932 = vst [vmem:[#allocation14_spill] sm:$0xff] %v7070_v40  ;;  %v1191_v59 = vld [vmem:[%s9887_s3 + $0x2f0] sm:$0xff] }
  0x5e   :  { %938 = vmatpush2.msra.mxu1 %v308_v50  ;;  %632 = vmatprep.mubr.f32.mxu0 %v411_v51  ;;  %v84_v50 = vld [vmem:[%s9884_s0 + $0x108] sm:$0xff]  ;;  %v421_v51 = vsel %vm374_vm1, %v414_v4, %v420_v30 }
  0x5f   :  { %939 = vmatprep.subr.mxu1 %v9900_v2  ;;  %4886 = vmatprep.mubr.msk.f32.mxu1 %vm7020_vm4, %v6724_v62  ;;  %v415_v62 = vsel %vm374_vm1, %v408_v41, %v414_v4  ;;  %v7067_v39 = vsel %vm153_vm0, %v199_v47, %v205_v56  ;;  %v219_v41 = vrot.slane %v85_v29, 7  ;;  %v88_v47 = vld [vmem:[%s9884_s0 + $0x128] sm:$0xff] }
  0x60   :  { %940 = vmatpush2.msra.mxu1 %v307_v0  ;;  %633 = vmatmul.mubr.f32.gmra.mxu0 %v409_v1  ;;  %v426_v55 = vrot.slane %v7067_v39, 1  ;;  %v434_v0 = vrot.slane %v7070_v40, 1  ;;  %v225_v4 = vrot.slane %v88_v47, 7 }
  0x61   :  { %4888 = vmatmul.mubr.msk.f32.vlgmr.msra.gmra.mxu1 %vm7020_vm4, %v6742_v5  ;;  %637 = vmatprep.mubr.f32.mxu0 %v417_v8  ;;  %v211_v5 = vrot.slane %v81_v22, 7  ;;  %v217_v8 = vrot.slane %v84_v50, 7  ;;  %v87_v22 = vld [vmem:[%s9884_s0 + $0x120] sm:$0xff] }
  0x62   :  { %946 = vmatprep.mubr.f32.mxu1 %v6766_v15  ;;  %5447 = vmatpush3.msra.mxu0 %v330_v27  ;;  %v7096_v27 = vsel %vm153_vm0, %v213_v14, %v219_v41  ;;  %v427_v14 = vsel %vm374_vm1, %v420_v30, %v426_v55  ;;  %v7122_v47 = vsel %vm153_vm0, %v219_v41, %v225_v4 }
  0x63   :  { %5448 = vmatprep.subr.mxu0 %v9900_v2  ;;  %1385 = vmatprep.subr.mxu1 %v9900_v2  ;;  %v7093_v1 = vsel %vm153_vm0, %v205_v56, %v211_v5  ;;  %9933 = vst [vmem:[#allocation15_spill] sm:$0xff] %v7096_v27  ;;  %v91_v56 = vld [vmem:[%s9884_s0 + $0x140] sm:$0xff]  ;;  %v7119_v50 = vsel %vm153_vm0, %v211_v5, %v217_v8  ;;  %v94_v5 = vld [vmem:[%s9884_s0 + $0x158] sm:$0xff] }
  0x64   :  { %638 = vmatmul.mubr.f32.gmra.mxu0 %v415_v62  ;;  %1386 = vmatpush1.msra.mxu1 %v1192_v33  ;;  %v432_v29 = vrot.slane %v7093_v1, 1  ;;  %v1190_v62 = vld [vmem:[%s9887_s3 + $0x2e8] sm:$0xff]  ;;  %v435_v33 = vsel %vm374_vm1, %v428_v37, %v434_v0  ;;  %v231_v30 = vrot.slane %v91_v56, 7  ;;  %v327_v37 = vld [vmem:[%s9887_s3 + $0x120] sm:$0xff] }
  0x65   :  { %947 = vmatmul.mubr.f32.gmra.mxu1 %v6790_v23  ;;  %642 = vmatprep.mubr.f32.mxu0 %v423_v35  ;;  %v440_v35 = vrot.slane %v7096_v27, 1 }
  0x66   :  { %951 = vmatprep.mubr.f32.mxu1 %v6806_v32  ;;  %5449 = vmatpush3.msra.mxu0 %v329_v44  ;;  %v223_v44 = vrot.slane %v87_v22, 7  ;;  %v433_v41 = vsel %vm374_vm1, %v426_v55, %v432_v29  ;;  %v237_v55 = vrot.slane %v94_v5, 7 }
  0x67   :  { %5450 = vmatprep.subr.mxu0 %v9900_v2  ;;  %1387 = vmatprep.subr.mxu1 %v9900_v2  ;;  %v441_v22 = vsel %vm374_vm1, %v434_v0, %v440_v35  ;;  %v326_v0 = vld [vmem:[%s9887_s3 + $0x118] sm:$0xff] }
  0x68   :  { %643 = vmatmul.mubr.f32.gmra.mxu0 %v421_v51  ;;  %1388 = vmatpush1.msra.mxu1 %v1191_v59  ;;  %v90_v51 = vld [vmem:[%s9884_s0 + $0x138] sm:$0xff]  ;;  %v438_v59 = vrot.slane %v7119_v50, 1  ;;  %v7145_v56 = vsel %vm153_vm0, %v217_v8, %v223_v44  ;;  %v97_v8 = vld [vmem:[%s9884_s0 + $0x170] sm:$0xff] }
  0x69   :  { %952 = vmatmul.mubr.f32.gmra.mxu1 %v6842_v49  ;;  %647 = vmatprep.mubr.f32.mxu0 %v429_v63  ;;  %v1189_v63 = vld [vmem:[%s9887_s3 + $0x2e0] sm:$0xff]  ;;  %9934 = vst [vmem:[#allocation16_spill] sm:$0xff] %v7145_v56 }
  0x6a   :  { %956 = vmatprep.mubr.f32.mxu1 %v6864_v58  ;;  %5451 = vmatpush3.msra.mxu0 %v328_v10  ;;  %v446_v10 = vrot.slane %v7122_v47, 1 }
  0x6b   :  { %5452 = vmatprep.subr.mxu0 %v9900_v2  ;;  %1389 = vmatprep.subr.mxu1 %v9900_v2 }
  0x6c   :  { %648 = vmatmul.mubr.f32.gmra.mxu0 %v427_v14  ;;  %1390 = vmatpush1.msra.mxu1 %v1190_v62  ;;  %v229_v14 = vrot.slane %v90_v51, 7  ;;  %v7148_v62 = vsel %vm153_vm0, %v225_v4, %v231_v30  ;;  %v439_v4 = vsel %vm374_vm1, %v432_v29, %v438_v59  ;;  %v444_v51 = vrot.slane %v7145_v56, 1 }
  0x6d   :  { %957 = vmatmul.mubr.f32.gmra.mxu1 %v6883_v9  ;;  %652 = vmatprep.mubr.f32.mxu0 %v435_v33  ;;  %v93_v33 = vld [vmem:[%s9884_s0 + $0x150] sm:$0xff]  ;;  %v447_v5 = vsel %vm374_vm1, %v440_v35, %v446_v10  ;;  %v243_v29 = vrot.slane %v97_v8, 7 }
  0x6e   :  { %961 = vmatprep.mubr.f32.mxu1 %v6900_v21  ;;  %5453 = vmatpush3.msra.mxu0 %v327_v37  ;;  %v1188_v37 = vld [vmem:[%s9887_s3 + $0x2d8] sm:$0xff]  ;;  %v325_v35 = vld [vmem:[%s9887_s3 + $0x110] sm:$0xff] }
  0x6f   :  { %5454 = vmatprep.subr.mxu0 %v9900_v2  ;;  %1391 = vmatprep.subr.mxu1 %v9900_v2  ;;  %v7171_v2 = vsel %vm153_vm0, %v223_v44, %v229_v14  ;;  %v100_v44 = vld [vmem:[%s9884_s0 + $0x188] sm:$0xff]  ;;  %s6289_s0 = smov 48  }
  0x70   :  { %653 = vmatmul.mubr.f32.gmra.mxu0 %v433_v41  ;;  %1392 = vmatpush1.msra.mxu1 %v1189_v63  ;;  %v452_v41 = vrot.slane %v7148_v62, 1  ;;  %v235_v63 = vrot.slane %v93_v33, 7  ;;  %v450_v33 = vrot.slane %v7171_v2, 1 }
  0x71   :  { %962 = vmatmul.mubr.f32.gmra.mxu1 %v6917_v36  ;;  %657 = vmatprep.mubr.f32.mxu0 %v441_v22  ;;  %v7174_v22 = vsel %vm153_vm0, %v231_v30, %v237_v55  ;;  %v445_v30 = vsel %vm374_vm1, %v438_v59, %v444_v51  ;;  %v249_v59 = vrot.slane %v100_v44, 7 }
  0x72   :  { %966 = vmatprep.mubr.f32.mxu1 %v6933_v45  ;;  %5455 = vmatpush3.msra.mxu0 %v326_v0  ;;  %9935 = vst [vmem:[#allocation17_spill] sm:$0xff] %v7174_v22  ;;  %v1187_v0 = vld [vmem:[%s9887_s3 + $0x2d0] sm:$0xff]  ;;  %v453_v8 = vsel %vm374_vm1, %v446_v10, %v452_v41  ;;  %v7197_v13 = vsel %vm153_vm0, %v229_v14, %v235_v63  ;;  %v324_v10 = vld [vmem:[%s9887_s3 + $0x108] sm:$0xff] }
  0x73   :  { %5456 = vmatprep.subr.mxu0 %v9936_v42  ;;  %1393 = vmatprep.subr.mxu1 %v9936_v42  ;;  %v456_v14 = vrot.slane %v7197_v13, 1 }
  0x74   :  { %658 = vmatmul.mubr.f32.gmra.mxu0 %v439_v4  ;;  %1394 = vmatpush1.msra.mxu1 %v1188_v37  ;;  %v458_v4 = vrot.slane %v7174_v22, 1  ;;  %v241_v37 = vrot.slane %v96_v60, 7  ;;  %v451_v60 = vsel %vm374_vm1, %v444_v51, %v450_v33  ;;  %v323_v51 = vld [vmem:[%s9887_s3 + $0x100] sm:$0xff] }
  0x75   :  { %967 = vmatmul.mubr.f32.gmra.mxu1 %v6948_v57  ;;  %662 = vmatprep.mubr.f32.mxu0 %v447_v5  ;;  %v7200_v5 = vsel %vm153_vm0, %v237_v55, %v243_v29  ;;  %v1186_v55 = vld [vmem:[%s9887_s3 + $0x2c8] sm:$0xff] }
  0x76   :  { %971 = vmatprep.mubr.f32.mxu1 %v6962_v6  ;;  %5457 = vmatpush3.msra.mxu0 %v325_v35  ;;  %v459_v35 = vsel %vm374_vm1, %v452_v41, %v458_v4  ;;  %v464_v44 = vrot.slane %v7200_v5, 1  ;;  %v457_v41 = vsel %vm374_vm1, %v450_v33, %v456_v14  ;;  %v1184_v33 = vld [vmem:[%s9887_s3 + $0x2b8] sm:$0xff] }
  0x77   :  { %5458 = vmatprep.subr.mxu0 %v9936_v42  ;;  %1395 = vmatprep.subr.mxu1 %v9936_v42 }
  0x78   :  { %663 = vmatmul.mubr.f32.gmra.mxu0 %v445_v30  ;;  %1396 = vmatpush1.msra.mxu1 %v1187_v0  ;;  %v7220_v30 = vsel %vm153_vm0, %v235_v63, %v241_v37  ;;  %v247_v0 = vrot.slane %v99_v54, 7  ;;  %v1185_v63 = vld [vmem:[%s9887_s3 + $0x2c0] sm:$0xff] }
  0x79   :  { %972 = vmatmul.mubr.f32.gmra.mxu1 %v6976_v20  ;;  %667 = vmatprep.mubr.f32.mxu0 %v453_v8  ;;  %9937 = vst [vmem:[#allocation18_spill] sm:$0xff] %v7220_v30  ;;  %v7223_v8 = vsel %vm153_vm0, %v243_v29, %v249_v59  ;;  %v462_v54 = vrot.slane %v7220_v30, 1  ;;  %v465_v29 = vsel %vm374_vm1, %v458_v4, %v464_v44 }
  0x7a   :  { %976 = vmatprep.mubr.f32.mxu1 %v6987_v31  ;;  %5459 = vmatpush3.msra.mxu0 %v324_v10  ;;  %9938 = vst [vmem:[#allocation19_spill] sm:$0xff] %v7223_v8  ;;  %v470_v59 = vrot.slane %v7223_v8, 1  ;;  %v7240_v10 = vsel %vm153_vm0, %v241_v37, %v247_v0  ;;  %v1180_v0 = vld [vmem:[%s9887_s3 + $0x298] sm:$0xff] }
  0x7b   :  { %5460 = vmatprep.subr.mxu0 %v9936_v42  ;;  %1397 = vmatprep.subr.mxu1 %v9936_v42  ;;  %v463_v4 = vsel %vm374_vm1, %v456_v14, %v462_v54 }
  0x7c   :  { %668 = vmatmul.mubr.f32.gmra.mxu0 %v451_v60  ;;  %1398 = vmatpush1.msra.mxu1 %v1186_v55  ;;  %v468_v60 = vrot.slane %v7240_v10, 1  ;;  %v471_v37 = vsel %vm374_vm1, %v464_v44, %v470_v59  ;;  %v1183_v55 = vld [vmem:[%s9887_s3 + $0x2b0] sm:$0xff]  ;;  %v1181_v44 = vld [vmem:[%s9887_s3 + $0x2a0] sm:$0xff] }
  0x7d   :  { %977 = vmatmul.mubr.f32.gmra.mxu1 %v7004_v46  ;;  %672 = vmatprep.mubr.f32.mxu0 %v459_v35  ;;  %v1182_v35 = vld [vmem:[%s9887_s3 + $0x2a8] sm:$0xff] }
  0x7e   :  { %981 = vmatprep.mubr.f32.mxu1 %v7014_v53  ;;  %5461 = vmatpush3.msra.mxu0 %v323_v51  ;;  %v469_v14 = vsel %vm374_vm1, %v462_v54, %v468_v60  ;;  %v1179_v51 = vld [vmem:[%s9887_s3 + $0x290] sm:$0xff]  ;;  %v1216_v54 = vld [vmem:[%s9887_s3 + $0x3b8] sm:$0xff] }
  0x7f   :  { %1399 = vmatprep.subr.mxu1 %v9936_v42  ;;  %5513 = vmatprep.subr.mxu0 %v9936_v42 }
  0x80   :  { %673 = vmatmul.mubr.f32.gmra.mxu0 %v457_v41  ;;  %1400 = vmatpush1.msra.mxu1 %v1185_v63  ;;  %v1178_v41 = vld [vmem:[%s9887_s3 + $0x288] sm:$0xff]  ;;  %v1177_v63 = vld [vmem:[%s9887_s3 + $0x280] sm:$0xff] }
  0x81   :  { %982 = vmatmul.mubr.f32.gmra.mxu1 %v7037_v11  ;;  %677 = vmatprep.mubr.f32.mxu0 %v465_v29  ;;  %v1208_v29 = vld [vmem:[%s9887_s3 + $0x378] sm:$0xff] }
  0x82   :  { %986 = vmatprep.mubr.f32.mxu1 %v7044_v12  ;;  %1401 = vmatprep.subr.mxu1 %v9936_v42 }
  0x83   :  { %1402 = vmatpush1.msra.mxu1 %v1184_v33  ;;  %v1215_v33 = vld [vmem:[%s9887_s3 + $0x3b0] sm:$0xff] }
  0x84   :  { %678 = vmatmul.mubr.f32.gmra.mxu0 %v463_v4  ;;  %1403 = vmatprep.subr.mxu1 %v9936_v42  ;;  %v1206_v4 = vld [vmem:[%s9887_s3 + $0x368] sm:$0xff] }
  0x85   :  { %987 = vmatmul.mubr.f32.gmra.mxu1 %v7067_v39  ;;  %682 = vmatprep.mubr.f32.mxu0 %v471_v37  ;;  %v1214_v37 = vld [vmem:[%s9887_s3 + $0x3a8] sm:$0xff] }
  0x86   :  { %991 = vmatprep.mubr.f32.mxu1 %v7070_v40  ;;  %1404 = vmatpush1.msra.mxu1 %v1183_v55  ;;  %v1204_v55 = vld [vmem:[%s9887_s3 + $0x358] sm:$0xff] }
  0x87   :  { %1405 = vmatprep.subr.mxu1 %v9936_v42 }
  0x88   :  { %683 = vmatmul.mubr.f32.gmra.mxu0 %v469_v14  ;;  %1406 = vmatpush1.msra.mxu1 %v1182_v35  ;;  %v1203_v14 = vld [vmem:[%s9887_s3 + $0x350] sm:$0xff]  ;;  %v1213_v35 = vld [vmem:[%s9887_s3 + $0x3a0] sm:$0xff] }
  0x89   :  { %992 = vmatmul.mubr.f32.gmra.mxu1 %v7093_v1  ;;  %687 = vmatprep.mubr.f32.mxu0 %v470_v59  ;;  %v1207_v59 = vld [vmem:[%s9887_s3 + $0x370] sm:$0xff] }
  0x8a   :  { %996 = vmatprep.mubr.f32.mxu1 %v7096_v27  ;;  %1407 = vmatprep.subr.mxu1 %v9936_v42 }
  0x8b   :  { %1408 = vmatpush1.msra.mxu1 %v1181_v44  ;;  %v1202_v44 = vld [vmem:[%s9887_s3 + $0x348] sm:$0xff] }
  0x8c   :  { %688 = vmatmul.mubr.f32.gmra.mxu0 %v468_v60  ;;  %1409 = vmatprep.subr.mxu1 %v9936_v42  ;;  %v1205_v60 = vld [vmem:[%s9887_s3 + $0x360] sm:$0xff] }
  0x8d   :  { %997 = vmatmul.mubr.f32.gmra.mxu1 %v7119_v50  ;;  %5462 = vmatprep.mubr.msk.f32.mxu0 %vm6284_vm3, %v9936_v42 }
  0x8e   :  { %1001 = vmatprep.mubr.f32.mxu1 %v7122_v47  ;;  %1410 = vmatpush1.msra.mxu1 %v1180_v0  ;;  %v1201_v0 = vld [vmem:[%s9887_s3 + $0x340] sm:$0xff] }
  0x8f   :  { %1411 = vmatprep.subr.mxu1 %v9936_v42 }
  0x90   :  { %5463 = vmatmul.mubr.msk.f32.vlgmr.msra.gmra.mxu0 %vm508_vm2, %v6423_v17  ;;  %1412 = vmatpush1.msra.mxu1 %v1179_v51  ;;  %v1212_v51 = vld [vmem:[%s9887_s3 + $0x398] sm:$0xff] }
  0x91   :  { %1002 = vmatmul.mubr.f32.gmra.mxu1 %v7145_v56  ;;  %5465 = vmatprep.mubr.msk.f32.mxu0 %vm6284_vm3, %v9936_v42 }
  0x92   :  { %1006 = vmatprep.mubr.f32.mxu1 %v7148_v62  ;;  %1413 = vmatprep.subr.mxu1 %v9936_v42 }
  0x93   :  { %1414 = vmatpush1.msra.mxu1 %v1178_v41  ;;  %5514 = vmatpush3.msra.mxu0 %v1216_v54  ;;  %v1200_v41 = vld [vmem:[%s9887_s3 + $0x338] sm:$0xff]  ;;  %v1199_v54 = vld [vmem:[%s9887_s3 + $0x330] sm:$0xff] }
  0x94   :  { %5466 = vmatmul.mubr.msk.f32.gmra.mxu0 %vm508_vm2, %v6420_v16  ;;  %1415 = vmatprep.subr.mxu1 %v9936_v42 }
  0x95   :  { %1007 = vmatmul.mubr.f32.gmra.mxu1 %v7171_v2  ;;  %5468 = vmatprep.mubr.msk.f32.mxu0 %vm6284_vm3, %v9936_v42 }
  0x96   :  { %1011 = vmatprep.mubr.f32.mxu1 %v7174_v22  ;;  %1416 = vmatpush1.msra.mxu1 %v1177_v63  ;;  %v1211_v63 = vld [vmem:[%s9887_s3 + $0x390] sm:$0xff] }
  0x97   :  { %1417 = vmatprep.subr.mxu1 %v9936_v42  ;;  %5515 = vmatprep.subr.mxu0 %v9936_v42 }
  0x98   :  { %5469 = vmatmul.mubr.msk.f32.gmra.mxu0 %vm508_vm2, %v6447_v26  ;;  %1418 = vmatpush2.msra.mxu1 %v1208_v29  ;;  %v1221_v29 = vrot.slane %v6770_v19, 2 }
  0x99   :  { %1012 = vmatmul.mubr.f32.gmra.mxu1 %v7197_v13  ;;  %5471 = vmatprep.mubr.msk.f32.mxu0 %vm6284_vm3, %v9936_v42 }
  0x9a   :  { %1016 = vmatprep.mubr.f32.mxu1 %v7200_v5  ;;  %1419 = vmatprep.subr.mxu1 %v9936_v42 }
  0x9b   :  { %1420 = vmatpush2.msra.mxu1 %v1207_v59  ;;  %5516 = vmatpush3.msra.mxu0 %v1215_v33  ;;  %v1222_v59 = vrot.slane %v6766_v15, 2  ;;  %v1198_v33 = vld [vmem:[%s9887_s3 + $0x328] sm:$0xff] }
  0x9c   :  { %5472 = vmatmul.mubr.msk.f32.gmra.mxu0 %vm508_vm2, %v6468_v34  ;;  %1421 = vmatprep.subr.mxu1 %v9936_v42 }
  0x9d   :  { %1017 = vmatmul.mubr.f32.gmra.mxu1 %v7220_v30  ;;  %5474 = vmatprep.mubr.msk.f32.mxu0 %vm6284_vm3, %v9936_v42 }
  0x9e   :  { %1021 = vmatprep.mubr.f32.mxu1 %v7223_v8  ;;  %1422 = vmatpush2.msra.mxu1 %v1206_v4  ;;  %v1197_v4 = vld [vmem:[%s9887_s3 + $0x320] sm:$0xff] }
  0x9f   :  { %1423 = vmatprep.subr.mxu1 %v9936_v42  ;;  %5517 = vmatprep.subr.mxu0 %v9936_v42 }
  0xa0   :  { %5475 = vmatmul.mubr.msk.f32.gmra.mxu0 %vm508_vm2, %v6497_v43  ;;  %1424 = vmatpush2.msra.mxu1 %v1205_v60  ;;  %v1223_v60 = vsel %vm1217_vm5, %v1221_v29, %v1222_v59  ;;  %v1227_v29 = vrot.slane %v6842_v49, 2 }
  0xa1   :  { %1022 = vmatmul.mubr.f32.gmra.mxu1 %v7240_v10  ;;  %5477 = vmatprep.mubr.msk.f32.mxu0 %vm6284_vm3, %v9936_v42 }
  0xa2   :  { %1425 = vmatprep.subr.mxu1 %v9936_v42  ;;  %5518 = vmatpush3.msra.mxu0 %v1214_v37  ;;  %v1196_v37 = vld [vmem:[%s9887_s3 + $0x318] sm:$0xff] }
  0xa3   :  { %1426 = vmatpush2.msra.mxu1 %v1204_v55  ;;  %5519 = vmatprep.subr.mxu0 %v9936_v42  ;;  %v1210_v55 = vld [vmem:[%s9887_s3 + $0x388] sm:$0xff] }
  0xa4   :  { %5478 = vmatmul.mubr.msk.f32.gmra.mxu0 %vm508_vm2, %v6525_v52  ;;  %1427 = vmatprep.subr.mxu1 %v9936_v42 }
  0xa5   :  { %5480 = vmatprep.mubr.msk.f32.mxu0 %vm6284_vm3, %v9936_v42  ;;  %1428 = vmatpush2.msra.mxu1 %v1203_v14  ;;  %v1195_v14 = vld [vmem:[%s9887_s3 + $0x310] sm:$0xff] }
  0xa6   :  { %1429 = vmatprep.subr.mxu1 %v9936_v42  ;;  %5520 = vmatpush3.msra.mxu0 %v1213_v35  ;;  %v1218_v35 = vrot.slane %v6794_v24, 2 }
  0xa7   :  { %1430 = vmatpush2.msra.mxu1 %v1202_v44  ;;  %5521 = vmatprep.subr.mxu0 %v9936_v42  ;;  %v1219_v44 = vrot.slane %v6790_v23, 2 }
  0xa8   :  { %5481 = vmatmul.mubr.msk.f32.gmra.mxu0 %vm508_vm2, %v6552_v61  ;;  %1431 = vmatprep.subr.mxu1 %v9936_v42 }
  0xa9   :  { %5483 = vmatprep.mubr.msk.f32.mxu0 %vm6284_vm3, %v9936_v42  ;;  %1432 = vmatpush2.msra.mxu1 %v1201_v0  ;;  %v1194_v0 = vld [vmem:[%s9887_s3 + $0x308] sm:$0xff] }
  0xaa   :  { %1433 = vmatprep.subr.mxu1 %v9936_v42  ;;  %5522 = vmatpush3.msra.mxu0 %v1212_v51  ;;  %v1209_v51 = vld [vmem:[%s9887_s3 + $0x380] sm:$0xff] }
  0xab   :  { %1434 = vmatpush2.msra.mxu1 %v1200_v41  ;;  %5523 = vmatprep.subr.mxu0 %v9936_v42  ;;  %v1229_v41 = vrot.slane %v6806_v32, 2 }
  0xac   :  { %5484 = vmatmul.mubr.msk.f32.gmra.mxu0 %vm508_vm2, %v6579_v7  ;;  %1435 = vmatprep.subr.mxu1 %v9936_v42 }
  0xad   :  { %5486 = vmatprep.mubr.msk.f32.mxu0 %vm6284_vm3, %v9936_v42  ;;  %1436 = vmatpush2.msra.mxu1 %v1199_v54  ;;  %v1193_v54 = vld [vmem:[%s9887_s3 + $0x300] sm:$0xff] }
  0xae   :  { %1437 = vmatprep.subr.mxu1 %v9936_v42  ;;  %5524 = vmatpush3.msra.mxu0 %v1211_v63  ;;  %v1220_v63 = vsel %vm1217_vm5, %v1218_v35, %v1219_v44  ;;  %v1715_v35 = vld [vmem:[%s9887_s3 + $0x428] sm:$0xff] }
  0xaf   :  { %1438 = vmatpush2.msra.mxu1 %v1198_v33  ;;  %5525 = vmatprep.subr.mxu0 %v9936_v42  ;;  %v1230_v33 = vsel %vm1217_vm5, %v1222_v59, %v1229_v41  ;;  %v1228_v59 = vsel %vm1217_vm5, %v1219_v44, %v1227_v29  ;;  %v1714_v44 = vld [vmem:[%s9887_s3 + $0x420] sm:$0xff] }
  0xb0   :  { %5487 = vmatmul.mubr.msk.f32.gmra.mxu0 %vm508_vm2, %v6606_v18  ;;  %1439 = vmatprep.subr.mxu1 %v9936_v42 }
  0xb1   :  { %5489 = vmatprep.mubr.msk.f32.mxu0 %vm6284_vm3, %v9936_v42  ;;  %1440 = vmatpush2.msra.mxu1 %v1197_v4  ;;  %v1717_v4 = vld [vmem:[%s9887_s3 + $0x438] sm:$0xff] }
  0xb2   :  { %1441 = vmatprep.subr.mxu1 %v9936_v42  ;;  %1449 = vmatprep.mubr.f32.mxu1 %v1223_v60  ;;  %v1235_v60 = vrot.slane %v6864_v58, 2 }
  0xb3   :  { %1442 = vmatpush2.msra.mxu1 %v1196_v37  ;;  %5526 = vmatpush3.msra.mxu0 %v1210_v55  ;;  %v1716_v37 = vld [vmem:[%s9887_s3 + $0x430] sm:$0xff]  ;;  %v1233_v55 = vrot.slane %v6883_v9, 2 }
  0xb4   :  { %5490 = vmatmul.mubr.msk.f32.gmra.mxu0 %vm508_vm2, %v6633_v28  ;;  %1443 = vmatprep.subr.mxu1 %v9936_v42 }
  0xb5   :  { %5492 = vmatprep.mubr.msk.f32.mxu0 %vm6284_vm3, %v9936_v42  ;;  %1444 = vmatpush2.msra.mxu1 %v1195_v14  ;;  %v1236_v14 = vsel %vm1217_vm5, %v1229_v41, %v1235_v60  ;;  %v1239_v41 = vrot.slane %v6917_v36, 2 }
  0xb6   :  { %1445 = vmatprep.subr.mxu1 %v9936_v42  ;;  %5527 = vmatprep.subr.mxu0 %v9936_v42 }
  0xb7   :  { %1446 = vmatpush2.msra.mxu1 %v1194_v0  ;;  %5528 = vmatpush3.msra.mxu0 %v1209_v51  ;;  %v1241_v0 = vrot.slane %v6900_v21, 2  ;;  %v1234_v51 = vsel %vm1217_vm5, %v1227_v29, %v1233_v55  ;;  %v1712_v29 = vld [vmem:[%s9887_s3 + $0x410] sm:$0xff] }
  0xb8   :  { %5493 = vmatmul.mubr.msk.f32.gmra.mxu0 %vm508_vm2, %v6660_v38  ;;  %1447 = vmatprep.subr.mxu1 %v9936_v42 }
  0xb9   :  { %5495 = vmatprep.mubr.msk.f32.mxu0 %vm6284_vm3, %v9936_v42  ;;  %1448 = vmatpush2.msra.mxu1 %v1193_v54  ;;  %v1242_v54 = vsel %vm1217_vm5, %v1235_v60, %v1241_v0  ;;  %v1245_v60 = vrot.slane %v6948_v57, 2 }
  0xba   :  { %1450 = vmatmul.mubr.f32.vlgmr.msra.gmra.mxu1 %v1220_v63  ;;  %1910 = vmatprep.subr.mxu1 %v9936_v42  ;;  %v1713_v63 = vld [vmem:[%s9887_s3 + $0x418] sm:$0xff] }
  0xbb   :  { %1454 = vmatprep.mubr.f32.mxu1 %v1230_v33  ;;  %1911 = vmatpush1.msra.mxu1 %v1717_v4  ;;  %v1247_v33 = vrot.slane %v6933_v45, 2  ;;  %v1240_v4 = vsel %vm1217_vm5, %v1233_v55, %v1239_v41  ;;  %v1710_v55 = vld [vmem:[%s9887_s3 + $0x400] sm:$0xff] }
  0xbc   :  { %5496 = vmatmul.mubr.msk.f32.gmra.mxu0 %vm508_vm2, %v6687_v48  ;;  %1912 = vmatprep.subr.mxu1 %v9936_v42 }
  0xbd   :  { %5498 = vmatprep.mubr.msk.f32.mxu0 %vm6284_vm3, %v9936_v42  ;;  %1913 = vmatpush1.msra.mxu1 %v1716_v37  ;;  %v1248_v37 = vsel %vm1217_vm5, %v1241_v0, %v1247_v33  ;;  %v1251_v0 = vrot.slane %v6976_v20, 2 }
  0xbe   :  { %1455 = vmatmul.mubr.f32.gmra.mxu1 %v1228_v59  ;;  %1914 = vmatprep.subr.mxu1 %v9936_v42  ;;  %v1711_v59 = vld [vmem:[%s9887_s3 + $0x408] sm:$0xff] }
  0xbf   :  { %1459 = vmatprep.mubr.f32.mxu1 %v1236_v14  ;;  %1915 = vmatpush1.msra.mxu1 %v1715_v35  ;;  %v1253_v14 = vrot.slane %v6962_v6, 2  ;;  %v1246_v35 = vsel %vm1217_vm5, %v1239_v41, %v1245_v60  ;;  %v1708_v41 = vld [vmem:[%s9887_s3 + $0x3f0] sm:$0xff] }
  0xc0   :  { %5499 = vmatmul.mubr.msk.f32.gmra.mxu0 %vm508_vm2, %v6737_v3  ;;  %1916 = vmatprep.subr.mxu1 %v9936_v42 }
  0xc1   :  { %5501 = vmatprep.mubr.msk.f32.mxu0 %vm6284_vm3, %v9936_v42  ;;  %1917 = vmatpush1.msra.mxu1 %v1714_v44  ;;  %v9939_v44 = vld [vmem:[#allocation6_spill] sm:$0xff] }
  0xc2   :  { %1460 = vmatmul.mubr.f32.gmra.mxu1 %v1234_v51  ;;  %1918 = vmatprep.subr.mxu1 %v9936_v42  ;;  %v1254_v51 = vsel %vm1217_vm5, %v1247_v33, %v1253_v14  ;;  %v1252_v33 = vsel %vm1217_vm5, %v1245_v60, %v1251_v0  ;;  %v1224_v60 = vrot.slane %v6423_v17, 2 }
  0xc3   :  { %1464 = vmatprep.mubr.f32.mxu1 %v1242_v54  ;;  %1919 = vmatpush1.msra.mxu1 %v1713_v63  ;;  %v1709_v54 = vld [vmem:[%s9887_s3 + $0x3f8] sm:$0xff]  ;;  %v1259_v63 = vrot.slane %v6987_v31, 2 }
  0xc4   :  { %5502 = vmatmul.mubr.msk.f32.gmra.mxu0 %vm508_vm2, %v6797_v25  ;;  %1920 = vmatprep.subr.mxu1 %v9936_v42 }
  0xc5   :  { %5504 = vmatprep.mubr.msk.f32.mxu0 %vm6284_vm3, %v9936_v42  ;;  %1921 = vmatpush1.msra.mxu1 %v1712_v29  ;;  %v1257_v29 = vrot.slane %v7004_v46, 2  ;;  %v1271_v46 = vrot.slane %v7044_v12, 2 }
  0xc6   :  { %1465 = vmatmul.mubr.f32.gmra.mxu1 %v1240_v4  ;;  %1922 = vmatprep.subr.mxu1 %v9936_v42  ;;  %v9940_v4 = vld [vmem:[#allocation7_spill] sm:$0xff] }
  0xc7   :  { %1469 = vmatprep.mubr.f32.mxu1 %v1248_v37  ;;  %1923 = vmatpush1.msra.mxu1 %v1711_v59  ;;  %v1260_v37 = vsel %vm1217_vm5, %v1253_v14, %v1259_v63  ;;  %v1707_v59 = vld [vmem:[%s9887_s3 + $0x3e8] sm:$0xff]  ;;  %v1706_v14 = vld [vmem:[%s9887_s3 + $0x3e0] sm:$0xff] }
  0xc8   :  { %5505 = vmatmul.mubr.msk.f32.gmra.mxu0 %vm508_vm2, %v9939_v44  ;;  %1924 = vmatprep.subr.mxu1 %v9936_v42 }
  0xc9   :  { %5507 = vmatprep.mubr.msk.f32.mxu0 %vm6284_vm3, %v9936_v42  ;;  %1925 = vmatpush1.msra.mxu1 %v1710_v55  ;;  %v1265_v55 = vrot.slane %v7014_v53, 2  ;;  %v9941_v53 = vld [vmem:[#allocation8_spill] sm:$0xff] }
  0xca   :  { %1470 = vmatmul.mubr.f32.gmra.mxu1 %v1246_v35  ;;  %1926 = vmatprep.subr.mxu1 %v9936_v42  ;;  %v1225_v35 = vrot.slane %v6420_v16, 2 }
  0xcb   :  { %1474 = vmatprep.mubr.f32.mxu1 %v1254_v51  ;;  %1927 = vmatpush1.msra.mxu1 %v1709_v54  ;;  %v1258_v51 = vsel %vm1217_vm5, %v1251_v0, %v1257_v29  ;;  %v1263_v54 = vrot.slane %v7037_v11, 2  ;;  %v1269_v11 = vrot.slane %v7067_v39, 2 }
  0xcc   :  { %5508 = vmatmul.mubr.msk.f32.gmra.mxu0 %vm508_vm2, %v9940_v4  ;;  %1928 = vmatprep.subr.mxu1 %v9936_v42  ;;  %v1226_v0 = vsel %vm1217_vm5, %v1224_v60, %v1225_v35 }
  0xcd   :  { %5510 = vmatprep.mubr.msk.f32.mxu0 %vm6284_vm3, %v9936_v42  ;;  %1929 = vmatpush1.msra.mxu1 %v1708_v41  ;;  %v1266_v41 = vsel %vm1217_vm5, %v1259_v63, %v1265_v55  ;;  %v1704_v63 = vld [vmem:[%s9887_s3 + $0x3d0] sm:$0xff]  ;;  %v1264_v12 = vsel %vm1217_vm5, %v1257_v29, %v1263_v54 }
  0xce   :  { %1475 = vmatmul.mubr.f32.gmra.mxu1 %v1252_v33  ;;  %1930 = vmatprep.subr.mxu1 %v9936_v42  ;;  %v1705_v33 = vld [vmem:[%s9887_s3 + $0x3d8] sm:$0xff] }
  0xcf   :  { %1479 = vmatprep.mubr.f32.mxu1 %v1260_v37  ;;  %1931 = vmatpush1.msra.mxu1 %v1707_v59  ;;  %v1231_v37 = vrot.slane %v6447_v26, 2  ;;  %v1277_v26 = vrot.slane %v7070_v40, 2 }
  0xd0   :  { %5511 = vmatmul.mubr.msk.f32.gmra.mxu0 %vm508_vm2, %v9941_v53  ;;  %1932 = vmatprep.subr.mxu1 %v9936_v42 }
  0xd1   :  { %5529 = vmatprep.mubr.msk.f32.mxu0 %vm6284_vm3, %v9936_v42  ;;  %1933 = vmatpush1.msra.mxu1 %v1706_v14  ;;  %v1272_v14 = vsel %vm1217_vm5, %v1265_v55, %v1271_v46  ;;  %v1232_v29 = vsel %vm1217_vm5, %v1225_v35, %v1231_v37  ;;  %v1702_v55 = vld [vmem:[%s9887_s3 + $0x3c0] sm:$0xff] }
  0xd2   :  { %v7551_v59 = vpop.f32.mrf.mxu1  ;;  %1480 = vmatmul.mubr.f32.gmra.mxu1 %v1258_v51  ;;  %1934 = vmatprep.subr.mxu1 %v9936_v42  ;;  %v1703_v51 = vld [vmem:[%s9887_s3 + $0x3c8] sm:$0xff] }
  0xd3   :  { %1484 = vmatprep.mubr.f32.mxu1 %v1266_v41  ;;  %1935 = vmatpush1.msra.mxu1 %v1705_v33  ;;  %v1237_v41 = vrot.slane %v6468_v34, 2 }
  0xd4   :  { %5530 = vmatmul.mubr.msk.f32.vlgmr.msra.gmra.mxu0 %vm508_vm2, %v1226_v0  ;;  %v5397_v60 = vpop.f32.mrf.mxu1  ;;  %1936 = vmatprep.subr.mxu1 %v9936_v42  ;;  %v1270_v0 = vsel %vm1217_vm5, %v1263_v54, %v1269_v11  ;;  %v1733_v54 = vld [vmem:[%s9887_s3 + $0x4b8] sm:$0xff] }
  0xd5   :  { %5532 = vmatprep.mubr.msk.f32.mxu0 %vm6284_vm3, %v9936_v42  ;;  %1937 = vmatpush1.msra.mxu1 %v1704_v63  ;;  %v1275_v60 = vrot.slane %v7093_v1, 2  ;;  %v1278_v63 = vsel %vm1217_vm5, %v1271_v46, %v1277_v26  ;;  %v1238_v40 = vsel %vm1217_vm5, %v1231_v37, %v1237_v41  ;;  %v1741_v46 = vld [vmem:[%s9887_s3 + $0x4f8] sm:$0xff]  ;;  %v1281_v37 = vrot.slane %v7119_v50, 2 }
  0xd6   :  { %v7570_v33 = vpop.f32.mrf.mxu1  ;;  %1485 = vmatmul.mubr.f32.gmra.mxu1 %v1264_v12  ;;  %1938 = vmatprep.subr.mxu1 %v9936_v42  ;;  %v1283_v12 = vrot.slane %v7096_v27, 2  ;;  %v1289_v27 = vrot.slane %v7122_v47, 2 }
  0xd7   :  { %1489 = vmatprep.mubr.f32.mxu1 %v1272_v14  ;;  %1939 = vmatpush1.msra.mxu1 %v1703_v51  ;;  %v1243_v14 = vrot.slane %v6497_v43, 2 }
  0xd8   :  { %5533 = vmatmul.mubr.msk.f32.gmra.mxu0 %vm508_vm2, %v1232_v29  ;;  %v5400_v35 = vpop.f32.mrf.mxu1  ;;  %1940 = vmatprep.subr.mxu1 %v9936_v42  ;;  %v1276_v29 = vsel %vm1217_vm5, %v1269_v11, %v1275_v60 }
  0xd9   :  { %5535 = vmatprep.mubr.msk.f32.mxu0 %vm6284_vm3, %v9936_v42  ;;  %1941 = vmatpush1.msra.mxu1 %v1702_v55  ;;  %v1284_v35 = vsel %vm1217_vm5, %v1277_v26, %v1283_v12  ;;  %v1244_v11 = vsel %vm1217_vm5, %v1237_v41, %v1243_v14  ;;  %v1731_v26 = vld [vmem:[%s9887_s3 + $0x4a8] sm:$0xff]  ;;  %v1290_v41 = vsel %vm1217_vm5, %v1283_v12, %v1289_v27  ;;  %v1729_v12 = vld [vmem:[%s9887_s3 + $0x498] sm:$0xff] }
  0xda   :  { %v7589_v51 = vpop.f32.mrf.mxu1  ;;  %1490 = vmatmul.mubr.f32.gmra.mxu1 %v1270_v0  ;;  %1942 = vmatprep.subr.mxu1 %v9936_v42  ;;  %v1732_v0 = vld [vmem:[%s9887_s3 + $0x4b0] sm:$0xff] }
  0xdb   :  { %1494 = vmatprep.mubr.f32.mxu1 %v1278_v63  ;;  %5580 = vmatprep.subr.mxu0 %v9936_v42  ;;  %v1249_v63 = vrot.slane %v6525_v52, 2 }
  0xdc   :  { %5536 = vmatmul.mubr.msk.f32.gmra.mxu0 %vm508_vm2, %v1238_v40  ;;  %v5403_v55 = vpop.f32.mrf.mxu1  ;;  %1943 = vmatpush2.msra.mxu1 %v1733_v54  ;;  %v1282_v54 = vsel %vm1217_vm5, %v1275_v60, %v1281_v37 }
  0xdd   :  { %5538 = vmatprep.mubr.msk.f32.mxu0 %vm6284_vm3, %v9936_v42  ;;  %5581 = vmatpush3.msra.mxu0 %v1741_v46  ;;  %v1287_v55 = vrot.slane %v7145_v56, 2  ;;  %v1730_v46 = vld [vmem:[%s9887_s3 + $0x4a0] sm:$0xff]  ;;  %v1293_v56 = vrot.slane %v7171_v2, 2 }
  0xde   :  { %1495 = vmatmul.mubr.f32.gmra.mxu1 %v1276_v29  ;;  %1944 = vmatprep.subr.mxu1 %v9936_v42  ;;  %v1250_v29 = vsel %vm1217_vm5, %v1243_v14, %v1249_v63 }
  0xdf   :  { %v7612_v40 = vpop.f32.mrf.mxu1  ;;  %1499 = vmatprep.mubr.f32.mxu1 %v1284_v35  ;;  %1945 = vmatpush2.msra.mxu1 %v1732_v0  ;;  %v1255_v35 = vrot.slane %v6552_v61, 2  ;;  %v1295_v0 = vrot.slane %v7148_v62, 2 }
  0xe0   :  { %5539 = vmatmul.mubr.msk.f32.gmra.mxu0 %vm508_vm2, %v1244_v11  ;;  %1946 = vmatprep.subr.mxu1 %v9936_v42  ;;  %v1288_v11 = vsel %vm1217_vm5, %v1281_v37, %v1287_v55  ;;  %v1261_v37 = vrot.slane %v6579_v7, 2 }
  0xe1   :  { %5541 = vmatprep.mubr.msk.f32.mxu0 %vm6284_vm3, %v9936_v42  ;;  %v5406_v60 = vpop.f32.mrf.mxu1  ;;  %1947 = vmatpush2.msra.mxu1 %v1731_v26  ;;  %v1740_v26 = vld [vmem:[%s9887_s3 + $0x4f0] sm:$0xff] }
  0xe2   :  { %1500 = vmatmul.mubr.f32.gmra.mxu1 %v1282_v54  ;;  %1948 = vmatprep.subr.mxu1 %v9936_v42  ;;  %v1301_v54 = vrot.slane %v7174_v22, 2  ;;  %v1728_v60 = vld [vmem:[%s9887_s3 + $0x490] sm:$0xff]  ;;  %v1294_v22 = vsel %vm1217_vm5, %v1287_v55, %v1293_v56  ;;  %v1267_v55 = vrot.slane %v6606_v18, 2 }
  0xe3   :  { %1504 = vmatprep.mubr.f32.mxu1 %v1290_v41  ;;  %1949 = vmatpush2.msra.mxu1 %v1730_v46  ;;  %v1256_v41 = vsel %vm1217_vm5, %v1249_v63, %v1255_v35  ;;  %v1296_v46 = vsel %vm1217_vm5, %v1289_v27, %v1295_v0  ;;  %v1299_v63 = vrot.slane %v7197_v13, 2  ;;  %v1727_v27 = vld [vmem:[%s9887_s3 + $0x488] sm:$0xff] }
  0xe4   :  { %5542 = vmatmul.mubr.msk.f32.gmra.mxu0 %vm508_vm2, %v1250_v29  ;;  %v7634_v14 = vpop.f32.mrf.mxu1  ;;  %1950 = vmatprep.subr.mxu1 %v9936_v42 }
  0xe5   :  { %5544 = vmatprep.mubr.msk.f32.mxu0 %vm6284_vm3, %v9936_v42  ;;  %1951 = vmatpush2.msra.mxu1 %v1729_v12  ;;  %v1302_v12 = vsel %vm1217_vm5, %v1295_v0, %v1301_v54  ;;  %v1300_v0 = vsel %vm1217_vm5, %v1293_v56, %v1299_v63 }
  0xe6   :  { %v5409_v29 = vpop.f32.mrf.mxu1  ;;  %1505 = vmatmul.mubr.f32.gmra.mxu1 %v1288_v11  ;;  %5582 = vmatprep.subr.mxu0 %v9936_v42  ;;  %v1262_v11 = vsel %vm1217_vm5, %v1255_v35, %v1261_v37  ;;  %v1305_v35 = vrot.slane %v7220_v30, 2  ;;  %v1311_v30 = vrot.slane %v7240_v10, 2 }
  0xe7   :  { %1952 = vmatprep.subr.mxu1 %v9936_v42  ;;  %5583 = vmatpush3.msra.mxu0 %v1740_v26  ;;  %v1726_v26 = vld [vmem:[%s9887_s3 + $0x480] sm:$0xff] }
  0xe8   :  { %5545 = vmatmul.mubr.msk.f32.gmra.mxu0 %vm508_vm2, %v1256_v41  ;;  %1509 = vmatprep.mubr.f32.mxu1 %v1296_v46  ;;  %v1307_v46 = vrot.slane %v7200_v5, 2 }
  0xe9   :  { %5547 = vmatprep.mubr.msk.f32.mxu0 %vm6284_vm3, %v9936_v42  ;;  %v7661_v29 = vpop.f32.mrf.mxu1  ;;  %1953 = vmatpush2.msra.mxu1 %v1728_v60  ;;  %v1268_v60 = vsel %vm1217_vm5, %v1261_v37, %v1267_v55  ;;  %v1724_v37 = vld [vmem:[%s9887_s3 + $0x470] sm:$0xff] }
  0xea   :  { %1510 = vmatmul.mubr.f32.gmra.mxu1 %v1294_v22  ;;  %1954 = vmatprep.subr.mxu1 %v9936_v42  ;;  %v1725_v22 = vld [vmem:[%s9887_s3 + $0x478] sm:$0xff] }
  0xeb   :  { %v5412_v41 = vpop.f32.mrf.mxu1  ;;  %1955 = vmatpush2.msra.mxu1 %v1727_v27  ;;  %1514 = vmatprep.mubr.f32.mxu1 %v1302_v12  ;;  %v1273_v27 = vrot.slane %v6633_v28, 2  ;;  %v1739_v12 = vld [vmem:[%s9887_s3 + $0x4e8] sm:$0xff] }
  0xec   :  { %5548 = vmatmul.mubr.msk.f32.gmra.mxu0 %vm508_vm2, %v1262_v11  ;;  %1956 = vmatprep.subr.mxu1 %v9936_v42  ;;  %v1308_v11 = vsel %vm1217_vm5, %v1301_v54, %v1307_v46 }
  0xed   :  { %5550 = vmatprep.mubr.msk.f32.mxu0 %vm6284_vm3, %v9936_v42  ;;  %1957 = vmatpush2.msra.mxu1 %v1726_v26  ;;  %v1313_v26 = vrot.slane %v7223_v8, 2  ;;  %v1274_v54 = vsel %vm1217_vm5, %v1267_v55, %v1273_v27  ;;  %v1723_v8 = vld [vmem:[%s9887_s3 + $0x468] sm:$0xff]  ;;  %v1722_v55 = vld [vmem:[%s9887_s3 + $0x460] sm:$0xff] }
  0xee   :  { %v7680_v56 = vpop.f32.mrf.mxu1  ;;  %1515 = vmatmul.mubr.f32.gmra.mxu1 %v1300_v0  ;;  %1958 = vmatprep.subr.mxu1 %v9936_v42  ;;  %v1306_v0 = vsel %vm1217_vm5, %v1299_v63, %v1305_v35 }
  0xef   :  { %1959 = vmatpush2.msra.mxu1 %v1725_v22  ;;  %5584 = vmatprep.subr.mxu0 %v9936_v42  ;;  %v1279_v22 = vrot.slane %v6660_v38, 2  ;;  %v1314_v63 = vsel %vm1217_vm5, %v1307_v46, %v1313_v26  ;;  %v1721_v46 = vld [vmem:[%s9887_s3 + $0x458] sm:$0xff] }
  0xf0   :  { %5551 = vmatmul.mubr.msk.f32.gmra.mxu0 %vm508_vm2, %v1268_v60  ;;  %v5415_v41 = vpop.f32.mrf.mxu1  ;;  %1960 = vmatprep.subr.mxu1 %v9936_v42 }
  0xf1   :  { %5553 = vmatprep.mubr.msk.f32.mxu0 %vm6284_vm3, %v9936_v42  ;;  %5585 = vmatpush3.msra.mxu0 %v1739_v12  ;;  %v1312_v12 = vsel %vm1217_vm5, %v1305_v35, %v1311_v30  ;;  %v1285_v41 = vrot.slane %v6687_v48, 2 }
  0xf2   :  { %1519 = vmatprep.mubr.f32.mxu1 %v1308_v11  ;;  %1961 = vmatpush2.msra.mxu1 %v1724_v37  ;;  %v1280_v11 = vsel %vm1217_vm5, %v1273_v27, %v1279_v22  ;;  %v1291_v27 = vrot.slane %v6737_v3, 2 }
  0xf3   :  { %v7703_v60 = vpop.f32.mrf.mxu1  ;;  %1520 = vmatmul.mubr.f32.gmra.mxu1 %v1306_v0  ;;  %1962 = vmatprep.subr.mxu1 %v9936_v42  ;;  %v1286_v0 = vsel %vm1217_vm5, %v1279_v22, %v1285_v41 }
  0xf4   :  { %5554 = vmatmul.mubr.msk.f32.gmra.mxu0 %vm508_vm2, %v1274_v54  ;;  %1963 = vmatpush2.msra.mxu1 %v1723_v8  ;;  %v1738_v8 = vld [vmem:[%s9887_s3 + $0x4e0] sm:$0xff]  ;;  %v1720_v54 = vld [vmem:[%s9887_s3 + $0x450] sm:$0xff]  ;;  %v1292_v22 = vsel %vm1217_vm5, %v1285_v41, %v1291_v27  ;;  %v1743_v41 = vrot.slane %v6794_v24, 3  ;;  %v1735_v24 = vld [vmem:[%s9887_s3 + $0x4c8] sm:$0xff] }
  0xf5   :  { %5556 = vmatprep.mubr.msk.f32.mxu0 %vm6284_vm3, %v9936_v42  ;;  %v5418_v37 = vpop.f32.mrf.mxu1  ;;  %1964 = vmatprep.subr.mxu1 %v9936_v42 }
  0xf6   :  { %1524 = vmatprep.mubr.f32.mxu1 %v1314_v63  ;;  %1965 = vmatpush2.msra.mxu1 %v1722_v55  ;;  %v1737_v55 = vld [vmem:[%s9887_s3 + $0x4d8] sm:$0xff]  ;;  %v1747_v37 = vrot.slane %v6766_v15, 3  ;;  %v1736_v15 = vld [vmem:[%s9887_s3 + $0x4d0] sm:$0xff] }
  0xf7   :  { %1525 = vmatmul.mubr.f32.gmra.mxu1 %v1312_v12  ;;  %1966 = vmatprep.subr.mxu1 %v9936_v42  ;;  %v1719_v12 = vld [vmem:[%s9887_s3 + $0x448] sm:$0xff] }
  0xf8   :  { %5557 = vmatmul.mubr.msk.f32.gmra.mxu0 %vm508_vm2, %v1280_v11  ;;  %v7725_v35 = vpop.f32.mrf.mxu1  ;;  %5586 = vmatprep.subr.mxu0 %v9936_v42  ;;  %v1746_v11 = vrot.slane %v6770_v19, 3 }
  0xf9   :  { %5559 = vmatprep.mubr.msk.f32.mxu0 %vm6284_vm3, %v9936_v42  ;;  %1967 = vmatpush2.msra.mxu1 %v1721_v46 }
  0xfa   :  { %v5421_v63 = vpop.f32.mrf.mxu1  ;;  %5587 = vmatpush3.msra.mxu0 %v1738_v8  ;;  %1968 = vmatprep.subr.mxu1 %v9936_v42  ;;  %v1744_v8 = vrot.slane %v6790_v23, 3  ;;  %v1748_v23 = vsel %vm1742_vm6, %v1746_v11, %v1747_v37 }
  0xfb   :  { %5588 = vmatprep.subr.mxu0 %v9936_v42  ;;  %1529 = vmatprep.mubr.f32.mxu1 %v1313_v26  ;;  %v1297_v26 = vrot.slane %v6797_v25, 2  ;;  %v1303_v63 = vrot.slane %v9939_v44, 2 }
  0xfc   :  { %5560 = vmatmul.mubr.msk.f32.gmra.mxu0 %vm508_vm2, %v1286_v0  ;;  %1969 = vmatpush2.msra.mxu1 %v1720_v54  ;;  %v1718_v0 = vld [vmem:[%s9887_s3 + $0x440] sm:$0xff]  ;;  %v1754_v54 = vrot.slane %v6806_v32, 3  ;;  %v1745_v32 = vsel %vm1742_vm6, %v1743_v41, %v1744_v8 }
  0xfd   :  { %5562 = vmatprep.mubr.msk.f32.mxu0 %vm6284_vm3, %v9936_v42  ;;  %v7749_v46 = vpop.f32.mrf.mxu1  ;;  %5589 = vmatpush3.msra.mxu0 %v1737_v55  ;;  %v1752_v55 = vrot.slane %v6842_v49, 3  ;;  %v1304_v49 = vsel %vm1217_vm5, %v1297_v26, %v1303_v63 }
  0xfe   :  { %1530 = vmatmul.mubr.f32.gmra.mxu1 %v1311_v30  ;;  %1970 = vmatprep.subr.mxu1 %v9936_v42  ;;  %v1298_v30 = vsel %vm1217_vm5, %v1291_v27, %v1297_v26  ;;  %v1734_v27 = vld [vmem:[%s9887_s3 + $0x4c0] sm:$0xff]  ;;  %v1755_v11 = vsel %vm1742_vm6, %v1747_v37, %v1754_v54  ;;  %s6285_s3 = smov 96  }
  0xff   :  { %v5424_v19 = vpop.f32.mrf.mxu1  ;;  %5590 = vmatprep.subr.mxu0 %v9936_v42  ;;  %1971 = vmatpush2.msra.mxu1 %v1719_v12  ;;  %v1760_v12 = vrot.slane %v6864_v58, 3  ;;  %v1753_v58 = vsel %vm1742_vm6, %v1744_v8, %v1752_v55  ;;  %v1315_v8 = vrot.slane %v9941_v53, 2 }
 0x100   :  { %5563 = vmatmul.mubr.msk.f32.gmra.mxu0 %vm508_vm2, %v1292_v22  ;;  %1972 = vmatprep.subr.mxu1 %v9936_v42  ;;  %v1758_v19 = vrot.slane %v6883_v9, 3 }
 0x101   :  { %5565 = vmatprep.mubr.msk.f32.mxu0 %vm6284_vm3, %v9936_v42  ;;  %5591 = vmatpush3.msra.mxu0 %v1736_v15  ;;  %v1309_v15 = vrot.slane %v9940_v4, 2  ;;  %v1761_v37 = vsel %vm1742_vm6, %v1754_v54, %v1760_v12  ;;  %v1764_v54 = vrot.slane %v6917_v36, 3 }
 0x102   :  { %v7775_v22 = vpop.f32.mrf.mxu1  ;;  %5592 = vmatprep.subr.mxu0 %v9936_v42  ;;  %1973 = vmatpush2.msra.mxu1 %v1718_v0  ;;  %v1766_v0 = vrot.slane %v6900_v21, 3  ;;  %v1759_v21 = vsel %vm1742_vm6, %v1752_v55, %v1758_v19  ;;  %v1770_v55 = vrot.slane %v6948_v57, 3  ;;  %v1750_v57 = vrot.slane %v6420_v16, 3 }
 0x103   :  { %1974 = vmatprep.mubr.f32.mxu1 %v1748_v23  ;;  %5593 = vmatpush3.msra.mxu0 %v1735_v24  ;;  %v1310_v9 = vsel %vm1217_vm5, %v1303_v63, %v1309_v15  ;;  %v1316_v63 = vsel %vm1217_vm5, %v1309_v15, %v1315_v8  ;;  %v1765_v36 = vsel %vm1742_vm6, %v1758_v19, %v1764_v54 }
 0x104   :  { %5566 = vmatmul.mubr.msk.f32.gmra.mxu0 %vm508_vm2, %v1298_v30  ;;  %v5427_v41 = vpop.f32.mrf.mxu1  ;;  %1975 = vmatmul.mubr.f32.vlgmr.msra.gmra.mxu1 %v1745_v32  ;;  %v1767_v24 = vsel %vm1742_vm6, %v1760_v12, %v1766_v0  ;;  %v1772_v30 = vrot.slane %v6933_v45, 3  ;;  %v1771_v19 = vsel %vm1742_vm6, %v1764_v54, %v1770_v55  ;;  %v9943_v54 = vld [vmem:[#allocation9_spill] sm:$0xff] }
 0x105   :  { %5568 = vmatprep.mubr.msk.f32.mxu0 %vm6284_vm3, %v9936_v42  ;;  %5594 = vmatprep.subr.mxu0 %v9936_v42 }
 0x106   :  { %5595 = vmatpush3.msra.mxu0 %v1734_v27  ;;  %1979 = vmatprep.mubr.f32.mxu1 %v1755_v11  ;;  %v1773_v41 = vsel %vm1742_vm6, %v1766_v0, %v1772_v30 }
 0x107   :  { %v7793_v23 = vpop.f32.mrf.mxu1  ;;  %2513 = vmatprep.subr.mxu1 %v9936_v42  ;;  %5647 = vmatprep.subr.mxu0 %v9936_v42 }
 0x108   :  { %5569 = vmatmul.mubr.msk.f32.gmra.mxu0 %vm508_vm2, %v1304_v49  ;;  %1980 = vmatmul.mubr.f32.gmra.mxu1 %v1753_v58  ;;  %v1778_v49 = vrot.slane %v6962_v6, 3  ;;  %v1776_v6 = vrot.slane %v6976_v20, 3 }
 0x109   :  { %v5430_v26 = vpop.f32.mrf.mxu1  ;;  %5571 = vmatprep.mubr.msk.f32.mxu0 %vm6284_vm3, %v9936_v42  ;;  %1984 = vmatprep.mubr.f32.mxu1 %v1761_v37 }
 0x10a   :  { %v1779_v26 = vsel %vm1742_vm6, %v1772_v30, %v1778_v49  ;;  %v1782_v30 = vrot.slane %v9943_v54, 3  ;;  %v1794_v54 = vrot.slane %v7067_v39, 3  ;;  %v1774_v39 = vrot.slane %v6525_v52, 3 }
 0x10c   :  { %v609_v32 = vpop.f32.mrf.mxu0  ;;  %v7806_v27 = vpop.f32.mrf.mxu1  ;;  %5572 = vmatmul.mubr.msk.f32.gmra.mxu0 %vm508_vm2, %v1310_v9  ;;  %1985 = vmatmul.mubr.f32.gmra.mxu1 %v1759_v21  ;;  %v9942_v21 = vld [vmem:[#allocation5_spill] sm:$0xff] }
 0x10d   :  { %v7810_v11 = vadd.f32 %v7551_v59, %v609_v32  ;;  %5574 = vmatprep.mubr.msk.f32.mxu0 %vm6284_vm3, %v9936_v42  ;;  %1989 = vmatprep.mubr.f32.mxu1 %v1767_v24  ;;  %v1749_v59 = vrot.slane %v6423_v17, 3  ;;  %v1784_v17 = vrot.slane %v6987_v31, 3  ;;  %v1756_v24 = vrot.slane %v9942_v21, 3 }
 0x10e   :  { %v611_v45 = vpop.f32.mrf.mxu0  ;;  %v5433_v12 = vpop.f32.mrf.mxu1  ;;  %v1777_v31 = vsel %vm1742_vm6, %v1770_v55, %v1776_v6  ;;  %v1762_v55 = vrot.slane %v6468_v34, 3 }
 0x10f   :  { %v1751_v20 = vsel %vm1742_vm6, %v1749_v59, %v1750_v57 }
 0x110   :  { %v614_v58 = vpop.f32.mrf.mxu0  ;;  %5575 = vmatmul.mubr.msk.f32.gmra.mxu0 %vm508_vm2, %v1316_v63  ;;  %1990 = vmatmul.mubr.f32.gmra.mxu1 %v1765_v36  ;;  %v9944_v36 = vld [vmem:[#allocation10_spill] sm:$0xff] }
 0x111   :  { %v7822_v37 = vadd.f32 %v7570_v33, %v614_v58  ;;  %v7824_v15 = vpop.f32.mrf.mxu1  ;;  %5577 = vmatprep.mubr.msk.f32.mxu0 %vm6284_vm3, %v9936_v42  ;;  %1994 = vmatprep.mubr.f32.mxu1 %v1773_v41  ;;  %v1790_v45 = vrot.slane %v9944_v36, 3  ;;  %v1757_v41 = vsel %vm1742_vm6, %v1750_v57, %v1756_v24  ;;  %v9946_v57 = vld [vmem:[#allocation13_spill] sm:$0xff] }
 0x112   :  { %v616_v0 = vpop.f32.mrf.mxu0 }
 0x113   :  { %v5436_v9 = vpop.f32.mrf.mxu1 }
 0x114   :  { %v619_v33 = vpop.f32.mrf.mxu0  ;;  %5578 = vmatmul.mubr.msk.f32.gmra.mxu0 %vm508_vm2, %v1315_v8  ;;  %1995 = vmatmul.mubr.f32.gmra.mxu1 %v1771_v19  ;;  %v1785_v8 = vsel %vm1742_vm6, %v1778_v49, %v1784_v17  ;;  %v1783_v49 = vsel %vm1742_vm6, %v1776_v6, %v1782_v30  ;;  %v9945_v19 = vld [vmem:[#allocation12_spill] sm:$0xff]  ;;  %v1791_v9 = vsel %vm1742_vm6, %v1784_v17, %v1790_v45 }
 0x115   :  { %v7836_v32 = vadd.f32 %v7589_v51, %v619_v33  ;;  %v7838_v16 = vpop.f32.mrf.mxu1  ;;  %5596 = vmatprep.mubr.msk.f32.mxu0 %vm6284_vm3, %v9936_v42  ;;  %1999 = vmatprep.mubr.f32.mxu1 %v1779_v26  ;;  %v1788_v0 = vrot.slane %v9945_v19, 3  ;;  %v1796_v33 = vrot.slane %v9946_v57, 3  ;;  %v1763_v6 = vsel %vm1742_vm6, %v1756_v24, %v1762_v55 }
 0x116   :  { %v621_v63 = vpop.f32.mrf.mxu0 }
 0x117   :  { %v5439_v12 = vpop.f32.mrf.mxu1  ;;  %v1789_v17 = vsel %vm1742_vm6, %v1782_v30, %v1788_v0  ;;  %v1795_v30 = vsel %vm1742_vm6, %v1788_v0, %v1794_v54 }
 0x118   :  { %v624_v51 = vpop.f32.mrf.mxu0  ;;  %5597 = vmatmul.mubr.msk.f32.vlgmr.msra.gmra.mxu0 %vm508_vm2, %v1751_v20  ;;  %2000 = vmatmul.mubr.f32.gmra.mxu1 %v1777_v31  ;;  %v1768_v20 = vrot.slane %v6497_v43, 3  ;;  %v9947_v43 = vld [vmem:[#allocation14_spill] sm:$0xff] }
 0x119   :  { %v7850_v58 = vadd.f32 %v7612_v40, %v624_v51  ;;  %v7852_v59 = vpop.f32.mrf.mxu1  ;;  %5599 = vmatprep.mubr.msk.f32.mxu0 %vm6284_vm3, %v9936_v42  ;;  %2004 = vmatprep.mubr.f32.mxu1 %v1785_v8  ;;  %v1797_v8 = vsel %vm1742_vm6, %v1790_v45, %v1796_v33  ;;  %v1802_v36 = vrot.slane %v9947_v43, 3  ;;  %v1800_v45 = vrot.slane %v7093_v1, 3 }
 0x11a   :  { %v626_v26 = vpop.f32.mrf.mxu0  ;;  %v1769_v51 = vsel %vm1742_vm6, %v1762_v55, %v1768_v20  ;;  %v1775_v1 = vsel %vm1742_vm6, %v1768_v20, %v1774_v39 }
 0x11b   :  { %v5442_v21 = vpop.f32.mrf.mxu1  ;;  %v1803_v55 = vsel %vm1742_vm6, %v1796_v33, %v1802_v36  ;;  %v9948_v26 = vld [vmem:[#allocation15_spill] sm:$0xff]  ;;  %v1806_v33 = vrot.slane %v7119_v50, 3  ;;  %v1786_v50 = vrot.slane %v6579_v7, 3 }
 0x11c   :  { %v629_v40 = vpop.f32.mrf.mxu0  ;;  %5600 = vmatmul.mubr.msk.f32.gmra.mxu0 %vm508_vm2, %v1757_v41  ;;  %2005 = vmatmul.mubr.f32.gmra.mxu1 %v1783_v49  ;;  %v1780_v21 = vrot.slane %v6552_v61, 3 }
 0x11d   :  { %v7864_v31 = vadd.f32 %v7634_v14, %v629_v40  ;;  %v7866_v34 = vpop.f32.mrf.mxu1  ;;  %5602 = vmatprep.mubr.msk.f32.mxu0 %vm6284_vm3, %v9936_v42  ;;  %2009 = vmatprep.mubr.f32.mxu1 %v1791_v9 }
 0x11e   :  { %v631_v63 = vpop.f32.mrf.mxu0 }
 0x11f   :  { %v5445_v12 = vpop.f32.mrf.mxu1 }
 0x120   :  { %v634_v14 = vpop.f32.mrf.mxu0  ;;  %5603 = vmatmul.mubr.msk.f32.gmra.mxu0 %vm508_vm2, %v1763_v6  ;;  %2010 = vmatmul.mubr.f32.gmra.mxu1 %v1789_v17 }
 0x121   :  { %v7878_v41 = vadd.f32 %v7661_v29, %v634_v14  ;;  %v943_v24 = vpop.f32.mrf.mxu1  ;;  %5605 = vmatprep.mubr.msk.f32.mxu0 %vm6284_vm3, %v9936_v42  ;;  %2014 = vmatprep.mubr.f32.mxu1 %v1797_v8  ;;  %v1808_v29 = vrot.slane %v9948_v26, 3  ;;  %v1781_v8 = vsel %vm1742_vm6, %v1774_v39, %v1780_v21  ;;  %v1792_v39 = vrot.slane %v6606_v18, 3  ;;  %v9950_v26 = vld [vmem:[#allocation17_spill] sm:$0xff] }
 0x122   :  { %v7886_v49 = vadd.f32 %v943_v24, %v7810_v11  ;;  %v636_v19 = vpop.f32.mrf.mxu0  ;;  %v1801_v11 = vsel %vm1742_vm6, %v1794_v54, %v1800_v45 }
 0x123   :  { %v945_v9 = vpop.f32.mrf.mxu1  ;;  %v1809_v61 = vsel %vm1742_vm6, %v1802_v36, %v1808_v29 }
 0x124   :  { %v639_v57 = vpop.f32.mrf.mxu0  ;;  %5606 = vmatmul.mubr.msk.f32.gmra.mxu0 %vm508_vm2, %v1769_v51  ;;  %2015 = vmatmul.mubr.f32.gmra.mxu1 %v1795_v30 }
 0x125   :  { %v7893_v52 = vadd.f32 %v7680_v56, %v639_v57  ;;  %v948_v0 = vpop.f32.mrf.mxu1  ;;  %5608 = vmatprep.mubr.msk.f32.mxu0 %vm6284_vm3, %v9936_v42  ;;  %2019 = vmatprep.mubr.f32.mxu1 %v1803_v55  ;;  %v1814_v56 = vrot.slane %v7122_v47, 3  ;;  %v9949_v47 = vld [vmem:[#allocation16_spill] sm:$0xff]  ;;  %v1793_v57 = vsel %vm1742_vm6, %v1786_v50, %v1792_v39 }
 0x126   :  { %v7901_v40 = vadd.f32 %v948_v0, %v7822_v37  ;;  %v641_v6 = vpop.f32.mrf.mxu0  ;;  %v1807_v37 = vsel %vm1742_vm6, %v1800_v45, %v1806_v33  ;;  %v1812_v43 = vrot.slane %v9949_v47, 3 }
 0x127   :  { %v950_v17 = vpop.f32.mrf.mxu1  ;;  %v1815_v14 = vsel %vm1742_vm6, %v1808_v29, %v1814_v56 }
 0x128   :  { %v644_v63 = vpop.f32.mrf.mxu0  ;;  %5609 = vmatmul.mubr.msk.f32.gmra.mxu0 %vm508_vm2, %v1775_v1  ;;  %2020 = vmatmul.mubr.f32.gmra.mxu1 %v1801_v11  ;;  %v1813_v45 = vsel %vm1742_vm6, %v1806_v33, %v1812_v43  ;;  %v1824_v1 = vrot.slane %v7197_v13, 3  ;;  %v1804_v17 = vrot.slane %v6660_v38, 3 }
 0x129   :  { %v7908_v20 = vadd.f32 %v7703_v60, %v644_v63  ;;  %v953_v54 = vpop.f32.mrf.mxu1  ;;  %5611 = vmatprep.mubr.msk.f32.mxu0 %vm6284_vm3, %v9936_v42  ;;  %2024 = vmatprep.mubr.f32.mxu1 %v1809_v61  ;;  %v1820_v60 = vrot.slane %v7148_v62, 3  ;;  %v1818_v62 = vrot.slane %v7171_v2, 3  ;;  %v1798_v2 = vrot.slane %v6633_v28, 3 }
 0x12a   :  { %v7916_v36 = vadd.f32 %v953_v54, %v7836_v32  ;;  %v646_v12 = vpop.f32.mrf.mxu0  ;;  %v1787_v32 = vsel %vm1742_vm6, %v1780_v21, %v1786_v50 }
 0x12b   :  { %v955_v51 = vpop.f32.mrf.mxu1  ;;  %v1821_v18 = vsel %vm1742_vm6, %v1814_v56, %v1820_v60  ;;  %v1799_v13 = vsel %vm1742_vm6, %v1792_v39, %v1798_v2  ;;  %v1805_v12 = vsel %vm1742_vm6, %v1798_v2, %v1804_v17 }
 0x12c   :  { %v649_v24 = vpop.f32.mrf.mxu0  ;;  %5612 = vmatmul.mubr.msk.f32.gmra.mxu0 %vm508_vm2, %v1781_v8  ;;  %2025 = vmatmul.mubr.f32.gmra.mxu1 %v1807_v37  ;;  %v9952_v37 = vld [vmem:[#allocation19_spill] sm:$0xff] }
 0x12d   :  { %v7923_v7 = vadd.f32 %v7725_v35, %v649_v24  ;;  %v958_v30 = vpop.f32.mrf.mxu1  ;;  %5614 = vmatprep.mubr.msk.f32.mxu0 %vm6284_vm3, %v9936_v42  ;;  %2029 = vmatprep.mubr.f32.mxu1 %v1815_v14  ;;  %v1826_v35 = vrot.slane %v9950_v26, 3  ;;  %v1836_v24 = vrot.slane %v7240_v10, 3  ;;  %v1816_v10 = vrot.slane %v6737_v3, 3 }
 0x12e   :  { %v7931_v19 = vadd.f32 %v958_v30, %v7850_v58  ;;  %v651_v55 = vpop.f32.mrf.mxu0  ;;  %v1819_v58 = vsel %vm1742_vm6, %v1812_v43, %v1818_v62 }
 0x12f   :  { %v960_v29 = vpop.f32.mrf.mxu1  ;;  %v1827_v6 = vsel %vm1742_vm6, %v1820_v60, %v1826_v35 }
 0x130   :  { %v654_v9 = vpop.f32.mrf.mxu0  ;;  %5615 = vmatmul.mubr.msk.f32.gmra.mxu0 %vm508_vm2, %v1787_v32  ;;  %2030 = vmatmul.mubr.f32.gmra.mxu1 %v1813_v45 }
 0x131   :  { %v7938_v21 = vadd.f32 %v7749_v46, %v654_v9  ;;  %v963_v0 = vpop.f32.mrf.mxu1  ;;  %5617 = vmatprep.mubr.msk.f32.mxu0 %vm6284_vm3, %v9936_v42  ;;  %2034 = vmatprep.mubr.f32.mxu1 %v1821_v18  ;;  %v1832_v46 = vrot.slane %v7200_v5, 3  ;;  %v9951_v5 = vld [vmem:[#allocation18_spill] sm:$0xff] }
 0x132   :  { %v7946_v11 = vadd.f32 %v963_v0, %v7864_v31  ;;  %v656_v33 = vpop.f32.mrf.mxu0  ;;  %v1825_v31 = vsel %vm1742_vm6, %v1818_v62, %v1824_v1  ;;  %v1830_v8 = vrot.slane %v9951_v5, 3 }
 0x133   :  { %v965_v61 = vpop.f32.mrf.mxu1  ;;  %v1833_v38 = vsel %vm1742_vm6, %v1826_v35, %v1832_v46 }
 0x134   :  { %v659_v56 = vpop.f32.mrf.mxu0  ;;  %5618 = vmatmul.mubr.msk.f32.gmra.mxu0 %vm508_vm2, %v1793_v57  ;;  %2035 = vmatmul.mubr.f32.gmra.mxu1 %v1819_v58  ;;  %v1831_v51 = vsel %vm1742_vm6, %v1824_v1, %v1830_v8  ;;  %v1822_v57 = vrot.slane %v6797_v25, 3  ;;  %v1828_v25 = vrot.slane %v9939_v44, 3 }
 0x135   :  { %v7953_v28 = vadd.f32 %v7775_v22, %v659_v56  ;;  %v968_v63 = vpop.f32.mrf.mxu1  ;;  %5620 = vmatprep.mubr.msk.f32.mxu0 %vm6284_vm3, %v9936_v42  ;;  %2039 = vmatprep.mubr.f32.mxu1 %v1827_v6  ;;  %v1838_v22 = vrot.slane %v9952_v37, 3 }
 0x136   :  { %v7961_v54 = vadd.f32 %v968_v63, %v7878_v41  ;;  %v661_v50 = vpop.f32.mrf.mxu0  ;;  %v1810_v41 = vrot.slane %v6687_v48, 3  ;;  %v1823_v33 = vsel %vm1742_vm6, %v1816_v10, %v1822_v57  ;;  %v1834_v63 = vrot.slane %v9940_v4, 3 }
 0x137   :  { %v970_v47 = vpop.f32.mrf.mxu1  ;;  %v1839_v32 = vsel %vm1742_vm6, %v1832_v46, %v1838_v22  ;;  %v1840_v50 = vrot.slane %v9941_v53, 3 }
 0x138   :  { %v664_v43 = vpop.f32.mrf.mxu0  ;;  %5621 = vmatmul.mubr.msk.f32.gmra.mxu0 %vm508_vm2, %v1799_v13  ;;  %2040 = vmatmul.mubr.f32.gmra.mxu1 %v1825_v31  ;;  %v1811_v48 = vsel %vm1742_vm6, %v1804_v17, %v1810_v41  ;;  %v1817_v3 = vsel %vm1742_vm6, %v1810_v41, %v1816_v10 }
 0x139   :  { %v7968_v14 = vadd.f32 %v7793_v23, %v664_v43  ;;  %v973_v60 = vpop.f32.mrf.mxu1  ;;  %5623 = vmatprep.mubr.msk.f32.mxu0 %vm6284_vm3, %v9936_v42  ;;  %2044 = vmatprep.mubr.f32.mxu1 %v1833_v38 }
 0x13a   :  { %v7976_v39 = vadd.f32 %v973_v60, %v7893_v52  ;;  %v666_v30 = vpop.f32.mrf.mxu0  ;;  %v1837_v52 = vsel %vm1742_vm6, %v1830_v8, %v1836_v24 }
 0x13b   :  { %v975_v45 = vpop.f32.mrf.mxu1 }
 0x13c   :  { %v669_v23 = vpop.f32.mrf.mxu0  ;;  %5624 = vmatmul.mubr.msk.f32.gmra.mxu0 %vm508_vm2, %v1805_v12  ;;  %2045 = vmatmul.mubr.f32.gmra.mxu1 %v1831_v51 }
 0x13d   :  { %v820_v62 = vadd.f32 %v7806_v27, %v669_v23  ;;  %v978_v55 = vpop.f32.mrf.mxu1  ;;  %5626 = vmatprep.mubr.msk.f32.mxu0 %vm6284_vm3, %v9936_v42  ;;  %2049 = vmatprep.mubr.f32.mxu1 %v1839_v32 }
 0x13e   :  { %v7987_v18 = vadd.f32 %v978_v55, %v7908_v20  ;;  %v671_v26 = vpop.f32.mrf.mxu0 }
 0x13f   :  { %v980_v35 = vpop.f32.mrf.mxu1 }
 0x140   :  { %v674_v29 = vpop.f32.mrf.mxu0  ;;  %5627 = vmatmul.mubr.msk.f32.gmra.mxu0 %vm508_vm2, %v1811_v48  ;;  %2050 = vmatmul.mubr.f32.gmra.mxu1 %v1837_v52 }
 0x141   :  { %v825_v27 = vadd.f32 %v7824_v15, %v674_v29  ;;  %v983_v9 = vpop.f32.mrf.mxu1  ;;  %5629 = vmatprep.mubr.msk.f32.mxu0 %vm6284_vm3, %v9936_v42  ;;  %2054 = vmatprep.mubr.f32.mxu1 %v1838_v22 }
 0x142   :  { %v7996_v20 = vadd.f32 %v983_v9, %v7923_v7  ;;  %v676_v0 = vpop.f32.mrf.mxu0 }
 0x143   :  { %v985_v2 = vpop.f32.mrf.mxu1 }
 0x144   :  { %v679_v58 = vpop.f32.mrf.mxu0  ;;  %5630 = vmatmul.mubr.msk.f32.gmra.mxu0 %vm508_vm2, %v1817_v3  ;;  %2055 = vmatmul.mubr.f32.gmra.mxu1 %v1836_v24 }
 0x145   :  { %v830_v15 = vadd.f32 %v7838_v16, %v679_v58  ;;  %v988_v1 = vpop.f32.mrf.mxu1  ;;  %5632 = vmatprep.mubr.msk.f32.mxu0 %vm6284_vm3, %v9936_v42  ;;  %v1829_v16 = vsel %vm1742_vm6, %v1822_v57, %v1828_v25 }
 0x146   :  { %v8005_v6 = vadd.f32 %v988_v1, %v7938_v21  ;;  %v681_v7 = vpop.f32.mrf.mxu0 }
 0x147   :  { %v990_v46 = vpop.f32.mrf.mxu1 }
 0x148   :  { %v684_v61 = vpop.f32.mrf.mxu0  ;;  %5633 = vmatmul.mubr.msk.f32.gmra.mxu0 %vm508_vm2, %v1823_v33 }
 0x149   :  { %v835_v56 = vadd.f32 %v7852_v59, %v684_v61  ;;  %v993_v17 = vpop.f32.mrf.mxu1  ;;  %5635 = vmatprep.mubr.msk.f32.mxu0 %vm6284_vm3, %v9936_v42  ;;  %v1835_v59 = vsel %vm1742_vm6, %v1828_v25, %v1834_v63 }
 0x14a   :  { %v8014_v44 = vadd.f32 %v993_v17, %v7953_v28  ;;  %v686_v21 = vpop.f32.mrf.mxu0 }
 0x14b   :  { %v995_v13 = vpop.f32.mrf.mxu1 }
 0x14c   :  { %v689_v31 = vpop.f32.mrf.mxu0  ;;  %5636 = vmatmul.mubr.msk.f32.gmra.mxu0 %vm508_vm2, %v1829_v16 }
 0x14d   :  { %v840_v5 = vadd.f32 %v7866_v34, %v689_v31  ;;  %v998_v8 = vpop.f32.mrf.mxu1  ;;  %5638 = vmatprep.mubr.msk.f32.mxu0 %vm6284_vm3, %v9936_v42  ;;  %v1841_v34 = vsel %vm1742_vm6, %v1834_v63, %v1840_v50 }
 0x14e   :  { %v999_v4 = vadd.f32 %v998_v8, %v7968_v14  ;;  %v691_v38 = vpop.f32.mrf.mxu0 }
 0x14f   :  { %v1000_v28 = vpop.f32.mrf.mxu1 }
 0x150   :  { %v1093_v37 = vpop.f32.mrf.mxu0  ;;  %5639 = vmatmul.mubr.msk.f32.gmra.mxu0 %vm508_vm2, %v1835_v59 }
 0x151   :  { %v1003_v22 = vpop.f32.mrf.mxu1  ;;  %v8025_v47 = vadd.f32 %v1093_v37, %v7886_v49  ;;  %5641 = vmatprep.mubr.msk.f32.mxu0 %vm6284_vm3, %v9936_v42 }
 0x152   :  { %v1004_v43 = vadd.f32 %v1003_v22, %v820_v62  ;;  %v5464_v12 = vpop.f32.mrf.mxu0 }
 0x153   :  { %v1005_v60 = vpop.f32.mrf.mxu1 }
 0x154   :  { %v1098_v53 = vpop.f32.mrf.mxu0  ;;  %5642 = vmatmul.mubr.msk.f32.gmra.mxu0 %vm508_vm2, %v1841_v34 }
 0x155   :  { %v1008_v14 = vpop.f32.mrf.mxu1  ;;  %v8032_v41 = vadd.f32 %v1098_v53, %v7901_v40  ;;  %5644 = vmatprep.mubr.msk.f32.mxu0 %vm6284_vm3, %v9936_v42 }
 0x156   :  { %v1009_v49 = vadd.f32 %v1008_v14, %v825_v27  ;;  %v5467_v51 = vpop.f32.mrf.mxu0 }
 0x157   :  { %v1010_v24 = vpop.f32.mrf.mxu1 }
 0x158   :  { %v1103_v30 = vpop.f32.mrf.mxu0  ;;  %5645 = vmatmul.mubr.msk.f32.gmra.mxu0 %vm508_vm2, %v1840_v50 }
 0x159   :  { %v1013_v32 = vpop.f32.mrf.mxu1  ;;  %v8038_v45 = vadd.f32 %v1103_v30, %v7916_v36  ;;  %5679 = vmatprep.mubr.msk.f32.mxu0 %vm6284_vm3, %v9936_v42 }
 0x15a   :  { %v1014_v23 = vadd.f32 %v1013_v32, %v830_v15  ;;  %v5470_v62 = vpop.f32.mrf.mxu0 }
 0x15b   :  { %v1015_v40 = vpop.f32.mrf.mxu1 }
 0x15c   :  { %v1108_v55 = vpop.f32.mrf.mxu0 }
 0x15d   :  { %v1018_v48 = vpop.f32.mrf.mxu1  ;;  %v8043_v10 = vadd.f32 %v1108_v55, %v7931_v19 }
 0x15e   :  { %v1019_v52 = vadd.f32 %v1018_v48, %v835_v56  ;;  %v5473_v26 = vpop.f32.mrf.mxu0 }
 0x15f   :  { %v1020_v35 = vpop.f32.mrf.mxu1 }
 0x160   :  { %v1113_v29 = vpop.f32.mrf.mxu0 }
 0x161   :  { %v1023_v27 = vpop.f32.mrf.mxu1  ;;  %v8046_v9 = vadd.f32 %v1113_v29, %v7946_v11 }
 0x162   :  { %v1024_v36 = vadd.f32 %v1023_v27, %v840_v5  ;;  %v5476_v3 = vpop.f32.mrf.mxu0 }
 0x163   :  { %v1025_v57 = vpop.f32.mrf.mxu1 }
 0x164   :  { %v1118_v0 = vpop.f32.mrf.mxu0 }
 0x165   :  { %v8049_v2 = vadd.f32 %v1118_v0, %v7961_v54 }
 0x166   :  { %v5479_v58 = vpop.f32.mrf.mxu0 }
 0x168   :  { %v1123_v15 = vpop.f32.mrf.mxu0 }
 0x169   :  { %v8052_v19 = vadd.f32 %v1123_v15, %v7976_v39 }
 0x16a   :  { %v5482_v1 = vpop.f32.mrf.mxu0 }
 0x16c   :  { %v1128_v33 = vpop.f32.mrf.mxu0 }
 0x16d   :  { %v8055_v25 = vadd.f32 %v1128_v33, %v7987_v18 }
 0x16e   :  { %v5485_v7 = vpop.f32.mrf.mxu0 }
 0x170   :  { %v1133_v11 = vpop.f32.mrf.mxu0 }
 0x171   :  { %v8058_v46 = vadd.f32 %v1133_v11, %v7996_v20 }
 0x172   :  { %v5488_v61 = vpop.f32.mrf.mxu0 }
 0x174   :  { %v1138_v56 = vpop.f32.mrf.mxu0 }
 0x175   :  { %v8061_v54 = vadd.f32 %v1138_v56, %v8005_v6 }
 0x176   :  { %v5491_v17 = vpop.f32.mrf.mxu0 }
 0x178   :  { %v1143_v16 = vpop.f32.mrf.mxu0 }
 0x179   :  { %v8064_v39 = vadd.f32 %v1143_v16, %v8014_v44 }
 0x17a   :  { %v5494_v63 = vpop.f32.mrf.mxu0  ;;  %v1451_v21 = vpop.f32.mrf.mxu1 }
 0x17c   :  { %v1148_v13 = vpop.f32.mrf.mxu0  ;;  %v1453_v18 = vpop.f32.mrf.mxu1 }
 0x17d   :  { %v8066_v31 = vadd.f32 %v1148_v13, %v999_v4 }
 0x17e   :  { %v5497_v5 = vpop.f32.mrf.mxu0  ;;  %v1456_v8 = vpop.f32.mrf.mxu1 }
 0x180   :  { %v1153_v20 = vpop.f32.mrf.mxu0  ;;  %v1458_v59 = vpop.f32.mrf.mxu1 }
 0x181   :  { %v8068_v50 = vadd.f32 %v1153_v20, %v1004_v43 }
 0x182   :  { %v5500_v38 = vpop.f32.mrf.mxu0  ;;  %v1461_v6 = vpop.f32.mrf.mxu1 }
 0x184   :  { %v1158_v28 = vpop.f32.mrf.mxu0  ;;  %v1463_v37 = vpop.f32.mrf.mxu1 }
 0x185   :  { %v8070_v22 = vadd.f32 %v1158_v28, %v1009_v49 }
 0x186   :  { %v5503_v44 = vpop.f32.mrf.mxu0  ;;  %v1466_v34 = vpop.f32.mrf.mxu1 }
 0x188   :  { %v1163_v12 = vpop.f32.mrf.mxu0  ;;  %v1468_v60 = vpop.f32.mrf.mxu1 }
 0x189   :  { %v8072_v53 = vadd.f32 %v1163_v12, %v1014_v23 }
 0x18a   :  { %v5506_v4 = vpop.f32.mrf.mxu0  ;;  %v1471_v14 = vpop.f32.mrf.mxu1 }
 0x18c   :  { %v1168_v51 = vpop.f32.mrf.mxu0  ;;  %v1473_v24 = vpop.f32.mrf.mxu1 }
 0x18d   :  { %v8074_v30 = vadd.f32 %v1168_v51, %v1019_v52 }
 0x18e   :  { %v5509_v43 = vpop.f32.mrf.mxu0  ;;  %v1476_v32 = vpop.f32.mrf.mxu1 }
 0x190   :  { %v1173_v62 = vpop.f32.mrf.mxu0  ;;  %v1478_v40 = vpop.f32.mrf.mxu1 }
 0x191   :  { %v8076_v55 = vadd.f32 %v1173_v62, %v1024_v36 }
 0x192   :  { %v5512_v49 = vpop.f32.mrf.mxu0  ;;  %v1481_v48 = vpop.f32.mrf.mxu1 }
 0x194   :  { %v1601_v26 = vpop.f32.mrf.mxu0  ;;  %v1483_v35 = vpop.f32.mrf.mxu1 }
 0x195   :  { %v1602_v29 = vadd.f32 %v1601_v26, %v1451_v21 }
 0x196   :  { %v5531_v27 = vpop.f32.mrf.mxu0  ;;  %v1486_v23 = vpop.f32.mrf.mxu1 }
 0x197   :  { %v8079_v3 = vadd.f32 %v1602_v29, %v8025_v47 }
 0x198   :  { %v1606_v57 = vpop.f32.mrf.mxu0  ;;  %v1488_v0 = vpop.f32.mrf.mxu1 }
 0x199   :  { %v1607_v52 = vadd.f32 %v1606_v57, %v1456_v8 }
 0x19a   :  { %v5534_v58 = vpop.f32.mrf.mxu0  ;;  %v1491_v15 = vpop.f32.mrf.mxu1 }
 0x19b   :  { %v8082_v1 = vadd.f32 %v1607_v52, %v8032_v41 }
 0x19c   :  { %v1611_v36 = vpop.f32.mrf.mxu0  ;;  %v1493_v33 = vpop.f32.mrf.mxu1 }
 0x19d   :  { %v1612_v7 = vadd.f32 %v1611_v36, %v1461_v6 }
 0x19e   :  { %v5537_v11 = vpop.f32.mrf.mxu0  ;;  %v1496_v61 = vpop.f32.mrf.mxu1 }
 0x19f   :  { %v8085_v56 = vadd.f32 %v1612_v7, %v8038_v45 }
 0x1a0   :  { %v1616_v17 = vpop.f32.mrf.mxu0  ;;  %v1498_v16 = vpop.f32.mrf.mxu1 }
 0x1a1   :  { %v1617_v47 = vadd.f32 %v1616_v17, %v1466_v34 }
 0x1a2   :  { %v5540_v63 = vpop.f32.mrf.mxu0  ;;  %v1501_v21 = vpop.f32.mrf.mxu1 }
 0x1a3   :  { %v8088_v13 = vadd.f32 %v1617_v47, %v8043_v10 }
 0x1a4   :  { %v1621_v18 = vpop.f32.mrf.mxu0  ;;  %v1503_v5 = vpop.f32.mrf.mxu1 }
 0x1a5   :  { %v1622_v41 = vadd.f32 %v1621_v18, %v1471_v14 }
 0x1a6   :  { %v5543_v8 = vpop.f32.mrf.mxu0  ;;  %v1506_v20 = vpop.f32.mrf.mxu1 }
 0x1a7   :  { %v8091_v59 = vadd.f32 %v1622_v41, %v8046_v9 }
 0x1a8   :  { %v1626_v38 = vpop.f32.mrf.mxu0  ;;  %v1508_v6 = vpop.f32.mrf.mxu1 }
 0x1a9   :  { %v1627_v45 = vadd.f32 %v1626_v38, %v1476_v32 }
 0x1aa   :  { %v5546_v28 = vpop.f32.mrf.mxu0  ;;  %v1511_v37 = vpop.f32.mrf.mxu1 }
 0x1ab   :  { %v8094_v44 = vadd.f32 %v1627_v45, %v8049_v2 }
 0x1ac   :  { %v1631_v34 = vpop.f32.mrf.mxu0  ;;  %v1513_v12 = vpop.f32.mrf.mxu1 }
 0x1ad   :  { %v1632_v10 = vadd.f32 %v1631_v34, %v1481_v48 }
 0x1ae   :  { %v5549_v60 = vpop.f32.mrf.mxu0  ;;  %v1516_v4 = vpop.f32.mrf.mxu1 }
 0x1af   :  { %v8097_v14 = vadd.f32 %v1632_v10, %v8052_v19 }
 0x1b0   :  { %v1636_v51 = vpop.f32.mrf.mxu0  ;;  %v1518_v24 = vpop.f32.mrf.mxu1 }
 0x1b1   :  { %v1637_v9 = vadd.f32 %v1636_v51, %v1486_v23 }
 0x1b2   :  { %v5552_v43 = vpop.f32.mrf.mxu0 }
 0x1b3   :  { %v8100_v62 = vadd.f32 %v1637_v9, %v8055_v25  ;;  %v1521_v32 = vpop.f32.mrf.mxu1 }
 0x1b4   :  { %v1641_v40 = vpop.f32.mrf.mxu0 }
 0x1b5   :  { %v1642_v49 = vadd.f32 %v1641_v40, %v1491_v15  ;;  %v1523_v2 = vpop.f32.mrf.mxu1 }
 0x1b6   :  { %v5555_v26 = vpop.f32.mrf.mxu0 }
 0x1b7   :  { %v8103_v35 = vadd.f32 %v1642_v49, %v8058_v46  ;;  %v1526_v48 = vpop.f32.mrf.mxu1 }
 0x1b8   :  { %v1646_v29 = vpop.f32.mrf.mxu0 }
 0x1b9   :  { %v1647_v27 = vadd.f32 %v1646_v29, %v1496_v61  ;;  %v1528_v19 = vpop.f32.mrf.mxu1 }
 0x1ba   :  { %v5558_v57 = vpop.f32.mrf.mxu0 }
 0x1bb   :  { %v8106_v0 = vadd.f32 %v1647_v27, %v8061_v54 }
 0x1bc   :  { %v1651_v23 = vpop.f32.mrf.mxu0 }
 0x1bd   :  { %v1652_v52 = vadd.f32 %v1651_v23, %v1501_v21 }
 0x1be   :  { %v5561_v25 = vpop.f32.mrf.mxu0  ;;  %v1531_v58 = vpop.f32.mrf.mxu1 }
 0x1bf   :  { %v8109_v36 = vadd.f32 %v1652_v52, %v8064_v39 }
 0x1c0   :  { %v1656_v15 = vpop.f32.mrf.mxu0  ;;  %v1533_v33 = vpop.f32.mrf.mxu1 }
 0x1c1   :  { %v1657_v7 = vadd.f32 %v1656_v15, %v1506_v20 }
 0x1c2   :  { %v5564_v46 = vpop.f32.mrf.mxu0 }
 0x1c3   :  { %v8112_v11 = vadd.f32 %v1657_v7, %v8066_v31 }
 0x1c4   :  { %v1661_v61 = vpop.f32.mrf.mxu0  ;;  %v1976_v17 = vpop.f32.mrf.mxu1 }
 0x1c5   :  { %v1662_v16 = vadd.f32 %v1661_v61, %v1511_v37 }
 0x1c6   :  { %v5567_v47 = vpop.f32.mrf.mxu0  ;;  %v1978_v54 = vpop.f32.mrf.mxu1 }
 0x1c7   :  { %v8115_v63 = vadd.f32 %v1662_v16, %v8068_v50 }
 0x1c8   :  { %v1666_v21 = vpop.f32.mrf.mxu0  ;;  %v1981_v18 = vpop.f32.mrf.mxu1 }
 0x1c9   :  { %v1667_v5 = vadd.f32 %v1666_v21, %v1516_v4 }
 0x1ca   :  { %v5570_v39 = vpop.f32.mrf.mxu0  ;;  %v1983_v41 = vpop.f32.mrf.mxu1 }
 0x1cb   :  { %v8118_v8 = vadd.f32 %v1667_v5, %v8070_v22 }
 0x1cc   :  { %v1671_v20 = vpop.f32.mrf.mxu0  ;;  %v1986_v38 = vpop.f32.mrf.mxu1 }
 0x1cd   :  { %v1672_v31 = vadd.f32 %v1671_v20, %v1521_v32 }
 0x1ce   :  { %v5573_v6 = vpop.f32.mrf.mxu0  ;;  %v1988_v45 = vpop.f32.mrf.mxu1 }
 0x1cf   :  { %v8121_v28 = vadd.f32 %v1672_v31, %v8072_v53 }
 0x1d0   :  { %v1676_v37 = vpop.f32.mrf.mxu0  ;;  %v1991_v34 = vpop.f32.mrf.mxu1 }
 0x1d1   :  { %v1677_v50 = vadd.f32 %v1676_v37, %v1526_v48 }
 0x1d2   :  { %v5576_v12 = vpop.f32.mrf.mxu0  ;;  %v1993_v10 = vpop.f32.mrf.mxu1 }
 0x1d3   :  { %v8124_v60 = vadd.f32 %v1677_v50, %v8074_v30 }
 0x1d4   :  { %v1681_v4 = vpop.f32.mrf.mxu0  ;;  %v1996_v51 = vpop.f32.mrf.mxu1 }
 0x1d5   :  { %v1682_v22 = vadd.f32 %v1681_v4, %v1531_v58 }
 0x1d6   :  { %v5579_v24 = vpop.f32.mrf.mxu0  ;;  %v1998_v9 = vpop.f32.mrf.mxu1 }
 0x1d7   :  { %v8127_v43 = vadd.f32 %v1682_v22, %v8076_v55 }
 0x1d8   :  { %v2126_v32 = vpop.f32.mrf.mxu0  ;;  %v2001_v40 = vpop.f32.mrf.mxu1 }
 0x1d9   :  { %v2127_v53 = vadd.f32 %v2126_v32, %v1976_v17 }
 0x1da   :  { %v5598_v49 = vpop.f32.mrf.mxu0  ;;  %v2003_v2 = vpop.f32.mrf.mxu1 }
 0x1db   :  { %v8130_v26 = vadd.f32 %v2127_v53, %v8079_v3 }
 0x1dc   :  { %v2131_v48 = vpop.f32.mrf.mxu0  ;;  %v2006_v29 = vpop.f32.mrf.mxu1 }
 0x1dd   :  { %v2132_v30 = vadd.f32 %v2131_v48, %v1981_v18 }
 0x1de   :  { %v5601_v27 = vpop.f32.mrf.mxu0  ;;  %v2008_v19 = vpop.f32.mrf.mxu1 }
 0x1df   :  { %v8133_v57 = vadd.f32 %v2132_v30, %v8082_v1 }
 0x1e0   :  { %v2136_v23 = vpop.f32.mrf.mxu0  ;;  %v2011_v52 = vpop.f32.mrf.mxu1 }
 0x1e1   :  { %v2137_v55 = vadd.f32 %v2136_v23, %v1986_v38 }
 0x1e2   :  { %v5604_v25 = vpop.f32.mrf.mxu0  ;;  %v2013_v58 = vpop.f32.mrf.mxu1 }
 0x1e3   :  { %v8136_v15 = vadd.f32 %v2137_v55, %v8085_v56 }
 0x1e4   :  { %v2141_v33 = vpop.f32.mrf.mxu0  ;;  %v8138_v7 = vpop.f32.mrf.mxu1 }
 0x1e5   :  { %v2142_v3 = vadd.f32 %v2141_v33, %v1991_v34 }
 0x1e6   :  { %v5607_v46 = vpop.f32.mrf.mxu0  ;;  %v2018_v61 = vpop.f32.mrf.mxu1 }
 0x1e7   :  { %v8141_v17 = vadd.f32 %v2142_v3, %v8088_v13 }
 0x1e8   :  { %v2146_v16 = vpop.f32.mrf.mxu0  ;;  %v8143_v1 = vpop.f32.mrf.mxu1 }
 0x1e9   :  { %v2147_v47 = vadd.f32 %v2146_v16, %v1996_v51 }
 0x1ea   :  { %v5610_v54 = vpop.f32.mrf.mxu0  ;;  %v2023_v21 = vpop.f32.mrf.mxu1 }
 0x1eb   :  { %v8146_v18 = vadd.f32 %v2147_v47, %v8091_v59 }
 0x1ec   :  { %v2151_v56 = vpop.f32.mrf.mxu0  ;;  %v2026_v5 = vpop.f32.mrf.mxu1 }
 0x1ed   :  { %v2152_v39 = vadd.f32 %v2151_v56, %v2001_v40 }
 0x1ee   :  { %v5613_v41 = vpop.f32.mrf.mxu0  ;;  %v2028_v20 = vpop.f32.mrf.mxu1 }
 0x1ef   :  { %v8149_v38 = vadd.f32 %v2152_v39, %v8094_v44 }
 0x1f0   :  { %v2156_v31 = vpop.f32.mrf.mxu0  ;;  %v2031_v13 = vpop.f32.mrf.mxu1 }
 0x1f1   :  { %v2157_v6 = vadd.f32 %v2156_v31, %v2006_v29 }
 0x1f2   :  { %v5616_v45 = vpop.f32.mrf.mxu0  ;;  %v2033_v37 = vpop.f32.mrf.mxu1 }
 0x1f3   :  { %v8152_v34 = vadd.f32 %v2157_v6, %v8097_v14 }
 0x1f4   :  { %v2161_v50 = vpop.f32.mrf.mxu0  ;;  %v2036_v12 = vpop.f32.mrf.mxu1 }
 0x1f5   :  { %v2162_v59 = vadd.f32 %v2161_v50, %v2011_v52 }
 0x1f6   :  { %v5619_v10 = vpop.f32.mrf.mxu0  ;;  %v2038_v4 = vpop.f32.mrf.mxu1 }
 0x1f7   :  { %v8155_v51 = vadd.f32 %v2162_v59, %v8100_v62 }
 0x1f8   :  { %v2166_v22 = vpop.f32.mrf.mxu0  ;;  %v2041_v24 = vpop.f32.mrf.mxu1 }
 0x1fa   :  { %v5622_v44 = vpop.f32.mrf.mxu0  ;;  %v2043_v9 = vpop.f32.mrf.mxu1 }
 0x1fc   :  { %v2171_v32 = vpop.f32.mrf.mxu0  ;;  %v2046_v40 = vpop.f32.mrf.mxu1 }
 0x1fe   :  { %v5625_v53 = vpop.f32.mrf.mxu0  ;;  %v2048_v49 = vpop.f32.mrf.mxu1 }
 0x200   :  { %v2176_v2 = vpop.f32.mrf.mxu0  ;;  %v2051_v48 = vpop.f32.mrf.mxu1 }
 0x201   :  { %v2177_v47 = vadd.f32 %v2176_v2, %v2026_v5  ;;  %v2172_v5 = vadd.f32 %v2171_v32, %v8143_v1 }
 0x202   :  { %v5628_v14 = vpop.f32.mrf.mxu0  ;;  %v2053_v29 = vpop.f32.mrf.mxu1 }
 0x203   :  { %v2220_v20 = vadd.f32 %v2177_v47, %v8109_v36  ;;  %v2219_v36 = vadd.f32 %v2172_v5, %v8106_v0 }
 0x204   :  { %v2181_v30 = vpop.f32.mrf.mxu0  ;;  %v2056_v27 = vpop.f32.mrf.mxu1 }
 0x205   :  { %v2182_v31 = vadd.f32 %v2181_v30, %v2031_v13 }
 0x206   :  { %v5631_v19 = vpop.f32.mrf.mxu0  ;;  %v2058_v23 = vpop.f32.mrf.mxu1 }
 0x207   :  { %v2221_v37 = vadd.f32 %v2182_v31, %v8112_v11  ;;  %v2424_v11 = vld [vmem:[%s9885_s1 + $0x8] sm:$0xff] }
 0x208   :  { %v2186_v52 = vpop.f32.mrf.mxu0  ;;  %4944 = vmatprep.mubr.msk.f32.mxu1 %vm2457_vm7, %v2424_v11 }
 0x209   :  { %v2187_v33 = vadd.f32 %v2186_v52, %v2036_v12 }
 0x20a   :  { %v5634_v55 = vpop.f32.mrf.mxu0 }
 0x20b   :  { %v2222_v54 = vadd.f32 %v2187_v33, %v8115_v63 }
 0x20c   :  { %v2191_v62 = vpop.f32.mrf.mxu0 }
 0x20d   :  { %v2192_v25 = vadd.f32 %v2191_v62, %v2041_v24 }
 0x20e   :  { %v5637_v58 = vpop.f32.mrf.mxu0 }
 0x20f   :  { %v2223_v3 = vadd.f32 %v2192_v25, %v8118_v8  ;;  %v2167_v8 = vadd.f32 %v2166_v22, %v8138_v7 }
 0x210   :  { %v2196_v46 = vpop.f32.mrf.mxu0 }
 0x211   :  { %v2197_v61 = vadd.f32 %v2196_v46, %v2046_v40  ;;  %2270 = vrot.lane.b32.xlu1 %v2223_v3, %s6285_s3 }
 0x212   :  { %v5640_v16 = vpop.f32.mrf.mxu0 }
 0x213   :  { %v2224_v21 = vadd.f32 %v2197_v61, %v8121_v28  ;;  %v2218_v28 = vadd.f32 %v2167_v8, %v8103_v35 }
 0x214   :  { %v2201_v56 = vpop.f32.mrf.mxu0 }
 0x215   :  { %v2202_v39 = vadd.f32 %v2201_v56, %v2051_v48  ;;  %2268 = vrot.lane.b32.xlu1 %v2222_v54, %s6285_s3  ;;  %2272 = vrot.lane.b32.xlu0 %v2224_v21, %s6285_s3 }
 0x216   :  { %v5643_v41 = vpop.f32.mrf.mxu0 }
 0x217   :  { %v2225_v6 = vadd.f32 %v2202_v39, %v8124_v60 }
 0x218   :  { %v2206_v45 = vpop.f32.mrf.mxu0 }
 0x219   :  { %2264 = vrot.lane.b32.xlu1 %v2220_v20, %s6285_s3  ;;  %2274 = vrot.lane.b32.xlu0 %v2225_v6, %s6285_s3  ;;  %v2207_v35 = vadd.f32 %v2206_v45, %v2056_v27 }
 0x21a   :  { %v5646_v63 = vpop.f32.mrf.mxu0 }
 0x21b   :  { %v8192_v0 = vadd.f32 %v2207_v35, %v8127_v43  ;;  %v8203_v43 = vld [vmem:[%s9888_s4] ss:$0 sm:$0xff] }
 0x21d   :  { %2260 = vrot.lane.b32.xlu1 %v2218_v28, %s6285_s3  ;;  %2266 = vrot.lane.b32.xlu0 %v2221_v37, %s6285_s3 }
 0x221   :  { %2256 = vrot.lane.b32.xlu1 %v8152_v34, %s6285_s3  ;;  %2262 = vrot.lane.b32.xlu0 %v2219_v36, %s6285_s3 }
 0x225   :  { %2252 = vrot.lane.b32.xlu1 %v8146_v18, %s6285_s3  ;;  %2258 = vrot.lane.b32.xlu0 %v8155_v51, %s6285_s3 }
 0x229   :  { %2248 = vrot.lane.b32.xlu1 %v8136_v15, %s6285_s3  ;;  %2254 = vrot.lane.b32.xlu0 %v8149_v38, %s6285_s3 }
 0x22d   :  { %2244 = vrot.lane.b32.xlu1 %v8130_v26, %s6285_s3  ;;  %2250 = vrot.lane.b32.xlu0 %v8141_v17, %s6285_s3 }
 0x231   :  { %2246 = vrot.lane.b32.xlu0 %v8133_v57, %s6285_s3 }
 0x235   :  { %2276 = vrot.lane.b32.xlu0 %v8192_v0, %s6285_s3 }
 0x283   :  { %v2271_v60 = vpop.permute.xlu1 %2270 }
 0x284   :  { %v2308_v50 = vmax.f32 %v2223_v3, %v2271_v60 }
 0x286   :  { %v2332_v24 = vadd.f32 %v8203_v43, %v2308_v50 }
 0x287   :  { %v2269_v7 = vpop.permute.xlu1 %2268  ;;  %v2273_v1 = vpop.permute.xlu0 %2272 }
 0x288   :  { %v2309_v13 = vmax.f32 %v2224_v21, %v2273_v1  ;;  %v2307_v12 = vmax.f32 %v2222_v54, %v2269_v7  ;;  %v2349_v14 = vmax.f32 %v2332_v24, 0.0 }
 0x28a   :  { %v2333_v59 = vadd.f32 %v8203_v43, %v2309_v13  ;;  %v2331_v44 = vadd.f32 %v8203_v43, %v2307_v12  ;;  %v2395_v33 = vrot.slane %v2349_v14, 7 }
 0x28b   :  { %v2265_v10 = vpop.permute.xlu1 %2264  ;;  %v2275_v4 = vpop.permute.xlu0 %2274 }
 0x28c   :  { %v2310_v22 = vmax.f32 %v2225_v6, %v2275_v4  ;;  %v2350_v32 = vmax.f32 %v2333_v59, 0.0  ;;  %v2305_v40 = vmax.f32 %v2220_v20, %v2265_v10  ;;  %v2348_v29 = vmax.f32 %v2331_v44, 0.0 }
 0x28e   :  { %v2334_v9 = vadd.f32 %v8203_v43, %v2310_v22  ;;  %v2397_v19 = vrot.slane %v2350_v32, 7  ;;  %v2329_v23 = vadd.f32 %v8203_v43, %v2305_v40  ;;  %v2393_v3 = vrot.slane %v2348_v29, 7 }
 0x28f   :  { %v2261_v53 = vpop.permute.xlu1 %2260  ;;  %v2267_v49 = vpop.permute.xlu0 %2266 }
 0x290   :  { %v2351_v2 = vmax.f32 %v2334_v9, 0.0  ;;  %v2306_v48 = vmax.f32 %v2221_v37, %v2267_v49  ;;  %v2303_v52 = vmax.f32 %v2218_v28, %v2261_v53  ;;  %v2346_v47 = vmax.f32 %v2329_v23, 0.0 }
 0x291   :  { %v2398_v39 = vsel %vm153_vm0, %v2395_v33, %v2397_v19 }
 0x292   :  { %v8209_v30 = vrot.slane %v2351_v2, 7  ;;  %v2330_v27 = vadd.f32 %v8203_v43, %v2306_v48  ;;  %v2327_v54 = vadd.f32 %v8203_v43, %v2303_v52  ;;  %v2389_v63 = vrot.slane %v2346_v47, 7 }
 0x293   :  { %v2257_v55 = vpop.permute.xlu1 %2256  ;;  %v2263_v62 = vpop.permute.xlu0 %2262 }
 0x294   :  { %v2347_v25 = vmax.f32 %v2330_v27, 0.0  ;;  %v2304_v58 = vmax.f32 %v2219_v36, %v2263_v62  ;;  %v2400_v46 = vsel %vm153_vm0, %v2397_v19, %v8209_v30  ;;  %v2301_v61 = vmax.f32 %v8152_v34, %v2257_v55 }
 0x295   :  { %2514 = vmatpush1.msra.mxu1 %v2400_v46  ;;  %v2396_v34 = vsel %vm153_vm0, %v2393_v3, %v2395_v33  ;;  %v2344_v28 = vmax.f32 %v2327_v54, 0.0 }
 0x296   :  { %v2328_v16 = vadd.f32 %v8203_v43, %v2304_v58  ;;  %v2391_v21 = vrot.slane %v2347_v25, 7  ;;  %2515 = vmatprep.subr.mxu1 %v9936_v42  ;;  %v2325_v31 = vadd.f32 %v8203_v43, %v2301_v61 }
 0x297   :  { %v2253_v56 = vpop.permute.xlu1 %2252  ;;  %v2259_v41 = vpop.permute.xlu0 %2258  ;;  %2516 = vmatpush1.msra.mxu1 %v2398_v39  ;;  %v2385_v13 = vrot.slane %v2344_v28, 7  ;;  %v2431_v28 = vld [vmem:[%s9885_s1 + $0x40] sm:$0xff]  ;;  %v4304_v39 = vld [vmem:[%s9891_s7 + $0x78] sm:$0xff] }
 0x298   :  { %v2345_v8 = vmax.f32 %v2328_v16, 0.0  ;;  %v2302_v20 = vmax.f32 %v8155_v51, %v2259_v41  ;;  %2517 = vmatprep.subr.mxu1 %v9936_v42  ;;  %v2299_v6 = vmax.f32 %v8146_v18, %v2253_v56  ;;  %v2394_v36 = vsel %vm153_vm0, %v2391_v21, %v2393_v3  ;;  %v2423_v41 = vld [vmem:[%s9885_s1] sm:$0xff] }
 0x299   :  { %2518 = vmatpush1.msra.mxu1 %v2396_v34  ;;  %v2392_v18 = vsel %vm153_vm0, %v2389_v63, %v2391_v21  ;;  %v2342_v60 = vmax.f32 %v2325_v31, 0.0  ;;  %v2428_v34 = vld [vmem:[%s9885_s1 + $0x28] sm:$0xff]  ;;  %v2427_v31 = vld [vmem:[%s9885_s1 + $0x20] sm:$0xff] }
 0x29a   :  { %v2326_v45 = vadd.f32 %v8203_v43, %v2302_v20  ;;  %v2387_v5 = vrot.slane %v2345_v8, 7  ;;  %2519 = vmatprep.subr.mxu1 %v9936_v42  ;;  %v2323_v7 = vadd.f32 %v8203_v43, %v2299_v6  ;;  %v2426_v20 = vld [vmem:[%s9885_s1 + $0x18] sm:$0xff] }
 0x29b   :  { %v2249_v37 = vpop.permute.xlu1 %2248  ;;  %v2255_v51 = vpop.permute.xlu0 %2254  ;;  %2520 = vmatpush1.msra.mxu1 %v2394_v36  ;;  %v2381_v44 = vrot.slane %v2342_v60, 7  ;;  %v2430_v6 = vld [vmem:[%s9885_s1 + $0x38] sm:$0xff]  ;;  %v2436_v36 = vld [vmem:[%s9885_s1 + $0x68] sm:$0xff]  ;;  %v2439_v60 = vld [vmem:[%s9885_s1 + $0x80] sm:$0xff] }
 0x29c   :  { %v2343_v35 = vmax.f32 %v2326_v45, 0.0  ;;  %v2300_v11 = vmax.f32 %v8149_v38, %v2255_v51  ;;  %2521 = vmatprep.subr.mxu1 %v9936_v42  ;;  %v2297_v12 = vmax.f32 %v8136_v15, %v2249_v37  ;;  %v2390_v59 = vsel %vm153_vm0, %v2387_v5, %v2389_v63  ;;  %v2429_v45 = vld [vmem:[%s9885_s1 + $0x30] sm:$0xff]  ;;  %v2432_v63 = vld [vmem:[%s9885_s1 + $0x48] sm:$0xff]  ;;  %v2435_v51 = vld [vmem:[%s9885_s1 + $0x60] sm:$0xff] }
 0x29d   :  { %2522 = vmatpush1.msra.mxu1 %v2392_v18  ;;  %v2388_v24 = vsel %vm153_vm0, %v2385_v13, %v2387_v5  ;;  %v2340_v9 = vmax.f32 %v2323_v7, 0.0  ;;  %v2434_v5 = vld [vmem:[%s9885_s1 + $0x58] sm:$0xff]  ;;  %v2433_v37 = vld [vmem:[%s9885_s1 + $0x50] sm:$0xff]  ;;  %v2440_v18 = vld [vmem:[%s9885_s1 + $0x88] sm:$0xff] }
 0x29e   :  { %v2324_v1 = vadd.f32 %v8203_v43, %v2300_v11  ;;  %v2383_v50 = vrot.slane %v2343_v35, 7  ;;  %2523 = vmatprep.subr.mxu1 %v9936_v42  ;;  %v2321_v15 = vadd.f32 %v8203_v43, %v2297_v12  ;;  %v2438_v35 = vld [vmem:[%s9885_s1 + $0x78] sm:$0xff]  ;;  %v2437_v11 = vld [vmem:[%s9885_s1 + $0x70] sm:$0xff] }
 0x29f   :  { %v2251_v10 = vpop.permute.xlu0 %2250  ;;  %v2245_v4 = vpop.permute.xlu1 %2244  ;;  %2524 = vmatpush1.msra.mxu1 %v2390_v59  ;;  %v2377_v29 = vrot.slane %v2340_v9, 7  ;;  %v2442_v7 = vld [vmem:[%s9885_s1 + $0x98] sm:$0xff]  ;;  %v2445_v59 = vld [vmem:[%s9885_s1 + $0xb0] sm:$0xff] }
 0x2a0   :  { %v2341_v38 = vmax.f32 %v2324_v1, 0.0  ;;  %v2298_v22 = vmax.f32 %v8141_v17, %v2251_v10  ;;  %2525 = vmatprep.subr.mxu1 %v9936_v42  ;;  %v2295_v53 = vmax.f32 %v8130_v26, %v2245_v4  ;;  %v2386_v49 = vsel %vm153_vm0, %v2383_v50, %v2385_v13  ;;  %v2441_v1 = vld [vmem:[%s9885_s1 + $0x90] sm:$0xff]  ;;  %v2444_v13 = vld [vmem:[%s9885_s1 + $0xa8] sm:$0xff]  ;;  %v2446_v12 = vld [vmem:[%s9885_s1 + $0xb8] sm:$0xff] }
 0x2a1   :  { %2526 = vmatpush1.msra.mxu1 %v2388_v24  ;;  %v2384_v14 = vsel %vm153_vm0, %v2381_v44, %v2383_v50  ;;  %v2338_v19 = vmax.f32 %v2321_v15, 0.0  ;;  %v2443_v50 = vld [vmem:[%s9885_s1 + $0xa0] sm:$0xff]  ;;  %v2448_v10 = vld [vmem:[%s9885_s1 + $0xc8] sm:$0xff]  ;;  %v2450_v4 = vld [vmem:[%s9885_s1 + $0xd8] sm:$0xff] }
 0x2a2   :  { %v2322_v32 = vadd.f32 %v8203_v43, %v2298_v22  ;;  %v2379_v40 = vrot.slane %v2341_v38, 7  ;;  %2527 = vmatprep.subr.mxu1 %v9936_v42  ;;  %v2319_v26 = vadd.f32 %v8203_v43, %v2295_v53  ;;  %v2447_v38 = vld [vmem:[%s9885_s1 + $0xc0] sm:$0xff]  ;;  %v2449_v22 = vld [vmem:[%s9885_s1 + $0xd0] sm:$0xff]  ;;  %v2452_v24 = vld [vmem:[%s9885_s1 + $0xe8] sm:$0xff] }
 0x2a3   :  { %v2247_v2 = vpop.permute.xlu0 %2246  ;;  %2528 = vmatpush1.msra.mxu1 %v2386_v49  ;;  %v2373_v33 = vrot.slane %v2338_v19, 7  ;;  %v2454_v9 = vld [vmem:[%s9885_s1 + $0xf8] sm:$0xff]  ;;  %v2456_v15 = vld [vmem:[%s9885_s1 + $0x108] sm:$0xf] }
 0x2a4   :  { %v2339_v17 = vmax.f32 %v2322_v32, 0.0  ;;  %v2296_v48 = vmax.f32 %v8133_v57, %v2247_v2  ;;  %2529 = vmatprep.subr.mxu1 %v9936_v42  ;;  %v2382_v52 = vsel %vm153_vm0, %v2379_v40, %v2381_v44  ;;  %v2380_v25 = vsel %vm153_vm0, %v2377_v29, %v2379_v40  ;;  %v2451_v44 = vld [vmem:[%s9885_s1 + $0xe0] sm:$0xff]  ;;  %v2453_v32 = vld [vmem:[%s9885_s1 + $0xf0] sm:$0xff] }
 0x2a5   :  { %2530 = vmatpush1.msra.mxu1 %v2384_v14  ;;  %v2336_v3 = vmax.f32 %v2319_v26, 0.0  ;;  %v2455_v40 = vld [vmem:[%s9885_s1 + $0x100] sm:$0xf] }
 0x2a6   :  { %v2320_v27 = vadd.f32 %v8203_v43, %v2296_v48  ;;  %v2375_v23 = vrot.slane %v2339_v17, 7  ;;  %2531 = vmatprep.subr.mxu1 %v9936_v42 }
 0x2a7   :  { %v2277_v55 = vpop.permute.xlu0 %2276  ;;  %2532 = vmatpush1.msra.mxu1 %v2382_v52  ;;  %v2370_v54 = vrot.slane %v2336_v3, 7  ;;  %v2796_v52 = vld [vmem:[%s9889_s5 + $0xf8] sm:$0xff] }
 0x2a8   :  { %v2337_v62 = vmax.f32 %v2320_v27, 0.0  ;;  %v2311_v57 = vmax.f32 %v8192_v0, %v2277_v55  ;;  %2533 = vmatprep.subr.mxu1 %v9936_v42  ;;  %v2378_v61 = vsel %vm153_vm0, %v2375_v23, %v2377_v29  ;;  %v2376_v0 = vsel %vm153_vm0, %v2373_v33, %v2375_v23  ;;  %v2780_v23 = vld [vmem:[%s9889_s5 + $0x78] sm:$0xff]  ;;  %v2779_v55 = vld [vmem:[%s9889_s5 + $0x70] sm:$0xff]  ;;  %5648 = vmatpush3.msra.mxu0 %v2796_v52  ;;  %v2765_v52 = vld [vmem:[%s9889_s5] sm:$0xff] }
 0x2a9   :  { %2534 = vmatpush1.msra.mxu1 %v2380_v25  ;;  %5649 = vmatprep.subr.mxu0 %v9936_v42  ;;  %v2778_v25 = vld [vmem:[%s9889_s5 + $0x68] sm:$0xff] }
 0x2aa   :  { %v2335_v58 = vadd.f32 %v8203_v43, %v2311_v57  ;;  %v2371_v46 = vrot.slane %v2337_v62, 7  ;;  %2535 = vmatprep.subr.mxu1 %v9936_v42  ;;  %v2795_v57 = vld [vmem:[%s9889_s5 + $0xf0] sm:$0xff] }
 0x2ab   :  { %2536 = vmatpush1.msra.mxu1 %v2378_v61  ;;  %5650 = vmatpush3.msra.mxu0 %v2795_v57  ;;  %v2793_v61 = vld [vmem:[%s9889_s5 + $0xe0] sm:$0xff] }
 0x2ac   :  { %v2352_v16 = vmax.f32 %v2335_v58, 0.0  ;;  %2537 = vmatprep.subr.mxu1 %v9936_v42  ;;  %v2374_v43 = vsel %vm153_vm0, %v2371_v46, %v2373_v33  ;;  %v2372_v21 = vsel %vm153_vm0, %v2370_v54, %v2371_v46  ;;  %v2794_v58 = vld [vmem:[%s9889_s5 + $0xe8] sm:$0xff]  ;;  %5651 = vmatprep.subr.mxu0 %v9936_v42  ;;  %v2777_v46 = vld [vmem:[%s9889_s5 + $0x60] sm:$0xff] }
 0x2ad   :  { %2538 = vmatpush1.msra.mxu1 %v2376_v0  ;;  %5652 = vmatpush3.msra.mxu0 %v2794_v58 }
 0x2ae   :  { %v2401_v47 = vrot.slane %v2352_v16, 7  ;;  %2539 = vmatprep.subr.mxu1 %v9936_v42  ;;  %5653 = vmatprep.subr.mxu0 %v9936_v42 }
 0x2af   :  { %2540 = vmatpush1.msra.mxu1 %v2374_v43  ;;  %v2792_v43 = vld [vmem:[%s9889_s5 + $0xd8] sm:$0xff]  ;;  %5654 = vmatpush3.msra.mxu0 %v2793_v61 }
 0x2b0   :  { %2541 = vmatprep.subr.mxu1 %v9936_v42  ;;  %v2402_v56 = vsel %vm153_vm0, %v8209_v30, %v2401_v47  ;;  %v2425_v30 = vld [vmem:[%s9885_s1 + $0x10] sm:$0xff]  ;;  %5655 = vmatprep.subr.mxu0 %v9936_v42  ;;  %s6291_s1 = smov [#allocation2]  }
 0x2b1   :  { %2542 = vmatpush1.msra.mxu1 %v2372_v21  ;;  %v2422_v8 = vsel %vm2421_vm8, %v2402_v56, 0.0  ;;  %5656 = vmatpush3.msra.mxu0 %v2792_v43  ;;  %s4860_s27 = sshll.u32 %s6291_s1, 4  ;;  %s4861_s27 = int_to_ptr.vmem [resolvable:$true] %s4860_s27 }
 0x2b2   :  { %2543 = vmatprep.subr.mxu1 %v9936_v42  ;;  %5657 = vmatprep.subr.mxu0 %v9936_v42  ;;  %p6266_p1 = scmp.lt.s32.totalorder %s4861_s27, %s4861_s27 }
 0x2b3   :  { %4942 = vmatpush1.msk.msra.mxu1 %vm7020_vm4, %v2370_v54  ;;  %v2776_v54 = vld [vmem:[%s9889_s5 + $0x58] sm:$0xff] }
 0x2b4   :  { %2575 = vmatprep.subr.mxu1 %v9936_v42 }
 0x2b5   :  { %4943 = vmatpush2.msk.msra.mxu1 %vm2509_vm9, %v2422_v8  ;;  %v2775_v8 = vld [vmem:[%s9889_s5 + $0x50] sm:$0xff] }
 0x2b6   :  { %2578 = vmatmul.mubr.f32.vlgmr.msra.gmra.mxu1 %v2423_v41  ;;  %5688 = vmatprep.subr.mxu1 %v9936_v42 }
 0x2b7   :  { %4945 = vmatprep.mubr.msk.f32.mxu1 %vm2457_vm7, %v2426_v20  ;;  %5689 = vmatpush3.msra.mxu1 %v2780_v23 }
 0x2b8   :  { %5690 = vmatprep.subr.mxu1 %v9936_v42 }
 0x2b9   :  { %5691 = vmatpush3.msra.mxu1 %v2779_v55 }
 0x2ba   :  { %2583 = vmatmul.mubr.f32.gmra.mxu1 %v2425_v30  ;;  %5692 = vmatprep.subr.mxu1 %v9936_v42 }
 0x2bb   :  { %4946 = vmatprep.mubr.msk.f32.mxu1 %vm2457_vm7, %v2428_v34  ;;  %5693 = vmatpush3.msra.mxu1 %v2778_v25  ;;  %v2774_v34 = vld [vmem:[%s9889_s5 + $0x48] sm:$0xff]  ;;  %v2781_v25 = vld [vmem:[%s9889_s5 + $0x80] sm:$0xff] }
 0x2bc   :  { %5694 = vmatprep.subr.mxu1 %v9936_v42 }
 0x2bd   :  { %5695 = vmatpush3.msra.mxu1 %v2777_v46 }
 0x2be   :  { %2588 = vmatmul.mubr.f32.gmra.mxu1 %v2427_v31  ;;  %5696 = vmatprep.subr.mxu1 %v9936_v42 }
 0x2bf   :  { %4947 = vmatprep.mubr.msk.f32.mxu1 %vm2457_vm7, %v2430_v6  ;;  %5697 = vmatpush3.msra.mxu1 %v2776_v54 }
 0x2c0   :  { %5698 = vmatprep.subr.mxu1 %v9936_v42 }
 0x2c1   :  { %5699 = vmatpush3.msra.mxu1 %v2775_v8 }
 0x2c2   :  { %2593 = vmatmul.mubr.f32.gmra.mxu1 %v2429_v45  ;;  %5700 = vmatprep.subr.mxu1 %v9936_v42  ;;  %v2791_v45 = vld [vmem:[%s9889_s5 + $0xd0] sm:$0xff] }
 0x2c3   :  { %4948 = vmatprep.mubr.msk.f32.mxu1 %vm2457_vm7, %v2432_v63  ;;  %5701 = vmatpush3.msra.mxu1 %v2774_v34  ;;  %v2773_v63 = vld [vmem:[%s9889_s5 + $0x40] sm:$0xff] }
 0x2c4   :  { %5658 = vmatpush3.msra.mxu0 %v2791_v45  ;;  %5702 = vmatprep.subr.mxu1 %v9936_v42 }
 0x2c5   :  { %5659 = vmatprep.subr.mxu0 %v9936_v42  ;;  %5703 = vmatpush3.msra.mxu1 %v2773_v63 }
 0x2c6   :  { %2598 = vmatmul.mubr.f32.gmra.mxu1 %v2431_v28  ;;  %5704 = vmatprep.subr.mxu1 %v9936_v42 }
 0x2c7   :  { %4949 = vmatprep.mubr.msk.f32.mxu1 %vm2457_vm7, %v2434_v5  ;;  %v2790_v5 = vld [vmem:[%s9889_s5 + $0xc8] sm:$0xff] }
 0x2c8   :  { %5660 = vmatpush3.msra.mxu0 %v2790_v5 }
 0x2c9   :  { %5661 = vmatprep.subr.mxu0 %v9936_v42 }
 0x2ca   :  { %2603 = vmatmul.mubr.f32.gmra.mxu1 %v2433_v37  ;;  %v2772_v37 = vld [vmem:[%s9889_s5 + $0x38] sm:$0xff] }
 0x2cb   :  { %4950 = vmatprep.mubr.msk.f32.mxu1 %vm2457_vm7, %v2436_v36  ;;  %5705 = vmatpush3.msra.mxu1 %v2772_v37 }
 0x2cc   :  { %5706 = vmatprep.subr.mxu1 %v9936_v42 }
 0x2ce   :  { %2608 = vmatmul.mubr.f32.gmra.mxu1 %v2435_v51  ;;  %v2789_v51 = vld [vmem:[%s9889_s5 + $0xc0] sm:$0xff] }
 0x2cf   :  { %4951 = vmatprep.mubr.msk.f32.mxu1 %vm2457_vm7, %v2438_v35  ;;  %5662 = vmatpush3.msra.mxu0 %v2789_v51  ;;  %v2771_v35 = vld [vmem:[%s9889_s5 + $0x30] sm:$0xff] }
 0x2d0   :  { %5663 = vmatprep.subr.mxu0 %v9936_v42  ;;  %5707 = vmatpush3.msra.mxu1 %v2771_v35 }
 0x2d1   :  { %5708 = vmatprep.subr.mxu1 %v9936_v42 }
 0x2d2   :  { %2613 = vmatmul.mubr.f32.gmra.mxu1 %v2437_v11  ;;  %v2788_v11 = vld [vmem:[%s9889_s5 + $0xb8] sm:$0xff] }
 0x2d3   :  { %4952 = vmatprep.mubr.msk.f32.mxu1 %vm2457_vm7, %v2440_v18  ;;  %v2770_v18 = vld [vmem:[%s9889_s5 + $0x28] sm:$0xff]  ;;  %5664 = vmatpush3.msra.mxu0 %v2788_v11 }
 0x2d4   :  { %5665 = vmatprep.subr.mxu0 %v9936_v42  ;;  %5709 = vmatpush3.msra.mxu1 %v2770_v18 }
 0x2d5   :  { %5710 = vmatprep.subr.mxu1 %v9936_v42 }
 0x2d6   :  { %2618 = vmatmul.mubr.f32.gmra.mxu1 %v2439_v60 }
 0x2d7   :  { %4953 = vmatprep.mubr.msk.f32.mxu1 %vm2457_vm7, %v2442_v7  ;;  %v2787_v7 = vld [vmem:[%s9889_s5 + $0xb0] sm:$0xff] }
 0x2d8   :  { %5666 = vmatpush3.msra.mxu0 %v2787_v7 }
 0x2d9   :  { %5667 = vmatprep.subr.mxu0 %v9936_v42 }
 0x2da   :  { %2623 = vmatmul.mubr.f32.gmra.mxu1 %v2441_v1 }
 0x2db   :  { %4954 = vmatprep.mubr.msk.f32.mxu1 %vm2457_vm7, %v2444_v13  ;;  %v2769_v13 = vld [vmem:[%s9889_s5 + $0x20] sm:$0xff] }
 0x2dc   :  { %5711 = vmatpush3.msra.mxu1 %v2769_v13 }
 0x2dd   :  { %5712 = vmatprep.subr.mxu1 %v9936_v42 }
 0x2de   :  { %2628 = vmatmul.mubr.f32.gmra.mxu1 %v2443_v50 }
 0x2df   :  { %4955 = vmatprep.mubr.msk.f32.mxu1 %vm2457_vm7, %v2446_v12  ;;  %v2786_v12 = vld [vmem:[%s9889_s5 + $0xa8] sm:$0xff] }
 0x2e0   :  { %5668 = vmatpush3.msra.mxu0 %v2786_v12 }
 0x2e1   :  { %5669 = vmatprep.subr.mxu0 %v9936_v42 }
 0x2e2   :  { %2633 = vmatmul.mubr.f32.gmra.mxu1 %v2445_v59 }
 0x2e3   :  { %4956 = vmatprep.mubr.msk.f32.mxu1 %vm2457_vm7, %v2448_v10 }
 0x2e6   :  { %2638 = vmatmul.mubr.f32.gmra.mxu1 %v2447_v38  ;;  %v2768_v38 = vld [vmem:[%s9889_s5 + $0x18] sm:$0xff] }
 0x2e7   :  { %4957 = vmatprep.mubr.msk.f32.mxu1 %vm2457_vm7, %v2450_v4  ;;  %5713 = vmatpush3.msra.mxu1 %v2768_v38  ;;  %v3090_v38 = vld [vmem:[%s9889_s5 + $0x1f8] sm:$0xff] }
 0x2e8   :  { %5714 = vmatprep.subr.mxu1 %v9936_v42 }
 0x2ea   :  { %2643 = vmatmul.mubr.f32.gmra.mxu1 %v2449_v22  ;;  %v2785_v22 = vld [vmem:[%s9889_s5 + $0xa0] sm:$0xff] }
 0x2eb   :  { %4958 = vmatprep.mubr.msk.f32.mxu1 %vm2457_vm7, %v2452_v24  ;;  %5670 = vmatpush3.msra.mxu0 %v2785_v22 }
 0x2ec   :  { %5671 = vmatprep.subr.mxu0 %v9936_v42 }
 0x2ee   :  { %2648 = vmatmul.mubr.f32.gmra.mxu1 %v2451_v44 }
 0x2ef   :  { %4959 = vmatprep.mubr.msk.f32.mxu1 %vm2457_vm7, %v2454_v9 }
 0x2f2   :  { %2653 = vmatmul.mubr.f32.gmra.mxu1 %v2453_v32 }
 0x2f3   :  { %4960 = vmatprep.mubr.msk.f32.mxu1 %vm2457_vm7, %v2456_v15  ;;  %v2767_v15 = vld [vmem:[%s9889_s5 + $0x10] sm:$0xff] }
 0x2f4   :  { %5715 = vmatpush3.msra.mxu1 %v2767_v15 }
 0x2f5   :  { %5716 = vmatprep.subr.mxu1 %v9936_v42 }
 0x2f6   :  { %2658 = vmatmul.mubr.f32.gmra.mxu1 %v2455_v40  ;;  %v2784_v40 = vld [vmem:[%s9889_s5 + $0x98] sm:$0xff] }
 0x2f7   :  { %5720 = vmatprep.mubr.msk.f32.mxu1 %vm6284_vm3, %v9936_v42  ;;  %5672 = vmatpush3.msra.mxu0 %v2784_v40 }
 0x2f8   :  { %5673 = vmatprep.subr.mxu0 %v9936_v42 }
 0x376   :  { %v8389_v53 = vpop.f32.mrf.mxu1 }
 0x378   :  { %v2581_v49 = vpop.f32.mrf.mxu1 }
 0x37a   :  { %v8391_v2 = vpop.f32.mrf.mxu1 }
 0x37c   :  { %v2586_v17 = vpop.f32.mrf.mxu1 }
 0x37e   :  { %v8393_v48 = vpop.f32.mrf.mxu1 }
 0x380   :  { %v2591_v14 = vpop.f32.mrf.mxu1 }
 0x381   :  { %v2766_v14 = vld [vmem:[%s9889_s5 + $0x8] sm:$0xff] }
 0x382   :  { %v8395_v29 = vpop.f32.mrf.mxu1  ;;  %5717 = vmatpush3.msra.mxu1 %v2766_v14  ;;  %v2982_v14 = vld [vmem:[%s9889_s5 + $0x170] sm:$0xff] }
 0x383   :  { %5718 = vmatprep.subr.mxu1 %v9936_v42 }
 0x384   :  { %v2596_v27 = vpop.f32.mrf.mxu1  ;;  %5719 = vmatpush3.msra.mxu1 %v2765_v52  ;;  %v2981_v52 = vld [vmem:[%s9889_s5 + $0x168] sm:$0xff] }
 0x385   :  { %5770 = vmatprep.subr.mxu1 %v9936_v42 }
 0x386   :  { %v8397_v19 = vpop.f32.mrf.mxu1 }
 0x387   :  { %v2668_v0 = vrot.slane %v8397_v19, 1 }
 0x388   :  { %v2601_v26 = vpop.f32.mrf.mxu1 }
 0x389   :  { %v2783_v26 = vld [vmem:[%s9889_s5 + $0x90] sm:$0xff] }
 0x38a   :  { %v2604_v62 = vpop.f32.mrf.mxu1  ;;  %5674 = vmatpush3.msra.mxu0 %v2783_v26  ;;  %v3087_v26 = vld [vmem:[%s9889_s5 + $0x1e0] sm:$0xff] }
 0x38b   :  { %v2669_v3 = vrot.slane %v2604_v62, 1  ;;  %v2782_v62 = vld [vmem:[%s9889_s5 + $0x88] sm:$0xff]  ;;  %5675 = vmatprep.subr.mxu0 %v9936_v42 }
 0x38c   :  { %v2606_v33 = vpop.f32.mrf.mxu1  ;;  %5676 = vmatpush3.msra.mxu0 %v2782_v62  ;;  %v2980_v62 = vld [vmem:[%s9889_s5 + $0x160] sm:$0xff] }
 0x38d   :  { %v2670_v56 = vsel %vm374_vm1, %v2668_v0, %v2669_v3  ;;  %5677 = vmatprep.subr.mxu0 %v9936_v42 }
 0x38e   :  { %v8427_v16 = vpop.f32.mrf.mxu1  ;;  %5678 = vmatpush3.msra.mxu0 %v2781_v25  ;;  %v2979_v25 = vld [vmem:[%s9889_s5 + $0x158] sm:$0xff] }
 0x38f   :  { %v2671_v47 = vrot.slane %v8427_v16, 1  ;;  %5729 = vmatprep.subr.mxu0 %v9936_v42 }
 0x390   :  { %v2611_v21 = vpop.f32.mrf.mxu1 }
 0x391   :  { %v2672_v41 = vsel %vm374_vm1, %v2669_v3, %v2671_v47 }
 0x392   :  { %v8448_v20 = vpop.f32.mrf.mxu1  ;;  %v6241_v30 = vpack.i.bf16 %v2672_v41, %v2670_v56 }
 0x393   :  { %v2673_v49 = vrot.slane %v8448_v20, 1 }
 0x394   :  { %6242 = vrot.lane.b32.xlu1 %v6241_v30, %s6286_s16  ;;  %v2616_v31 = vpop.f32.mrf.mxu1 }
 0x395   :  { %v2674_v23 = vsel %vm374_vm1, %v2671_v47, %v2673_v49 }
 0x396   :  { %v8457_v6 = vpop.f32.mrf.mxu1 }
 0x397   :  { %v2696_v59 = vrot.slane %v8457_v6, 2  ;;  %v2675_v34 = vrot.slane %v8457_v6, 1 }
 0x398   :  { %v2621_v28 = vpop.f32.mrf.mxu1 }
 0x399   :  { %v2676_v5 = vsel %vm374_vm1, %v2673_v49, %v2675_v34 }
 0x39a   :  { %v2624_v36 = vpop.f32.mrf.mxu1 }
 0x39b   :  { %v2697_v1 = vrot.slane %v2624_v36, 2 }
 0x39c   :  { %v2626_v60 = vpop.f32.mrf.mxu1 }
 0x39d   :  { %v2698_v24 = vsel %vm1217_vm5, %v2696_v59, %v2697_v1 }
 0x39e   :  { %v8496_v50 = vpop.f32.mrf.mxu1 }
 0x39f   :  { %v2699_v10 = vrot.slane %v8496_v50, 2 }
 0x3a0   :  { %v2631_v4 = vpop.f32.mrf.mxu1 }
 0x3a1   :  { %v2700_v44 = vsel %vm1217_vm5, %v2697_v1, %v2699_v10 }
 0x3a2   :  { %v2634_v9 = vpop.f32.mrf.mxu1  ;;  %v6246_v32 = vpack.i.bf16 %v2700_v44, %v2698_v24  ;;  %v3089_v24 = vld [vmem:[%s9889_s5 + $0x1f0] sm:$0xff] }
 0x3a3   :  { %v2701_v21 = vrot.slane %v2634_v9, 2 }
 0x3a4   :  { %6247 = vrot.lane.b32.xlu0 %v6246_v32, %s6287_s28  ;;  %v2636_v17 = vpop.f32.mrf.mxu1 }
 0x3a5   :  { %v2702_v31 = vsel %vm1217_vm5, %v2699_v10, %v2701_v21  ;;  %v3088_v17 = vld [vmem:[%s9889_s5 + $0x1e8] sm:$0xff] }
 0x3a6   :  { %v2639_v27 = vpop.f32.mrf.mxu1 }
 0x3a7   :  { %v2724_v46 = vrot.slane %v2639_v27, 3  ;;  %v2703_v8 = vrot.slane %v2639_v27, 2 }
 0x3a8   :  { %2681 = vrot.lane.b32.xlu0 %v2674_v23, %s6286_s16  ;;  %v2641_v55 = vpop.f32.mrf.mxu1 }
 0x3a9   :  { %v2704_v63 = vsel %vm1217_vm5, %v2701_v21, %v2703_v8  ;;  %v3086_v55 = vld [vmem:[%s9889_s5 + $0x1d8] sm:$0xff]  ;;  %v3079_v21 = vld [vmem:[%s9889_s5 + $0x1a0] sm:$0xff] }
 0x3aa   :  { %v2644_v57 = vpop.f32.mrf.mxu1 }
 0x3ab   :  { %v2725_v33 = vrot.slane %v2644_v57, 3  ;;  %v3085_v57 = vld [vmem:[%s9889_s5 + $0x1d0] sm:$0xff] }
 0x3ac   :  { %v2646_v58 = vpop.f32.mrf.mxu1 }
 0x3ad   :  { %v2726_v0 = vsel %vm1742_vm6, %v2724_v46, %v2725_v33  ;;  %v3084_v58 = vld [vmem:[%s9889_s5 + $0x1c8] sm:$0xff] }
 0x3ae   :  { %v2649_v3 = vpop.f32.mrf.mxu1  ;;  %v2977_v46 = vld [vmem:[%s9889_s5 + $0x148] sm:$0xff] }
 0x3af   :  { %v2727_v61 = vrot.slane %v2649_v3, 3  ;;  %v3083_v3 = vld [vmem:[%s9889_s5 + $0x1c0] sm:$0xff] }
 0x3b0   :  { %v2651_v16 = vpop.f32.mrf.mxu1 }
 0x3b1   :  { %v2728_v47 = vsel %vm1742_vm6, %v2725_v33, %v2727_v61  ;;  %v2978_v33 = vld [vmem:[%s9889_s5 + $0x150] sm:$0xff]  ;;  %v2976_v16 = vld [vmem:[%s9889_s5 + $0x140] sm:$0xff] }
 0x3b2   :  { %v2654_v54 = vpop.f32.mrf.mxu1  ;;  %v6251_v43 = vpack.i.bf16 %v2728_v47, %v2726_v0  ;;  %v3081_v0 = vld [vmem:[%s9889_s5 + $0x1b0] sm:$0xff]  ;;  %v2975_v47 = vld [vmem:[%s9889_s5 + $0x138] sm:$0xff] }
 0x3b3   :  { %v2729_v56 = vrot.slane %v2654_v54, 3  ;;  %v3080_v54 = vld [vmem:[%s9889_s5 + $0x1a8] sm:$0xff] }
 0x3b4   :  { %6252 = vrot.lane.b32.xlu1 %v6251_v43, %s6285_s3  ;;  %v2656_v41 = vpop.f32.mrf.mxu1  ;;  %v2974_v43 = vld [vmem:[%s9889_s5 + $0x130] sm:$0xff] }
 0x3b5   :  { %v2730_v20 = vsel %vm1742_vm6, %v2727_v61, %v2729_v56  ;;  %v3082_v61 = vld [vmem:[%s9889_s5 + $0x1b8] sm:$0xff] }
 0x3b6   :  { %2737 = vrot.lane.b32.xlu0 %v2730_v20, %s6285_s3  ;;  %v2659_v30 = vpop.f32.mrf.mxu1  ;;  %v3078_v41 = vld [vmem:[%s9889_s5 + $0x198] sm:$0xff]  ;;  %v3077_v20 = vld [vmem:[%s9889_s5 + $0x190] sm:$0xff] }
 0x3b7   :  { %v2731_v28 = vrot.slane %v2659_v30, 3  ;;  %v2971_v30 = vld [vmem:[%s9889_s5 + $0x118] sm:$0xff] }
 0x3b8   :  { %2709 = vrot.lane.b32.xlu1 %v2702_v31, %s6287_s28  ;;  %v2661_v45 = vpop.f32.mrf.mxu1  ;;  %v2970_v31 = vld [vmem:[%s9889_s5 + $0x110] sm:$0xff] }
 0x3b9   :  { %v2732_v37 = vsel %vm1742_vm6, %v2729_v56, %v2731_v28  ;;  %v2973_v56 = vld [vmem:[%s9889_s5 + $0x128] sm:$0xff]  ;;  %v3075_v45 = vld [vmem:[%s9889_s5 + $0x180] sm:$0xff] }
 0x3ba   :  { %2711 = vrot.lane.b32.xlu0 %v2704_v63, %s6287_s28 }
 0x3bc   :  { %2683 = vrot.lane.b32.xlu1 %v2676_v5, %s6286_s16  ;;  %v2969_v5 = vld [vmem:[%s9889_s5 + $0x108] sm:$0xff] }
 0x3be   :  { %2685 = vrot.lane.b32.xlu0 %v2675_v34, %s6286_s16  ;;  %v3076_v34 = vld [vmem:[%s9889_s5 + $0x188] sm:$0xff] }
 0x3c0   :  { %2739 = vrot.lane.b32.xlu1 %v2732_v37, %s6285_s3 }
 0x3c2   :  { %2741 = vrot.lane.b32.xlu0 %v2731_v28, %s6285_s3 }
 0x3c4   :  { %2713 = vrot.lane.b32.xlu1 %v2703_v8, %s6287_s28  ;;  %v2972_v8 = vld [vmem:[%s9889_s5 + $0x120] sm:$0xff] }
 0x406   :  { %v6243_v6 = vpop.permute.xlu1 %6242 }
 0x407   :  { %v6245_v51 = vunpack.i.h.bf16 %v6243_v6  ;;  %v6244_v35 = vunpack.i.l.bf16 %v6243_v6  ;;  %v3307_v6 = vld [vmem:[%s9889_s5 + $0x2f8] sm:$0xff] }
 0x409   :  { %v2750_v7 = vsel %vm2748_vm10, %v8391_v2, %v6245_v51  ;;  %v2749_v1 = vsel %vm2748_vm10, %v8389_v53, %v6244_v35 }
 0x416   :  { %v6248_v36 = vpop.permute.xlu0 %6247 }
 0x417   :  { %v6250_v11 = vunpack.i.h.bf16 %v6248_v36  ;;  %v6249_v18 = vunpack.i.l.bf16 %v6248_v36  ;;  %v2968_v36 = vld [vmem:[%s9889_s5 + $0x100] sm:$0xff] }
 0x419   :  { %v2755_v59 = vsel %vm508_vm2, %v2750_v7, %v6250_v11  ;;  %v2754_v10 = vsel %vm508_vm2, %v2749_v1, %v6249_v18  ;;  %v3306_v18 = vld [vmem:[%s9889_s5 + $0x2f0] sm:$0xff]  ;;  %v3197_v7 = vld [vmem:[%s9889_s5 + $0x278] sm:$0xff] }
 0x41a   :  { %v2682_v13 = vpop.permute.xlu0 %2681 }
 0x41b   :  { %v2751_v53 = vsel %vm2748_vm10, %v8393_v48, %v2682_v13  ;;  %v2983_v48 = vld [vmem:[%s9889_s5 + $0x178] sm:$0xff]  ;;  %v3305_v13 = vld [vmem:[%s9889_s5 + $0x2e8] sm:$0xff] }
 0x426   :  { %v6253_v60 = vpop.permute.xlu1 %6252 }
 0x427   :  { %v6255_v50 = vunpack.i.h.bf16 %v6253_v60  ;;  %v6254_v12 = vunpack.i.l.bf16 %v6253_v60 }
 0x428   :  { %v2738_v32 = vpop.permute.xlu0 %2737 }
 0x429   :  { %v8583_v4 = vsel %vm2759_vm11, %v2755_v59, %v6255_v50  ;;  %v8586_v22 = vsel %vm2759_vm11, %v2754_v10, %v6254_v12  ;;  %v3196_v12 = vld [vmem:[%s9889_s5 + $0x270] sm:$0xff]  ;;  %v3304_v59 = vld [vmem:[%s9889_s5 + $0x2e0] sm:$0xff] }
 0x42a   :  { %v2710_v2 = vpop.permute.xlu1 %2709  ;;  %5721 = vmatmul.mubr.f32.vlgmr.msra.gmra.mxu1 %v8586_v22  ;;  %v2800_v44 = vrot.slane %v8586_v22, 1  ;;  %v2801_v9 = vrot.slane %v8583_v4, 1  ;;  %v3091_v63 = vrot.slane %v8586_v22, 3  ;;  %v3092_v28 = vrot.slane %v8583_v4, 3 }
 0x42b   :  { %v2756_v15 = vsel %vm508_vm2, %v2751_v53, %v2710_v2  ;;  %5771 = vmatpush3.msra.mxu1 %v3090_v38  ;;  %5723 = vmatprep.mubr.msk.f32.mxu1 %vm6284_vm3, %v9936_v42  ;;  %v2984_v51 = vrot.slane %v8586_v22, 2  ;;  %v2985_v35 = vrot.slane %v8583_v4, 2  ;;  %v3195_v38 = vld [vmem:[%s9889_s5 + $0x268] sm:$0xff]  ;;  %v3303_v53 = vld [vmem:[%s9889_s5 + $0x2d8] sm:$0xff]  ;;  %v3194_v2 = vld [vmem:[%s9889_s5 + $0x260] sm:$0xff] }
 0x42c   :  { %v8603_v40 = vsel %vm2759_vm11, %v2756_v15, %v2738_v32  ;;  %5772 = vmatprep.subr.mxu1 %v9936_v42  ;;  %v2802_v49 = vsel %vm374_vm1, %v2800_v44, %v2801_v9  ;;  %v3093_v37 = vsel %vm1742_vm6, %v3091_v63, %v3092_v28  ;;  %v3193_v44 = vld [vmem:[%s9889_s5 + $0x258] sm:$0xff]  ;;  %v3192_v32 = vld [vmem:[%s9889_s5 + $0x250] sm:$0xff]  ;;  %v3300_v15 = vld [vmem:[%s9889_s5 + $0x2c0] sm:$0xff] }
 0x42d   :  { %5773 = vmatpush3.msra.mxu1 %v3089_v24  ;;  %5680 = vmatmul.mubr.f32.vlgmr.msra.gmra.mxu0 %v2802_v49  ;;  %v8614_v27 = vrot.slane %v8603_v40, 1  ;;  %v8752_v11 = vrot.slane %v8603_v40, 3  ;;  %v2986_v60 = vsel %vm1217_vm5, %v2984_v51, %v2985_v35  ;;  %v8775_v50 = vrot.slane %v8603_v40, 2  ;;  %v3302_v24 = vld [vmem:[%s9889_s5 + $0x2d0] sm:$0xff]  ;;  %v3299_v49 = vld [vmem:[%s9889_s5 + $0x2b8] sm:$0xff] }
 0x42e   :  { %5730 = vmatpush3.msra.mxu0 %v2983_v48  ;;  %5774 = vmatprep.subr.mxu1 %v9936_v42  ;;  %v3191_v48 = vld [vmem:[%s9889_s5 + $0x248] sm:$0xff]  ;;  %v3525_v63 = vld [vmem:[%s9889_s5 + $0x3f0] sm:$0xff]  ;;  %v3202_v51 = vrot.slane %v8603_v40, 4 }
 0x42f   :  { %5724 = vmatmul.mubr.f32.gmra.mxu1 %v8583_v4  ;;  %5731 = vmatprep.subr.mxu0 %v9936_v42  ;;  %v8624_v23 = vsel %vm374_vm1, %v2801_v9, %v8614_v27  ;;  %v8769_v1 = vsel %vm1742_vm6, %v3092_v28, %v8752_v11  ;;  %v8791_v10 = vsel %vm1217_vm5, %v2985_v35, %v8775_v50  ;;  %v3301_v9 = vld [vmem:[%s9889_s5 + $0x2c8] sm:$0xff]  ;;  %v3415_v35 = vld [vmem:[%s9889_s5 + $0x370] sm:$0xff] }
 0x430   :  { %5775 = vmatpush3.msra.mxu1 %v3088_v17  ;;  %5732 = vmatpush3.msra.mxu0 %v2982_v14  ;;  %v3190_v17 = vld [vmem:[%s9889_s5 + $0x240] sm:$0xff]  ;;  %v3298_v14 = vld [vmem:[%s9889_s5 + $0x2b0] sm:$0xff] }
 0x431   :  { %5776 = vmatprep.subr.mxu1 %v9936_v42  ;;  %5682 = vmatprep.mubr.msk.f32.mxu0 %vm6284_vm3, %v9936_v42 }
 0x432   :  { %5733 = vmatprep.subr.mxu0 %v9936_v42  ;;  %5777 = vmatpush3.msra.mxu1 %v3087_v26  ;;  %v3189_v26 = vld [vmem:[%s9889_s5 + $0x238] sm:$0xff] }
 0x433   :  { %5683 = vmatmul.mubr.f32.gmra.mxu0 %v8624_v23  ;;  %5726 = vmatprep.mubr.msk.f32.mxu1 %vm6284_vm3, %v9936_v42 }
 0x434   :  { %5734 = vmatpush3.msra.mxu0 %v2981_v52  ;;  %5778 = vmatprep.subr.mxu1 %v9936_v42  ;;  %v3297_v52 = vld [vmem:[%s9889_s5 + $0x2a8] sm:$0xff] }
 0x435   :  { %5727 = vmatmul.mubr.f32.gmra.mxu1 %v8603_v40  ;;  %5735 = vmatprep.subr.mxu0 %v9936_v42 }
 0x436   :  { %5779 = vmatpush3.msra.mxu1 %v3086_v55  ;;  %5736 = vmatpush3.msra.mxu0 %v2980_v62  ;;  %v3188_v55 = vld [vmem:[%s9889_s5 + $0x230] sm:$0xff]  ;;  %v3296_v62 = vld [vmem:[%s9889_s5 + $0x2a0] sm:$0xff] }
 0x437   :  { %5780 = vmatprep.subr.mxu1 %v9936_v42  ;;  %5685 = vmatprep.mubr.msk.f32.mxu0 %vm6284_vm3, %v9936_v42 }
 0x438   :  { %5737 = vmatprep.subr.mxu0 %v9936_v42  ;;  %5781 = vmatpush3.msra.mxu1 %v3085_v57  ;;  %v3187_v57 = vld [vmem:[%s9889_s5 + $0x228] sm:$0xff] }
 0x439   :  { %5686 = vmatmul.mubr.f32.gmra.mxu0 %v8614_v27  ;;  %5782 = vmatprep.subr.mxu1 %v9936_v42 }
 0x43a   :  { %5738 = vmatpush3.msra.mxu0 %v2979_v25  ;;  %5783 = vmatpush3.msra.mxu1 %v3084_v58  ;;  %v3295_v25 = vld [vmem:[%s9889_s5 + $0x298] sm:$0xff]  ;;  %v3186_v58 = vld [vmem:[%s9889_s5 + $0x220] sm:$0xff] }
 0x43b   :  { %5739 = vmatprep.subr.mxu0 %v9936_v42  ;;  %5784 = vmatprep.subr.mxu1 %v9936_v42 }
 0x43c   :  { %5740 = vmatpush3.msra.mxu0 %v2978_v33  ;;  %5785 = vmatpush3.msra.mxu1 %v3083_v3  ;;  %v3294_v33 = vld [vmem:[%s9889_s5 + $0x290] sm:$0xff]  ;;  %v3185_v3 = vld [vmem:[%s9889_s5 + $0x218] sm:$0xff] }
 0x43d   :  { %5741 = vmatprep.subr.mxu0 %v9936_v42  ;;  %5786 = vmatprep.subr.mxu1 %v9936_v42 }
 0x43e   :  { %5742 = vmatpush3.msra.mxu0 %v2977_v46  ;;  %5787 = vmatpush3.msra.mxu1 %v3082_v61  ;;  %v3293_v46 = vld [vmem:[%s9889_s5 + $0x288] sm:$0xff]  ;;  %v3184_v61 = vld [vmem:[%s9889_s5 + $0x210] sm:$0xff] }
 0x43f   :  { %5743 = vmatprep.subr.mxu0 %v9936_v42  ;;  %5788 = vmatprep.subr.mxu1 %v9936_v42 }
 0x440   :  { %5744 = vmatpush3.msra.mxu0 %v2976_v16  ;;  %5789 = vmatpush3.msra.mxu1 %v3081_v0  ;;  %v2684_v16 = vpop.permute.xlu1 %2683  ;;  %v3308_v0 = vrot.slane %v8586_v22, 5 }
 0x441   :  { %5745 = vmatprep.subr.mxu0 %v9936_v42  ;;  %5790 = vmatprep.subr.mxu1 %v9936_v42 }
 0x442   :  { %5746 = vmatpush3.msra.mxu0 %v2975_v47  ;;  %5791 = vmatpush3.msra.mxu1 %v3080_v54  ;;  %v3309_v47 = vrot.slane %v8583_v4, 5  ;;  %v3292_v54 = vld [vmem:[%s9889_s5 + $0x280] sm:$0xff] }
 0x443   :  { %5747 = vmatprep.subr.mxu0 %v9936_v42  ;;  %5792 = vmatprep.subr.mxu1 %v9936_v42 }
 0x444   :  { %5748 = vmatpush3.msra.mxu0 %v2974_v43  ;;  %5793 = vmatpush3.msra.mxu1 %v3079_v21  ;;  %v3183_v43 = vld [vmem:[%s9889_s5 + $0x208] sm:$0xff]  ;;  %v3310_v21 = vsel %vm2421_vm8, %v3308_v0, %v3309_v47  ;;  %v3528_v0 = vrot.slane %v8583_v4, 7 }
 0x445   :  { %5749 = vmatprep.subr.mxu0 %v9936_v42  ;;  %5794 = vmatprep.subr.mxu1 %v9936_v42 }
 0x446   :  { %5750 = vmatpush3.msra.mxu0 %v2973_v56  ;;  %5795 = vmatpush3.msra.mxu1 %v3078_v41  ;;  %v3526_v56 = vld [vmem:[%s9889_s5 + $0x3f8] sm:$0xff]  ;;  %v3182_v41 = vld [vmem:[%s9889_s5 + $0x200] sm:$0xff] }
 0x447   :  { %5751 = vmatprep.subr.mxu0 %v9936_v42  ;;  %5796 = vmatprep.subr.mxu1 %v9936_v42 }
 0x448   :  { %5752 = vmatpush3.msra.mxu0 %v2972_v8  ;;  %5797 = vmatpush3.msra.mxu1 %v3077_v20  ;;  %v3199_v8 = vrot.slane %v8586_v22, 4  ;;  %v3200_v20 = vrot.slane %v8583_v4, 4 }
 0x449   :  { %5753 = vmatprep.subr.mxu0 %v9936_v42  ;;  %5798 = vmatprep.subr.mxu1 %v9936_v42 }
 0x44a   :  { %5754 = vmatpush3.msra.mxu0 %v2971_v30  ;;  %5799 = vmatpush3.msra.mxu1 %v3076_v34  ;;  %v2752_v30 = vsel %vm2748_vm10, %v8395_v29, %v2684_v16  ;;  %v2740_v34 = vpop.permute.xlu1 %2739  ;;  %v3201_v29 = vsel %vm2509_vm9, %v3199_v8, %v3200_v20  ;;  %v3527_v16 = vrot.slane %v8586_v22, 7  ;;  %v3419_v8 = vrot.slane %v8583_v4, 6 }
 0x44b   :  { %5755 = vmatprep.subr.mxu0 %v9936_v42  ;;  %5800 = vmatprep.subr.mxu1 %v9936_v42 }
 0x44c   :  { %5756 = vmatpush3.msra.mxu0 %v2970_v31  ;;  %5801 = vmatpush3.msra.mxu1 %v3075_v45  ;;  %v3311_v31 = vrot.slane %v8603_v40, 5  ;;  %v2712_v45 = vpop.permute.xlu0 %2711 }
 0x44d   :  { %5757 = vmatprep.subr.mxu0 %v9936_v42  ;;  %5802 = vmatprep.mubr.msk.f32.mxu1 %vm6284_vm3, %v9936_v42  ;;  %v2757_v28 = vsel %vm508_vm2, %v2752_v30, %v2712_v45  ;;  %v3733_v30 = vld [vmem:[%s9889_s5 + $0x4f0] sm:$0xff]  ;;  %v3732_v45 = vld [vmem:[%s9889_s5 + $0x4e8] sm:$0xff] }
 0x44e   :  { %5758 = vmatpush3.msra.mxu0 %v2969_v5  ;;  %5803 = vmatmul.mubr.f32.vlgmr.msra.gmra.mxu1 %v3093_v37  ;;  %v3416_v5 = vld [vmem:[%s9889_s5 + $0x378] sm:$0xff]  ;;  %v8930_v37 = vsel %vm2759_vm11, %v2757_v28, %v2740_v34  ;;  %v3634_v28 = vld [vmem:[%s9889_s5 + $0x470] sm:$0xff] }
 0x44f   :  { %5852 = vmatprep.subr.mxu1 %v9936_v42  ;;  %5759 = vmatprep.subr.mxu0 %v9936_v42  ;;  %v3635_v34 = vld [vmem:[%s9889_s5 + $0x478] sm:$0xff] }
 0x450   :  { %5853 = vmatpush3.msra.mxu1 %v3307_v6  ;;  %5760 = vmatpush3.msra.mxu0 %v2968_v36  ;;  %v3312_v6 = vsel %vm2421_vm8, %v3309_v47, %v3311_v31  ;;  %v3524_v36 = vld [vmem:[%s9889_s5 + $0x3e8] sm:$0xff]  ;;  %v3511_v47 = vld [vmem:[%s9889_s5 + $0x380] sm:$0xff] }
 0x451   :  { %5761 = vmatprep.mubr.msk.f32.mxu0 %vm6284_vm3, %v9936_v42  ;;  %5854 = vmatprep.subr.mxu1 %v9936_v42 }
 0x452   :  { %5762 = vmatmul.mubr.f32.vlgmr.msra.gmra.mxu0 %v2986_v60  ;;  %5805 = vmatprep.mubr.msk.f32.mxu1 %vm6284_vm3, %v9936_v42  ;;  %v3523_v60 = vld [vmem:[%s9889_s5 + $0x3e0] sm:$0xff] }
 0x453   :  { %5811 = vmatprep.subr.mxu0 %v9936_v42  ;;  %5855 = vmatpush3.msra.mxu1 %v3306_v18  ;;  %v3313_v18 = vrot.slane %v8930_v37, 5 }
 0x454   :  { %5806 = vmatmul.mubr.f32.gmra.mxu1 %v8769_v1  ;;  %5812 = vmatpush3.msra.mxu0 %v3197_v7  ;;  %v8953_v7 = vsel %vm2509_vm9, %v3200_v20, %v3202_v51  ;;  %v3530_v20 = vrot.slane %v8603_v40, 7 }
 0x455   :  { %5856 = vmatprep.subr.mxu1 %v9936_v42  ;;  %5813 = vmatprep.subr.mxu0 %v9936_v42 }
 0x456   :  { %5857 = vmatpush3.msra.mxu1 %v3305_v13  ;;  %5764 = vmatprep.mubr.msk.f32.mxu0 %vm6284_vm3, %v9936_v42  ;;  %v3414_v13 = vld [vmem:[%s9889_s5 + $0x368] sm:$0xff] }
 0x457   :  { %5814 = vmatpush3.msra.mxu0 %v3196_v12  ;;  %5858 = vmatprep.subr.mxu1 %v9936_v42  ;;  %v3314_v12 = vsel %vm2421_vm8, %v3311_v31, %v3313_v18  ;;  %v3531_v31 = vsel %vm153_vm0, %v3528_v0, %v3530_v20  ;;  %v3423_v18 = vrot.slane %v8930_v37, 6 }
 0x458   :  { %5765 = vmatmul.mubr.f32.gmra.mxu0 %v8791_v10  ;;  %5808 = vmatprep.mubr.msk.f32.mxu1 %vm6284_vm3, %v9936_v42 }
 0x459   :  { %5815 = vmatprep.subr.mxu0 %v9936_v42  ;;  %5859 = vmatpush3.msra.mxu1 %v3304_v59  ;;  %v3522_v59 = vld [vmem:[%s9889_s5 + $0x3d8] sm:$0xff] }
 0x45a   :  { %5809 = vmatmul.mubr.f32.gmra.mxu1 %v8752_v11  ;;  %5816 = vmatpush3.msra.mxu0 %v3195_v38  ;;  %v3204_v38 = vrot.slane %v8930_v37, 4 }
 0x45b   :  { %5860 = vmatprep.subr.mxu1 %v9936_v42  ;;  %5817 = vmatprep.subr.mxu0 %v9936_v42 }
 0x45c   :  { %5861 = vmatpush3.msra.mxu1 %v3303_v53  ;;  %5767 = vmatprep.mubr.msk.f32.mxu0 %vm6284_vm3, %v9936_v42  ;;  %v3413_v53 = vld [vmem:[%s9889_s5 + $0x360] sm:$0xff] }
 0x45d   :  { %5818 = vmatpush3.msra.mxu0 %v3194_v2  ;;  %5862 = vmatprep.subr.mxu1 %v9936_v42  ;;  %v3521_v2 = vld [vmem:[%s9889_s5 + $0x3d0] sm:$0xff] }
 0x45e   :  { %5768 = vmatmul.mubr.f32.gmra.mxu0 %v8775_v50  ;;  %5819 = vmatprep.subr.mxu0 %v9936_v42 }
 0x45f   :  { %5863 = vmatpush3.msra.mxu1 %v3302_v24  ;;  %5820 = vmatpush3.msra.mxu0 %v3193_v44  ;;  %v3412_v24 = vld [vmem:[%s9889_s5 + $0x358] sm:$0xff]  ;;  %v8984_v44 = vsel %vm2509_vm9, %v3202_v51, %v3204_v38 }
 0x460   :  { %5864 = vmatprep.subr.mxu1 %v9936_v42  ;;  %5821 = vmatprep.subr.mxu0 %v9936_v42 }
 0x461   :  { %5865 = vmatpush3.msra.mxu1 %v3301_v9  ;;  %5822 = vmatpush3.msra.mxu0 %v3192_v32  ;;  %v3520_v9 = vld [vmem:[%s9889_s5 + $0x3c8] sm:$0xff]  ;;  %v3411_v32 = vld [vmem:[%s9889_s5 + $0x350] sm:$0xff] }
 0x462   :  { %5866 = vmatprep.subr.mxu1 %v9936_v42  ;;  %5823 = vmatprep.subr.mxu0 %v9936_v42 }
 0x463   :  { %5867 = vmatpush3.msra.mxu1 %v3300_v15  ;;  %5824 = vmatpush3.msra.mxu0 %v3191_v48  ;;  %v3519_v15 = vld [vmem:[%s9889_s5 + $0x3c0] sm:$0xff]  ;;  %v3410_v48 = vld [vmem:[%s9889_s5 + $0x348] sm:$0xff] }
 0x464   :  { %5868 = vmatprep.subr.mxu1 %v9936_v42  ;;  %5825 = vmatprep.subr.mxu0 %v9936_v42 }
 0x465   :  { %5869 = vmatpush3.msra.mxu1 %v3299_v49  ;;  %5826 = vmatpush3.msra.mxu0 %v3190_v17  ;;  %v3518_v49 = vld [vmem:[%s9889_s5 + $0x3b8] sm:$0xff]  ;;  %v3409_v17 = vld [vmem:[%s9889_s5 + $0x340] sm:$0xff] }
 0x466   :  { %5870 = vmatprep.subr.mxu1 %v9936_v42  ;;  %5827 = vmatprep.subr.mxu0 %v9936_v42 }
 0x467   :  { %5871 = vmatpush3.msra.mxu1 %v3298_v14  ;;  %5828 = vmatpush3.msra.mxu0 %v3189_v26  ;;  %v3517_v14 = vld [vmem:[%s9889_s5 + $0x3b0] sm:$0xff]  ;;  %v3408_v26 = vld [vmem:[%s9889_s5 + $0x338] sm:$0xff] }
 0x468   :  { %5872 = vmatprep.subr.mxu1 %v9936_v42  ;;  %5829 = vmatprep.subr.mxu0 %v9936_v42 }
 0x469   :  { %5873 = vmatpush3.msra.mxu1 %v3297_v52  ;;  %5830 = vmatpush3.msra.mxu0 %v3188_v55  ;;  %v3516_v52 = vld [vmem:[%s9889_s5 + $0x3a8] sm:$0xff]  ;;  %v3407_v55 = vld [vmem:[%s9889_s5 + $0x330] sm:$0xff] }
 0x46a   :  { %5874 = vmatprep.subr.mxu1 %v9936_v42  ;;  %5831 = vmatprep.subr.mxu0 %v9936_v42 }
 0x46b   :  { %5875 = vmatpush3.msra.mxu1 %v3296_v62  ;;  %5832 = vmatpush3.msra.mxu0 %v3187_v57  ;;  %v3515_v62 = vld [vmem:[%s9889_s5 + $0x3a0] sm:$0xff]  ;;  %v3406_v57 = vld [vmem:[%s9889_s5 + $0x328] sm:$0xff] }
 0x46c   :  { %5876 = vmatprep.subr.mxu1 %v9936_v42  ;;  %5833 = vmatprep.subr.mxu0 %v9936_v42 }
 0x46d   :  { %5877 = vmatpush3.msra.mxu1 %v3295_v25  ;;  %5834 = vmatpush3.msra.mxu0 %v3186_v58  ;;  %v3514_v25 = vld [vmem:[%s9889_s5 + $0x398] sm:$0xff]  ;;  %v3405_v58 = vld [vmem:[%s9889_s5 + $0x320] sm:$0xff] }
 0x46e   :  { %5878 = vmatprep.subr.mxu1 %v9936_v42  ;;  %5835 = vmatprep.subr.mxu0 %v9936_v42 }
 0x46f   :  { %5879 = vmatpush3.msra.mxu1 %v3294_v33  ;;  %5836 = vmatpush3.msra.mxu0 %v3185_v3  ;;  %v3513_v33 = vld [vmem:[%s9889_s5 + $0x390] sm:$0xff]  ;;  %v3404_v3 = vld [vmem:[%s9889_s5 + $0x318] sm:$0xff] }
 0x470   :  { %5880 = vmatprep.subr.mxu1 %v9936_v42  ;;  %5837 = vmatprep.subr.mxu0 %v9936_v42 }
 0x471   :  { %5881 = vmatpush3.msra.mxu1 %v3293_v46  ;;  %5838 = vmatpush3.msra.mxu0 %v3184_v61  ;;  %v3512_v46 = vld [vmem:[%s9889_s5 + $0x388] sm:$0xff]  ;;  %v3403_v61 = vld [vmem:[%s9889_s5 + $0x310] sm:$0xff] }
 0x472   :  { %5882 = vmatprep.subr.mxu1 %v9936_v42  ;;  %5839 = vmatprep.subr.mxu0 %v9936_v42 }
 0x473   :  { %5883 = vmatpush3.msra.mxu1 %v3292_v54  ;;  %5884 = vmatprep.mubr.msk.f32.mxu1 %vm6284_vm3, %v9936_v42  ;;  %v3402_v54 = vld [vmem:[%s9889_s5 + $0x308] sm:$0xff] }
 0x474   :  { %5840 = vmatpush3.msra.mxu0 %v3183_v43  ;;  %5885 = vmatmul.mubr.f32.vlgmr.msra.gmra.mxu1 %v3310_v21  ;;  %v3529_v43 = vsel %vm153_vm0, %v3527_v16, %v3528_v0  ;;  %v3734_v21 = vld [vmem:[%s9889_s5 + $0x4f8] sm:$0xff]  ;;  %v3620_v16 = vld [vmem:[%s9889_s5 + $0x400] sm:$0xff]  ;;  %v3735_v0 = vrot.slane %v8930_v37, 1 }
 0x475   :  { %5934 = vmatprep.subr.mxu1 %v9936_v42  ;;  %5841 = vmatprep.subr.mxu0 %v9936_v42 }
 0x476   :  { %5935 = vmatpush3.msra.mxu1 %v3526_v56  ;;  %5842 = vmatpush3.msra.mxu0 %v3182_v41  ;;  %v3401_v56 = vld [vmem:[%s9889_s5 + $0x300] sm:$0xff]  ;;  %v3418_v41 = vrot.slane %v8586_v22, 6 }
 0x477   :  { %5843 = vmatprep.mubr.msk.f32.mxu0 %vm6284_vm3, %v9936_v42  ;;  %5936 = vmatprep.subr.mxu1 %v9936_v42 }
 0x478   :  { %5844 = vmatmul.mubr.f32.vlgmr.msra.gmra.mxu0 %v3201_v29  ;;  %5887 = vmatprep.mubr.msk.f32.mxu1 %vm6284_vm3, %v9936_v42  ;;  %v3420_v22 = vsel %vm3417_vm12, %v3418_v41, %v3419_v8  ;;  %v3532_v29 = vrot.slane %v8930_v37, 7  ;;  %v3834_v41 = vld [vmem:[%s9889_s5 + $0x560] sm:$0xff] }
 0x479   :  { %5893 = vmatprep.subr.mxu0 %v9936_v42  ;;  %5937 = vmatpush3.msra.mxu1 %v3525_v63  ;;  %v3421_v63 = vrot.slane %v8603_v40, 6 }
 0x47a   :  { %5888 = vmatmul.mubr.f32.gmra.mxu1 %v3312_v6  ;;  %5894 = vmatpush3.msra.mxu0 %v3416_v5  ;;  %v3731_v5 = vld [vmem:[%s9889_s5 + $0x4e0] sm:$0xff]  ;;  %v3533_v51 = vsel %vm153_vm0, %v3530_v20, %v3532_v29  ;;  %v3934_v20 = vld [vmem:[%s9889_s5 + $0x5c8] sm:$0xff] }
 0x47b   :  { %5938 = vmatprep.subr.mxu1 %v9936_v42  ;;  %5895 = vmatprep.subr.mxu0 %v9936_v42  ;;  %v3422_v6 = vsel %vm3417_vm12, %v3419_v8, %v3421_v63  ;;  %v3833_v8 = vld [vmem:[%s9889_s5 + $0x558] sm:$0xff]  ;;  %v3930_v29 = vld [vmem:[%s9889_s5 + $0x5a8] sm:$0xff] }
 0x47c   :  { %5939 = vmatpush3.msra.mxu1 %v3524_v36  ;;  %5846 = vmatprep.mubr.msk.f32.mxu0 %vm6284_vm3, %v9936_v42  ;;  %v3633_v36 = vld [vmem:[%s9889_s5 + $0x468] sm:$0xff] }
 0x47d   :  { %5896 = vmatpush3.msra.mxu0 %v3415_v35  ;;  %5940 = vmatprep.subr.mxu1 %v9936_v42  ;;  %v3730_v35 = vld [vmem:[%s9889_s5 + $0x4d8] sm:$0xff] }
 0x47e   :  { %5847 = vmatmul.mubr.f32.gmra.mxu0 %v8953_v7  ;;  %5890 = vmatprep.mubr.msk.f32.mxu1 %vm6284_vm3, %v9936_v42 }
 0x47f   :  { %5897 = vmatprep.subr.mxu0 %v9936_v42  ;;  %5941 = vmatpush3.msra.mxu1 %v3523_v60  ;;  %v3632_v60 = vld [vmem:[%s9889_s5 + $0x460] sm:$0xff] }
 0x480   :  { %5891 = vmatmul.mubr.f32.gmra.mxu1 %v3314_v12  ;;  %5898 = vmatpush3.msra.mxu0 %v3414_v13  ;;  %v3729_v13 = vld [vmem:[%s9889_s5 + $0x4d0] sm:$0xff]  ;;  %v3631_v12 = vld [vmem:[%s9889_s5 + $0x458] sm:$0xff] }
 0x481   :  { %5942 = vmatprep.subr.mxu1 %v9936_v42  ;;  %5899 = vmatprep.subr.mxu0 %v9936_v42 }
 0x482   :  { %5943 = vmatpush3.msra.mxu1 %v3522_v59  ;;  %5849 = vmatprep.mubr.msk.f32.mxu0 %vm6284_vm3, %v9936_v42  ;;  %v3424_v59 = vsel %vm3417_vm12, %v3421_v63, %v3423_v18  ;;  %v3931_v63 = vld [vmem:[%s9889_s5 + $0x5b0] sm:$0xff] }
 0x483   :  { %5900 = vmatpush3.msra.mxu0 %v3413_v53  ;;  %5944 = vmatprep.subr.mxu1 %v9936_v42  ;;  %v3728_v53 = vld [vmem:[%s9889_s5 + $0x4c8] sm:$0xff]  ;;  %v3927_v18 = vld [vmem:[%s9889_s5 + $0x590] sm:$0xff] }
 0x484   :  { %5850 = vmatmul.mubr.f32.gmra.mxu0 %v8984_v44  ;;  %5901 = vmatprep.subr.mxu0 %v9936_v42 }
 0x485   :  { %5945 = vmatpush3.msra.mxu1 %v3521_v2  ;;  %5902 = vmatpush3.msra.mxu0 %v3412_v24  ;;  %v3630_v2 = vld [vmem:[%s9889_s5 + $0x450] sm:$0xff]  ;;  %v3727_v24 = vld [vmem:[%s9889_s5 + $0x4c0] sm:$0xff] }
 0x486   :  { %5946 = vmatprep.subr.mxu1 %v9936_v42  ;;  %5903 = vmatprep.subr.mxu0 %v9936_v42 }
 0x487   :  { %5947 = vmatpush3.msra.mxu1 %v3520_v9  ;;  %5904 = vmatpush3.msra.mxu0 %v3411_v32  ;;  %v3629_v9 = vld [vmem:[%s9889_s5 + $0x448] sm:$0xff]  ;;  %v3726_v32 = vld [vmem:[%s9889_s5 + $0x4b8] sm:$0xff] }
 0x488   :  { %5948 = vmatprep.subr.mxu1 %v9936_v42  ;;  %5905 = vmatprep.subr.mxu0 %v9936_v42 }
 0x489   :  { %5949 = vmatpush3.msra.mxu1 %v3519_v15  ;;  %5906 = vmatpush3.msra.mxu0 %v3410_v48  ;;  %v3628_v15 = vld [vmem:[%s9889_s5 + $0x440] sm:$0xff]  ;;  %v3725_v48 = vld [vmem:[%s9889_s5 + $0x4b0] sm:$0xff] }
 0x48a   :  { %5950 = vmatprep.subr.mxu1 %v9936_v42  ;;  %5907 = vmatprep.subr.mxu0 %v9936_v42 }
 0x48b   :  { %5951 = vmatpush3.msra.mxu1 %v3518_v49  ;;  %5908 = vmatpush3.msra.mxu0 %v3409_v17  ;;  %v3627_v49 = vld [vmem:[%s9889_s5 + $0x438] sm:$0xff]  ;;  %v3724_v17 = vld [vmem:[%s9889_s5 + $0x4a8] sm:$0xff] }
 0x48c   :  { %5952 = vmatprep.subr.mxu1 %v9936_v42  ;;  %5909 = vmatprep.subr.mxu0 %v9936_v42 }
 0x48d   :  { %5953 = vmatpush3.msra.mxu1 %v3517_v14  ;;  %5910 = vmatpush3.msra.mxu0 %v3408_v26  ;;  %v3626_v14 = vld [vmem:[%s9889_s5 + $0x430] sm:$0xff]  ;;  %v3723_v26 = vld [vmem:[%s9889_s5 + $0x4a0] sm:$0xff] }
 0x48e   :  { %5954 = vmatprep.subr.mxu1 %v9936_v42  ;;  %5911 = vmatprep.subr.mxu0 %v9936_v42 }
 0x48f   :  { %5955 = vmatpush3.msra.mxu1 %v3516_v52  ;;  %5912 = vmatpush3.msra.mxu0 %v3407_v55  ;;  %v3625_v52 = vld [vmem:[%s9889_s5 + $0x428] sm:$0xff]  ;;  %v3722_v55 = vld [vmem:[%s9889_s5 + $0x498] sm:$0xff] }
 0x490   :  { %5956 = vmatprep.subr.mxu1 %v9936_v42  ;;  %5913 = vmatprep.subr.mxu0 %v9936_v42 }
 0x491   :  { %5957 = vmatpush3.msra.mxu1 %v3515_v62  ;;  %5914 = vmatpush3.msra.mxu0 %v3406_v57  ;;  %v3624_v62 = vld [vmem:[%s9889_s5 + $0x420] sm:$0xff]  ;;  %v3721_v57 = vld [vmem:[%s9889_s5 + $0x490] sm:$0xff] }
 0x492   :  { %5958 = vmatprep.subr.mxu1 %v9936_v42  ;;  %5915 = vmatprep.subr.mxu0 %v9936_v42 }
 0x493   :  { %5959 = vmatpush3.msra.mxu1 %v3514_v25  ;;  %5916 = vmatpush3.msra.mxu0 %v3405_v58  ;;  %v3623_v25 = vld [vmem:[%s9889_s5 + $0x418] sm:$0xff]  ;;  %v3720_v58 = vld [vmem:[%s9889_s5 + $0x488] sm:$0xff] }
 0x494   :  { %5960 = vmatprep.subr.mxu1 %v9936_v42  ;;  %5917 = vmatprep.subr.mxu0 %v9936_v42 }
 0x495   :  { %5961 = vmatpush3.msra.mxu1 %v3513_v33  ;;  %5918 = vmatpush3.msra.mxu0 %v3404_v3  ;;  %v3622_v33 = vld [vmem:[%s9889_s5 + $0x410] sm:$0xff]  ;;  %v3719_v3 = vld [vmem:[%s9889_s5 + $0x480] sm:$0xff] }
 0x496   :  { %5962 = vmatprep.subr.mxu1 %v9936_v42  ;;  %5919 = vmatprep.subr.mxu0 %v9936_v42 }
 0x497   :  { %5963 = vmatpush3.msra.mxu1 %v3512_v46  ;;  %5920 = vmatpush3.msra.mxu0 %v3403_v61  ;;  %v3621_v46 = vld [vmem:[%s9889_s5 + $0x408] sm:$0xff]  ;;  %v3940_v61 = vld [vmem:[%s9889_s5 + $0x5f8] sm:$0xff] }
 0x498   :  { %5964 = vmatprep.subr.mxu1 %v9936_v42  ;;  %5921 = vmatprep.subr.mxu0 %v9936_v42 }
 0x499   :  { %5965 = vmatpush3.msra.mxu1 %v3511_v47  ;;  %5966 = vmatprep.mubr.msk.f32.mxu1 %vm6284_vm3, %v9936_v42  ;;  %v3939_v47 = vld [vmem:[%s9889_s5 + $0x5f0] sm:$0xff] }
 0x49a   :  { %5922 = vmatpush3.msra.mxu0 %v3402_v54  ;;  %5967 = vmatmul.mubr.f32.vlgmr.msra.gmra.mxu1 %v3529_v43  ;;  %v3736_v54 = vsel %vm374_vm1, %v8614_v27, %v3735_v0  ;;  %v3938_v43 = vld [vmem:[%s9889_s5 + $0x5e8] sm:$0xff] }
 0x49b   :  { %6016 = vmatprep.subr.mxu1 %v9936_v42  ;;  %5923 = vmatprep.subr.mxu0 %v9936_v42  ;;  %v3835_v27 = vld [vmem:[%s9889_s5 + $0x568] sm:$0xff] }
 0x49c   :  { %6017 = vmatpush3.msra.mxu1 %v3734_v21  ;;  %5924 = vmatpush3.msra.mxu0 %v3401_v56  ;;  %v3836_v21 = vld [vmem:[%s9889_s5 + $0x570] sm:$0xff]  ;;  %v3936_v56 = vld [vmem:[%s9889_s5 + $0x5d8] sm:$0xff] }
 0x49d   :  { %5925 = vmatprep.mubr.msk.f32.mxu0 %vm6284_vm3, %v9936_v42  ;;  %6018 = vmatprep.subr.mxu1 %v9936_v42 }
 0x49e   :  { %5926 = vmatmul.mubr.f32.vlgmr.msra.gmra.mxu0 %v3420_v22  ;;  %5969 = vmatprep.mubr.msk.f32.mxu1 %vm6284_vm3, %v9936_v42  ;;  %v3933_v22 = vld [vmem:[%s9889_s5 + $0x5c0] sm:$0xff] }
 0x49f   :  { %5975 = vmatprep.subr.mxu0 %v9936_v42  ;;  %6019 = vmatpush3.msra.mxu1 %v3733_v30  ;;  %v3832_v30 = vld [vmem:[%s9889_s5 + $0x550] sm:$0xff] }
 0x4a0   :  { %5970 = vmatmul.mubr.f32.gmra.mxu1 %v3531_v31  ;;  %5976 = vmatpush3.msra.mxu0 %v3635_v34  ;;  %v3831_v34 = vld [vmem:[%s9889_s5 + $0x548] sm:$0xff]  ;;  %v3932_v31 = vld [vmem:[%s9889_s5 + $0x5b8] sm:$0xff] }
 0x4a1   :  { %6020 = vmatprep.subr.mxu1 %v9936_v42  ;;  %5977 = vmatprep.subr.mxu0 %v9936_v42 }
 0x4a2   :  { %6021 = vmatpush3.msra.mxu1 %v3732_v45  ;;  %5928 = vmatprep.mubr.msk.f32.mxu0 %vm6284_vm3, %v9936_v42  ;;  %v3830_v45 = vld [vmem:[%s9889_s5 + $0x540] sm:$0xff] }
 0x4a3   :  { %5978 = vmatpush3.msra.mxu0 %v3634_v28  ;;  %6022 = vmatprep.subr.mxu1 %v9936_v42  ;;  %v3829_v28 = vld [vmem:[%s9889_s5 + $0x538] sm:$0xff] }
 0x4a4   :  { %5929 = vmatmul.mubr.f32.gmra.mxu0 %v3422_v6  ;;  %5972 = vmatprep.mubr.msk.f32.mxu1 %vm6284_vm3, %v9936_v42  ;;  %v3929_v6 = vld [vmem:[%s9889_s5 + $0x5a0] sm:$0xff] }
 0x4a5   :  { %5979 = vmatprep.subr.mxu0 %v9936_v42  ;;  %6023 = vmatpush3.msra.mxu1 %v3731_v5  ;;  %v3828_v5 = vld [vmem:[%s9889_s5 + $0x530] sm:$0xff] }
 0x4a6   :  { %5973 = vmatmul.mubr.f32.gmra.mxu1 %v3533_v51  ;;  %5980 = vmatpush3.msra.mxu0 %v3633_v36  ;;  %v3827_v36 = vld [vmem:[%s9889_s5 + $0x528] sm:$0xff]  ;;  %v3928_v51 = vld [vmem:[%s9889_s5 + $0x598] sm:$0xff] }
 0x4a7   :  { %6024 = vmatprep.subr.mxu1 %v9936_v42  ;;  %5981 = vmatprep.subr.mxu0 %v9936_v42 }
 0x4a8   :  { %6025 = vmatpush3.msra.mxu1 %v3730_v35  ;;  %5931 = vmatprep.mubr.msk.f32.mxu0 %vm6284_vm3, %v9936_v42  ;;  %v3826_v35 = vld [vmem:[%s9889_s5 + $0x520] sm:$0xff] }
 0x4a9   :  { %5982 = vmatpush3.msra.mxu0 %v3632_v60  ;;  %6026 = vmatprep.subr.mxu1 %v9936_v42  ;;  %v3825_v60 = vld [vmem:[%s9889_s5 + $0x518] sm:$0xff] }
 0x4aa   :  { %5932 = vmatmul.mubr.f32.gmra.mxu0 %v3424_v59  ;;  %5983 = vmatprep.subr.mxu0 %v9936_v42  ;;  %v3925_v59 = vld [vmem:[%s9889_s5 + $0x580] sm:$0xff] }
 0x4ab   :  { %6027 = vmatpush3.msra.mxu1 %v3729_v13  ;;  %5984 = vmatpush3.msra.mxu0 %v3631_v12  ;;  %v3926_v13 = vld [vmem:[%s9889_s5 + $0x588] sm:$0xff]  ;;  %v3824_v12 = vld [vmem:[%s9889_s5 + $0x510] sm:$0xff] }
 0x4ac   :  { %6028 = vmatprep.subr.mxu1 %v9936_v42  ;;  %5985 = vmatprep.subr.mxu0 %v9936_v42 }
 0x4ad   :  { %6029 = vmatpush3.msra.mxu1 %v3728_v53  ;;  %5986 = vmatpush3.msra.mxu0 %v3630_v2  ;;  %v3823_v53 = vld [vmem:[%s9889_s5 + $0x508] sm:$0xff]  ;;  %v3822_v2 = vld [vmem:[%s9889_s5 + $0x500] sm:$0xff] }
 0x4ae   :  { %6030 = vmatprep.subr.mxu1 %v9936_v42  ;;  %5987 = vmatprep.subr.mxu0 %v9936_v42 }
 0x4af   :  { %6031 = vmatpush3.msra.mxu1 %v3727_v24  ;;  %5988 = vmatpush3.msra.mxu0 %v3629_v9  ;;  %v3941_v24 = vrot.slane %v8930_v37, 3  ;;  %v4043_v9 = vld [vmem:[%s9889_s5 + $0x678] sm:$0xff] }
 0x4b0   :  { %6032 = vmatprep.subr.mxu1 %v9936_v42  ;;  %5989 = vmatprep.subr.mxu0 %v9936_v42 }
 0x4b1   :  { %6033 = vmatpush3.msra.mxu1 %v3726_v32  ;;  %5990 = vmatpush3.msra.mxu0 %v3628_v15  ;;  %v3838_v32 = vrot.slane %v8930_v37, 2  ;;  %v4042_v15 = vld [vmem:[%s9889_s5 + $0x670] sm:$0xff] }
 0x4b2   :  { %6034 = vmatprep.subr.mxu1 %v9936_v42  ;;  %5991 = vmatprep.subr.mxu0 %v9936_v42 }
 0x4b3   :  { %6035 = vmatpush3.msra.mxu1 %v3725_v48  ;;  %5992 = vmatpush3.msra.mxu0 %v3627_v49 }
 0x4b4   :  { %6036 = vmatprep.subr.mxu1 %v9936_v42  ;;  %5993 = vmatprep.subr.mxu0 %v9936_v42 }
 0x4b5   :  { %6037 = vmatpush3.msra.mxu1 %v3724_v17  ;;  %5994 = vmatpush3.msra.mxu0 %v3626_v14  ;;  %v4040_v17 = vld [vmem:[%s9889_s5 + $0x660] sm:$0xff] }
 0x4b6   :  { %6038 = vmatprep.subr.mxu1 %v9936_v42  ;;  %5995 = vmatprep.subr.mxu0 %v9936_v42 }
 0x4b7   :  { %6039 = vmatpush3.msra.mxu1 %v3723_v26  ;;  %5996 = vmatpush3.msra.mxu0 %v3625_v52 }
 0x4b8   :  { %6040 = vmatprep.subr.mxu1 %v9936_v42  ;;  %5997 = vmatprep.subr.mxu0 %v9936_v42 }
 0x4b9   :  { %6041 = vmatpush3.msra.mxu1 %v3722_v55  ;;  %5998 = vmatpush3.msra.mxu0 %v3624_v62  ;;  %v4038_v62 = vld [vmem:[%s9889_s5 + $0x650] sm:$0xff] }
 0x4ba   :  { %6042 = vmatprep.subr.mxu1 %v9936_v42  ;;  %5999 = vmatprep.subr.mxu0 %v9936_v42 }
 0x4bb   :  { %6043 = vmatpush3.msra.mxu1 %v3721_v57  ;;  %6000 = vmatpush3.msra.mxu0 %v3623_v25  ;;  %v4037_v25 = vld [vmem:[%s9889_s5 + $0x648] sm:$0xff] }
 0x4bc   :  { %6044 = vmatprep.subr.mxu1 %v9936_v42  ;;  %6001 = vmatprep.subr.mxu0 %v9936_v42 }
 0x4bd   :  { %6045 = vmatpush3.msra.mxu1 %v3720_v58  ;;  %6002 = vmatpush3.msra.mxu0 %v3622_v33 }
 0x4be   :  { %6046 = vmatprep.subr.mxu1 %v9936_v42  ;;  %6003 = vmatprep.subr.mxu0 %v9936_v42 }
 0x4bf   :  { %6047 = vmatpush3.msra.mxu1 %v3719_v3  ;;  %6048 = vmatprep.mubr.msk.f32.mxu1 %vm6284_vm3, %v9936_v42  ;;  %v4036_v3 = vld [vmem:[%s9889_s5 + $0x640] sm:$0xff] }
 0x4c0   :  { %6004 = vmatpush3.msra.mxu0 %v3621_v46  ;;  %6049 = vmatmul.mubr.f32.vlgmr.msra.gmra.mxu1 %v8624_v23  ;;  %v3837_v23 = vld [vmem:[%s9889_s5 + $0x578] sm:$0xff] }
 0x4c1   :  { %6098 = vmatprep.subr.mxu1 %v9936_v42  ;;  %6005 = vmatprep.subr.mxu0 %v9936_v42 }
 0x4c2   :  { %6099 = vmatpush3.msra.mxu1 %v3940_v61  ;;  %6006 = vmatpush3.msra.mxu0 %v3620_v16  ;;  %v4035_v16 = vld [vmem:[%s9889_s5 + $0x638] sm:$0xff] }
 0x4c3   :  { %6007 = vmatprep.mubr.msk.f32.mxu0 %vm6284_vm3, %v9936_v42  ;;  %6100 = vmatprep.subr.mxu1 %v9936_v42 }
 0x4c4   :  { %6008 = vmatmul.mubr.f32.vlgmr.msra.gmra.mxu0 %v8583_v4  ;;  %6051 = vmatprep.mubr.msk.f32.mxu1 %vm6284_vm3, %v9936_v42  ;;  %v3937_v4 = vld [vmem:[%s9889_s5 + $0x5e0] sm:$0xff] }
 0x4c5   :  { %6057 = vmatprep.subr.mxu0 %v9936_v42  ;;  %6101 = vmatpush3.msra.mxu1 %v3939_v47  ;;  %v4034_v47 = vld [vmem:[%s9889_s5 + $0x630] sm:$0xff] }
 0x4c6   :  { %6052 = vmatmul.mubr.f32.gmra.mxu1 %v3736_v54  ;;  %6058 = vmatpush3.msra.mxu0 %v3837_v23 }
 0x4c7   :  { %6102 = vmatprep.subr.mxu1 %v9936_v42  ;;  %6059 = vmatprep.subr.mxu0 %v9936_v42 }
 0x4c8   :  { %6103 = vmatpush3.msra.mxu1 %v3938_v43  ;;  %6010 = vmatprep.mubr.msk.f32.mxu0 %vm6284_vm3, %v9936_v42  ;;  %v4033_v43 = vld [vmem:[%s9889_s5 + $0x628] sm:$0xff] }
 0x4c9   :  { %6060 = vmatpush3.msra.mxu0 %v3836_v21  ;;  %6104 = vmatprep.subr.mxu1 %v9936_v42 }
 0x4ca   :  { %6011 = vmatmul.mubr.f32.gmra.mxu0 %v8603_v40  ;;  %6054 = vmatprep.mubr.msk.f32.mxu1 %vm6284_vm3, %v9936_v42  ;;  %v3935_v40 = vld [vmem:[%s9889_s5 + $0x5d0] sm:$0xff] }
 0x4cb   :  { %6061 = vmatprep.subr.mxu0 %v9936_v42  ;;  %6105 = vmatpush3.msra.mxu1 %v3937_v4  ;;  %v4032_v4 = vld [vmem:[%s9889_s5 + $0x620] sm:$0xff] }
 0x4cc   :  { %6055 = vmatmul.mubr.f32.gmra.mxu1 %v3735_v0  ;;  %6062 = vmatpush3.msra.mxu0 %v3835_v27  ;;  %v4031_v27 = vld [vmem:[%s9889_s5 + $0x618] sm:$0xff] }
 0x4cd   :  { %6106 = vmatprep.subr.mxu1 %v9936_v42  ;;  %6063 = vmatprep.subr.mxu0 %v9936_v42 }
 0x4ce   :  { %6107 = vmatpush3.msra.mxu1 %v3936_v56  ;;  %6013 = vmatprep.mubr.msk.f32.mxu0 %vm6284_vm3, %v9936_v42  ;;  %v4030_v56 = vld [vmem:[%s9889_s5 + $0x610] sm:$0xff] }
 0x4cf   :  { %6064 = vmatpush3.msra.mxu0 %v3834_v41  ;;  %6108 = vmatprep.subr.mxu1 %v9936_v42  ;;  %v2686_v41 = vpop.permute.xlu0 %2685 }
 0x4d0   :  { %6014 = vmatmul.mubr.f32.gmra.mxu0 %v8930_v37  ;;  %6065 = vmatprep.subr.mxu0 %v9936_v42 }
 0x4d1   :  { %6109 = vmatpush3.msra.mxu1 %v3935_v40  ;;  %6066 = vmatpush3.msra.mxu0 %v3833_v8  ;;  %v2714_v40 = vpop.permute.xlu1 %2713  ;;  %v4029_v8 = vld [vmem:[%s9889_s5 + $0x608] sm:$0xff] }
 0x4d2   :  { %6110 = vmatprep.subr.mxu1 %v9936_v42  ;;  %6067 = vmatprep.subr.mxu0 %v9936_v42 }
 0x4d3   :  { %6111 = vmatpush3.msra.mxu1 %v3934_v20  ;;  %6068 = vmatpush3.msra.mxu0 %v3832_v30  ;;  %v2753_v20 = vsel %vm2748_vm10, %v8397_v19, %v2686_v41  ;;  %v4028_v30 = vld [vmem:[%s9889_s5 + $0x600] sm:$0xff] }
 0x4d4   :  { %6112 = vmatprep.subr.mxu1 %v9936_v42  ;;  %6069 = vmatprep.subr.mxu0 %v9936_v42 }
 0x4d5   :  { %6113 = vmatpush3.msra.mxu1 %v3933_v22  ;;  %6070 = vmatpush3.msra.mxu0 %v3831_v34  ;;  %v2758_v22 = vsel %vm508_vm2, %v2753_v20, %v2714_v40  ;;  %v2742_v34 = vpop.permute.xlu0 %2741 }
 0x4d6   :  { %6114 = vmatprep.subr.mxu1 %v9936_v42  ;;  %6071 = vmatprep.subr.mxu0 %v9936_v42 }
 0x4d7   :  { %6115 = vmatpush3.msra.mxu1 %v3932_v31  ;;  %6072 = vmatpush3.msra.mxu0 %v3830_v45  ;;  %v2764_v31 = vsel %vm2759_vm11, %v2758_v22, %v2742_v34 }
 0x4d8   :  { %6116 = vmatprep.subr.mxu1 %v9936_v42  ;;  %6073 = vmatprep.subr.mxu0 %v9936_v42  ;;  %v4045_v19 = vrot.slane %v2764_v31, 4 }
 0x4d9   :  { %6117 = vmatpush3.msra.mxu1 %v3931_v63  ;;  %6074 = vmatpush3.msra.mxu0 %v3829_v28 }
 0x4da   :  { %6118 = vmatprep.subr.mxu1 %v9936_v42  ;;  %6075 = vmatprep.subr.mxu0 %v9936_v42  ;;  %v4046_v63 = vsel %vm2509_vm9, %v3204_v38, %v4045_v19 }
 0x4db   :  { %6119 = vmatpush3.msra.mxu1 %v3930_v29  ;;  %6076 = vmatpush3.msra.mxu0 %v3828_v5 }
 0x4dc   :  { %6120 = vmatprep.subr.mxu1 %v9936_v42  ;;  %6077 = vmatprep.subr.mxu0 %v9936_v42 }
 0x4dd   :  { %6121 = vmatpush3.msra.mxu1 %v3929_v6  ;;  %6078 = vmatpush3.msra.mxu0 %v3827_v36 }
 0x4de   :  { %6122 = vmatprep.subr.mxu1 %v9936_v42  ;;  %6079 = vmatprep.subr.mxu0 %v9936_v42 }
 0x4df   :  { %6123 = vmatpush3.msra.mxu1 %v3928_v51  ;;  %6080 = vmatpush3.msra.mxu0 %v3826_v35 }
 0x4e0   :  { %6124 = vmatprep.subr.mxu1 %v9936_v42  ;;  %6081 = vmatprep.subr.mxu0 %v9936_v42 }
 0x4e1   :  { %6125 = vmatpush3.msra.mxu1 %v3927_v18  ;;  %6082 = vmatpush3.msra.mxu0 %v3825_v60 }
 0x4e2   :  { %6126 = vmatprep.subr.mxu1 %v9936_v42  ;;  %6083 = vmatprep.subr.mxu0 %v9936_v42 }
 0x4e3   :  { %6127 = vmatpush3.msra.mxu1 %v3926_v13  ;;  %6084 = vmatpush3.msra.mxu0 %v3824_v12 }
 0x4e4   :  { %6128 = vmatprep.subr.mxu1 %v9936_v42  ;;  %6085 = vmatprep.subr.mxu0 %v9936_v42 }
 0x4e5   :  { %6129 = vmatpush3.msra.mxu1 %v3925_v59  ;;  %6130 = vmatprep.mubr.msk.f32.mxu1 %vm6284_vm3, %v9936_v42 }
 0x4e6   :  { %6086 = vmatpush3.msra.mxu0 %v3823_v53  ;;  %6131 = vmatmul.mubr.f32.vlgmr.msra.gmra.mxu1 %v8769_v1  ;;  %v3942_v1 = vsel %vm1742_vm6, %v8752_v11, %v3941_v24  ;;  %v3839_v11 = vsel %vm1217_vm5, %v8775_v50, %v3838_v32  ;;  %v4039_v50 = vld [vmem:[%s9889_s5 + $0x658] sm:$0xff] }
 0x4e7   :  { %6087 = vmatprep.subr.mxu0 %v9936_v42  ;;  %6089 = vmatprep.mubr.msk.f32.mxu0 %vm6284_vm3, %v9936_v42 }
 0x4e8   :  { %6088 = vmatpush3.msra.mxu0 %v3822_v2  ;;  %6133 = vmatprep.mubr.msk.f32.mxu1 %vm6284_vm3, %v9936_v42 }
 0x4e9   :  { %6090 = vmatmul.mubr.f32.vlgmr.msra.gmra.mxu0 %v8791_v10  ;;  %6139 = vmatprep.subr.mxu0 %v9936_v42  ;;  %v4041_v10 = vld [vmem:[%s9889_s5 + $0x668] sm:$0xff]  ;;  %s6288_s5 = smov 80  }
 0x4ea   :  { %6134 = vmatmul.mubr.f32.gmra.mxu1 %v3942_v1  ;;  %6140 = vmatpush3.msra.mxu0 %v4043_v9  ;;  %v2954_v48 = vpop.f32.mrf.mxu1 }
 0x4eb   :  { %6141 = vmatprep.subr.mxu0 %v9936_v42  ;;  %6092 = vmatprep.mubr.msk.f32.mxu0 %vm6284_vm3, %v9936_v42 }
 0x4ec   :  { %6142 = vmatpush3.msra.mxu0 %v4042_v15  ;;  %6136 = vmatprep.mubr.msk.f32.mxu1 %vm6284_vm3, %v9936_v42  ;;  %v5722_v49 = vpop.f32.mrf.mxu1 }
 0x4ed   :  { %6093 = vmatmul.mubr.f32.gmra.mxu0 %v3839_v11  ;;  %6143 = vmatprep.subr.mxu0 %v9936_v42  ;;  %v2874_v14 = vpop.f32.mrf.mxu0 }
 0x4ee   :  { %6137 = vmatmul.mubr.f32.gmra.mxu1 %v3941_v24  ;;  %6144 = vmatpush3.msra.mxu0 %v4041_v10  ;;  %v9406_v26 = vadd.f32 %v2954_v48, %v2874_v14 }
 0x4ef   :  { %6145 = vmatprep.subr.mxu0 %v9936_v42  ;;  %6095 = vmatprep.mubr.msk.f32.mxu0 %vm6284_vm3, %v9936_v42  ;;  %v2959_v52 = vpop.f32.mrf.mxu1  ;;  %v5681_v55 = vpop.f32.mrf.mxu0 }
 0x4f0   :  { %6146 = vmatpush3.msra.mxu0 %v4040_v17  ;;  %6180 = vmatprep.subr.mxu1 %v9936_v42 }
 0x4f1   :  { %6096 = vmatmul.mubr.f32.gmra.mxu0 %v3838_v32  ;;  %6147 = vmatprep.subr.mxu0 %v9936_v42  ;;  %v5725_v57 = vpop.f32.mrf.mxu1 }
 0x4f2   :  { %6148 = vmatpush3.msra.mxu0 %v4039_v50  ;;  %6171 = vmatprep.mubr.msk.f32.mxu0 %vm6284_vm3, %v9936_v42 }
 0x4f3   :  { %6149 = vmatprep.subr.mxu0 %v9936_v42  ;;  %v2879_v58 = vpop.f32.mrf.mxu0  ;;  %6186 = vmatprep.mubr.msk.f32.mxu1 %vm6284_vm3, %v9936_v42 }
 0x4f4   :  { %6150 = vmatpush3.msra.mxu0 %v4038_v62  ;;  %v2960_v33 = vadd.f32 %v2959_v52, %v2879_v58 }
 0x4f5   :  { %6151 = vmatprep.subr.mxu0 %v9936_v42  ;;  %v2964_v46 = vpop.f32.mrf.mxu1  ;;  %v5684_v61 = vpop.f32.mrf.mxu0 }
 0x4f6   :  { %6152 = vmatpush3.msra.mxu0 %v4037_v25 }
 0x4f7   :  { %6153 = vmatprep.subr.mxu0 %v9936_v42  ;;  %v5728_v0 = vpop.f32.mrf.mxu1 }
 0x4f8   :  { %6154 = vmatpush3.msra.mxu0 %v4036_v3 }
 0x4f9   :  { %6155 = vmatprep.subr.mxu0 %v9936_v42  ;;  %v2884_v23 = vpop.f32.mrf.mxu0 }
 0x4fa   :  { %6156 = vmatpush3.msra.mxu0 %v4035_v16  ;;  %v2965_v54 = vadd.f32 %v2964_v46, %v2884_v23 }
 0x4fb   :  { %6157 = vmatprep.subr.mxu0 %v9936_v42  ;;  %v5687_v21 = vpop.f32.mrf.mxu0 }
 0x4fc   :  { %6158 = vmatpush3.msra.mxu0 %v4034_v47 }
 0x4fd   :  { %6159 = vmatprep.subr.mxu0 %v9936_v42 }
 0x4fe   :  { %6160 = vmatpush3.msra.mxu0 %v4033_v43 }
 0x4ff   :  { %6161 = vmatprep.subr.mxu0 %v9936_v42 }
 0x500   :  { %6162 = vmatpush3.msra.mxu0 %v4032_v4 }
 0x501   :  { %6163 = vmatprep.subr.mxu0 %v9936_v42 }
 0x502   :  { %6164 = vmatpush3.msra.mxu0 %v4031_v27 }
 0x503   :  { %6165 = vmatprep.subr.mxu0 %v9936_v42 }
 0x504   :  { %6166 = vmatpush3.msra.mxu0 %v4030_v56 }
 0x505   :  { %6167 = vmatprep.subr.mxu0 %v9936_v42 }
 0x506   :  { %6168 = vmatpush3.msra.mxu0 %v4029_v8 }
 0x507   :  { %6169 = vmatprep.subr.mxu0 %v9936_v42 }
 0x508   :  { %6170 = vmatpush3.msra.mxu0 %v4028_v30 }
 0x509   :  { %6172 = vmatmul.mubr.f32.vlgmr.msra.gmra.mxu0 %v8953_v7  ;;  %4344 = vmatprep.subr.mxu0 %v9936_v42 }
 0x50a   :  { %6174 = vmatprep.mubr.msk.f32.mxu0 %vm6284_vm3, %v9936_v42 }
 0x50d   :  { %6175 = vmatmul.mubr.f32.gmra.mxu0 %v8984_v44 }
 0x50e   :  { %6177 = vmatprep.mubr.msk.f32.mxu0 %vm6284_vm3, %v9936_v42  ;;  %v3165_v45 = vpop.f32.mrf.mxu1 }
 0x510   :  { %v5804_v28 = vpop.f32.mrf.mxu1 }
 0x511   :  { %6178 = vmatmul.mubr.f32.gmra.mxu0 %v4046_v63 }
 0x512   :  { %v3058_v29 = vpop.f32.mrf.mxu0 }
 0x513   :  { %v3072_v7 = vadd.f32 %v3058_v29, %v9406_v26 }
 0x514   :  { %v3170_v5 = vpop.f32.mrf.mxu1  ;;  %v5763_v6 = vpop.f32.mrf.mxu0 }
 0x515   :  { %v3179_v36 = vadd.f32 %v3165_v45, %v3072_v7 }
 0x516   :  { %v5807_v51 = vpop.f32.mrf.mxu1 }
 0x518   :  { %v3063_v35 = vpop.f32.mrf.mxu0 }
 0x519   :  { %v3073_v18 = vadd.f32 %v3063_v35, %v2960_v33 }
 0x51a   :  { %v3175_v44 = vpop.f32.mrf.mxu1  ;;  %v5766_v60 = vpop.f32.mrf.mxu0 }
 0x51b   :  { %v3180_v13 = vadd.f32 %v3170_v5, %v3073_v18 }
 0x51c   :  { %v5810_v12 = vpop.f32.mrf.mxu1 }
 0x51e   :  { %v3068_v59 = vpop.f32.mrf.mxu0 }
 0x51f   :  { %v3074_v53 = vadd.f32 %v3068_v59, %v2965_v54 }
 0x520   :  { %v5769_v37 = vpop.f32.mrf.mxu0 }
 0x521   :  { %v3181_v2 = vadd.f32 %v3175_v44, %v3074_v53 }
 0x534   :  { %v3384_v38 = vpop.f32.mrf.mxu1 }
 0x536   :  { %v5886_v24 = vpop.f32.mrf.mxu1 }
 0x538   :  { %v3275_v9 = vpop.f32.mrf.mxu0 }
 0x539   :  { %v3289_v32 = vadd.f32 %v3275_v9, %v3179_v36 }
 0x53a   :  { %v3389_v1 = vpop.f32.mrf.mxu1  ;;  %v5845_v15 = vpop.f32.mrf.mxu0 }
 0x53b   :  { %v3398_v48 = vadd.f32 %v3384_v38, %v3289_v32 }
 0x53c   :  { %v5889_v10 = vpop.f32.mrf.mxu1 }
 0x53e   :  { %v3280_v11 = vpop.f32.mrf.mxu0 }
 0x53f   :  { %v3290_v49 = vadd.f32 %v3280_v11, %v3180_v13 }
 0x540   :  { %v3394_v17 = vpop.f32.mrf.mxu1  ;;  %v5848_v14 = vpop.f32.mrf.mxu0 }
 0x541   :  { %v3399_v26 = vadd.f32 %v3389_v1, %v3290_v49 }
 0x542   :  { %v5892_v50 = vpop.f32.mrf.mxu1 }
 0x544   :  { %v3285_v52 = vpop.f32.mrf.mxu0 }
 0x545   :  { %v3291_v55 = vadd.f32 %v3285_v52, %v3181_v2 }
 0x546   :  { %v5851_v62 = vpop.f32.mrf.mxu0 }
 0x547   :  { %v3400_v57 = vadd.f32 %v3394_v17, %v3291_v55 }
 0x55a   :  { %v3603_v25 = vpop.f32.mrf.mxu1 }
 0x55c   :  { %v5968_v58 = vpop.f32.mrf.mxu1 }
 0x55d   :  { %v4961_v58 = vld [vmem:[%s9890_s6] ss:$0 sm:$0xff] }
 0x55e   :  { %v3494_v33 = vpop.f32.mrf.mxu0 }
 0x55f   :  { %v3508_v3 = vadd.f32 %v3494_v33, %v3398_v48 }
 0x560   :  { %v3608_v46 = vpop.f32.mrf.mxu1  ;;  %v5927_v61 = vpop.f32.mrf.mxu0 }
 0x561   :  { %v3617_v16 = vadd.f32 %v3603_v25, %v3508_v3 }
 0x562   :  { %v5971_v0 = vpop.f32.mrf.mxu1 }
 0x564   :  { %v3499_v47 = vpop.f32.mrf.mxu0 }
 0x565   :  { %v3509_v23 = vadd.f32 %v3499_v47, %v3399_v26 }
 0x566   :  { %v3613_v54 = vpop.f32.mrf.mxu1  ;;  %v5930_v43 = vpop.f32.mrf.mxu0 }
 0x567   :  { %v3618_v21 = vadd.f32 %v3608_v46, %v3509_v23 }
 0x568   :  { %v5974_v4 = vpop.f32.mrf.mxu1 }
 0x56a   :  { %v3504_v27 = vpop.f32.mrf.mxu0 }
 0x56b   :  { %v3510_v56 = vadd.f32 %v3504_v27, %v3400_v57 }
 0x56c   :  { %v5933_v41 = vpop.f32.mrf.mxu0 }
 0x56d   :  { %v3619_v40 = vadd.f32 %v3613_v54, %v3510_v56 }
 0x580   :  { %v3805_v8 = vpop.f32.mrf.mxu1 }
 0x582   :  { %v6050_v20 = vpop.f32.mrf.mxu1 }
 0x583   :  { %v4172_v20 = vld [vmem:[%s9886_s2] sm:$0xff] }
 0x584   :  { %v3702_v30 = vpop.f32.mrf.mxu0 }
 0x585   :  { %v3716_v22 = vadd.f32 %v3702_v30, %v3617_v16  ;;  %v4173_v30 = vld [vmem:[%s9886_s2 + $0x8] sm:$0xff] }
 0x586   :  { %v3810_v34 = vpop.f32.mrf.mxu1  ;;  %v6009_v31 = vpop.f32.mrf.mxu0 }
 0x587   :  { %v3819_v19 = vadd.f32 %v3805_v8, %v3716_v22  ;;  %v4174_v22 = vld [vmem:[%s9886_s2 + $0x10] sm:$0xff] }
 0x588   :  { %v6053_v45 = vpop.f32.mrf.mxu1  ;;  %v4303_v31 = vld [vmem:[%s9891_s7 + $0x70] sm:$0xff] }
 0x589   :  { %v4302_v45 = vld [vmem:[%s9891_s7 + $0x68] sm:$0xff] }
 0x58a   :  { %v3707_v63 = vpop.f32.mrf.mxu0 }
 0x58b   :  { %v3717_v28 = vadd.f32 %v3707_v63, %v3618_v21  ;;  %v4326_v63 = vld [vmem:[%s9891_s7 + $0x128] sm:$0xff] }
 0x58c   :  { %v3815_v29 = vpop.f32.mrf.mxu1  ;;  %v6012_v7 = vpop.f32.mrf.mxu0 }
 0x58d   :  { %v3820_v5 = vadd.f32 %v3810_v34, %v3717_v28  ;;  %v4328_v34 = vld [vmem:[%s9891_s7 + $0x138] sm:$0xff]  ;;  %v4301_v28 = vld [vmem:[%s9891_s7 + $0x60] sm:$0xff] }
 0x58e   :  { %v6056_v6 = vpop.f32.mrf.mxu1  ;;  %4345 = vmatpush1.msra.mxu0 %v4328_v34  ;;  %v4300_v7 = vld [vmem:[%s9891_s7 + $0x58] sm:$0xff] }
 0x58f   :  { %4346 = vmatprep.subr.mxu0 %v9936_v42  ;;  %v4299_v6 = vld [vmem:[%s9891_s7 + $0x50] sm:$0xff] }
 0x590   :  { %v3712_v36 = vpop.f32.mrf.mxu0 }
 0x591   :  { %v3718_v9 = vadd.f32 %v3712_v36, %v3619_v40  ;;  %v4323_v36 = vld [vmem:[%s9891_s7 + $0x110] sm:$0xff] }
 0x592   :  { %v6015_v51 = vpop.f32.mrf.mxu0 }
 0x593   :  { %v3821_v15 = vadd.f32 %v3815_v29, %v3718_v9  ;;  %v4325_v29 = vld [vmem:[%s9891_s7 + $0x120] sm:$0xff]  ;;  %v4298_v51 = vld [vmem:[%s9891_s7 + $0x48] sm:$0xff]  ;;  %v4316_v9 = vld [vmem:[%s9891_s7 + $0xd8] sm:$0xff] }
 0x5a6   :  { %v4011_v35 = vpop.f32.mrf.mxu1 }
 0x5a8   :  { %v6132_v18 = vpop.f32.mrf.mxu1 }
 0x5a9   :  { %v3908_v44 = vpop.f32.mrf.mxu0  ;;  %v4297_v18 = vld [vmem:[%s9891_s7 + $0x40] sm:$0xff] }
 0x5aa   :  { %v4016_v60 = vpop.f32.mrf.mxu1  ;;  %v3922_v10 = vadd.f32 %v3908_v44, %v3819_v19  ;;  %v4327_v19 = vld [vmem:[%s9891_s7 + $0x130] sm:$0xff]  ;;  %v4321_v44 = vld [vmem:[%s9891_s7 + $0x100] sm:$0xff] }
 0x5ab   :  { %v6091_v13 = vpop.f32.mrf.mxu0  ;;  %4347 = vmatpush1.msra.mxu0 %v4327_v19 }
 0x5ac   :  { %v6135_v12 = vpop.f32.mrf.mxu1  ;;  %v4025_v50 = vadd.f32 %v4011_v35, %v3922_v10  ;;  %4348 = vmatprep.subr.mxu0 %v9936_v42  ;;  %v4322_v35 = vld [vmem:[%s9891_s7 + $0x108] sm:$0xff]  ;;  %v4320_v13 = vld [vmem:[%s9891_s7 + $0xf8] sm:$0xff]  ;;  %v4289_v10 = vld [vmem:[%s9891_s7] sm:$0xff] }
 0x5ad   :  { %v3913_v59 = vpop.f32.mrf.mxu0  ;;  %4349 = vmatpush1.msra.mxu0 %v4326_v63  ;;  %v4295_v12 = vld [vmem:[%s9891_s7 + $0x30] sm:$0xff] }
 0x5ae   :  { %v4021_v53 = vpop.f32.mrf.mxu1  ;;  %v3923_v32 = vadd.f32 %v3913_v59, %v3820_v5  ;;  %4350 = vmatprep.subr.mxu0 %v9936_v42  ;;  %v4324_v5 = vld [vmem:[%s9891_s7 + $0x118] sm:$0xff]  ;;  %v4319_v59 = vld [vmem:[%s9891_s7 + $0xf0] sm:$0xff] }
 0x5af   :  { %v6094_v37 = vpop.f32.mrf.mxu0  ;;  %4351 = vmatpush1.msra.mxu0 %v4325_v29  ;;  %v4552_v29 = vld [vmem:[%s9893_s9 + $0x130] sm:$0xff] }
 0x5b0   :  { %v6138_v2 = vpop.f32.mrf.mxu1  ;;  %v4026_v49 = vadd.f32 %v4016_v60, %v3923_v32  ;;  %4352 = vmatprep.subr.mxu0 %v9936_v42  ;;  %v4296_v60 = vld [vmem:[%s9891_s7 + $0x38] sm:$0xff]  ;;  %v4318_v37 = vld [vmem:[%s9891_s7 + $0xe8] sm:$0xff]  ;;  %v4291_v32 = vld [vmem:[%s9891_s7 + $0x10] sm:$0xff] }
 0x5b1   :  { %v3918_v38 = vpop.f32.mrf.mxu0  ;;  %4353 = vmatpush1.msra.mxu0 %v4324_v5  ;;  %v4293_v2 = vld [vmem:[%s9891_s7 + $0x20] sm:$0xff] }
 0x5b2   :  { %v3924_v11 = vadd.f32 %v3918_v38, %v3821_v15  ;;  %4354 = vmatprep.subr.mxu0 %v9936_v42  ;;  %v4317_v38 = vld [vmem:[%s9891_s7 + $0xe0] sm:$0xff]  ;;  %v4290_v15 = vld [vmem:[%s9891_s7 + $0x8] sm:$0xff] }
 0x5b3   :  { %v6097_v24 = vpop.f32.mrf.mxu0  ;;  %4355 = vmatpush1.msra.mxu0 %v4323_v36  ;;  %v4550_v5 = vld [vmem:[%s9893_s9 + $0x120] sm:$0xff]  ;;  %v4548_v36 = vld [vmem:[%s9893_s9 + $0x110] sm:$0xff] }
 0x5b4   :  { %v4027_v52 = vadd.f32 %v4021_v53, %v3924_v11  ;;  %4356 = vmatprep.subr.mxu0 %v9936_v42  ;;  %v4294_v53 = vld [vmem:[%s9891_s7 + $0x28] sm:$0xff]  ;;  %v4292_v24 = vld [vmem:[%s9891_s7 + $0x18] sm:$0xff]  ;;  %v4313_v11 = vld [vmem:[%s9891_s7 + $0xc0] sm:$0xff] }
 0x5b5   :  { %4357 = vmatpush1.msra.mxu0 %v4322_v35  ;;  %v4546_v35 = vld [vmem:[%s9893_s9 + $0x100] sm:$0xff] }
 0x5b6   :  { %4358 = vmatprep.subr.mxu0 %v9936_v42 }
 0x5b7   :  { %4359 = vmatpush1.msra.mxu0 %v4321_v44 }
 0x5b8   :  { %4360 = vmatprep.subr.mxu0 %v9936_v42 }
 0x5b9   :  { %4361 = vmatpush1.msra.mxu0 %v4320_v13  ;;  %v4545_v13 = vld [vmem:[%s9893_s9 + $0xf8] sm:$0xff] }
 0x5ba   :  { %4362 = vmatprep.subr.mxu0 %v9936_v42 }
 0x5bb   :  { %4363 = vmatpush1.msra.mxu0 %v4319_v59  ;;  %v4544_v59 = vld [vmem:[%s9893_s9 + $0xf0] sm:$0xff] }
 0x5bc   :  { %4364 = vmatprep.subr.mxu0 %v9936_v42 }
 0x5bd   :  { %4365 = vmatpush1.msra.mxu0 %v4318_v37  ;;  %v4528_v37 = vld [vmem:[%s9893_s9 + $0x70] sm:$0xff] }
 0x5be   :  { %4366 = vmatprep.subr.mxu0 %v9936_v42 }
 0x5bf   :  { %4367 = vmatpush1.msra.mxu0 %v4317_v38  ;;  %v4543_v38 = vld [vmem:[%s9893_s9 + $0xe8] sm:$0xff] }
 0x5c0   :  { %4368 = vmatprep.subr.mxu0 %v9936_v42 }
 0x5c1   :  { %4369 = vmatpush1.msra.mxu0 %v4316_v9  ;;  %v4542_v9 = vld [vmem:[%s9893_s9 + $0xe0] sm:$0xff] }
 0x5c2   :  { %4370 = vmatprep.subr.mxu0 %v9936_v42 }
 0x5c9   :  { %v4114_v1 = vpop.f32.mrf.mxu0 }
 0x5ca   :  { %v4128_v62 = vadd.f32 %v4114_v1, %v4025_v50  ;;  %v4315_v1 = vld [vmem:[%s9891_s7 + $0xd0] sm:$0xff]  ;;  %v4310_v50 = vld [vmem:[%s9891_s7 + $0xa8] sm:$0xff] }
 0x5cb   :  { %v6173_v48 = vpop.f32.mrf.mxu0  ;;  %4371 = vmatpush1.msra.mxu0 %v4315_v1  ;;  %v4541_v1 = vld [vmem:[%s9893_s9 + $0xd8] sm:$0xff] }
 0x5cc   :  { %v4314_v48 = vld [vmem:[%s9891_s7 + $0xc8] sm:$0xff]  ;;  %4372 = vmatprep.subr.mxu0 %v9936_v42 }
 0x5cd   :  { %v4119_v17 = vpop.f32.mrf.mxu0  ;;  %4373 = vmatpush1.msra.mxu0 %v4314_v48  ;;  %v4540_v48 = vld [vmem:[%s9893_s9 + $0xd0] sm:$0xff] }
 0x5ce   :  { %v4129_v14 = vadd.f32 %v4119_v17, %v4026_v49  ;;  %4374 = vmatprep.subr.mxu0 %v9936_v42  ;;  %v4312_v49 = vld [vmem:[%s9891_s7 + $0xb8] sm:$0xff] }
 0x5cf   :  { %v6176_v26 = vpop.f32.mrf.mxu0  ;;  %v4336_v17 = vld [vmem:[%s9891_s7 + $0x178] sm:$0xff]  ;;  %4375 = vmatpush1.msra.mxu0 %v4313_v11  ;;  %v4539_v11 = vld [vmem:[%s9893_s9 + $0xc8] sm:$0xff] }
 0x5d0   :  { %4136 = vrot.lane.b32.xlu1 %v4129_v14, %s6288_s5  ;;  %4392 = vmatprep.subr.mxu0 %v9936_v42  ;;  %v4335_v26 = vld [vmem:[%s9891_s7 + $0x170] sm:$0xff] }
 0x5d1   :  { %v4124_v55 = vpop.f32.mrf.mxu0  ;;  %4393 = vmatpush2.msra.mxu0 %v4336_v17  ;;  %v4538_v17 = vld [vmem:[%s9893_s9 + $0xc0] sm:$0xff] }
 0x5d2   :  { %v4130_v57 = vadd.f32 %v4124_v55, %v4027_v52  ;;  %4394 = vmatprep.subr.mxu0 %v9936_v42  ;;  %v4334_v52 = vld [vmem:[%s9891_s7 + $0x168] sm:$0xff]  ;;  %v4309_v55 = vld [vmem:[%s9891_s7 + $0xa0] sm:$0xff] }
 0x5d3   :  { %v6179_v25 = vpop.f32.mrf.mxu0  ;;  %4395 = vmatpush2.msra.mxu0 %v4335_v26  ;;  %v4537_v26 = vld [vmem:[%s9893_s9 + $0xb8] sm:$0xff] }
 0x5d4   :  { %4134 = vrot.lane.b32.xlu1 %v4128_v62, %s6288_s5  ;;  %4138 = vrot.lane.b32.xlu0 %v4130_v57, %s6288_s5  ;;  %v4332_v25 = vld [vmem:[%s9891_s7 + $0x158] sm:$0xff] }
 0x5d5   :  { %4396 = vmatprep.subr.mxu0 %v9936_v42 }
 0x5d6   :  { %4397 = vmatpush2.msra.mxu0 %v4334_v52  ;;  %v4536_v52 = vld [vmem:[%s9893_s9 + $0xb0] sm:$0xff] }
 0x5d7   :  { %4398 = vmatprep.subr.mxu0 %v9936_v42 }
 0x642   :  { %v4137_v33 = vpop.permute.xlu1 %4136 }
 0x643   :  { %v4144_v3 = vmax.f32 %v4129_v14, %v4137_v33  ;;  %v4311_v14 = vld [vmem:[%s9891_s7 + $0xb0] sm:$0xff] }
 0x644   :  { %v4331_v33 = vld [vmem:[%s9891_s7 + $0x150] sm:$0xff] }
 0x645   :  { %v4154_v46 = vadd.f32 %v4961_v58, %v4144_v3  ;;  %v4306_v3 = vld [vmem:[%s9891_s7 + $0x88] sm:$0xff] }
 0x646   :  { %v4135_v61 = vpop.permute.xlu1 %4134  ;;  %v4139_v16 = vpop.permute.xlu0 %4138 }
 0x647   :  { %v4143_v0 = vmax.f32 %v4128_v62, %v4135_v61  ;;  %v4145_v47 = vmax.f32 %v4130_v57, %v4139_v16  ;;  %v4157_v23 = vmax.f32 %v4154_v46, 0.0  ;;  %v4333_v62 = vld [vmem:[%s9891_s7 + $0x160] sm:$0xff]  ;;  %v4308_v57 = vld [vmem:[%s9891_s7 + $0x98] sm:$0xff]  ;;  %v4330_v46 = vld [vmem:[%s9891_s7 + $0x148] sm:$0xff] }
 0x648   :  { %4399 = vmatpush2.msra.mxu0 %v4333_v62  ;;  %v4305_v61 = vld [vmem:[%s9891_s7 + $0x80] sm:$0xff]  ;;  %v4535_v62 = vld [vmem:[%s9893_s9 + $0xa8] sm:$0xff] }
 0x649   :  { %v4153_v54 = vadd.f32 %v4961_v58, %v4143_v0  ;;  %v4155_v43 = vadd.f32 %v4961_v58, %v4145_v47  ;;  %v4163_v27 = vrot.slane %v4157_v23, 7  ;;  %4400 = vmatprep.subr.mxu0 %v9936_v42  ;;  %v4307_v58 = vld [vmem:[%s9891_s7 + $0x90] sm:$0xff]  ;;  %v4329_v0 = vld [vmem:[%s9891_s7 + $0x140] sm:$0xff]  ;;  %s6290_s7 = smov 16  }
 0x64a   :  { %4401 = vmatpush2.msra.mxu0 %v4332_v25  ;;  %v4534_v25 = vld [vmem:[%s9893_s9 + $0xa0] sm:$0xff] }
 0x64b   :  { %v4156_v21 = vmax.f32 %v4153_v54, 0.0  ;;  %v4158_v4 = vmax.f32 %v4155_v43, 0.0  ;;  %4402 = vmatprep.subr.mxu0 %v9936_v42 }
 0x64c   :  { %4403 = vmatpush2.msra.mxu0 %v4331_v33  ;;  %v4533_v33 = vld [vmem:[%s9893_s9 + $0x98] sm:$0xff] }
 0x64d   :  { %v4162_v56 = vrot.slane %v4156_v21, 7  ;;  %v4165_v41 = vrot.slane %v4158_v4, 7  ;;  %4404 = vmatprep.subr.mxu0 %v9936_v42 }
 0x64e   :  { %4405 = vmatpush2.msra.mxu0 %v4330_v46  ;;  %v4532_v46 = vld [vmem:[%s9893_s9 + $0x90] sm:$0xff] }
 0x64f   :  { %v4166_v40 = vsel %vm153_vm0, %v4163_v27, %v4165_v41  ;;  %v4164_v8 = vsel %vm153_vm0, %v4162_v56, %v4163_v27  ;;  %4406 = vmatprep.subr.mxu0 %v9936_v42 }
 0x650   :  { %6181 = vmatpush3.msk.msra.mxu1 %vm1217_vm5, %v4166_v40  ;;  %4407 = vmatpush2.msra.mxu0 %v4329_v0  ;;  %v4515_v0 = vld [vmem:[%s9893_s9 + $0x8] sm:$0xff] }
 0x651   :  { %6182 = vmatprep.subr.mxu1 %v9936_v42  ;;  %5327 = vmatprep.subr.mxu0 %v4545_v13  ;;  %v4777_v13 = vld [vmem:[%s9897_s13] sm:$0xff] }
 0x652   :  { %6183 = vmatpush3.msra.mxu1 %v4164_v8 }
 0x653   :  { %6184 = vmatprep.subr.mxu1 %v9936_v42 }
 0x654   :  { %6185 = vmatpush3.msk.msra.mxu1 %vm7020_vm4, %v4162_v56 }
 0x655   :  { %6187 = vmatmul.mubr.msk.f32.vlgmr.msra.gmra.mxu1 %vm4175_vm13, %v4172_v20  ;;  %4416 = vmatprep.subr.mxu1 %v9936_v42 }
 0x656   :  { %6189 = vmatprep.mubr.msk.f32.mxu1 %vm6284_vm3, %v9936_v42  ;;  %4417 = vmatpush1.msra.mxu1 %v4304_v39 }
 0x657   :  { %4418 = vmatprep.subr.mxu1 %v9936_v42 }
 0x658   :  { %4419 = vmatpush1.msra.mxu1 %v4303_v31 }
 0x659   :  { %6190 = vmatmul.mubr.msk.f32.gmra.mxu1 %vm4175_vm13, %v4173_v30  ;;  %4420 = vmatprep.subr.mxu1 %v9936_v42 }
 0x65a   :  { %6192 = vmatprep.mubr.msk.f32.mxu1 %vm6284_vm3, %v9936_v42  ;;  %4421 = vmatpush1.msra.mxu1 %v4302_v45 }
 0x65b   :  { %4422 = vmatprep.subr.mxu1 %v9936_v42 }
 0x65c   :  { %4423 = vmatpush1.msra.mxu1 %v4301_v28  ;;  %v4553_v28 = vld [vmem:[%s9893_s9 + $0x138] sm:$0xff] }
 0x65d   :  { %6193 = vmatmul.mubr.msk.f32.gmra.mxu1 %vm4175_vm13, %v4174_v22  ;;  %4424 = vmatprep.subr.mxu1 %v9936_v42 }
 0x65e   :  { %4425 = vmatpush1.msra.mxu1 %v4300_v7  ;;  %v4551_v7 = vld [vmem:[%s9893_s9 + $0x128] sm:$0xff] }
 0x65f   :  { %4426 = vmatprep.subr.mxu1 %v9936_v42 }
 0x660   :  { %4427 = vmatpush1.msra.mxu1 %v4299_v6  ;;  %v4549_v6 = vld [vmem:[%s9893_s9 + $0x118] sm:$0xff] }
 0x661   :  { %4428 = vmatprep.subr.mxu1 %v9936_v42 }
 0x662   :  { %4429 = vmatpush1.msra.mxu1 %v4298_v51  ;;  %v4547_v51 = vld [vmem:[%s9893_s9 + $0x108] sm:$0xff] }
 0x663   :  { %4430 = vmatprep.subr.mxu1 %v9936_v42 }
 0x664   :  { %4431 = vmatpush1.msra.mxu1 %v4297_v18 }
 0x665   :  { %4432 = vmatprep.subr.mxu1 %v9936_v42 }
 0x666   :  { %4433 = vmatpush1.msra.mxu1 %v4296_v60 }
 0x667   :  { %4434 = vmatprep.subr.mxu1 %v9936_v42 }
 0x668   :  { %4435 = vmatpush1.msra.mxu1 %v4295_v12  ;;  %v4529_v12 = vld [vmem:[%s9893_s9 + $0x78] sm:$0xff] }
 0x669   :  { %4436 = vmatprep.subr.mxu1 %v9936_v42 }
 0x66a   :  { %4437 = vmatpush1.msra.mxu1 %v4294_v53 }
 0x66b   :  { %4438 = vmatprep.subr.mxu1 %v9936_v42 }
 0x66c   :  { %4439 = vmatpush1.msra.mxu1 %v4293_v2 }
 0x66d   :  { %4440 = vmatprep.subr.mxu1 %v9936_v42 }
 0x66e   :  { %4441 = vmatpush1.msra.mxu1 %v4292_v24  ;;  %v4527_v24 = vld [vmem:[%s9893_s9 + $0x68] sm:$0xff] }
 0x66f   :  { %4442 = vmatprep.subr.mxu1 %v9936_v42 }
 0x670   :  { %4443 = vmatpush1.msra.mxu1 %v4291_v32  ;;  %v4526_v32 = vld [vmem:[%s9893_s9 + $0x60] sm:$0xff] }
 0x671   :  { %4444 = vmatprep.subr.mxu1 %v9936_v42 }
 0x672   :  { %4445 = vmatpush1.msra.mxu1 %v4290_v15  ;;  %v4525_v15 = vld [vmem:[%s9893_s9 + $0x58] sm:$0xff] }
 0x673   :  { %4446 = vmatprep.subr.mxu1 %v9936_v42 }
 0x674   :  { %4447 = vmatpush1.msra.mxu1 %v4289_v10  ;;  %v4524_v10 = vld [vmem:[%s9893_s9 + $0x50] sm:$0xff] }
 0x675   :  { %4464 = vmatprep.subr.mxu1 %v9936_v42 }
 0x676   :  { %4465 = vmatpush2.msra.mxu1 %v4312_v49  ;;  %v4523_v49 = vld [vmem:[%s9893_s9 + $0x48] sm:$0xff] }
 0x677   :  { %4466 = vmatprep.subr.mxu1 %v9936_v42 }
 0x678   :  { %4467 = vmatpush2.msra.mxu1 %v4311_v14  ;;  %v4522_v14 = vld [vmem:[%s9893_s9 + $0x40] sm:$0xff] }
 0x679   :  { %4468 = vmatprep.subr.mxu1 %v9936_v42 }
 0x67a   :  { %4469 = vmatpush2.msra.mxu1 %v4310_v50  ;;  %v4521_v50 = vld [vmem:[%s9893_s9 + $0x38] sm:$0xff] }
 0x67b   :  { %4470 = vmatprep.subr.mxu1 %v9936_v42 }
 0x67c   :  { %4471 = vmatpush2.msra.mxu1 %v4309_v55  ;;  %v4520_v55 = vld [vmem:[%s9893_s9 + $0x30] sm:$0xff] }
 0x67d   :  { %4472 = vmatprep.subr.mxu1 %v9936_v42 }
 0x67e   :  { %4473 = vmatpush2.msra.mxu1 %v4308_v57  ;;  %v4519_v57 = vld [vmem:[%s9893_s9 + $0x28] sm:$0xff] }
 0x67f   :  { %4474 = vmatprep.subr.mxu1 %v9936_v42 }
 0x680   :  { %4475 = vmatpush2.msra.mxu1 %v4307_v58  ;;  %v4518_v58 = vld [vmem:[%s9893_s9 + $0x20] sm:$0xff] }
 0x681   :  { %4476 = vmatprep.subr.mxu1 %v9936_v42 }
 0x682   :  { %4477 = vmatpush2.msra.mxu1 %v4306_v3  ;;  %v4517_v3 = vld [vmem:[%s9893_s9 + $0x18] sm:$0xff] }
 0x683   :  { %4478 = vmatprep.subr.mxu1 %v9936_v42 }
 0x684   :  { %4479 = vmatpush2.msra.mxu1 %v4305_v61  ;;  %v4516_v61 = vld [vmem:[%s9893_s9 + $0x10] sm:$0xff] }
 0x685   :  { %6195 = vmatprep.subr.mxu1 %v9936_v42 }
 0x715   :  { %v4251_v16 = vpop.f32.mrf.mxu1 }
 0x716   :  { %v4267_v54 = vrot.slane %v4251_v16, 6 }
 0x717   :  { %v6188_v47 = vpop.f32.mrf.mxu1 }
 0x718   :  { %v4530_v47 = vld [vmem:[%s9893_s9 + $0x80] sm:$0xff] }
 0x719   :  { %v4256_v23 = vpop.f32.mrf.mxu1 }
 0x71a   :  { %v4268_v43 = vrot.slane %v4256_v23, 6  ;;  %v4274_v56 = vrot.slane %v4256_v23, 4  ;;  %v4970_v23 = vld [vmem:[%s9892_s8] ss:$0 sm:$0xff] }
 0x71b   :  { %v6191_v21 = vpop.f32.mrf.mxu1 }
 0x71c   :  { %v4269_v4 = vsel %vm3417_vm12, %v4267_v54, %v4268_v43  ;;  %v4514_v43 = vld [vmem:[%s9893_s9] sm:$0xff] }
 0x71d   :  { %4270 = vrot.lane.b32.xlu0 %v4269_v4, %s6289_s0  ;;  %v4261_v27 = vpop.f32.mrf.mxu1 }
 0x71e   :  { %v4275_v41 = vrot.slane %v4261_v27, 4  ;;  %v4280_v40 = vrot.slane %v4261_v27, 2 }
 0x71f   :  { %v6194_v8 = vpop.f32.mrf.mxu1 }
 0x720   :  { %v4276_v20 = vsel %vm2509_vm9, %v4274_v56, %v4275_v41 }
 0x721   :  { %4281 = vrot.lane.b32.xlu0 %v4280_v40, %s6290_s7  ;;  %4277 = vrot.lane.b32.xlu1 %v4276_v20, %s6285_s3 }
 0x78f   :  { %v4271_v30 = vpop.permute.xlu0 %4270 }
 0x790   :  { %v4285_v22 = vsel %vm4284_vm14, %v4251_v16, %v4271_v30  ;;  %v4531_v16 = vld [vmem:[%s9893_s9 + $0x88] sm:$0xff] }
 0x793   :  { %v4282_v39 = vpop.permute.xlu0 %4281  ;;  %v4278_v34 = vpop.permute.xlu1 %4277 }
 0x794   :  { %v4286_v31 = vsel %vm2759_vm11, %v4285_v22, %v4278_v34  ;;  %v4288_v19 = vsel %vm4287_vm15, %v4278_v34, %v4282_v39 }
 0x795   :  { %v4339_v45 = vrot.slane %v4286_v31, 1  ;;  %v4340_v63 = vrot.slane %v4288_v19, 1  ;;  %4969 = vmatprep.mubr.msk.f32.mxu1 %vm508_vm2, %v4288_v19  ;;  %v4701_v19 = vld [vmem:[%s9895_s11 + $0x18] sm:$0xff] }
 0x796   :  { %4481 = vmatmul.mubr.f32.vlgmr.msra.gmra.mxu1 %v4286_v31 }
 0x797   :  { %4968 = vmatprep.mubr.msk.f32.mxu0 %vm508_vm2, %v4340_v63  ;;  %6211 = vmatprep.mubr.msk.f32.mxu1 %vm6284_vm3, %v9936_v42 }
 0x798   :  { %4409 = vmatmul.mubr.f32.vlgmr.msra.gmra.mxu0 %v4339_v45  ;;  %6196 = vmatpush3.msra.mxu1 %v4553_v28  ;;  %v4700_v45 = vld [vmem:[%s9895_s11 + $0x10] sm:$0xff]  ;;  %v4699_v28 = vld [vmem:[%s9895_s11 + $0x8] sm:$0xff] }
 0x799   :  { %6197 = vmatprep.subr.mxu1 %v9936_v42  ;;  %5328 = vmatpush3.msra.mxu0 %v4529_v12  ;;  %v4702_v12 = vld [vmem:[%s9896_s12] sm:$0x1]  ;;  %s6265_s12 = scalar_lea.vmem %s4861_s27, 32 }
 0x79a   :  { %6198 = vmatpush3.msra.mxu1 %v4552_v29  ;;  %5329 = vmatprep.subr.mxu0 %v4544_v59 }
 0x79b   :  { %6199 = vmatprep.subr.mxu1 %v9936_v42  ;;  %5330 = vmatpush3.msra.mxu0 %v4528_v37 }
 0x79c   :  { %6200 = vmatpush3.msra.mxu1 %v4551_v7  ;;  %5331 = vmatprep.subr.mxu0 %v4543_v38  ;;  %v4698_v7 = vld [vmem:[%s9895_s11] sm:$0xff] }
 0x79d   :  { %6201 = vmatprep.subr.mxu1 %v9936_v42  ;;  %5332 = vmatpush3.msra.mxu0 %v4527_v24  ;;  %v4779_v38 = vld [vmem:[%s9898_s14] sm:$0x1] }
 0x79e   :  { %6202 = vmatpush3.msra.mxu1 %v4550_v5  ;;  %5333 = vmatprep.subr.mxu0 %v4542_v9 }
 0x79f   :  { %6203 = vmatprep.subr.mxu1 %v9936_v42  ;;  %5334 = vmatpush3.msra.mxu0 %v4526_v32 }
 0x7a0   :  { %6204 = vmatpush3.msra.mxu1 %v4549_v6  ;;  %5335 = vmatprep.subr.mxu0 %v4541_v1  ;;  %v4554_v6 = vld [vmem:[%s9894_s10] sm:$0x1] }
 0x7a1   :  { %6205 = vmatprep.subr.mxu1 %v9936_v42  ;;  %5336 = vmatpush3.msra.mxu0 %v4525_v15 }
 0x7a2   :  { %6206 = vmatpush3.msra.mxu1 %v4548_v36  ;;  %5337 = vmatprep.subr.mxu0 %v4540_v48 }
 0x7a3   :  { %6207 = vmatprep.subr.mxu1 %v9936_v42  ;;  %5338 = vmatpush3.msra.mxu0 %v4524_v10 }
 0x7a4   :  { %6208 = vmatpush3.msra.mxu1 %v4547_v51  ;;  %5339 = vmatprep.subr.mxu0 %v4539_v11 }
 0x7a5   :  { %6209 = vmatprep.subr.mxu1 %v9936_v42  ;;  %5340 = vmatpush3.msra.mxu0 %v4523_v49 }
 0x7a6   :  { %6210 = vmatpush3.msra.mxu1 %v4546_v35  ;;  %5341 = vmatprep.subr.mxu0 %v4538_v17 }
 0x7a7   :  { %6214 = vmatprep.subr.mxu1 %v9936_v42  ;;  %5342 = vmatpush3.msra.mxu0 %v4522_v14 }
 0x7a8   :  { %5343 = vmatprep.subr.mxu0 %v4537_v26 }
 0x7a9   :  { %5344 = vmatpush3.msra.mxu0 %v4521_v50 }
 0x7aa   :  { %5345 = vmatprep.subr.mxu0 %v4536_v52 }
 0x7ab   :  { %5346 = vmatpush3.msra.mxu0 %v4520_v55 }
 0x7ac   :  { %5347 = vmatprep.subr.mxu0 %v4535_v62 }
 0x7ad   :  { %5348 = vmatpush3.msra.mxu0 %v4519_v57 }
 0x7ae   :  { %5349 = vmatprep.subr.mxu0 %v4534_v25 }
 0x7af   :  { %5350 = vmatpush3.msra.mxu0 %v4518_v58 }
 0x7b0   :  { %5351 = vmatprep.subr.mxu0 %v4533_v33 }
 0x7b1   :  { %5352 = vmatpush3.msra.mxu0 %v4517_v3 }
 0x7b2   :  { %5353 = vmatprep.subr.mxu0 %v4532_v46 }
 0x7b3   :  { %5354 = vmatpush3.msra.mxu0 %v4516_v61 }
 0x7b4   :  { %5355 = vmatprep.subr.mxu0 %v4531_v16 }
 0x7b5   :  { %5356 = vmatpush3.msra.mxu0 %v4515_v0 }
 0x7b6   :  { %5357 = vmatprep.subr.mxu0 %v4530_v47 }
 0x7b7   :  { %5358 = vmatpush3.msra.mxu0 %v4514_v43 }
 0x856   :  { %v4482_v18 = vpop.f32.mrf.mxu1 }
 0x858   :  { %v4410_v44 = vpop.f32.mrf.mxu0  ;;  %v4484_v60 = vpop.f32.mrf.mxu1 }
 0x859   :  { %v9744_v53 = vadd.f32 %v4482_v18, %v4410_v44  ;;  %v4778_v60 = vld [vmem:[%s9897_s13 + $0x8] sm:$0xff]  ;;  %s6261_s13 = scalar_lea.vmem %s4861_s27, 16 }
 0x85a   :  { %v4412_v2 = vpop.f32.mrf.mxu0  ;;  %p6262_p0 = scmp.ne.s32.totalorder %s4861_s27, %s6261_s13  ;;  %p6267_p2 = scmp.lt.s32.totalorder %s6265_s12, %s6261_s13 }
 0x85b   :  { %4487 = vrot.lane.b32.xlu1 %v9744_v53, %s6287_s28 }
 0x85c   :  { %p6268_p3 = por %p6267_p2, %p6266_p1 }
 0x85e   :  { %p6269_p4 = pnand %p6268_p3, %p6262_p0 }
 0x8cd   :  { %v4488_v54 = vpop.permute.xlu1 %4487 }
 0x8ce   :  { %v4490_v21 = vmax.f32 %v9744_v53, %v4488_v54 }
 0x8d0   :  { %v4498_v4 = vadd.f32 %v4970_v23, %v4490_v21 }
 0x8d2   :  { %v4499_v27 = vmax.f32 %v4498_v4, 0.0 }
 0x8d4   :  { %v4511_v56 = vrot.slane %v4499_v27, 4  ;;  %v4501_v41 = vrot.slane %v4499_v27, 1  ;;  %v4507_v40 = vrot.slane %v4499_v27, 3  ;;  %v4505_v39 = vrot.slane %v4499_v27, 2 }
 0x8d6   :  { %6212 = vmatmul.mubr.msk.f32.vlgmr.msra.gmra.mxu1 %vm508_vm2, %v4511_v56  ;;  %v6256_v8 = vpack.i.bf16 %v4501_v41, %v4507_v40 }
 0x8d7   :  { %6222 = vmatprep.mubr.msk.f32.mxu1 %vm6284_vm3, %v9936_v42  ;;  %6215 = vmatpush3.msra.mxu1 %v4701_v19 }
 0x8d8   :  { %6257 = vrot.lane.b32.xlu0 %v6256_v8, %s6287_s28  ;;  %6216 = vmatprep.subr.mxu1 %v9936_v42 }
 0x8d9   :  { %6217 = vmatpush3.msra.mxu1 %v4700_v45 }
 0x8da   :  { %6218 = vmatprep.subr.mxu1 %v9936_v42 }
 0x8db   :  { %6219 = vmatpush3.msra.mxu1 %v4699_v28 }
 0x8dc   :  { %6220 = vmatprep.subr.mxu1 %v9936_v42 }
 0x8dd   :  { %6221 = vmatpush3.msra.mxu1 %v4698_v7 }
 0x8de   :  { %6225 = vmatprep.subr.mxu1 %v9936_v42 }
 0x94a   :  { %v6258_v20 = vpop.permute.xlu0 %6257 }
 0x94b   :  { %v6260_v30 = vunpack.i.h.bf16 %v6258_v20  ;;  %v6259_v22 = vunpack.i.l.bf16 %v6258_v20 }
 0x94d   :  { %v4512_v34 = vsel %vm508_vm2, %v4499_v27, %v6260_v30  ;;  %v4513_v31 = vsel %vm508_vm2, %v4505_v39, %v6259_v22 }
 0x94e   :  { %4621 = vmatprep.mubr.f32.mxu0 %v4513_v31 }
 0x94f   :  { %4622 = vmatmul.mubr.f32.vlgmr.msra.gmra.mxu0 %v4512_v34 }
 0x996   :  { %v4693_v63 = vpop.f32.mrf.mxu1 }
 0x998   :  { %v6213_v29 = vpop.f32.mrf.mxu1 }
 0xa0f   :  { %v5359_v5 = vpop.f32.mrf.mxu0 }
 0xa11   :  { %v5360_v36 = vpop.f32.mrf.mxu0 }
 0xa12   :  { %v5361_v51 = vadd.f32 %v5360_v36, %v5359_v5 }
 0xa14   :  { %v4624_v35 = vadd.f32 %v5361_v51, %v4554_v6 }
 0xa16   :  { %v4694_v18 = vadd.f32 %v4693_v63, %v4624_v35 }
 0xa18   :  { %v4697_v44 = vmax.f32 %v4694_v18, 0.0 }
 0xa1a   :  { %6223 = vmatmul.mubr.msk.f32.vlgmr.msra.gmra.mxu1 %vm2748_vm10, %v4697_v44 }
 0xa1b   :  { %6229 = vmatprep.mubr.msk.f32.mxu1 %vm6284_vm3, %v9936_v42  ;;  %6226 = vmatpush3.msra.mxu1 %v4778_v60 }
 0xa1c   :  { %6227 = vmatprep.subr.mxu1 %v9936_v42 }
 0xa1d   :  { %6228 = vmatpush3.msra.mxu1 %v4777_v13 }
 0xada   :  { %v4772_v59 = vpop.f32.mrf.mxu1 }
 0xadb   :  { %v4773_v53 = vadd.f32 %v4772_v59, %v4702_v12 }
 0xadc   :  { %v6224_v37 = vpop.f32.mrf.mxu1 }
 0xadd   :  { %v4776_v2 = vmax.f32 %v4773_v53, 0.0 }
 0xadf   :  { %6230 = vmatmul.mubr.msk.f32.vlgmr.msra.gmra.mxu1 %vm4287_vm15, %v4776_v2 }
 0xb9f   :  { %v4849_v42 = vpop.f32.mrf.mxu1 }
 0xba0   :  { %v4850_v24 = vadd.f32 %v4849_v42, %v4779_v38 }
 0xba1   :  { %v6231_v9 = vpop.f32.mrf.mxu1 }
 0xba2   :  { %4853 = vst [vmem:[#allocation2] sm:$0x1] %v4850_v24 }
 0xba3   :  { %6272 = shalt.err (!%p6269_p4)
}
 0xba4   :  { %4863 = dma.vmem_to_hbm [thread:$0]  %s4861_s27, 16, %s9899_s15, [#allocation3]  }
 0xba5   :  { %6281 = dma.done.wait [#allocation3], 16  }
 0xba6   :  { %6282 = vsyncadd [#allocation3], 4294967280 }
 0xba7   :  { %4867 = vsyncpa [#allocation3], 1 }

</bundles_post_ra>
